<compile_context>
chip_gen: v7x
topology: tpu7x:2x2x1
jax: 0.10.0
libtpu: 0.0.40
codegen_flags: <defaults>
</compile_context>

<pallas_src>
import functools

import numpy as np
import jax
import jax.numpy as jnp
from jax import lax
from jax.experimental import pallas as pl
from jax.experimental.pallas import tpu as pltpu

EPS = 1e-5
MAX_TILE_M = 512        # rows per grid step for matmul-style kernels
MAX_TILE_M_ELT = 1024   # rows per grid step for pure elementwise kernels


# ---------------------------- small helpers ----------------------------

@functools.lru_cache(maxsize=None)
def _vmem_limit_bytes():
    # Per-generation scoped-VMEM budget: v5e/v6e have 128 MiB physical VMEM,
    # v7x only 64 MiB, so cap lower there.  Fall back to a conservative 32 MiB.
    try:
        cap = pltpu.get_tpu_info().vmem_capacity_bytes
    except Exception:
        return 32 * 1024 * 1024
    return 64 * 1024 * 1024 if cap >= 100 * 1024 * 1024 else 40 * 1024 * 1024


def _cparams(semantics):
    # TODO(synk): on v7x, pltpu.CORE_PARALLEL on the row axis would engage the
    # second TensorCore; kept generation-agnostic "parallel" here.
    return pltpu.CompilerParams(dimension_semantics=semantics,
                                vmem_limit_bytes=_vmem_limit_bytes())


def _round_up(x, m):
    return ((x + m - 1) // m) * m


def _row_tiling(m, cap=MAX_TILE_M):
    """Pad row count to a sublane multiple and pick the largest dividing tile."""
    mp = _round_up(m, 8)
    tm = next(t for t in (1024, 512, 256, 128, 64, 32, 16, 8)
              if t <= cap and t <= mp and mp % t == 0)
    return mp, tm, mp // tm, mp != m


def _pad_rows(x, mp):
    m = x.shape[0]
    if mp == m:
        return x
    return jnp.pad(x, ((0, mp - m),) + ((0, 0),) * (x.ndim - 1))


def _pad_k16(x, w):
    k = x.shape[1]
    kp = _round_up(k, 16)
    if kp != k:
        x = jnp.pad(x, ((0, 0), (0, kp - k)))
        w = jnp.pad(w, ((0, kp - k), (0, 0)))
    return x, w


def _finish_stats(st, m):
    # st: (..., 2, C) packed per-tile [sum; sum-of-squares] partials.
    # NOTE: E[x^2]-E[x]^2 in f32; fine at this scale (Welford would be more
    # robust for |mean|^2 >> var).
    s = jnp.sum(st.reshape(-1, 2, st.shape[-1]), axis=0)
    mu = s[0] / m
    var = jnp.maximum(s[1] / m - mu * mu, 0.0)   # biased variance (training BN)
    return mu, var


def _bn_scale_shift(mu, var, gamma, beta):
    inv = gamma * lax.rsqrt(var + EPS)
    return inv.reshape(1, -1), (beta - mu * inv).reshape(1, -1)


# ---------------------------- Pallas kernels ----------------------------

def _stats_rows(y):
    # packed [sum; sum-of-squares] over the row axis -> (2, C)
    return jnp.concatenate([jnp.sum(y, axis=0, keepdims=True),
                            jnp.sum(y * y, axis=0, keepdims=True)], axis=0)


def _row_mask(tm, m_real):
    rid = pl.program_id(0) * tm + lax.broadcasted_iota(jnp.int32, (tm, 1), 0)
    return rid < m_real


def _make_mm_stats_only_kernel(m_real, tm, need_mask):
    # stats of x @ w + b without materializing the product in HBM
    def kernel(x_ref, w_ref, b_ref, st_ref):
        y = jnp.dot(x_ref[...], w_ref[...],
                    preferred_element_type=jnp.float32) + b_ref[...]
        if need_mask:
            y = jnp.where(_row_mask(tm, m_real), y, 0.0)
        st_ref[...] = _stats_rows(y)[None]
    return kernel


def _make_mm_bias_stats_kernel(m_real, tm, need_mask):
    # y = x @ w + b stored as bf16, plus packed partial batch stats of y
    def kernel(x_ref, w_ref, b_ref, y_ref, st_ref):
        y = jnp.dot(x_ref[...], w_ref[...],
                    preferred_element_type=jnp.float32) + b_ref[...]
        y_ref[...] = y.astype(y_ref.dtype)
        if need_mask:
            y = jnp.where(_row_mask(tm, m_real), y, 0.0)
        st_ref[...] = _stats_rows(y)[None]
    return kernel


def _make_fe_fused_kernel(m_real, tm, need_mask):
    # recompute conv1 (tiny K), BN1 + ReLU, conv2 + bias + packed stats;
    # the 32-wide intermediate never leaves VMEM.
    def kernel(x_ref, w1_ref, b1_ref, s1_ref, t1_ref, w2_ref, b2_ref,
               y2_ref, st_ref):
        y1 = jnp.dot(x_ref[...], w1_ref[...],
                     preferred_element_type=jnp.float32) + b1_ref[...]
        h = jnp.maximum(y1 * s1_ref[...] + t1_ref[...], 0.0)
        y2 = jnp.dot(h.astype(jnp.bfloat16), w2_ref[...],
                     preferred_element_type=jnp.float32) + b2_ref[...]
        y2_ref[...] = y2.astype(y2_ref.dtype)
        if need_mask:
            y2 = jnp.where(_row_mask(tm, m_real), y2, 0.0)
        st_ref[...] = _stats_rows(y2)[None]
    return kernel


def _bn_relu_kernel(y_ref, s_ref, t_ref, o_ref):
    y = y_ref[...].astype(jnp.float32)
    o_ref[...] = jnp.maximum(y * s_ref[...] + t_ref[...], 0.0).astype(o_ref.dtype)


def _merge_kernel(y2_ref, x_ref, ws_ref, bs_ref, s2_ref, t2_ref, ss_ref, ts_ref,
                  o_ref):
    # relu(BN2(y2) + BN_s(x @ ws + bs)); the 1x1 shortcut is recomputed in VMEM
    a = y2_ref[...].astype(jnp.float32) * s2_ref[...] + t2_ref[...]
    ys = jnp.dot(x_ref[...], ws_ref[...],
                 preferred_element_type=jnp.float32) + bs_ref[...]
    o_ref[...] = jnp.maximum(a + ys * ss_ref[...] + ts_ref[...],
                             0.0).astype(o_ref.dtype)


def _conv3x3_s1_kernel(x_ref, w_ref, b_ref, y_ref, st_ref, acc_ref):
    # Tap-accumulating 3x3 stride-1 conv.
    #   grid = (B, Ho, 3); last ("arbitrary") axis walks the 3 kernel rows.
    #   x_ref : (1, 1, Wp, Cin)   padded input row (h + di)
    #   w_ref : (1, 3, Cin, Cout) the 3 column-tap weights of kernel row di
    #   y_ref : (1, 1, Wo, Cout)  bf16 output row (written at the last tap)
    #   st_ref: (1, 1, 2, Cout)   packed [sum; ssq] of this output row
    di = pl.program_id(2)
    wo = y_ref.shape[2]
    x = x_ref[0, 0]                                   # (Wp, Cin)

    @pl.when(di == 0)
    def _():
        acc_ref[...] = jnp.zeros_like(acc_ref)

    acc = acc_ref[...]
    for dj in range(3):                               # static unroll over W taps
        acc = acc + jnp.dot(x[dj:dj + wo, :], w_ref[0, dj],
                            preferred_element_type=jnp.float32)
    acc_ref[...] = acc

    @pl.when(di == pl.num_programs(2) - 1)
    def _():
        y = acc_ref[...] + b_ref[...]
        y_ref[...] = y.astype(y_ref.dtype)[None, None]
        st_ref[...] = _stats_rows(y)[None, None]


def _maxpool_kernel(x_ref, o_ref):
    # x block: (tile, 2, Wo, 2*C)  ->  o block: (tile, Wo, C)
    c = o_ref.shape[-1]
    x = x_ref[...]
    m = jnp.maximum(x[..., :c], x[..., c:])      # max over the W pair (lane slice)
    o_ref[...] = jnp.maximum(m[:, 0], m[:, 1])   # max over the H pair


# ---------------------------- kernel wrappers ----------------------------

def matmul_stats_only(x_bf16, w_bf16, bias):
    """Batch mean / biased var of y = x @ w + bias, without storing y."""
    x_bf16, w_bf16 = _pad_k16(x_bf16, w_bf16)
    m, k = x_bf16.shape
    c = w_bf16.shape[1]
    mp, tm, nt, need_mask = _row_tiling(m)
    xp = _pad_rows(x_bf16, mp)
    st = pl.pallas_call(
        _make_mm_stats_only_kernel(m, tm, need_mask),
        grid=(nt,),
        in_specs=[pl.BlockSpec((tm, k), lambda i: (i, 0)),
                  pl.BlockSpec((k, c), lambda i: (0, 0)),
                  pl.BlockSpec((1, c), lambda i: (0, 0))],
        out_specs=pl.BlockSpec((1, 2, c), lambda i: (i, 0, 0)),
        out_shape=jax.ShapeDtypeStruct((nt, 2, c), jnp.float32),
        compiler_params=_cparams(("parallel",)),
    )(xp, w_bf16, bias.reshape(1, c))
    return _finish_stats(st, m)


def matmul_bias_stats(x_bf16, w_bf16, bias):
    """y = x @ w + bias stored as bf16, plus batch mean / biased var of y."""
    x_bf16, w_bf16 = _pad_k16(x_bf16, w_bf16)
    m, k = x_bf16.shape
    c = w_bf16.shape[1]
    mp, tm, nt, need_mask = _row_tiling(m)
    xp = _pad_rows(x_bf16, mp)
    y, st = pl.pallas_call(
        _make_mm_bias_stats_kernel(m, tm, need_mask),
        grid=(nt,),
        in_specs=[pl.BlockSpec((tm, k), lambda i: (i, 0)),
                  pl.BlockSpec((k, c), lambda i: (0, 0)),
                  pl.BlockSpec((1, c), lambda i: (0, 0))],
        out_specs=(pl.BlockSpec((tm, c), lambda i: (i, 0)),
                   pl.BlockSpec((1, 2, c), lambda i: (i, 0, 0))),
        out_shape=(jax.ShapeDtypeStruct((mp, c), jnp.bfloat16),
                   jax.ShapeDtypeStruct((nt, 2, c), jnp.float32)),
        compiler_params=_cparams(("parallel",)),
    )(xp, w_bf16, bias.reshape(1, c))
    mu, var = _finish_stats(st, m)
    return y[:m], mu, var


def fe_fused(xm, w1, b1, s1, t1, w2, b2):
    """relu(BN1(x@w1+b1)) @ w2 + b2 with packed stats of the result."""
    m, k1 = xm.shape
    c1 = w1.shape[1]
    c2 = w2.shape[1]
    mp, tm, nt, need_mask = _row_tiling(m)
    xp = _pad_rows(xm, mp)
    y2, st = pl.pallas_call(
        _make_fe_fused_kernel(m, tm, need_mask),
        grid=(nt,),
        in_specs=[pl.BlockSpec((tm, k1), lambda i: (i, 0)),
                  pl.BlockSpec((k1, c1), lambda i: (0, 0)),
                  pl.BlockSpec((1, c1), lambda i: (0, 0)),
                  pl.BlockSpec((1, c1), lambda i: (0, 0)),
                  pl.BlockSpec((1, c1), lambda i: (0, 0)),
                  pl.BlockSpec((c1, c2), lambda i: (0, 0)),
                  pl.BlockSpec((1, c2), lambda i: (0, 0))],
        out_specs=(pl.BlockSpec((tm, c2), lambda i: (i, 0)),
                   pl.BlockSpec((1, 2, c2), lambda i: (i, 0, 0))),
        out_shape=(jax.ShapeDtypeStruct((mp, c2), jnp.bfloat16),
                   jax.ShapeDtypeStruct((nt, 2, c2), jnp.float32)),
        compiler_params=_cparams(("parallel",)),
    )(xp, w1, b1.reshape(1, c1), s1, t1, w2, b2.reshape(1, c2))
    mu, var = _finish_stats(st, m)
    return y2[:m], mu, var


def bn_relu(y, mu, var, gamma, beta, out_dtype=jnp.bfloat16):
    """Training-mode BN affine + ReLU; lane-packs C<128 outputs to 128 lanes."""
    m, c = y.shape
    scale, shift = _bn_scale_shift(mu, var, gamma, beta)
    pack = 1
    if c < 128 and 128 % c == 0 and m % (128 // c) == 0:
        pack = 128 // c
        y = y.reshape(m // pack, c * pack)
        scale = jnp.tile(scale, (1, pack))
        shift = jnp.tile(shift, (1, pack))
    mr, cr = y.shape
    mp, tm, nt, _ = _row_tiling(mr, cap=MAX_TILE_M_ELT)
    yp = _pad_rows(y, mp)
    o = pl.pallas_call(
        _bn_relu_kernel,
        grid=(nt,),
        in_specs=[pl.BlockSpec((tm, cr), lambda i: (i, 0)),
                  pl.BlockSpec((1, cr), lambda i: (0, 0)),
                  pl.BlockSpec((1, cr), lambda i: (0, 0))],
        out_specs=pl.BlockSpec((tm, cr), lambda i: (i, 0)),
        out_shape=jax.ShapeDtypeStruct((mp, cr), out_dtype),
        compiler_params=_cparams(("parallel",)),
    )(yp, scale, shift)
    o = o[:mr]
    return o.reshape(m, c) if pack > 1 else o


def residual_merge(y2, xm, ws, bs, s2, t2, ss, ts, out_dtype=jnp.bfloat16):
    """relu(BN2(y2) + BN_s(xm @ ws + bs)); shortcut recomputed in VMEM."""
    m, cout = y2.shape
    cin = xm.shape[1]
    mp, tm, nt, _ = _row_tiling(m)
    y2p = _pad_rows(y2, mp)
    xp = _pad_rows(xm, mp)
    o = pl.pallas_call(
        _merge_kernel,
        grid=(nt,),
        in_specs=[pl.BlockSpec((tm, cout), lambda i: (i, 0)),
                  pl.BlockSpec((tm, cin), lambda i: (i, 0)),
                  pl.BlockSpec((cin, cout), lambda i: (0, 0)),
                  pl.BlockSpec((1, cout), lambda i: (0, 0)),
                  pl.BlockSpec((1, cout), lambda i: (0, 0)),
                  pl.BlockSpec((1, cout), lambda i: (0, 0)),
                  pl.BlockSpec((1, cout), lambda i: (0, 0)),
                  pl.BlockSpec((1, cout), lambda i: (0, 0))],
        out_specs=pl.BlockSpec((tm, cout), lambda i: (i, 0)),
        out_shape=jax.ShapeDtypeStruct((mp, cout), out_dtype),
        compiler_params=_cparams(("parallel",)),
    )(y2p, xp, ws, bs.reshape(1, cout), s2, t2, ss, ts)
    return o[:m]


def conv3x3_s1_stats(x_nhwc, w, b):
    """3x3 stride-1 pad-1 conv as a tap-accumulating Pallas kernel (no im2col)."""
    bsz, h, wdt, cin = x_nhwc.shape
    cout = w.shape[-1]
    xp = jnp.pad(x_nhwc, ((0, 0), (1, 1), (1, 1), (0, 0)))
    y, st = pl.pallas_call(
        _conv3x3_s1_kernel,
        grid=(bsz, h, 3),
        in_specs=[pl.BlockSpec((1, 1, wdt + 2, cin),
                               lambda b_, h_, d: (b_, h_ + d, 0, 0)),
                  pl.BlockSpec((1, 3, cin, cout),
                               lambda b_, h_, d: (d, 0, 0, 0)),
                  pl.BlockSpec((1, cout), lambda b_, h_, d: (0, 0))],
        out_specs=(pl.BlockSpec((1, 1, wdt, cout),
                                lambda b_, h_, d: (b_, h_, 0, 0)),
                   pl.BlockSpec((1, 1, 2, cout),
                                lambda b_, h_, d: (b_, h_, 0, 0))),
        out_shape=(jax.ShapeDtypeStruct((bsz, h, wdt, cout), jnp.bfloat16),
                   jax.ShapeDtypeStruct((bsz, h, 2, cout), jnp.float32)),
        scratch_shapes=[pltpu.VMEM((wdt, cout), jnp.float32)],
        compiler_params=_cparams(("parallel", "parallel", "arbitrary")),
    )(xp, w, b.reshape(1, cout))
    mu, var = _finish_stats(st, bsz * h * wdt)
    return y, mu, var


def maxpool_2x2(x_nhwc):
    bsz, h, wdt, c = x_nhwc.shape
    ho, wo = h // 2, wdt // 2
    r = bsz * ho
    x4 = x_nhwc.reshape(r, 2, wo, 2 * c)       # pure row-major regroup, lane-dense
    tr = next(t for t in (256, 128, 64, 32, 16, 8, 4, 2, 1) if r % t == 0)
    o = pl.pallas_call(
        _maxpool_kernel,
        grid=(r // tr,),
        in_specs=[pl.BlockSpec((tr, 2, wo, 2 * c), lambda i: (i, 0, 0, 0))],
        out_specs=pl.BlockSpec((tr, wo, c), lambda i: (i, 0, 0)),
        out_shape=jax.ShapeDtypeStruct((r, wo, c), x_nhwc.dtype),
        compiler_params=_cparams(("parallel",)),
    )(x4)
    return o.reshape(bsz, ho, wo, c)


# ---------------------------- conv0 (stride 2) glue ----------------------------

def im2col(x_nhwc, k, stride, pad):
    # TODO(synk): the single stride-2 backbone conv still uses im2col; a strided
    # tap-accumulating / halo-DMA Pallas conv would remove this inflation too.
    bsz, h, wdt, c = x_nhwc.shape
    ho = (h + 2 * pad - k) // stride + 1
    wo = (wdt + 2 * pad - k) // stride + 1
    xp = jnp.pad(x_nhwc, ((0, 0), (pad, pad), (pad, pad), (0, 0)))
    cols = []
    for i in range(k):
        for j in range(k):
            cols.append(xp[:, i:i + stride * ho:stride, j:j + stride * wo:stride, :])
    patches = jnp.stack(cols, axis=3)           # (B, Ho, Wo, k*k, C)
    return patches.reshape(bsz * ho * wo, k * k * c), ho, wo


# ---------------------------- residual block ----------------------------

def residual_block(x_nhwc, p):
    bsz, h, wdt, cin = x_nhwc.shape
    cout = p["w1"].shape[-1]
    # conv1 3x3 + fused batch stats, then BN1 + ReLU
    y1, mu1, v1 = conv3x3_s1_stats(x_nhwc, p["w1"], p["b1"])
    hact = bn_relu(y1.reshape(-1, cout), mu1, v1, p["g1"], p["be1"])
    hact = hact.reshape(bsz, h, wdt, cout)
    # conv2 3x3 + fused batch stats (BN2 applied in the fused merge kernel)
    y2, mu2, v2 = conv3x3_s1_stats(hact, p["w2"], p["b2"])
    # shortcut 1x1 conv: stats-only pass, value recomputed inside the merge
    xm = x_nhwc.reshape(-1, cin)
    mus, vs = matmul_stats_only(xm, p["ws"], p["bs"])
    s2, t2 = _bn_scale_shift(mu2, v2, p["g2"], p["be2"])
    ss, ts = _bn_scale_shift(mus, vs, p["gs"], p["bes"])
    out = residual_merge(y2.reshape(-1, cout), xm, p["ws"], p["bs"],
                         s2, t2, ss, ts)
    return out.reshape(bsz, h, wdt, cout)


# ---------------------------- voxelization (device-side) ----------------------------

def voxelize(points, pc, vs, grid_xyz):
    # Device-side, jit-compatible last-write-wins scatter (same semantics as the
    # PyTorch python loop: for duplicate voxel hits, the highest point index wins).
    # TODO(synk): data-dependent scatter stays XLA scatter-max + gather glue,
    # not a Pallas kernel.
    b, n, _ = points.shape
    gx, gy, gz = grid_xyz
    num_vox = gz * gy * gx
    lo = jnp.asarray(pc[0:3], dtype=jnp.float32)
    vsz = jnp.asarray(vs, dtype=jnp.float32)
    gmax = jnp.asarray([gx - 1, gy - 1, gz - 1], dtype=jnp.int32)
    idx = jnp.trunc((points - lo) / vsz).astype(jnp.int32)      # .long() truncates
    idx = jnp.clip(idx, 0, gmax)
    flat = idx[..., 2] * (gy * gx) + idx[..., 1] * gx + idx[..., 0]   # (B, N)
    order = jnp.broadcast_to(jnp.arange(n, dtype=jnp.int32)[None, :], (b, n))
    winner = jnp.full((b, num_vox), -1, dtype=jnp.int32)
    winner = winner.at[jnp.arange(b, dtype=jnp.int32)[:, None], flat].max(order)
    safe = jnp.clip(winner, 0, n - 1)
    gathered = points[jnp.arange(b, dtype=jnp.int32)[:, None], safe]  # (B, L, C)
    return jnp.where((winner >= 0)[..., None], gathered, 0.0)


# ---------------------------- full forward ----------------------------

def point_pillars_forward(points, params, voxel_size, pc_range):
    bsz, _, c = points.shape
    pc = np.asarray(pc_range, dtype=np.float32)
    vs = np.asarray(voxel_size, dtype=np.float32)
    grid = ((pc[3:6] - pc[0:3]) / vs).astype(np.int64)          # (gx, gy, gz)
    gx, gy, gz = int(grid[0]), int(grid[1]), int(grid[2])
    num_vox = gz * gy * gx

    voxels = voxelize(points, pc, vs, (gx, gy, gz))             # (B, L, 3)
    xm = voxels.reshape(bsz * num_vox, c).astype(jnp.bfloat16)

    # feature extractor: Conv1d(3,32,1)+BN+ReLU, Conv1d(32,64,1)+BN+ReLU
    xm_p, w1_p = _pad_k16(xm, params["fe_w1"])
    mu1, v1 = matmul_stats_only(xm_p, w1_p, params["fe_b1"])    # y1 never stored
    s1, t1 = _bn_scale_shift(mu1, v1, params["fe_g1"], params["fe_be1"])
    y2, mu2, v2 = fe_fused(xm_p, w1_p, params["fe_b1"], s1, t1,
                           params["fe_w2"], params["fe_b2"])
    h2 = bn_relu(y2, mu2, v2, params["fe_g2"], params["fe_be2"])      # bf16 (B*L, 64)

    # pseudo image: torch view(B, 64, gz, gy*gx)  ->  NHWC (B, gz, gy*gx, 64)
    feat = h2.reshape(bsz, gz, gy * gx, 64)

    # backbone: conv0 (3x3 stride 2) + BN + ReLU, two residual blocks + maxpools
    patches, ho, wo = im2col(feat, 3, 2, 1)
    y0, mu0, v0 = matmul_bias_stats(patches, params["bb_w0"], params["bb_b0"])
    h = bn_relu(y0, mu0, v0, params["bb_g0"], params["bb_be0"])
    h = h.reshape(bsz, ho, wo, 64)
    h = residual_block(h, params["rb1"])        # 64 -> 128
    h = maxpool_2x2(h)
    h = residual_block(h, params["rb2"])        # 128 -> 256
    h = maxpool_2x2(h)
    return jnp.transpose(h, (0, 3, 1, 2)).astype(jnp.float32)   # NCHW like PyTorch


# ---------------------------- deterministic parameter init ----------------------------

def init_params(key):
    keys = iter(jax.random.split(key, 64))

    def w(shape, scale=0.05):       # matmul/conv weights stored in bf16 (MXU operands)
        return (scale * jax.random.normal(next(keys), shape, dtype=jnp.float32)
                ).astype(jnp.bfloat16)

    def b(c, scale=0.05):
        return scale * jax.random.normal(next(keys), (c,), dtype=jnp.float32)

    def bn(c):
        return (1.0 + 0.1 * jax.random.normal(next(keys), (c,), dtype=jnp.float32),
                0.1 * jax.random.normal(next(keys), (c,), dtype=jnp.float32))

    p = {}
    # feature extractor (1x1 convs stored as (K_in, C_out) for channels-last matmul)
    p["fe_w1"], p["fe_b1"] = w((3, 32)), b(32)
    p["fe_g1"], p["fe_be1"] = bn(32)
    p["fe_w2"], p["fe_b2"] = w((32, 64)), b(64)
    p["fe_g2"], p["fe_be2"] = bn(64)
    # backbone first conv (3x3 stride-2), weights as (kh*kw*Cin, Cout) for im2col
    p["bb_w0"], p["bb_b0"] = w((9 * 64, 64)), b(64)
    p["bb_g0"], p["bb_be0"] = bn(64)

    def resblock(cin, cout):
        rp = {}
        rp["w1"], rp["b1"] = w((3, 3, cin, cout)), b(cout)     # HWIO for tap conv
        rp["g1"], rp["be1"] = bn(cout)
        rp["w2"], rp["b2"] = w((3, 3, cout, cout)), b(cout)
        rp["g2"], rp["be2"] = bn(cout)
        rp["ws"], rp["bs"] = w((cin, cout)), b(cout)           # 1x1 shortcut conv
        rp["gs"], rp["bes"] = bn(cout)
        return rp

    p["rb1"] = resblock(64, 128)
    p["rb2"] = resblock(128, 256)
    return p


# ---------------------------- main ----------------------------

if __name__ == "__main__":
    # Small synthetic config: grid_size = ((8-0)/1, (4-(-4))/1, (2-(-2))/0.5) = (8, 8, 8)
    voxel_size = (1.0, 1.0, 0.5)
    point_cloud_range = (0.0, -4.0, -2.0, 8.0, 4.0, 2.0)
    B, N = 2, 32

    key = jax.random.PRNGKey(0)
    kp, kw = jax.random.split(key)
    u = jax.random.uniform(kp, (B, N, 3), dtype=jnp.float32)
    lo = jnp.array([0.0, -4.0, -2.0], dtype=jnp.float32)
    hi = jnp.array([8.0, 4.0, 2.0], dtype=jnp.float32)
    points = lo + u * (hi - lo)

    params = init_params(kw)

    forward = jax.jit(point_pillars_forward, static_argnums=(2, 3))
    out = forward(points, params, voxel_size, point_cloud_range)
    out = jax.block_until_ready(out)

    assert out.shape == (B, 256, 1, 8), out.shape
    assert bool(jnp.all(jnp.isfinite(out)))
    print("KERNEL_OK")
</pallas_src>

<mosaic_0001>
module attributes {stable_mosaic.version = 11 : i64} {
  func.func private @main(%arg0: i32) attributes {dimension_semantics = [#tpu.dimension_semantics<core_parallel>], iteration_bounds = array<i64: 2>, tpu.core_type = #tpu.core_type<sc_scalar_subcore>, window_params = []} {
    return
  }
}

module attributes {stable_mosaic.version = 11 : i64} {
  func.func private @main(%arg0: i32) attributes {dimension_semantics = [#tpu.dimension_semantics<core_parallel>], iteration_bounds = array<i64: 2>, tpu.core_type = #tpu.core_type<sc_scalar_subcore>, window_params = []} {
    return
  }
}

module attributes {stable_mosaic.version = 11 : i64} {
  func.func @kernel(%arg0: i32, %arg1: memref<512x16xbf16, #tpu.memory_space<vmem>>, %arg2: memref<16x32xbf16, #tpu.memory_space<vmem>>, %arg3: memref<1x32xf32, #tpu.memory_space<vmem>>, %arg4: memref<1x2x32xf32, #tpu.memory_space<vmem>>) attributes {dimension_semantics = [#tpu.dimension_semantics<parallel>], iteration_bounds = array<i64: 2>, scalar_prefetch = 0 : i64, scratch_operands = 0 : i64, tpu.core_type = #tpu.core_type<tc>, window_params = [{transform_indices = @transform_0, window_bounds = array<i64: 512, 16>}, {pipeline_mode = #tpu.pipeline_mode<synchronous>, transform_indices = @transform_1, window_bounds = array<i64: 16, 32>}, {pipeline_mode = #tpu.pipeline_mode<synchronous>, transform_indices = @transform_2, window_bounds = array<i64: 1, 32>}, {transform_indices = @transform_3, window_bounds = array<i64: 1, 2, 32>}]} {
    %c0 = arith.constant 0 : index
    %c0_0 = arith.constant 0 : index
    %0 = vector.load %arg1[%c0, %c0_0] : memref<512x16xbf16, #tpu.memory_space<vmem>>, vector<512x16xbf16>
    %c0_1 = arith.constant 0 : index
    %c0_2 = arith.constant 0 : index
    %1 = vector.load %arg2[%c0_1, %c0_2] : memref<16x32xbf16, #tpu.memory_space<vmem>>, vector<16x32xbf16>
    %cst = arith.constant dense<0.000000e+00> : vector<512x32xf32>
    %2 = tpu.matmul %0, %1, %cst {dimension_numbers = #tpu.dot_dimension_numbers<[1], [0], [0], [1], [0, 0, 1, 1], [], []>} : vector<512x16xbf16>, vector<16x32xbf16>, vector<512x32xf32> -> vector<512x32xf32>
    %c0_3 = arith.constant 0 : index
    %c0_4 = arith.constant 0 : index
    %3 = vector.load %arg3[%c0_3, %c0_4] : memref<1x32xf32, #tpu.memory_space<vmem>>, vector<1x32xf32>
    %4 = vector.broadcast %3 : vector<1x32xf32> to vector<512x32xf32>
    %5 = arith.addf %2, %4 : vector<512x32xf32>
    %cst_5 = arith.constant dense<0.000000e+00> : vector<32xf32>
    %6 = vector.multi_reduction <add>, %5, %cst_5 [0] : vector<512x32xf32> to vector<32xf32>
    %7 = vector.shape_cast %6 : vector<32xf32> to vector<1x32xf32>
    %8 = arith.mulf %5, %5 : vector<512x32xf32>
    %cst_6 = arith.constant dense<0.000000e+00> : vector<32xf32>
    %9 = vector.multi_reduction <add>, %8, %cst_6 [0] : vector<512x32xf32> to vector<32xf32>
    %10 = vector.shape_cast %9 : vector<32xf32> to vector<1x32xf32>
    %11 = tpu.concatenate %7, %10 in 0 : vector<1x32xf32>, vector<1x32xf32> -> vector<2x32xf32>
    %12 = vector.shape_cast %11 : vector<2x32xf32> to vector<1x2x32xf32>
    %c0_7 = arith.constant 0 : index
    %c0_8 = arith.constant 0 : index
    %c0_9 = arith.constant 0 : index
    %13 = vector.load %arg4[%c0_7, %c0_8, %c0_9] : memref<1x2x32xf32, #tpu.memory_space<vmem>>, vector<1x2x32xf32>
    tpu.vector_store %arg4[%c0_7, %c0_8, %c0_9], %12 {strides = array<i32>} : memref<1x2x32xf32, #tpu.memory_space<vmem>>, vector<1x2x32xf32>,
    return
  }
  func.func @transform_0(%arg0: i32) -> (i32, i32) {
    %c0_i32 = arith.constant 0 : i32
    %c0_i32_0 = arith.constant 0 : i32
    return %arg0, %c0_i32 : i32, i32
  }
  func.func @transform_1(%arg0: i32) -> (i32, i32) {
    %c0_i32 = arith.constant 0 : i32
    %c0_i32_0 = arith.constant 0 : i32
    %c0_i32_1 = arith.constant 0 : i32
    return %c0_i32, %c0_i32_0 : i32, i32
  }
  func.func @transform_2(%arg0: i32) -> (i32, i32) {
    %c0_i32 = arith.constant 0 : i32
    %c0_i32_0 = arith.constant 0 : i32
    %c0_i32_1 = arith.constant 0 : i32
    return %c0_i32, %c0_i32_0 : i32, i32
  }
  func.func @transform_3(%arg0: i32) -> (i32, i32, i32) {
    %c0_i32 = arith.constant 0 : i32
    %c0_i32_0 = arith.constant 0 : i32
    %c0_i32_1 = arith.constant 0 : i32
    return %arg0, %c0_i32, %c0_i32_0 : i32, i32, i32
  }
}

module attributes {stable_mosaic.version = 11 : i64} {
  func.func @kernel(%arg0: i32, %arg1: memref<512x16xbf16, #tpu.memory_space<vmem>>, %arg2: memref<16x32xbf16, #tpu.memory_space<vmem>>, %arg3: memref<1x32xf32, #tpu.memory_space<vmem>>, %arg4: memref<1x32xf32, #tpu.memory_space<vmem>>, %arg5: memref<1x32xf32, #tpu.memory_space<vmem>>, %arg6: memref<32x64xbf16, #tpu.memory_space<vmem>>, %arg7: memref<1x64xf32, #tpu.memory_space<vmem>>, %arg8: memref<512x64xbf16, #tpu.memory_space<vmem>>, %arg9: memref<1x2x64xf32, #tpu.memory_space<vmem>>) attributes {dimension_semantics = [#tpu.dimension_semantics<parallel>], iteration_bounds = array<i64: 2>, scalar_prefetch = 0 : i64, scratch_operands = 0 : i64, tpu.core_type = #tpu.core_type<tc>, window_params = [{transform_indices = @transform_0, window_bounds = array<i64: 512, 16>}, {pipeline_mode = #tpu.pipeline_mode<synchronous>, transform_indices = @transform_1, window_bounds = array<i64: 16, 32>}, {pipeline_mode = #tpu.pipeline_mode<synchronous>, transform_indices = @transform_2, window_bounds = array<i64: 1, 32>}, {pipeline_mode = #tpu.pipeline_mode<synchronous>, transform_indices = @transform_3, window_bounds = array<i64: 1, 32>}, {pipeline_mode = #tpu.pipeline_mode<synchronous>, transform_indices = @transform_4, window_bounds = array<i64: 1, 32>}, {pipeline_mode = #tpu.pipeline_mode<synchronous>, transform_indices = @transform_5, window_bounds = array<i64: 32, 64>}, {pipeline_mode = #tpu.pipeline_mode<synchronous>, transform_indices = @transform_6, window_bounds = array<i64: 1, 64>}, {transform_indices = @transform_7, window_bounds = array<i64: 512, 64>}, {transform_indices = @transform_8, window_bounds = array<i64: 1, 2, 64>}]} {
    %c0 = arith.constant 0 : index
    %c0_0 = arith.constant 0 : index
    %0 = vector.load %arg1[%c0, %c0_0] : memref<512x16xbf16, #tpu.memory_space<vmem>>, vector<512x16xbf16>
    %c0_1 = arith.constant 0 : index
    %c0_2 = arith.constant 0 : index
    %1 = vector.load %arg2[%c0_1, %c0_2] : memref<16x32xbf16, #tpu.memory_space<vmem>>, vector<16x32xbf16>
    %cst = arith.constant dense<0.000000e+00> : vector<512x32xf32>
    %2 = tpu.matmul %0, %1, %cst {dimension_numbers = #tpu.dot_dimension_numbers<[1], [0], [0], [1], [0, 0, 1, 1], [], []>} : vector<512x16xbf16>, vector<16x32xbf16>, vector<512x32xf32> -> vector<512x32xf32>
    %c0_3 = arith.constant 0 : index
    %c0_4 = arith.constant 0 : index
    %3 = vector.load %arg3[%c0_3, %c0_4] : memref<1x32xf32, #tpu.memory_space<vmem>>, vector<1x32xf32>
    %4 = vector.broadcast %3 : vector<1x32xf32> to vector<512x32xf32>
    %5 = arith.addf %2, %4 : vector<512x32xf32>
    %c0_5 = arith.constant 0 : index
    %c0_6 = arith.constant 0 : index
    %6 = vector.load %arg4[%c0_5, %c0_6] : memref<1x32xf32, #tpu.memory_space<vmem>>, vector<1x32xf32>
    %7 = vector.broadcast %6 : vector<1x32xf32> to vector<512x32xf32>
    %8 = arith.mulf %5, %7 : vector<512x32xf32>
    %c0_7 = arith.constant 0 : index
    %c0_8 = arith.constant 0 : index
    %9 = vector.load %arg5[%c0_7, %c0_8] : memref<1x32xf32, #tpu.memory_space<vmem>>, vector<1x32xf32>
    %10 = vector.broadcast %9 : vector<1x32xf32> to vector<512x32xf32>
    %11 = arith.addf %8, %10 : vector<512x32xf32>
    %cst_9 = arith.constant 0.000000e+00 : f32
    %12 = vector.broadcast %cst_9 : f32 to vector<512x32xf32>
    %13 = arith.maximumf %11, %12 : vector<512x32xf32>
    %14 = arith.truncf %13 : vector<512x32xf32> to vector<512x32xbf16>
    %c0_10 = arith.constant 0 : index
    %c0_11 = arith.constant 0 : index
    %15 = vector.load %arg6[%c0_10, %c0_11] : memref<32x64xbf16, #tpu.memory_space<vmem>>, vector<32x64xbf16>
    %cst_12 = arith.constant dense<0.000000e+00> : vector<512x64xf32>
    %16 = tpu.matmul %14, %15, %cst_12 {dimension_numbers = #tpu.dot_dimension_numbers<[1], [0], [0], [1], [0, 0, 1, 1], [], []>} : vector<512x32xbf16>, vector<32x64xbf16>, vector<512x64xf32> -> vector<512x64xf32>
    %c0_13 = arith.constant 0 : index
    %c0_14 = arith.constant 0 : index
    %17 = vector.load %arg7[%c0_13, %c0_14] : memref<1x64xf32, #tpu.memory_space<vmem>>, vector<1x64xf32>
    %18 = vector.broadcast %17 : vector<1x64xf32> to vector<512x64xf32>
    %19 = arith.addf %16, %18 : vector<512x64xf32>
    %20 = arith.truncf %19 : vector<512x64xf32> to vector<512x64xbf16>
    %c0_15 = arith.constant 0 : index
    %c0_16 = arith.constant 0 : index
    %21 = vector.load %arg8[%c0_15, %c0_16] : memref<512x64xbf16, #tpu.memory_space<vmem>>, vector<512x64xbf16>
    tpu.vector_store %arg8[%c0_15, %c0_16], %20 {strides = array<i32>} : memref<512x64xbf16, #tpu.memory_space<vmem>>, vector<512x64xbf16>,
    %cst_17 = arith.constant dense<0.000000e+00> : vector<64xf32>
    %22 = vector.multi_reduction <add>, %19, %cst_17 [0] : vector<512x64xf32> to vector<64xf32>
    %23 = vector.shape_cast %22 : vector<64xf32> to vector<1x64xf32>
    %24 = arith.mulf %19, %19 : vector<512x64xf32>
    %cst_18 = arith.constant dense<0.000000e+00> : vector<64xf32>
    %25 = vector.multi_reduction <add>, %24, %cst_18 [0] : vector<512x64xf32> to vector<64xf32>
    %26 = vector.shape_cast %25 : vector<64xf32> to vector<1x64xf32>
    %27 = tpu.concatenate %23, %26 in 0 : vector<1x64xf32>, vector<1x64xf32> -> vector<2x64xf32>
    %28 = vector.shape_cast %27 : vector<2x64xf32> to vector<1x2x64xf32>
    %c0_19 = arith.constant 0 : index
    %c0_20 = arith.constant 0 : index
    %c0_21 = arith.constant 0 : index
    %29 = vector.load %arg9[%c0_19, %c0_20, %c0_21] : memref<1x2x64xf32, #tpu.memory_space<vmem>>, vector<1x2x64xf32>
    tpu.vector_store %arg9[%c0_19, %c0_20, %c0_21], %28 {strides = array<i32>} : memref<1x2x64xf32, #tpu.memory_space<vmem>>, vector<1x2x64xf32>,
    return
  }
  func.func @transform_0(%arg0: i32) -> (i32, i32) {
    %c0_i32 = arith.constant 0 : i32
    %c0_i32_0 = arith.constant 0 : i32
    return %arg0, %c0_i32 : i32, i32
  }
  func.func @transform_1(%arg0: i32) -> (i32, i32) {
    %c0_i32 = arith.constant 0 : i32
    %c0_i32_0 = arith.constant 0 : i32
    %c0_i32_1 = arith.constant 0 : i32
    return %c0_i32, %c0_i32_0 : i32, i32
  }
  func.func @transform_2(%arg0: i32) -> (i32, i32) {
    %c0_i32 = arith.constant 0 : i32
    %c0_i32_0 = arith.constant 0 : i32
    %c0_i32_1 = arith.constant 0 : i32
    return %c0_i32, %c0_i32_0 : i32, i32
  }
  func.func @transform_3(%arg0: i32) -> (i32, i32) {
    %c0_i32 = arith.constant 0 : i32
    %c0_i32_0 = arith.constant 0 : i32
    %c0_i32_1 = arith.constant 0 : i32
    return %c0_i32, %c0_i32_0 : i32, i32
  }
  func.func @transform_4(%arg0: i32) -> (i32, i32) {
    %c0_i32 = arith.constant 0 : i32
    %c0_i32_0 = arith.constant 0 : i32
    %c0_i32_1 = arith.constant 0 : i32
    return %c0_i32, %c0_i32_0 : i32, i32
  }
  func.func @transform_5(%arg0: i32) -> (i32, i32) {
    %c0_i32 = arith.constant 0 : i32
    %c0_i32_0 = arith.constant 0 : i32
    %c0_i32_1 = arith.constant 0 : i32
    return %c0_i32, %c0_i32_0 : i32, i32
  }
  func.func @transform_6(%arg0: i32) -> (i32, i32) {
    %c0_i32 = arith.constant 0 : i32
    %c0_i32_0 = arith.constant 0 : i32
    %c0_i32_1 = arith.constant 0 : i32
    return %c0_i32, %c0_i32_0 : i32, i32
  }
  func.func @transform_7(%arg0: i32) -> (i32, i32) {
    %c0_i32 = arith.constant 0 : i32
    %c0_i32_0 = arith.constant 0 : i32
    return %arg0, %c0_i32 : i32, i32
  }
  func.func @transform_8(%arg0: i32) -> (i32, i32, i32) {
    %c0_i32 = arith.constant 0 : i32
    %c0_i32_0 = arith.constant 0 : i32
    %c0_i32_1 = arith.constant 0 : i32
    return %arg0, %c0_i32, %c0_i32_0 : i32, i32, i32
  }
}

module attributes {stable_mosaic.version = 11 : i64} {
  func.func @_bn_relu_kernel(%arg0: i32, %arg1: memref<512x128xbf16, #tpu.memory_space<vmem>>, %arg2: memref<1x128xf32, #tpu.memory_space<vmem>>, %arg3: memref<1x128xf32, #tpu.memory_space<vmem>>, %arg4: memref<512x128xbf16, #tpu.memory_space<vmem>>) attributes {dimension_semantics = [#tpu.dimension_semantics<parallel>], iteration_bounds = array<i64: 1>, scalar_prefetch = 0 : i64, scratch_operands = 0 : i64, tpu.core_type = #tpu.core_type<tc>, window_params = [{transform_indices = @transform_0, window_bounds = array<i64: 512, 128>}, {pipeline_mode = #tpu.pipeline_mode<synchronous>, transform_indices = @transform_1, window_bounds = array<i64: 1, 128>}, {pipeline_mode = #tpu.pipeline_mode<synchronous>, transform_indices = @transform_2, window_bounds = array<i64: 1, 128>}, {transform_indices = @transform_3, window_bounds = array<i64: 512, 128>}]} {
    %c0 = arith.constant 0 : index
    %c0_0 = arith.constant 0 : index
    %0 = vector.load %arg1[%c0, %c0_0] : memref<512x128xbf16, #tpu.memory_space<vmem>>, vector<512x128xbf16>
    %1 = arith.extf %0 : vector<512x128xbf16> to vector<512x128xf32>
    %c0_1 = arith.constant 0 : index
    %c0_2 = arith.constant 0 : index
    %2 = vector.load %arg2[%c0_1, %c0_2] : memref<1x128xf32, #tpu.memory_space<vmem>>, vector<1x128xf32>
    %3 = vector.broadcast %2 : vector<1x128xf32> to vector<512x128xf32>
    %4 = arith.mulf %1, %3 : vector<512x128xf32>
    %c0_3 = arith.constant 0 : index
    %c0_4 = arith.constant 0 : index
    %5 = vector.load %arg3[%c0_3, %c0_4] : memref<1x128xf32, #tpu.memory_space<vmem>>, vector<1x128xf32>
    %6 = vector.broadcast %5 : vector<1x128xf32> to vector<512x128xf32>
    %7 = arith.addf %4, %6 : vector<512x128xf32>
    %cst = arith.constant 0.000000e+00 : f32
    %8 = vector.broadcast %cst : f32 to vector<512x128xf32>
    %9 = arith.maximumf %7, %8 : vector<512x128xf32>
    %10 = arith.truncf %9 : vector<512x128xf32> to vector<512x128xbf16>
    %c0_5 = arith.constant 0 : index
    %c0_6 = arith.constant 0 : index
    %11 = vector.load %arg4[%c0_5, %c0_6] : memref<512x128xbf16, #tpu.memory_space<vmem>>, vector<512x128xbf16>
    tpu.vector_store %arg4[%c0_5, %c0_6], %10 {strides = array<i32>} : memref<512x128xbf16, #tpu.memory_space<vmem>>, vector<512x128xbf16>,
    return
  }
  func.func @transform_0(%arg0: i32) -> (i32, i32) {
    %c0_i32 = arith.constant 0 : i32
    %c0_i32_0 = arith.constant 0 : i32
    return %arg0, %c0_i32 : i32, i32
  }
  func.func @transform_1(%arg0: i32) -> (i32, i32) {
    %c0_i32 = arith.constant 0 : i32
    %c0_i32_0 = arith.constant 0 : i32
    %c0_i32_1 = arith.constant 0 : i32
    return %c0_i32, %c0_i32_0 : i32, i32
  }
  func.func @transform_2(%arg0: i32) -> (i32, i32) {
    %c0_i32 = arith.constant 0 : i32
    %c0_i32_0 = arith.constant 0 : i32
    %c0_i32_1 = arith.constant 0 : i32
    return %c0_i32, %c0_i32_0 : i32, i32
  }
  func.func @transform_3(%arg0: i32) -> (i32, i32) {
    %c0_i32 = arith.constant 0 : i32
    %c0_i32_0 = arith.constant 0 : i32
    return %arg0, %c0_i32 : i32, i32
  }
}

module attributes {stable_mosaic.version = 11 : i64} {
  func.func @kernel(%arg0: i32, %arg1: memref<256x576xbf16, #tpu.memory_space<vmem>>, %arg2: memref<576x64xbf16, #tpu.memory_space<vmem>>, %arg3: memref<1x64xf32, #tpu.memory_space<vmem>>, %arg4: memref<256x64xbf16, #tpu.memory_space<vmem>>, %arg5: memref<1x2x64xf32, #tpu.memory_space<vmem>>) attributes {dimension_semantics = [#tpu.dimension_semantics<parallel>], iteration_bounds = array<i64: 1>, scalar_prefetch = 0 : i64, scratch_operands = 0 : i64, tpu.core_type = #tpu.core_type<tc>, window_params = [{transform_indices = @transform_0, window_bounds = array<i64: 256, 576>}, {pipeline_mode = #tpu.pipeline_mode<synchronous>, transform_indices = @transform_1, window_bounds = array<i64: 576, 64>}, {pipeline_mode = #tpu.pipeline_mode<synchronous>, transform_indices = @transform_2, window_bounds = array<i64: 1, 64>}, {transform_indices = @transform_3, window_bounds = array<i64: 256, 64>}, {transform_indices = @transform_4, window_bounds = array<i64: 1, 2, 64>}]} {
    %c0 = arith.constant 0 : index
    %c0_0 = arith.constant 0 : index
    %0 = vector.load %arg1[%c0, %c0_0] : memref<256x576xbf16, #tpu.memory_space<vmem>>, vector<256x576xbf16>
    %c0_1 = arith.constant 0 : index
    %c0_2 = arith.constant 0 : index
    %1 = vector.load %arg2[%c0_1, %c0_2] : memref<576x64xbf16, #tpu.memory_space<vmem>>, vector<576x64xbf16>
    %cst = arith.constant dense<0.000000e+00> : vector<256x64xf32>
    %2 = tpu.matmul %0, %1, %cst {dimension_numbers = #tpu.dot_dimension_numbers<[1], [0], [0], [1], [0, 0, 1, 1], [], []>} : vector<256x576xbf16>, vector<576x64xbf16>, vector<256x64xf32> -> vector<256x64xf32>
    %c0_3 = arith.constant 0 : index
    %c0_4 = arith.constant 0 : index
    %3 = vector.load %arg3[%c0_3, %c0_4] : memref<1x64xf32, #tpu.memory_space<vmem>>, vector<1x64xf32>
    %4 = vector.broadcast %3 : vector<1x64xf32> to vector<256x64xf32>
    %5 = arith.addf %2, %4 : vector<256x64xf32>
    %6 = arith.truncf %5 : vector<256x64xf32> to vector<256x64xbf16>
    %c0_5 = arith.constant 0 : index
    %c0_6 = arith.constant 0 : index
    %7 = vector.load %arg4[%c0_5, %c0_6] : memref<256x64xbf16, #tpu.memory_space<vmem>>, vector<256x64xbf16>
    tpu.vector_store %arg4[%c0_5, %c0_6], %6 {strides = array<i32>} : memref<256x64xbf16, #tpu.memory_space<vmem>>, vector<256x64xbf16>,
    %cst_7 = arith.constant dense<0.000000e+00> : vector<64xf32>
    %8 = vector.multi_reduction <add>, %5, %cst_7 [0] : vector<256x64xf32> to vector<64xf32>
    %9 = vector.shape_cast %8 : vector<64xf32> to vector<1x64xf32>
    %10 = arith.mulf %5, %5 : vector<256x64xf32>
    %cst_8 = arith.constant dense<0.000000e+00> : vector<64xf32>
    %11 = vector.multi_reduction <add>, %10, %cst_8 [0] : vector<256x64xf32> to vector<64xf32>
    %12 = vector.shape_cast %11 : vector<64xf32> to vector<1x64xf32>
    %13 = tpu.concatenate %9, %12 in 0 : vector<1x64xf32>, vector<1x64xf32> -> vector<2x64xf32>
    %14 = vector.shape_cast %13 : vector<2x64xf32> to vector<1x2x64xf32>
    %c0_9 = arith.constant 0 : index
    %c0_10 = arith.constant 0 : index
    %c0_11 = arith.constant 0 : index
    %15 = vector.load %arg5[%c0_9, %c0_10, %c0_11] : memref<1x2x64xf32, #tpu.memory_space<vmem>>, vector<1x2x64xf32>
    tpu.vector_store %arg5[%c0_9, %c0_10, %c0_11], %14 {strides = array<i32>} : memref<1x2x64xf32, #tpu.memory_space<vmem>>, vector<1x2x64xf32>,
    return
  }
  func.func @transform_0(%arg0: i32) -> (i32, i32) {
    %c0_i32 = arith.constant 0 : i32
    %c0_i32_0 = arith.constant 0 : i32
    return %arg0, %c0_i32 : i32, i32
  }
  func.func @transform_1(%arg0: i32) -> (i32, i32) {
    %c0_i32 = arith.constant 0 : i32
    %c0_i32_0 = arith.constant 0 : i32
    %c0_i32_1 = arith.constant 0 : i32
    return %c0_i32, %c0_i32_0 : i32, i32
  }
  func.func @transform_2(%arg0: i32) -> (i32, i32) {
    %c0_i32 = arith.constant 0 : i32
    %c0_i32_0 = arith.constant 0 : i32
    %c0_i32_1 = arith.constant 0 : i32
    return %c0_i32, %c0_i32_0 : i32, i32
  }
  func.func @transform_3(%arg0: i32) -> (i32, i32) {
    %c0_i32 = arith.constant 0 : i32
    %c0_i32_0 = arith.constant 0 : i32
    return %arg0, %c0_i32 : i32, i32
  }
  func.func @transform_4(%arg0: i32) -> (i32, i32, i32) {
    %c0_i32 = arith.constant 0 : i32
    %c0_i32_0 = arith.constant 0 : i32
    %c0_i32_1 = arith.constant 0 : i32
    return %arg0, %c0_i32, %c0_i32_0 : i32, i32, i32
  }
}

module attributes {stable_mosaic.version = 11 : i64} {
  func.func @_bn_relu_kernel(%arg0: i32, %arg1: memref<128x128xbf16, #tpu.memory_space<vmem>>, %arg2: memref<1x128xf32, #tpu.memory_space<vmem>>, %arg3: memref<1x128xf32, #tpu.memory_space<vmem>>, %arg4: memref<128x128xbf16, #tpu.memory_space<vmem>>) attributes {dimension_semantics = [#tpu.dimension_semantics<parallel>], iteration_bounds = array<i64: 1>, scalar_prefetch = 0 : i64, scratch_operands = 0 : i64, tpu.core_type = #tpu.core_type<tc>, window_params = [{transform_indices = @transform_0, window_bounds = array<i64: 128, 128>}, {pipeline_mode = #tpu.pipeline_mode<synchronous>, transform_indices = @transform_1, window_bounds = array<i64: 1, 128>}, {pipeline_mode = #tpu.pipeline_mode<synchronous>, transform_indices = @transform_2, window_bounds = array<i64: 1, 128>}, {transform_indices = @transform_3, window_bounds = array<i64: 128, 128>}]} {
    %c0 = arith.constant 0 : index
    %c0_0 = arith.constant 0 : index
    %0 = vector.load %arg1[%c0, %c0_0] : memref<128x128xbf16, #tpu.memory_space<vmem>>, vector<128x128xbf16>
    %1 = arith.extf %0 : vector<128x128xbf16> to vector<128x128xf32>
    %c0_1 = arith.constant 0 : index
    %c0_2 = arith.constant 0 : index
    %2 = vector.load %arg2[%c0_1, %c0_2] : memref<1x128xf32, #tpu.memory_space<vmem>>, vector<1x128xf32>
    %3 = vector.broadcast %2 : vector<1x128xf32> to vector<128x128xf32>
    %4 = arith.mulf %1, %3 : vector<128x128xf32>
    %c0_3 = arith.constant 0 : index
    %c0_4 = arith.constant 0 : index
    %5 = vector.load %arg3[%c0_3, %c0_4] : memref<1x128xf32, #tpu.memory_space<vmem>>, vector<1x128xf32>
    %6 = vector.broadcast %5 : vector<1x128xf32> to vector<128x128xf32>
    %7 = arith.addf %4, %6 : vector<128x128xf32>
    %cst = arith.constant 0.000000e+00 : f32
    %8 = vector.broadcast %cst : f32 to vector<128x128xf32>
    %9 = arith.maximumf %7, %8 : vector<128x128xf32>
    %10 = arith.truncf %9 : vector<128x128xf32> to vector<128x128xbf16>
    %c0_5 = arith.constant 0 : index
    %c0_6 = arith.constant 0 : index
    %11 = vector.load %arg4[%c0_5, %c0_6] : memref<128x128xbf16, #tpu.memory_space<vmem>>, vector<128x128xbf16>
    tpu.vector_store %arg4[%c0_5, %c0_6], %10 {strides = array<i32>} : memref<128x128xbf16, #tpu.memory_space<vmem>>, vector<128x128xbf16>,
    return
  }
  func.func @transform_0(%arg0: i32) -> (i32, i32) {
    %c0_i32 = arith.constant 0 : i32
    %c0_i32_0 = arith.constant 0 : i32
    return %arg0, %c0_i32 : i32, i32
  }
  func.func @transform_1(%arg0: i32) -> (i32, i32) {
    %c0_i32 = arith.constant 0 : i32
    %c0_i32_0 = arith.constant 0 : i32
    %c0_i32_1 = arith.constant 0 : i32
    return %c0_i32, %c0_i32_0 : i32, i32
  }
  func.func @transform_2(%arg0: i32) -> (i32, i32) {
    %c0_i32 = arith.constant 0 : i32
    %c0_i32_0 = arith.constant 0 : i32
    %c0_i32_1 = arith.constant 0 : i32
    return %c0_i32, %c0_i32_0 : i32, i32
  }
  func.func @transform_3(%arg0: i32) -> (i32, i32) {
    %c0_i32 = arith.constant 0 : i32
    %c0_i32_0 = arith.constant 0 : i32
    return %arg0, %c0_i32 : i32, i32
  }
}

module attributes {stable_mosaic.version = 11 : i64} {
  func.func @_conv3x3_s1_kernel(%arg0: i32, %arg1: i32, %arg2: i32, %arg3: memref<1x1x34x64xbf16, #tpu.memory_space<vmem>>, %arg4: memref<1x3x64x128xbf16, #tpu.memory_space<vmem>>, %arg5: memref<1x128xf32, #tpu.memory_space<vmem>>, %arg6: memref<1x1x32x128xbf16, #tpu.memory_space<vmem>>, %arg7: memref<1x1x2x128xf32, #tpu.memory_space<vmem>>, %arg8: memref<32x128xf32, #tpu.memory_space<vmem>>) attributes {dimension_semantics = [#tpu.dimension_semantics<parallel>, #tpu.dimension_semantics<parallel>, #tpu.dimension_semantics<arbitrary>], iteration_bounds = array<i64: 2, 4, 3>, scalar_prefetch = 0 : i64, scratch_operands = 1 : i64, tpu.core_type = #tpu.core_type<tc>, window_params = [{transform_indices = @transform_0, window_bounds = array<i64: 1, 1, 34, 64>}, {transform_indices = @transform_1, window_bounds = array<i64: 1, 3, 64, 128>}, {pipeline_mode = #tpu.pipeline_mode<synchronous>, transform_indices = @transform_2, window_bounds = array<i64: 1, 128>}, {transform_indices = @transform_3, window_bounds = array<i64: 1, 1, 32, 128>}, {transform_indices = @transform_4, window_bounds = array<i64: 1, 1, 2, 128>}]} {
    %c0 = arith.constant 0 : index
    %c0_0 = arith.constant 0 : index
    %c0_1 = arith.constant 0 : index
    %c0_2 = arith.constant 0 : index
    %0 = vector.load %arg3[%c0, %c0_0, %c0_1, %c0_2] : memref<1x1x34x64xbf16, #tpu.memory_space<vmem>>, vector<1x1x34x64xbf16>
    %1 = vector.shape_cast %0 : vector<1x1x34x64xbf16> to vector<34x64xbf16>
    %c0_i32 = arith.constant 0 : i32
    %2 = arith.cmpi eq, %arg2, %c0_i32 : i32
    %3 = arith.extui %2 : i1 to i32
    %c0_i32_3 = arith.constant 0 : i32
    %4 = arith.cmpi ne, %3, %c0_i32_3 : i32
    scf.if %4 {
      %cst_21 = arith.constant 0.000000e+00 : f32
      %25 = vector.broadcast %cst_21 : f32 to vector<32x128xf32>
      %c0_22 = arith.constant 0 : index
      %c0_23 = arith.constant 0 : index
      %26 = vector.load %arg8[%c0_22, %c0_23] : memref<32x128xf32, #tpu.memory_space<vmem>>, vector<32x128xf32>
      tpu.vector_store %arg8[%c0_22, %c0_23], %25 {strides = array<i32>} : memref<32x128xf32, #tpu.memory_space<vmem>>, vector<32x128xf32>,
    } else {
    }
    %c0_4 = arith.constant 0 : index
    %c0_5 = arith.constant 0 : index
    %5 = vector.load %arg8[%c0_4, %c0_5] : memref<32x128xf32, #tpu.memory_space<vmem>>, vector<32x128xf32>
    %6 = vector.extract_strided_slice %1 {offsets = [0, 0], sizes = [32, 64], strides = [1, 1]} : vector<34x64xbf16> to vector<32x64xbf16>
    %c0_6 = arith.constant 0 : index
    %c0_7 = arith.constant 0 : index
    %c0_8 = arith.constant 0 : index
    %c0_9 = arith.constant 0 : index
    %7 = vector.load %arg4[%c0_6, %c0_7, %c0_8, %c0_9] : memref<1x3x64x128xbf16, #tpu.memory_space<vmem>>, vector<1x1x64x128xbf16>
    %8 = vector.shape_cast %7 : vector<1x1x64x128xbf16> to vector<64x128xbf16>
    %cst = arith.constant dense<0.000000e+00> : vector<32x128xf32>
    %9 = tpu.matmul %6, %8, %cst {dimension_numbers = #tpu.dot_dimension_numbers<[1], [0], [0], [1], [0, 0, 1, 1], [], []>} : vector<32x64xbf16>, vector<64x128xbf16>, vector<32x128xf32> -> vector<32x128xf32>
    %10 = arith.addf %5, %9 : vector<32x128xf32>
    %11 = vector.extract_strided_slice %1 {offsets = [1, 0], sizes = [32, 64], strides = [1, 1]} : vector<34x64xbf16> to vector<32x64xbf16>
    %c0_10 = arith.constant 0 : index
    %c1 = arith.constant 1 : index
    %c0_11 = arith.constant 0 : index
    %c0_12 = arith.constant 0 : index
    %12 = vector.load %arg4[%c0_10, %c1, %c0_11, %c0_12] : memref<1x3x64x128xbf16, #tpu.memory_space<vmem>>, vector<1x1x64x128xbf16>
    %13 = vector.shape_cast %12 : vector<1x1x64x128xbf16> to vector<64x128xbf16>
    %cst_13 = arith.constant dense<0.000000e+00> : vector<32x128xf32>
    %14 = tpu.matmul %11, %13, %cst_13 {dimension_numbers = #tpu.dot_dimension_numbers<[1], [0], [0], [1], [0, 0, 1, 1], [], []>} : vector<32x64xbf16>, vector<64x128xbf16>, vector<32x128xf32> -> vector<32x128xf32>
    %15 = arith.addf %10, %14 : vector<32x128xf32>
    %16 = vector.extract_strided_slice %1 {offsets = [2, 0], sizes = [32, 64], strides = [1, 1]} : vector<34x64xbf16> to vector<32x64xbf16>
    %c0_14 = arith.constant 0 : index
    %c2 = arith.constant 2 : index
    %c0_15 = arith.constant 0 : index
    %c0_16 = arith.constant 0 : index
    %17 = vector.load %arg4[%c0_14, %c2, %c0_15, %c0_16] : memref<1x3x64x128xbf16, #tpu.memory_space<vmem>>, vector<1x1x64x128xbf16>
    %18 = vector.shape_cast %17 : vector<1x1x64x128xbf16> to vector<64x128xbf16>
    %cst_17 = arith.constant dense<0.000000e+00> : vector<32x128xf32>
    %19 = tpu.matmul %16, %18, %cst_17 {dimension_numbers = #tpu.dot_dimension_numbers<[1], [0], [0], [1], [0, 0, 1, 1], [], []>} : vector<32x64xbf16>, vector<64x128xbf16>, vector<32x128xf32> -> vector<32x128xf32>
    %20 = arith.addf %15, %19 : vector<32x128xf32>
    %c0_18 = arith.constant 0 : index
    %c0_19 = arith.constant 0 : index
    %21 = vector.load %arg8[%c0_18, %c0_19] : memref<32x128xf32, #tpu.memory_space<vmem>>, vector<32x128xf32>
    tpu.vector_store %arg8[%c0_18, %c0_19], %20 {strides = array<i32>} : memref<32x128xf32, #tpu.memory_space<vmem>>, vector<32x128xf32>,
    %c2_i32 = arith.constant 2 : i32
    %22 = arith.cmpi eq, %arg2, %c2_i32 : i32
    %23 = arith.extui %22 : i1 to i32
    %c0_i32_20 = arith.constant 0 : i32
    %24 = arith.cmpi ne, %23, %c0_i32_20 : i32
    scf.if %24 {
      %c0_21 = arith.constant 0 : index
      %c0_22 = arith.constant 0 : index
      %25 = vector.load %arg8[%c0_21, %c0_22] : memref<32x128xf32, #tpu.memory_space<vmem>>, vector<32x128xf32>
      %c0_23 = arith.constant 0 : index
      %c0_24 = arith.constant 0 : index
      %26 = vector.load %arg5[%c0_23, %c0_24] : memref<1x128xf32, #tpu.memory_space<vmem>>, vector<1x128xf32>
      %27 = vector.broadcast %26 : vector<1x128xf32> to vector<32x128xf32>
      %28 = arith.addf %25, %27 : vector<32x128xf32>
      %29 = arith.truncf %28 : vector<32x128xf32> to vector<32x128xbf16>
      %30 = vector.shape_cast %29 : vector<32x128xbf16> to vector<1x1x32x128xbf16>
      %c0_25 = arith.constant 0 : index
      %c0_26 = arith.constant 0 : index
      %c0_27 = arith.constant 0 : index
      %c0_28 = arith.constant 0 : index
      %31 = vector.load %arg6[%c0_25, %c0_26, %c0_27, %c0_28] : memref<1x1x32x128xbf16, #tpu.memory_space<vmem>>, vector<1x1x32x128xbf16>
      tpu.vector_store %arg6[%c0_25, %c0_26, %c0_27, %c0_28], %30 {strides = array<i32>} : memref<1x1x32x128xbf16, #tpu.memory_space<vmem>>, vector<1x1x32x128xbf16>,
      %cst_29 = arith.constant dense<0.000000e+00> : vector<128xf32>
      %32 = vector.multi_reduction <add>, %28, %cst_29 [0] : vector<32x128xf32> to vector<128xf32>
      %33 = vector.shape_cast %32 : vector<128xf32> to vector<1x128xf32>
      %34 = arith.mulf %28, %28 : vector<32x128xf32>
      %cst_30 = arith.constant dense<0.000000e+00> : vector<128xf32>
      %35 = vector.multi_reduction <add>, %34, %cst_30 [0] : vector<32x128xf32> to vector<128xf32>
      %36 = vector.shape_cast %35 : vector<128xf32> to vector<1x128xf32>
      %37 = tpu.concatenate %33, %36 in 0 : vector<1x128xf32>, vector<1x128xf32> -> vector<2x128xf32>
      %38 = vector.shape_cast %37 : vector<2x128xf32> to vector<1x1x2x128xf32>
      %c0_31 = arith.constant 0 : index
      %c0_32 = arith.constant 0 : index
      %c0_33 = arith.constant 0 : index
      %c0_34 = arith.constant 0 : index
      %39 = vector.load %arg7[%c0_31, %c0_32, %c0_33, %c0_34] : memref<1x1x2x128xf32, #tpu.memory_space<vmem>>, vector<1x1x2x128xf32>
      tpu.vector_store %arg7[%c0_31, %c0_32, %c0_33, %c0_34], %38 {strides = array<i32>} : memref<1x1x2x128xf32, #tpu.memory_space<vmem>>, vector<1x1x2x128xf32>,
    } else {
    }
    return
  }
  func.func @transform_0(%arg0: i32, %arg1: i32, %arg2: i32) -> (i32, i32, i32, i32) {
    %0 = arith.addi %arg1, %arg2 : i32
    %c0_i32 = arith.constant 0 : i32
    %c0_i32_0 = arith.constant 0 : i32
    %c0_i32_1 = arith.constant 0 : i32
    return %arg0, %0, %c0_i32, %c0_i32_0 : i32, i32, i32, i32
  }
  func.func @transform_1(%arg0: i32, %arg1: i32, %arg2: i32) -> (i32, i32, i32, i32) {
    %c0_i32 = arith.constant 0 : i32
    %c0_i32_0 = arith.constant 0 : i32
    %c0_i32_1 = arith.constant 0 : i32
    %c0_i32_2 = arith.constant 0 : i32
    return %arg2, %c0_i32, %c0_i32_0, %c0_i32_1 : i32, i32, i32, i32
  }
  func.func @transform_2(%arg0: i32, %arg1: i32, %arg2: i32) -> (i32, i32) {
    %c0_i32 = arith.constant 0 : i32
    %c0_i32_0 = arith.constant 0 : i32
    %c0_i32_1 = arith.constant 0 : i32
    return %c0_i32, %c0_i32_0 : i32, i32
  }
  func.func @transform_3(%arg0: i32, %arg1: i32, %arg2: i32) -> (i32, i32, i32, i32) {
    %c0_i32 = arith.constant 0 : i32
    %c0_i32_0 = arith.constant 0 : i32
    %c0_i32_1 = arith.constant 0 : i32
    return %arg0, %arg1, %c0_i32, %c0_i32_0 : i32, i32, i32, i32
  }
  func.func @transform_4(%arg0: i32, %arg1: i32, %arg2: i32) -> (i32, i32, i32, i32) {
    %c0_i32 = arith.constant 0 : i32
    %c0_i32_0 = arith.constant 0 : i32
    %c0_i32_1 = arith.constant 0 : i32
    return %arg0, %arg1, %c0_i32, %c0_i32_0 : i32, i32, i32, i32
  }
}

module attributes {stable_mosaic.version = 11 : i64} {
  func.func @_bn_relu_kernel(%arg0: i32, %arg1: memref<256x128xbf16, #tpu.memory_space<vmem>>, %arg2: memref<1x128xf32, #tpu.memory_space<vmem>>, %arg3: memref<1x128xf32, #tpu.memory_space<vmem>>, %arg4: memref<256x128xbf16, #tpu.memory_space<vmem>>) attributes {dimension_semantics = [#tpu.dimension_semantics<parallel>], iteration_bounds = array<i64: 1>, scalar_prefetch = 0 : i64, scratch_operands = 0 : i64, tpu.core_type = #tpu.core_type<tc>, window_params = [{transform_indices = @transform_0, window_bounds = array<i64: 256, 128>}, {pipeline_mode = #tpu.pipeline_mode<synchronous>, transform_indices = @transform_1, window_bounds = array<i64: 1, 128>}, {pipeline_mode = #tpu.pipeline_mode<synchronous>, transform_indices = @transform_2, window_bounds = array<i64: 1, 128>}, {transform_indices = @transform_3, window_bounds = array<i64: 256, 128>}]} {
    %c0 = arith.constant 0 : index
    %c0_0 = arith.constant 0 : index
    %0 = vector.load %arg1[%c0, %c0_0] : memref<256x128xbf16, #tpu.memory_space<vmem>>, vector<256x128xbf16>
    %1 = arith.extf %0 : vector<256x128xbf16> to vector<256x128xf32>
    %c0_1 = arith.constant 0 : index
    %c0_2 = arith.constant 0 : index
    %2 = vector.load %arg2[%c0_1, %c0_2] : memref<1x128xf32, #tpu.memory_space<vmem>>, vector<1x128xf32>
    %3 = vector.broadcast %2 : vector<1x128xf32> to vector<256x128xf32>
    %4 = arith.mulf %1, %3 : vector<256x128xf32>
    %c0_3 = arith.constant 0 : index
    %c0_4 = arith.constant 0 : index
    %5 = vector.load %arg3[%c0_3, %c0_4] : memref<1x128xf32, #tpu.memory_space<vmem>>, vector<1x128xf32>
    %6 = vector.broadcast %5 : vector<1x128xf32> to vector<256x128xf32>
    %7 = arith.addf %4, %6 : vector<256x128xf32>
    %cst = arith.constant 0.000000e+00 : f32
    %8 = vector.broadcast %cst : f32 to vector<256x128xf32>
    %9 = arith.maximumf %7, %8 : vector<256x128xf32>
    %10 = arith.truncf %9 : vector<256x128xf32> to vector<256x128xbf16>
    %c0_5 = arith.constant 0 : index
    %c0_6 = arith.constant 0 : index
    %11 = vector.load %arg4[%c0_5, %c0_6] : memref<256x128xbf16, #tpu.memory_space<vmem>>, vector<256x128xbf16>
    tpu.vector_store %arg4[%c0_5, %c0_6], %10 {strides = array<i32>} : memref<256x128xbf16, #tpu.memory_space<vmem>>, vector<256x128xbf16>,
    return
  }
  func.func @transform_0(%arg0: i32) -> (i32, i32) {
    %c0_i32 = arith.constant 0 : i32
    %c0_i32_0 = arith.constant 0 : i32
    return %arg0, %c0_i32 : i32, i32
  }
  func.func @transform_1(%arg0: i32) -> (i32, i32) {
    %c0_i32 = arith.constant 0 : i32
    %c0_i32_0 = arith.constant 0 : i32
    %c0_i32_1 = arith.constant 0 : i32
    return %c0_i32, %c0_i32_0 : i32, i32
  }
  func.func @transform_2(%arg0: i32) -> (i32, i32) {
    %c0_i32 = arith.constant 0 : i32
    %c0_i32_0 = arith.constant 0 : i32
    %c0_i32_1 = arith.constant 0 : i32
    return %c0_i32, %c0_i32_0 : i32, i32
  }
  func.func @transform_3(%arg0: i32) -> (i32, i32) {
    %c0_i32 = arith.constant 0 : i32
    %c0_i32_0 = arith.constant 0 : i32
    return %arg0, %c0_i32 : i32, i32
  }
}

module attributes {stable_mosaic.version = 11 : i64} {
  func.func @kernel(%arg0: i32, %arg1: memref<256x64xbf16, #tpu.memory_space<vmem>>, %arg2: memref<64x128xbf16, #tpu.memory_space<vmem>>, %arg3: memref<1x128xf32, #tpu.memory_space<vmem>>, %arg4: memref<1x2x128xf32, #tpu.memory_space<vmem>>) attributes {dimension_semantics = [#tpu.dimension_semantics<parallel>], iteration_bounds = array<i64: 1>, scalar_prefetch = 0 : i64, scratch_operands = 0 : i64, tpu.core_type = #tpu.core_type<tc>, window_params = [{transform_indices = @transform_0, window_bounds = array<i64: 256, 64>}, {pipeline_mode = #tpu.pipeline_mode<synchronous>, transform_indices = @transform_1, window_bounds = array<i64: 64, 128>}, {pipeline_mode = #tpu.pipeline_mode<synchronous>, transform_indices = @transform_2, window_bounds = array<i64: 1, 128>}, {transform_indices = @transform_3, window_bounds = array<i64: 1, 2, 128>}]} {
    %c0 = arith.constant 0 : index
    %c0_0 = arith.constant 0 : index
    %0 = vector.load %arg1[%c0, %c0_0] : memref<256x64xbf16, #tpu.memory_space<vmem>>, vector<256x64xbf16>
    %c0_1 = arith.constant 0 : index
    %c0_2 = arith.constant 0 : index
    %1 = vector.load %arg2[%c0_1, %c0_2] : memref<64x128xbf16, #tpu.memory_space<vmem>>, vector<64x128xbf16>
    %cst = arith.constant dense<0.000000e+00> : vector<256x128xf32>
    %2 = tpu.matmul %0, %1, %cst {dimension_numbers = #tpu.dot_dimension_numbers<[1], [0], [0], [1], [0, 0, 1, 1], [], []>} : vector<256x64xbf16>, vector<64x128xbf16>, vector<256x128xf32> -> vector<256x128xf32>
    %c0_3 = arith.constant 0 : index
    %c0_4 = arith.constant 0 : index
    %3 = vector.load %arg3[%c0_3, %c0_4] : memref<1x128xf32, #tpu.memory_space<vmem>>, vector<1x128xf32>
    %4 = vector.broadcast %3 : vector<1x128xf32> to vector<256x128xf32>
    %5 = arith.addf %2, %4 : vector<256x128xf32>
    %cst_5 = arith.constant dense<0.000000e+00> : vector<128xf32>
    %6 = vector.multi_reduction <add>, %5, %cst_5 [0] : vector<256x128xf32> to vector<128xf32>
    %7 = vector.shape_cast %6 : vector<128xf32> to vector<1x128xf32>
    %8 = arith.mulf %5, %5 : vector<256x128xf32>
    %cst_6 = arith.constant dense<0.000000e+00> : vector<128xf32>
    %9 = vector.multi_reduction <add>, %8, %cst_6 [0] : vector<256x128xf32> to vector<128xf32>
    %10 = vector.shape_cast %9 : vector<128xf32> to vector<1x128xf32>
    %11 = tpu.concatenate %7, %10 in 0 : vector<1x128xf32>, vector<1x128xf32> -> vector<2x128xf32>
    %12 = vector.shape_cast %11 : vector<2x128xf32> to vector<1x2x128xf32>
    %c0_7 = arith.constant 0 : index
    %c0_8 = arith.constant 0 : index
    %c0_9 = arith.constant 0 : index
    %13 = vector.load %arg4[%c0_7, %c0_8, %c0_9] : memref<1x2x128xf32, #tpu.memory_space<vmem>>, vector<1x2x128xf32>
    tpu.vector_store %arg4[%c0_7, %c0_8, %c0_9], %12 {strides = array<i32>} : memref<1x2x128xf32, #tpu.memory_space<vmem>>, vector<1x2x128xf32>,
    return
  }
  func.func @transform_0(%arg0: i32) -> (i32, i32) {
    %c0_i32 = arith.constant 0 : i32
    %c0_i32_0 = arith.constant 0 : i32
    return %arg0, %c0_i32 : i32, i32
  }
  func.func @transform_1(%arg0: i32) -> (i32, i32) {
    %c0_i32 = arith.constant 0 : i32
    %c0_i32_0 = arith.constant 0 : i32
    %c0_i32_1 = arith.constant 0 : i32
    return %c0_i32, %c0_i32_0 : i32, i32
  }
  func.func @transform_2(%arg0: i32) -> (i32, i32) {
    %c0_i32 = arith.constant 0 : i32
    %c0_i32_0 = arith.constant 0 : i32
    %c0_i32_1 = arith.constant 0 : i32
    return %c0_i32, %c0_i32_0 : i32, i32
  }
  func.func @transform_3(%arg0: i32) -> (i32, i32, i32) {
    %c0_i32 = arith.constant 0 : i32
    %c0_i32_0 = arith.constant 0 : i32
    %c0_i32_1 = arith.constant 0 : i32
    return %arg0, %c0_i32, %c0_i32_0 : i32, i32, i32
  }
}

module attributes {stable_mosaic.version = 11 : i64} {
  func.func @_conv3x3_s1_kernel(%arg0: i32, %arg1: i32, %arg2: i32, %arg3: memref<1x1x34x128xbf16, #tpu.memory_space<vmem>>, %arg4: memref<1x3x128x128xbf16, #tpu.memory_space<vmem>>, %arg5: memref<1x128xf32, #tpu.memory_space<vmem>>, %arg6: memref<1x1x32x128xbf16, #tpu.memory_space<vmem>>, %arg7: memref<1x1x2x128xf32, #tpu.memory_space<vmem>>, %arg8: memref<32x128xf32, #tpu.memory_space<vmem>>) attributes {dimension_semantics = [#tpu.dimension_semantics<parallel>, #tpu.dimension_semantics<parallel>, #tpu.dimension_semantics<arbitrary>], iteration_bounds = array<i64: 2, 4, 3>, scalar_prefetch = 0 : i64, scratch_operands = 1 : i64, tpu.core_type = #tpu.core_type<tc>, window_params = [{transform_indices = @transform_0, window_bounds = array<i64: 1, 1, 34, 128>}, {transform_indices = @transform_1, window_bounds = array<i64: 1, 3, 128, 128>}, {pipeline_mode = #tpu.pipeline_mode<synchronous>, transform_indices = @transform_2, window_bounds = array<i64: 1, 128>}, {transform_indices = @transform_3, window_bounds = array<i64: 1, 1, 32, 128>}, {transform_indices = @transform_4, window_bounds = array<i64: 1, 1, 2, 128>}]} {
    %c0 = arith.constant 0 : index
    %c0_0 = arith.constant 0 : index
    %c0_1 = arith.constant 0 : index
    %c0_2 = arith.constant 0 : index
    %0 = vector.load %arg3[%c0, %c0_0, %c0_1, %c0_2] : memref<1x1x34x128xbf16, #tpu.memory_space<vmem>>, vector<1x1x34x128xbf16>
    %1 = vector.shape_cast %0 : vector<1x1x34x128xbf16> to vector<34x128xbf16>
    %c0_i32 = arith.constant 0 : i32
    %2 = arith.cmpi eq, %arg2, %c0_i32 : i32
    %3 = arith.extui %2 : i1 to i32
    %c0_i32_3 = arith.constant 0 : i32
    %4 = arith.cmpi ne, %3, %c0_i32_3 : i32
    scf.if %4 {
      %cst_21 = arith.constant 0.000000e+00 : f32
      %25 = vector.broadcast %cst_21 : f32 to vector<32x128xf32>
      %c0_22 = arith.constant 0 : index
      %c0_23 = arith.constant 0 : index
      %26 = vector.load %arg8[%c0_22, %c0_23] : memref<32x128xf32, #tpu.memory_space<vmem>>, vector<32x128xf32>
      tpu.vector_store %arg8[%c0_22, %c0_23], %25 {strides = array<i32>} : memref<32x128xf32, #tpu.memory_space<vmem>>, vector<32x128xf32>,
    } else {
    }
    %c0_4 = arith.constant 0 : index
    %c0_5 = arith.constant 0 : index
    %5 = vector.load %arg8[%c0_4, %c0_5] : memref<32x128xf32, #tpu.memory_space<vmem>>, vector<32x128xf32>
    %6 = vector.extract_strided_slice %1 {offsets = [0, 0], sizes = [32, 128], strides = [1, 1]} : vector<34x128xbf16> to vector<32x128xbf16>
    %c0_6 = arith.constant 0 : index
    %c0_7 = arith.constant 0 : index
    %c0_8 = arith.constant 0 : index
    %c0_9 = arith.constant 0 : index
    %7 = vector.load %arg4[%c0_6, %c0_7, %c0_8, %c0_9] : memref<1x3x128x128xbf16, #tpu.memory_space<vmem>>, vector<1x1x128x128xbf16>
    %8 = vector.shape_cast %7 : vector<1x1x128x128xbf16> to vector<128x128xbf16>
    %cst = arith.constant dense<0.000000e+00> : vector<32x128xf32>
    %9 = tpu.matmul %6, %8, %cst {dimension_numbers = #tpu.dot_dimension_numbers<[1], [0], [0], [1], [0, 0, 1, 1], [], []>} : vector<32x128xbf16>, vector<128x128xbf16>, vector<32x128xf32> -> vector<32x128xf32>
    %10 = arith.addf %5, %9 : vector<32x128xf32>
    %11 = vector.extract_strided_slice %1 {offsets = [1, 0], sizes = [32, 128], strides = [1, 1]} : vector<34x128xbf16> to vector<32x128xbf16>
    %c0_10 = arith.constant 0 : index
    %c1 = arith.constant 1 : index
    %c0_11 = arith.constant 0 : index
    %c0_12 = arith.constant 0 : index
    %12 = vector.load %arg4[%c0_10, %c1, %c0_11, %c0_12] : memref<1x3x128x128xbf16, #tpu.memory_space<vmem>>, vector<1x1x128x128xbf16>
    %13 = vector.shape_cast %12 : vector<1x1x128x128xbf16> to vector<128x128xbf16>
    %cst_13 = arith.constant dense<0.000000e+00> : vector<32x128xf32>
    %14 = tpu.matmul %11, %13, %cst_13 {dimension_numbers = #tpu.dot_dimension_numbers<[1], [0], [0], [1], [0, 0, 1, 1], [], []>} : vector<32x128xbf16>, vector<128x128xbf16>, vector<32x128xf32> -> vector<32x128xf32>
    %15 = arith.addf %10, %14 : vector<32x128xf32>
    %16 = vector.extract_strided_slice %1 {offsets = [2, 0], sizes = [32, 128], strides = [1, 1]} : vector<34x128xbf16> to vector<32x128xbf16>
    %c0_14 = arith.constant 0 : index
    %c2 = arith.constant 2 : index
    %c0_15 = arith.constant 0 : index
    %c0_16 = arith.constant 0 : index
    %17 = vector.load %arg4[%c0_14, %c2, %c0_15, %c0_16] : memref<1x3x128x128xbf16, #tpu.memory_space<vmem>>, vector<1x1x128x128xbf16>
    %18 = vector.shape_cast %17 : vector<1x1x128x128xbf16> to vector<128x128xbf16>
    %cst_17 = arith.constant dense<0.000000e+00> : vector<32x128xf32>
    %19 = tpu.matmul %16, %18, %cst_17 {dimension_numbers = #tpu.dot_dimension_numbers<[1], [0], [0], [1], [0, 0, 1, 1], [], []>} : vector<32x128xbf16>, vector<128x128xbf16>, vector<32x128xf32> -> vector<32x128xf32>
    %20 = arith.addf %15, %19 : vector<32x128xf32>
    %c0_18 = arith.constant 0 : index
    %c0_19 = arith.constant 0 : index
    %21 = vector.load %arg8[%c0_18, %c0_19] : memref<32x128xf32, #tpu.memory_space<vmem>>, vector<32x128xf32>
    tpu.vector_store %arg8[%c0_18, %c0_19], %20 {strides = array<i32>} : memref<32x128xf32, #tpu.memory_space<vmem>>, vector<32x128xf32>,
    %c2_i32 = arith.constant 2 : i32
    %22 = arith.cmpi eq, %arg2, %c2_i32 : i32
    %23 = arith.extui %22 : i1 to i32
    %c0_i32_20 = arith.constant 0 : i32
    %24 = arith.cmpi ne, %23, %c0_i32_20 : i32
    scf.if %24 {
      %c0_21 = arith.constant 0 : index
      %c0_22 = arith.constant 0 : index
      %25 = vector.load %arg8[%c0_21, %c0_22] : memref<32x128xf32, #tpu.memory_space<vmem>>, vector<32x128xf32>
      %c0_23 = arith.constant 0 : index
      %c0_24 = arith.constant 0 : index
      %26 = vector.load %arg5[%c0_23, %c0_24] : memref<1x128xf32, #tpu.memory_space<vmem>>, vector<1x128xf32>
      %27 = vector.broadcast %26 : vector<1x128xf32> to vector<32x128xf32>
      %28 = arith.addf %25, %27 : vector<32x128xf32>
      %29 = arith.truncf %28 : vector<32x128xf32> to vector<32x128xbf16>
      %30 = vector.shape_cast %29 : vector<32x128xbf16> to vector<1x1x32x128xbf16>
      %c0_25 = arith.constant 0 : index
      %c0_26 = arith.constant 0 : index
      %c0_27 = arith.constant 0 : index
      %c0_28 = arith.constant 0 : index
      %31 = vector.load %arg6[%c0_25, %c0_26, %c0_27, %c0_28] : memref<1x1x32x128xbf16, #tpu.memory_space<vmem>>, vector<1x1x32x128xbf16>
      tpu.vector_store %arg6[%c0_25, %c0_26, %c0_27, %c0_28], %30 {strides = array<i32>} : memref<1x1x32x128xbf16, #tpu.memory_space<vmem>>, vector<1x1x32x128xbf16>,
      %cst_29 = arith.constant dense<0.000000e+00> : vector<128xf32>
      %32 = vector.multi_reduction <add>, %28, %cst_29 [0] : vector<32x128xf32> to vector<128xf32>
      %33 = vector.shape_cast %32 : vector<128xf32> to vector<1x128xf32>
      %34 = arith.mulf %28, %28 : vector<32x128xf32>
      %cst_30 = arith.constant dense<0.000000e+00> : vector<128xf32>
      %35 = vector.multi_reduction <add>, %34, %cst_30 [0] : vector<32x128xf32> to vector<128xf32>
      %36 = vector.shape_cast %35 : vector<128xf32> to vector<1x128xf32>
      %37 = tpu.concatenate %33, %36 in 0 : vector<1x128xf32>, vector<1x128xf32> -> vector<2x128xf32>
      %38 = vector.shape_cast %37 : vector<2x128xf32> to vector<1x1x2x128xf32>
      %c0_31 = arith.constant 0 : index
      %c0_32 = arith.constant 0 : index
      %c0_33 = arith.constant 0 : index
      %c0_34 = arith.constant 0 : index
      %39 = vector.load %arg7[%c0_31, %c0_32, %c0_33, %c0_34] : memref<1x1x2x128xf32, #tpu.memory_space<vmem>>, vector<1x1x2x128xf32>
      tpu.vector_store %arg7[%c0_31, %c0_32, %c0_33, %c0_34], %38 {strides = array<i32>} : memref<1x1x2x128xf32, #tpu.memory_space<vmem>>, vector<1x1x2x128xf32>,
    } else {
    }
    return
  }
  func.func @transform_0(%arg0: i32, %arg1: i32, %arg2: i32) -> (i32, i32, i32, i32) {
    %0 = arith.addi %arg1, %arg2 : i32
    %c0_i32 = arith.constant 0 : i32
    %c0_i32_0 = arith.constant 0 : i32
    %c0_i32_1 = arith.constant 0 : i32
    return %arg0, %0, %c0_i32, %c0_i32_0 : i32, i32, i32, i32
  }
  func.func @transform_1(%arg0: i32, %arg1: i32, %arg2: i32) -> (i32, i32, i32, i32) {
    %c0_i32 = arith.constant 0 : i32
    %c0_i32_0 = arith.constant 0 : i32
    %c0_i32_1 = arith.constant 0 : i32
    %c0_i32_2 = arith.constant 0 : i32
    return %arg2, %c0_i32, %c0_i32_0, %c0_i32_1 : i32, i32, i32, i32
  }
  func.func @transform_2(%arg0: i32, %arg1: i32, %arg2: i32) -> (i32, i32) {
    %c0_i32 = arith.constant 0 : i32
    %c0_i32_0 = arith.constant 0 : i32
    %c0_i32_1 = arith.constant 0 : i32
    return %c0_i32, %c0_i32_0 : i32, i32
  }
  func.func @transform_3(%arg0: i32, %arg1: i32, %arg2: i32) -> (i32, i32, i32, i32) {
    %c0_i32 = arith.constant 0 : i32
    %c0_i32_0 = arith.constant 0 : i32
    %c0_i32_1 = arith.constant 0 : i32
    return %arg0, %arg1, %c0_i32, %c0_i32_0 : i32, i32, i32, i32
  }
  func.func @transform_4(%arg0: i32, %arg1: i32, %arg2: i32) -> (i32, i32, i32, i32) {
    %c0_i32 = arith.constant 0 : i32
    %c0_i32_0 = arith.constant 0 : i32
    %c0_i32_1 = arith.constant 0 : i32
    return %arg0, %arg1, %c0_i32, %c0_i32_0 : i32, i32, i32, i32
  }
}

module attributes {stable_mosaic.version = 11 : i64} {
  func.func @_merge_kernel(%arg0: i32, %arg1: memref<256x128xbf16, #tpu.memory_space<vmem>>, %arg2: memref<256x64xbf16, #tpu.memory_space<vmem>>, %arg3: memref<64x128xbf16, #tpu.memory_space<vmem>>, %arg4: memref<1x128xf32, #tpu.memory_space<vmem>>, %arg5: memref<1x128xf32, #tpu.memory_space<vmem>>, %arg6: memref<1x128xf32, #tpu.memory_space<vmem>>, %arg7: memref<1x128xf32, #tpu.memory_space<vmem>>, %arg8: memref<1x128xf32, #tpu.memory_space<vmem>>, %arg9: memref<256x128xbf16, #tpu.memory_space<vmem>>) attributes {dimension_semantics = [#tpu.dimension_semantics<parallel>], iteration_bounds = array<i64: 1>, scalar_prefetch = 0 : i64, scratch_operands = 0 : i64, tpu.core_type = #tpu.core_type<tc>, window_params = [{transform_indices = @transform_0, window_bounds = array<i64: 256, 128>}, {transform_indices = @transform_1, window_bounds = array<i64: 256, 64>}, {pipeline_mode = #tpu.pipeline_mode<synchronous>, transform_indices = @transform_2, window_bounds = array<i64: 64, 128>}, {pipeline_mode = #tpu.pipeline_mode<synchronous>, transform_indices = @transform_3, window_bounds = array<i64: 1, 128>}, {pipeline_mode = #tpu.pipeline_mode<synchronous>, transform_indices = @transform_4, window_bounds = array<i64: 1, 128>}, {pipeline_mode = #tpu.pipeline_mode<synchronous>, transform_indices = @transform_5, window_bounds = array<i64: 1, 128>}, {pipeline_mode = #tpu.pipeline_mode<synchronous>, transform_indices = @transform_6, window_bounds = array<i64: 1, 128>}, {pipeline_mode = #tpu.pipeline_mode<synchronous>, transform_indices = @transform_7, window_bounds = array<i64: 1, 128>}, {transform_indices = @transform_8, window_bounds = array<i64: 256, 128>}]} {
    %c0 = arith.constant 0 : index
    %c0_0 = arith.constant 0 : index
    %0 = vector.load %arg1[%c0, %c0_0] : memref<256x128xbf16, #tpu.memory_space<vmem>>, vector<256x128xbf16>
    %1 = arith.extf %0 : vector<256x128xbf16> to vector<256x128xf32>
    %c0_1 = arith.constant 0 : index
    %c0_2 = arith.constant 0 : index
    %2 = vector.load %arg5[%c0_1, %c0_2] : memref<1x128xf32, #tpu.memory_space<vmem>>, vector<1x128xf32>
    %3 = vector.broadcast %2 : vector<1x128xf32> to vector<256x128xf32>
    %4 = arith.mulf %1, %3 : vector<256x128xf32>
    %c0_3 = arith.constant 0 : index
    %c0_4 = arith.constant 0 : index
    %5 = vector.load %arg6[%c0_3, %c0_4] : memref<1x128xf32, #tpu.memory_space<vmem>>, vector<1x128xf32>
    %6 = vector.broadcast %5 : vector<1x128xf32> to vector<256x128xf32>
    %7 = arith.addf %4, %6 : vector<256x128xf32>
    %c0_5 = arith.constant 0 : index
    %c0_6 = arith.constant 0 : index
    %8 = vector.load %arg2[%c0_5, %c0_6] : memref<256x64xbf16, #tpu.memory_space<vmem>>, vector<256x64xbf16>
    %c0_7 = arith.constant 0 : index
    %c0_8 = arith.constant 0 : index
    %9 = vector.load %arg3[%c0_7, %c0_8] : memref<64x128xbf16, #tpu.memory_space<vmem>>, vector<64x128xbf16>
    %cst = arith.constant dense<0.000000e+00> : vector<256x128xf32>
    %10 = tpu.matmul %8, %9, %cst {dimension_numbers = #tpu.dot_dimension_numbers<[1], [0], [0], [1], [0, 0, 1, 1], [], []>} : vector<256x64xbf16>, vector<64x128xbf16>, vector<256x128xf32> -> vector<256x128xf32>
    %c0_9 = arith.constant 0 : index
    %c0_10 = arith.constant 0 : index
    %11 = vector.load %arg4[%c0_9, %c0_10] : memref<1x128xf32, #tpu.memory_space<vmem>>, vector<1x128xf32>
    %12 = vector.broadcast %11 : vector<1x128xf32> to vector<256x128xf32>
    %13 = arith.addf %10, %12 : vector<256x128xf32>
    %c0_11 = arith.constant 0 : index
    %c0_12 = arith.constant 0 : index
    %14 = vector.load %arg7[%c0_11, %c0_12] : memref<1x128xf32, #tpu.memory_space<vmem>>, vector<1x128xf32>
    %15 = vector.broadcast %14 : vector<1x128xf32> to vector<256x128xf32>
    %16 = arith.mulf %13, %15 : vector<256x128xf32>
    %17 = arith.addf %7, %16 : vector<256x128xf32>
    %c0_13 = arith.constant 0 : index
    %c0_14 = arith.constant 0 : index
    %18 = vector.load %arg8[%c0_13, %c0_14] : memref<1x128xf32, #tpu.memory_space<vmem>>, vector<1x128xf32>
    %19 = vector.broadcast %18 : vector<1x128xf32> to vector<256x128xf32>
    %20 = arith.addf %17, %19 : vector<256x128xf32>
    %cst_15 = arith.constant 0.000000e+00 : f32
    %21 = vector.broadcast %cst_15 : f32 to vector<256x128xf32>
    %22 = arith.maximumf %20, %21 : vector<256x128xf32>
    %23 = arith.truncf %22 : vector<256x128xf32> to vector<256x128xbf16>
    %c0_16 = arith.constant 0 : index
    %c0_17 = arith.constant 0 : index
    %24 = vector.load %arg9[%c0_16, %c0_17] : memref<256x128xbf16, #tpu.memory_space<vmem>>, vector<256x128xbf16>
    tpu.vector_store %arg9[%c0_16, %c0_17], %23 {strides = array<i32>} : memref<256x128xbf16, #tpu.memory_space<vmem>>, vector<256x128xbf16>,
    return
  }
  func.func @transform_0(%arg0: i32) -> (i32, i32) {
    %c0_i32 = arith.constant 0 : i32
    %c0_i32_0 = arith.constant 0 : i32
    return %arg0, %c0_i32 : i32, i32
  }
  func.func @transform_1(%arg0: i32) -> (i32, i32) {
    %c0_i32 = arith.constant 0 : i32
    %c0_i32_0 = arith.constant 0 : i32
    return %arg0, %c0_i32 : i32, i32
  }
  func.func @transform_2(%arg0: i32) -> (i32, i32) {
    %c0_i32 = arith.constant 0 : i32
    %c0_i32_0 = arith.constant 0 : i32
    %c0_i32_1 = arith.constant 0 : i32
    return %c0_i32, %c0_i32_0 : i32, i32
  }
  func.func @transform_3(%arg0: i32) -> (i32, i32) {
    %c0_i32 = arith.constant 0 : i32
    %c0_i32_0 = arith.constant 0 : i32
    %c0_i32_1 = arith.constant 0 : i32
    return %c0_i32, %c0_i32_0 : i32, i32
  }
  func.func @transform_4(%arg0: i32) -> (i32, i32) {
    %c0_i32 = arith.constant 0 : i32
    %c0_i32_0 = arith.constant 0 : i32
    %c0_i32_1 = arith.constant 0 : i32
    return %c0_i32, %c0_i32_0 : i32, i32
  }
  func.func @transform_5(%arg0: i32) -> (i32, i32) {
    %c0_i32 = arith.constant 0 : i32
    %c0_i32_0 = arith.constant 0 : i32
    %c0_i32_1 = arith.constant 0 : i32
    return %c0_i32, %c0_i32_0 : i32, i32
  }
  func.func @transform_6(%arg0: i32) -> (i32, i32) {
    %c0_i32 = arith.constant 0 : i32
    %c0_i32_0 = arith.constant 0 : i32
    %c0_i32_1 = arith.constant 0 : i32
    return %c0_i32, %c0_i32_0 : i32, i32
  }
  func.func @transform_7(%arg0: i32) -> (i32, i32) {
    %c0_i32 = arith.constant 0 : i32
    %c0_i32_0 = arith.constant 0 : i32
    %c0_i32_1 = arith.constant 0 : i32
    return %c0_i32, %c0_i32_0 : i32, i32
  }
  func.func @transform_8(%arg0: i32) -> (i32, i32) {
    %c0_i32 = arith.constant 0 : i32
    %c0_i32_0 = arith.constant 0 : i32
    return %arg0, %c0_i32 : i32, i32
  }
}

module attributes {stable_mosaic.version = 11 : i64} {
  func.func @_maxpool_kernel(%arg0: i32, %arg1: memref<4x2x16x256xbf16, #tpu.memory_space<vmem>>, %arg2: memref<4x16x128xbf16, #tpu.memory_space<vmem>>) attributes {dimension_semantics = [#tpu.dimension_semantics<parallel>], iteration_bounds = array<i64: 1>, scalar_prefetch = 0 : i64, scratch_operands = 0 : i64, tpu.core_type = #tpu.core_type<tc>, window_params = [{transform_indices = @transform_0, window_bounds = array<i64: 4, 2, 16, 256>}, {transform_indices = @transform_1, window_bounds = array<i64: 4, 16, 128>}]} {
    %c0 = arith.constant 0 : index
    %c0_0 = arith.constant 0 : index
    %c0_1 = arith.constant 0 : index
    %c0_2 = arith.constant 0 : index
    %0 = vector.load %arg1[%c0, %c0_0, %c0_1, %c0_2] : memref<4x2x16x256xbf16, #tpu.memory_space<vmem>>, vector<4x2x16x256xbf16>
    %1 = vector.extract_strided_slice %0 {offsets = [0, 0, 0, 0], sizes = [4, 2, 16, 128], strides = [1, 1, 1, 1]} : vector<4x2x16x256xbf16> to vector<4x2x16x128xbf16>
    %2 = vector.extract_strided_slice %0 {offsets = [0, 0, 0, 128], sizes = [4, 2, 16, 128], strides = [1, 1, 1, 1]} : vector<4x2x16x256xbf16> to vector<4x2x16x128xbf16>
    %3 = arith.maximumf %1, %2 : vector<4x2x16x128xbf16>
    %4 = vector.extract_strided_slice %3 {offsets = [0, 0, 0, 0], sizes = [4, 1, 16, 128], strides = [1, 1, 1, 1]} : vector<4x2x16x128xbf16> to vector<4x1x16x128xbf16>
    %5 = vector.shape_cast %4 : vector<4x1x16x128xbf16> to vector<4x16x128xbf16>
    %6 = vector.extract_strided_slice %3 {offsets = [0, 1, 0, 0], sizes = [4, 1, 16, 128], strides = [1, 1, 1, 1]} : vector<4x2x16x128xbf16> to vector<4x1x16x128xbf16>
    %7 = vector.shape_cast %6 : vector<4x1x16x128xbf16> to vector<4x16x128xbf16>
    %8 = arith.maximumf %5, %7 : vector<4x16x128xbf16>
    %c0_3 = arith.constant 0 : index
    %c0_4 = arith.constant 0 : index
    %c0_5 = arith.constant 0 : index
    %9 = vector.load %arg2[%c0_3, %c0_4, %c0_5] : memref<4x16x128xbf16, #tpu.memory_space<vmem>>, vector<4x16x128xbf16>
    tpu.vector_store %arg2[%c0_3, %c0_4, %c0_5], %8 {strides = array<i32>} : memref<4x16x128xbf16, #tpu.memory_space<vmem>>, vector<4x16x128xbf16>,
    return
  }
  func.func @transform_0(%arg0: i32) -> (i32, i32, i32, i32) {
    %c0_i32 = arith.constant 0 : i32
    %c0_i32_0 = arith.constant 0 : i32
    %c0_i32_1 = arith.constant 0 : i32
    %c0_i32_2 = arith.constant 0 : i32
    return %arg0, %c0_i32, %c0_i32_0, %c0_i32_1 : i32, i32, i32, i32
  }
  func.func @transform_1(%arg0: i32) -> (i32, i32, i32) {
    %c0_i32 = arith.constant 0 : i32
    %c0_i32_0 = arith.constant 0 : i32
    %c0_i32_1 = arith.constant 0 : i32
    return %arg0, %c0_i32, %c0_i32_0 : i32, i32, i32
  }
}

module attributes {stable_mosaic.version = 11 : i64} {
  func.func @kernel(%arg0: i32, %arg1: memref<64x128xbf16, #tpu.memory_space<vmem>>, %arg2: memref<128x256xbf16, #tpu.memory_space<vmem>>, %arg3: memref<1x256xf32, #tpu.memory_space<vmem>>, %arg4: memref<1x2x256xf32, #tpu.memory_space<vmem>>) attributes {dimension_semantics = [#tpu.dimension_semantics<parallel>], iteration_bounds = array<i64: 1>, scalar_prefetch = 0 : i64, scratch_operands = 0 : i64, tpu.core_type = #tpu.core_type<tc>, window_params = [{transform_indices = @transform_0, window_bounds = array<i64: 64, 128>}, {pipeline_mode = #tpu.pipeline_mode<synchronous>, transform_indices = @transform_1, window_bounds = array<i64: 128, 256>}, {pipeline_mode = #tpu.pipeline_mode<synchronous>, transform_indices = @transform_2, window_bounds = array<i64: 1, 256>}, {transform_indices = @transform_3, window_bounds = array<i64: 1, 2, 256>}]} {
    %c0 = arith.constant 0 : index
    %c0_0 = arith.constant 0 : index
    %0 = vector.load %arg1[%c0, %c0_0] : memref<64x128xbf16, #tpu.memory_space<vmem>>, vector<64x128xbf16>
    %c0_1 = arith.constant 0 : index
    %c0_2 = arith.constant 0 : index
    %1 = vector.load %arg2[%c0_1, %c0_2] : memref<128x256xbf16, #tpu.memory_space<vmem>>, vector<128x256xbf16>
    %cst = arith.constant dense<0.000000e+00> : vector<64x256xf32>
    %2 = tpu.matmul %0, %1, %cst {dimension_numbers = #tpu.dot_dimension_numbers<[1], [0], [0], [1], [0, 0, 1, 1], [], []>} : vector<64x128xbf16>, vector<128x256xbf16>, vector<64x256xf32> -> vector<64x256xf32>
    %c0_3 = arith.constant 0 : index
    %c0_4 = arith.constant 0 : index
    %3 = vector.load %arg3[%c0_3, %c0_4] : memref<1x256xf32, #tpu.memory_space<vmem>>, vector<1x256xf32>
    %4 = vector.broadcast %3 : vector<1x256xf32> to vector<64x256xf32>
    %5 = arith.addf %2, %4 : vector<64x256xf32>
    %cst_5 = arith.constant dense<0.000000e+00> : vector<256xf32>
    %6 = vector.multi_reduction <add>, %5, %cst_5 [0] : vector<64x256xf32> to vector<256xf32>
    %7 = vector.shape_cast %6 : vector<256xf32> to vector<1x256xf32>
    %8 = arith.mulf %5, %5 : vector<64x256xf32>
    %cst_6 = arith.constant dense<0.000000e+00> : vector<256xf32>
    %9 = vector.multi_reduction <add>, %8, %cst_6 [0] : vector<64x256xf32> to vector<256xf32>
    %10 = vector.shape_cast %9 : vector<256xf32> to vector<1x256xf32>
    %11 = tpu.concatenate %7, %10 in 0 : vector<1x256xf32>, vector<1x256xf32> -> vector<2x256xf32>
    %12 = vector.shape_cast %11 : vector<2x256xf32> to vector<1x2x256xf32>
    %c0_7 = arith.constant 0 : index
    %c0_8 = arith.constant 0 : index
    %c0_9 = arith.constant 0 : index
    %13 = vector.load %arg4[%c0_7, %c0_8, %c0_9] : memref<1x2x256xf32, #tpu.memory_space<vmem>>, vector<1x2x256xf32>
    tpu.vector_store %arg4[%c0_7, %c0_8, %c0_9], %12 {strides = array<i32>} : memref<1x2x256xf32, #tpu.memory_space<vmem>>, vector<1x2x256xf32>,
    return
  }
  func.func @transform_0(%arg0: i32) -> (i32, i32) {
    %c0_i32 = arith.constant 0 : i32
    %c0_i32_0 = arith.constant 0 : i32
    return %arg0, %c0_i32 : i32, i32
  }
  func.func @transform_1(%arg0: i32) -> (i32, i32) {
    %c0_i32 = arith.constant 0 : i32
    %c0_i32_0 = arith.constant 0 : i32
    %c0_i32_1 = arith.constant 0 : i32
    return %c0_i32, %c0_i32_0 : i32, i32
  }
  func.func @transform_2(%arg0: i32) -> (i32, i32) {
    %c0_i32 = arith.constant 0 : i32
    %c0_i32_0 = arith.constant 0 : i32
    %c0_i32_1 = arith.constant 0 : i32
    return %c0_i32, %c0_i32_0 : i32, i32
  }
  func.func @transform_3(%arg0: i32) -> (i32, i32, i32) {
    %c0_i32 = arith.constant 0 : i32
    %c0_i32_0 = arith.constant 0 : i32
    %c0_i32_1 = arith.constant 0 : i32
    return %arg0, %c0_i32, %c0_i32_0 : i32, i32, i32
  }
}

module attributes {stable_mosaic.version = 11 : i64} {
  func.func @_conv3x3_s1_kernel(%arg0: i32, %arg1: i32, %arg2: i32, %arg3: memref<1x1x18x128xbf16, #tpu.memory_space<vmem>>, %arg4: memref<1x3x128x256xbf16, #tpu.memory_space<vmem>>, %arg5: memref<1x256xf32, #tpu.memory_space<vmem>>, %arg6: memref<1x1x16x256xbf16, #tpu.memory_space<vmem>>, %arg7: memref<1x1x2x256xf32, #tpu.memory_space<vmem>>, %arg8: memref<16x256xf32, #tpu.memory_space<vmem>>) attributes {dimension_semantics = [#tpu.dimension_semantics<parallel>, #tpu.dimension_semantics<parallel>, #tpu.dimension_semantics<arbitrary>], iteration_bounds = array<i64: 2, 2, 3>, scalar_prefetch = 0 : i64, scratch_operands = 1 : i64, tpu.core_type = #tpu.core_type<tc>, window_params = [{transform_indices = @transform_0, window_bounds = array<i64: 1, 1, 18, 128>}, {transform_indices = @transform_1, window_bounds = array<i64: 1, 3, 128, 256>}, {pipeline_mode = #tpu.pipeline_mode<synchronous>, transform_indices = @transform_2, window_bounds = array<i64: 1, 256>}, {transform_indices = @transform_3, window_bounds = array<i64: 1, 1, 16, 256>}, {transform_indices = @transform_4, window_bounds = array<i64: 1, 1, 2, 256>}]} {
    %c0 = arith.constant 0 : index
    %c0_0 = arith.constant 0 : index
    %c0_1 = arith.constant 0 : index
    %c0_2 = arith.constant 0 : index
    %0 = vector.load %arg3[%c0, %c0_0, %c0_1, %c0_2] : memref<1x1x18x128xbf16, #tpu.memory_space<vmem>>, vector<1x1x18x128xbf16>
    %1 = vector.shape_cast %0 : vector<1x1x18x128xbf16> to vector<18x128xbf16>
    %c0_i32 = arith.constant 0 : i32
    %2 = arith.cmpi eq, %arg2, %c0_i32 : i32
    %3 = arith.extui %2 : i1 to i32
    %c0_i32_3 = arith.constant 0 : i32
    %4 = arith.cmpi ne, %3, %c0_i32_3 : i32
    scf.if %4 {
      %cst_21 = arith.constant 0.000000e+00 : f32
      %25 = vector.broadcast %cst_21 : f32 to vector<16x256xf32>
      %c0_22 = arith.constant 0 : index
      %c0_23 = arith.constant 0 : index
      %26 = vector.load %arg8[%c0_22, %c0_23] : memref<16x256xf32, #tpu.memory_space<vmem>>, vector<16x256xf32>
      tpu.vector_store %arg8[%c0_22, %c0_23], %25 {strides = array<i32>} : memref<16x256xf32, #tpu.memory_space<vmem>>, vector<16x256xf32>,
    } else {
    }
    %c0_4 = arith.constant 0 : index
    %c0_5 = arith.constant 0 : index
    %5 = vector.load %arg8[%c0_4, %c0_5] : memref<16x256xf32, #tpu.memory_space<vmem>>, vector<16x256xf32>
    %6 = vector.extract_strided_slice %1 {offsets = [0, 0], sizes = [16, 128], strides = [1, 1]} : vector<18x128xbf16> to vector<16x128xbf16>
    %c0_6 = arith.constant 0 : index
    %c0_7 = arith.constant 0 : index
    %c0_8 = arith.constant 0 : index
    %c0_9 = arith.constant 0 : index
    %7 = vector.load %arg4[%c0_6, %c0_7, %c0_8, %c0_9] : memref<1x3x128x256xbf16, #tpu.memory_space<vmem>>, vector<1x1x128x256xbf16>
    %8 = vector.shape_cast %7 : vector<1x1x128x256xbf16> to vector<128x256xbf16>
    %cst = arith.constant dense<0.000000e+00> : vector<16x256xf32>
    %9 = tpu.matmul %6, %8, %cst {dimension_numbers = #tpu.dot_dimension_numbers<[1], [0], [0], [1], [0, 0, 1, 1], [], []>} : vector<16x128xbf16>, vector<128x256xbf16>, vector<16x256xf32> -> vector<16x256xf32>
    %10 = arith.addf %5, %9 : vector<16x256xf32>
    %11 = vector.extract_strided_slice %1 {offsets = [1, 0], sizes = [16, 128], strides = [1, 1]} : vector<18x128xbf16> to vector<16x128xbf16>
    %c0_10 = arith.constant 0 : index
    %c1 = arith.constant 1 : index
    %c0_11 = arith.constant 0 : index
    %c0_12 = arith.constant 0 : index
    %12 = vector.load %arg4[%c0_10, %c1, %c0_11, %c0_12] : memref<1x3x128x256xbf16, #tpu.memory_space<vmem>>, vector<1x1x128x256xbf16>
    %13 = vector.shape_cast %12 : vector<1x1x128x256xbf16> to vector<128x256xbf16>
    %cst_13 = arith.constant dense<0.000000e+00> : vector<16x256xf32>
    %14 = tpu.matmul %11, %13, %cst_13 {dimension_numbers = #tpu.dot_dimension_numbers<[1], [0], [0], [1], [0, 0, 1, 1], [], []>} : vector<16x128xbf16>, vector<128x256xbf16>, vector<16x256xf32> -> vector<16x256xf32>
    %15 = arith.addf %10, %14 : vector<16x256xf32>
    %16 = vector.extract_strided_slice %1 {offsets = [2, 0], sizes = [16, 128], strides = [1, 1]} : vector<18x128xbf16> to vector<16x128xbf16>
    %c0_14 = arith.constant 0 : index
    %c2 = arith.constant 2 : index
    %c0_15 = arith.constant 0 : index
    %c0_16 = arith.constant 0 : index
    %17 = vector.load %arg4[%c0_14, %c2, %c0_15, %c0_16] : memref<1x3x128x256xbf16, #tpu.memory_space<vmem>>, vector<1x1x128x256xbf16>
    %18 = vector.shape_cast %17 : vector<1x1x128x256xbf16> to vector<128x256xbf16>
    %cst_17 = arith.constant dense<0.000000e+00> : vector<16x256xf32>
    %19 = tpu.matmul %16, %18, %cst_17 {dimension_numbers = #tpu.dot_dimension_numbers<[1], [0], [0], [1], [0, 0, 1, 1], [], []>} : vector<16x128xbf16>, vector<128x256xbf16>, vector<16x256xf32> -> vector<16x256xf32>
    %20 = arith.addf %15, %19 : vector<16x256xf32>
    %c0_18 = arith.constant 0 : index
    %c0_19 = arith.constant 0 : index
    %21 = vector.load %arg8[%c0_18, %c0_19] : memref<16x256xf32, #tpu.memory_space<vmem>>, vector<16x256xf32>
    tpu.vector_store %arg8[%c0_18, %c0_19], %20 {strides = array<i32>} : memref<16x256xf32, #tpu.memory_space<vmem>>, vector<16x256xf32>,
    %c2_i32 = arith.constant 2 : i32
    %22 = arith.cmpi eq, %arg2, %c2_i32 : i32
    %23 = arith.extui %22 : i1 to i32
    %c0_i32_20 = arith.constant 0 : i32
    %24 = arith.cmpi ne, %23, %c0_i32_20 : i32
    scf.if %24 {
      %c0_21 = arith.constant 0 : index
      %c0_22 = arith.constant 0 : index
      %25 = vector.load %arg8[%c0_21, %c0_22] : memref<16x256xf32, #tpu.memory_space<vmem>>, vector<16x256xf32>
      %c0_23 = arith.constant 0 : index
      %c0_24 = arith.constant 0 : index
      %26 = vector.load %arg5[%c0_23, %c0_24] : memref<1x256xf32, #tpu.memory_space<vmem>>, vector<1x256xf32>
      %27 = vector.broadcast %26 : vector<1x256xf32> to vector<16x256xf32>
      %28 = arith.addf %25, %27 : vector<16x256xf32>
      %29 = arith.truncf %28 : vector<16x256xf32> to vector<16x256xbf16>
      %30 = vector.shape_cast %29 : vector<16x256xbf16> to vector<1x1x16x256xbf16>
      %c0_25 = arith.constant 0 : index
      %c0_26 = arith.constant 0 : index
      %c0_27 = arith.constant 0 : index
      %c0_28 = arith.constant 0 : index
      %31 = vector.load %arg6[%c0_25, %c0_26, %c0_27, %c0_28] : memref<1x1x16x256xbf16, #tpu.memory_space<vmem>>, vector<1x1x16x256xbf16>
      tpu.vector_store %arg6[%c0_25, %c0_26, %c0_27, %c0_28], %30 {strides = array<i32>} : memref<1x1x16x256xbf16, #tpu.memory_space<vmem>>, vector<1x1x16x256xbf16>,
      %cst_29 = arith.constant dense<0.000000e+00> : vector<256xf32>
      %32 = vector.multi_reduction <add>, %28, %cst_29 [0] : vector<16x256xf32> to vector<256xf32>
      %33 = vector.shape_cast %32 : vector<256xf32> to vector<1x256xf32>
      %34 = arith.mulf %28, %28 : vector<16x256xf32>
      %cst_30 = arith.constant dense<0.000000e+00> : vector<256xf32>
      %35 = vector.multi_reduction <add>, %34, %cst_30 [0] : vector<16x256xf32> to vector<256xf32>
      %36 = vector.shape_cast %35 : vector<256xf32> to vector<1x256xf32>
      %37 = tpu.concatenate %33, %36 in 0 : vector<1x256xf32>, vector<1x256xf32> -> vector<2x256xf32>
      %38 = vector.shape_cast %37 : vector<2x256xf32> to vector<1x1x2x256xf32>
      %c0_31 = arith.constant 0 : index
      %c0_32 = arith.constant 0 : index
      %c0_33 = arith.constant 0 : index
      %c0_34 = arith.constant 0 : index
      %39 = vector.load %arg7[%c0_31, %c0_32, %c0_33, %c0_34] : memref<1x1x2x256xf32, #tpu.memory_space<vmem>>, vector<1x1x2x256xf32>
      tpu.vector_store %arg7[%c0_31, %c0_32, %c0_33, %c0_34], %38 {strides = array<i32>} : memref<1x1x2x256xf32, #tpu.memory_space<vmem>>, vector<1x1x2x256xf32>,
    } else {
    }
    return
  }
  func.func @transform_0(%arg0: i32, %arg1: i32, %arg2: i32) -> (i32, i32, i32, i32) {
    %0 = arith.addi %arg1, %arg2 : i32
    %c0_i32 = arith.constant 0 : i32
    %c0_i32_0 = arith.constant 0 : i32
    %c0_i32_1 = arith.constant 0 : i32
    return %arg0, %0, %c0_i32, %c0_i32_0 : i32, i32, i32, i32
  }
  func.func @transform_1(%arg0: i32, %arg1: i32, %arg2: i32) -> (i32, i32, i32, i32) {
    %c0_i32 = arith.constant 0 : i32
    %c0_i32_0 = arith.constant 0 : i32
    %c0_i32_1 = arith.constant 0 : i32
    %c0_i32_2 = arith.constant 0 : i32
    return %arg2, %c0_i32, %c0_i32_0, %c0_i32_1 : i32, i32, i32, i32
  }
  func.func @transform_2(%arg0: i32, %arg1: i32, %arg2: i32) -> (i32, i32) {
    %c0_i32 = arith.constant 0 : i32
    %c0_i32_0 = arith.constant 0 : i32
    %c0_i32_1 = arith.constant 0 : i32
    return %c0_i32, %c0_i32_0 : i32, i32
  }
  func.func @transform_3(%arg0: i32, %arg1: i32, %arg2: i32) -> (i32, i32, i32, i32) {
    %c0_i32 = arith.constant 0 : i32
    %c0_i32_0 = arith.constant 0 : i32
    %c0_i32_1 = arith.constant 0 : i32
    return %arg0, %arg1, %c0_i32, %c0_i32_0 : i32, i32, i32, i32
  }
  func.func @transform_4(%arg0: i32, %arg1: i32, %arg2: i32) -> (i32, i32, i32, i32) {
    %c0_i32 = arith.constant 0 : i32
    %c0_i32_0 = arith.constant 0 : i32
    %c0_i32_1 = arith.constant 0 : i32
    return %arg0, %arg1, %c0_i32, %c0_i32_0 : i32, i32, i32, i32
  }
}

module attributes {stable_mosaic.version = 11 : i64} {
  func.func @_bn_relu_kernel(%arg0: i32, %arg1: memref<64x256xbf16, #tpu.memory_space<vmem>>, %arg2: memref<1x256xf32, #tpu.memory_space<vmem>>, %arg3: memref<1x256xf32, #tpu.memory_space<vmem>>, %arg4: memref<64x256xbf16, #tpu.memory_space<vmem>>) attributes {dimension_semantics = [#tpu.dimension_semantics<parallel>], iteration_bounds = array<i64: 1>, scalar_prefetch = 0 : i64, scratch_operands = 0 : i64, tpu.core_type = #tpu.core_type<tc>, window_params = [{transform_indices = @transform_0, window_bounds = array<i64: 64, 256>}, {pipeline_mode = #tpu.pipeline_mode<synchronous>, transform_indices = @transform_1, window_bounds = array<i64: 1, 256>}, {pipeline_mode = #tpu.pipeline_mode<synchronous>, transform_indices = @transform_2, window_bounds = array<i64: 1, 256>}, {transform_indices = @transform_3, window_bounds = array<i64: 64, 256>}]} {
    %c0 = arith.constant 0 : index
    %c0_0 = arith.constant 0 : index
    %0 = vector.load %arg1[%c0, %c0_0] : memref<64x256xbf16, #tpu.memory_space<vmem>>, vector<64x256xbf16>
    %1 = arith.extf %0 : vector<64x256xbf16> to vector<64x256xf32>
    %c0_1 = arith.constant 0 : index
    %c0_2 = arith.constant 0 : index
    %2 = vector.load %arg2[%c0_1, %c0_2] : memref<1x256xf32, #tpu.memory_space<vmem>>, vector<1x256xf32>
    %3 = vector.broadcast %2 : vector<1x256xf32> to vector<64x256xf32>
    %4 = arith.mulf %1, %3 : vector<64x256xf32>
    %c0_3 = arith.constant 0 : index
    %c0_4 = arith.constant 0 : index
    %5 = vector.load %arg3[%c0_3, %c0_4] : memref<1x256xf32, #tpu.memory_space<vmem>>, vector<1x256xf32>
    %6 = vector.broadcast %5 : vector<1x256xf32> to vector<64x256xf32>
    %7 = arith.addf %4, %6 : vector<64x256xf32>
    %cst = arith.constant 0.000000e+00 : f32
    %8 = vector.broadcast %cst : f32 to vector<64x256xf32>
    %9 = arith.maximumf %7, %8 : vector<64x256xf32>
    %10 = arith.truncf %9 : vector<64x256xf32> to vector<64x256xbf16>
    %c0_5 = arith.constant 0 : index
    %c0_6 = arith.constant 0 : index
    %11 = vector.load %arg4[%c0_5, %c0_6] : memref<64x256xbf16, #tpu.memory_space<vmem>>, vector<64x256xbf16>
    tpu.vector_store %arg4[%c0_5, %c0_6], %10 {strides = array<i32>} : memref<64x256xbf16, #tpu.memory_space<vmem>>, vector<64x256xbf16>,
    return
  }
  func.func @transform_0(%arg0: i32) -> (i32, i32) {
    %c0_i32 = arith.constant 0 : i32
    %c0_i32_0 = arith.constant 0 : i32
    return %arg0, %c0_i32 : i32, i32
  }
  func.func @transform_1(%arg0: i32) -> (i32, i32) {
    %c0_i32 = arith.constant 0 : i32
    %c0_i32_0 = arith.constant 0 : i32
    %c0_i32_1 = arith.constant 0 : i32
    return %c0_i32, %c0_i32_0 : i32, i32
  }
  func.func @transform_2(%arg0: i32) -> (i32, i32) {
    %c0_i32 = arith.constant 0 : i32
    %c0_i32_0 = arith.constant 0 : i32
    %c0_i32_1 = arith.constant 0 : i32
    return %c0_i32, %c0_i32_0 : i32, i32
  }
  func.func @transform_3(%arg0: i32) -> (i32, i32) {
    %c0_i32 = arith.constant 0 : i32
    %c0_i32_0 = arith.constant 0 : i32
    return %arg0, %c0_i32 : i32, i32
  }
}

module attributes {stable_mosaic.version = 11 : i64} {
  func.func @_conv3x3_s1_kernel(%arg0: i32, %arg1: i32, %arg2: i32, %arg3: memref<1x1x18x256xbf16, #tpu.memory_space<vmem>>, %arg4: memref<1x3x256x256xbf16, #tpu.memory_space<vmem>>, %arg5: memref<1x256xf32, #tpu.memory_space<vmem>>, %arg6: memref<1x1x16x256xbf16, #tpu.memory_space<vmem>>, %arg7: memref<1x1x2x256xf32, #tpu.memory_space<vmem>>, %arg8: memref<16x256xf32, #tpu.memory_space<vmem>>) attributes {dimension_semantics = [#tpu.dimension_semantics<parallel>, #tpu.dimension_semantics<parallel>, #tpu.dimension_semantics<arbitrary>], iteration_bounds = array<i64: 2, 2, 3>, scalar_prefetch = 0 : i64, scratch_operands = 1 : i64, tpu.core_type = #tpu.core_type<tc>, window_params = [{transform_indices = @transform_0, window_bounds = array<i64: 1, 1, 18, 256>}, {transform_indices = @transform_1, window_bounds = array<i64: 1, 3, 256, 256>}, {pipeline_mode = #tpu.pipeline_mode<synchronous>, transform_indices = @transform_2, window_bounds = array<i64: 1, 256>}, {transform_indices = @transform_3, window_bounds = array<i64: 1, 1, 16, 256>}, {transform_indices = @transform_4, window_bounds = array<i64: 1, 1, 2, 256>}]} {
    %c0 = arith.constant 0 : index
    %c0_0 = arith.constant 0 : index
    %c0_1 = arith.constant 0 : index
    %c0_2 = arith.constant 0 : index
    %0 = vector.load %arg3[%c0, %c0_0, %c0_1, %c0_2] : memref<1x1x18x256xbf16, #tpu.memory_space<vmem>>, vector<1x1x18x256xbf16>
    %1 = vector.shape_cast %0 : vector<1x1x18x256xbf16> to vector<18x256xbf16>
    %c0_i32 = arith.constant 0 : i32
    %2 = arith.cmpi eq, %arg2, %c0_i32 : i32
    %3 = arith.extui %2 : i1 to i32
    %c0_i32_3 = arith.constant 0 : i32
    %4 = arith.cmpi ne, %3, %c0_i32_3 : i32
    scf.if %4 {
      %cst_21 = arith.constant 0.000000e+00 : f32
      %25 = vector.broadcast %cst_21 : f32 to vector<16x256xf32>
      %c0_22 = arith.constant 0 : index
      %c0_23 = arith.constant 0 : index
      %26 = vector.load %arg8[%c0_22, %c0_23] : memref<16x256xf32, #tpu.memory_space<vmem>>, vector<16x256xf32>
      tpu.vector_store %arg8[%c0_22, %c0_23], %25 {strides = array<i32>} : memref<16x256xf32, #tpu.memory_space<vmem>>, vector<16x256xf32>,
    } else {
    }
    %c0_4 = arith.constant 0 : index
    %c0_5 = arith.constant 0 : index
    %5 = vector.load %arg8[%c0_4, %c0_5] : memref<16x256xf32, #tpu.memory_space<vmem>>, vector<16x256xf32>
    %6 = vector.extract_strided_slice %1 {offsets = [0, 0], sizes = [16, 256], strides = [1, 1]} : vector<18x256xbf16> to vector<16x256xbf16>
    %c0_6 = arith.constant 0 : index
    %c0_7 = arith.constant 0 : index
    %c0_8 = arith.constant 0 : index
    %c0_9 = arith.constant 0 : index
    %7 = vector.load %arg4[%c0_6, %c0_7, %c0_8, %c0_9] : memref<1x3x256x256xbf16, #tpu.memory_space<vmem>>, vector<1x1x256x256xbf16>
    %8 = vector.shape_cast %7 : vector<1x1x256x256xbf16> to vector<256x256xbf16>
    %cst = arith.constant dense<0.000000e+00> : vector<16x256xf32>
    %9 = tpu.matmul %6, %8, %cst {dimension_numbers = #tpu.dot_dimension_numbers<[1], [0], [0], [1], [0, 0, 1, 1], [], []>} : vector<16x256xbf16>, vector<256x256xbf16>, vector<16x256xf32> -> vector<16x256xf32>
    %10 = arith.addf %5, %9 : vector<16x256xf32>
    %11 = vector.extract_strided_slice %1 {offsets = [1, 0], sizes = [16, 256], strides = [1, 1]} : vector<18x256xbf16> to vector<16x256xbf16>
    %c0_10 = arith.constant 0 : index
    %c1 = arith.constant 1 : index
    %c0_11 = arith.constant 0 : index
    %c0_12 = arith.constant 0 : index
    %12 = vector.load %arg4[%c0_10, %c1, %c0_11, %c0_12] : memref<1x3x256x256xbf16, #tpu.memory_space<vmem>>, vector<1x1x256x256xbf16>
    %13 = vector.shape_cast %12 : vector<1x1x256x256xbf16> to vector<256x256xbf16>
    %cst_13 = arith.constant dense<0.000000e+00> : vector<16x256xf32>
    %14 = tpu.matmul %11, %13, %cst_13 {dimension_numbers = #tpu.dot_dimension_numbers<[1], [0], [0], [1], [0, 0, 1, 1], [], []>} : vector<16x256xbf16>, vector<256x256xbf16>, vector<16x256xf32> -> vector<16x256xf32>
    %15 = arith.addf %10, %14 : vector<16x256xf32>
    %16 = vector.extract_strided_slice %1 {offsets = [2, 0], sizes = [16, 256], strides = [1, 1]} : vector<18x256xbf16> to vector<16x256xbf16>
    %c0_14 = arith.constant 0 : index
    %c2 = arith.constant 2 : index
    %c0_15 = arith.constant 0 : index
    %c0_16 = arith.constant 0 : index
    %17 = vector.load %arg4[%c0_14, %c2, %c0_15, %c0_16] : memref<1x3x256x256xbf16, #tpu.memory_space<vmem>>, vector<1x1x256x256xbf16>
    %18 = vector.shape_cast %17 : vector<1x1x256x256xbf16> to vector<256x256xbf16>
    %cst_17 = arith.constant dense<0.000000e+00> : vector<16x256xf32>
    %19 = tpu.matmul %16, %18, %cst_17 {dimension_numbers = #tpu.dot_dimension_numbers<[1], [0], [0], [1], [0, 0, 1, 1], [], []>} : vector<16x256xbf16>, vector<256x256xbf16>, vector<16x256xf32> -> vector<16x256xf32>
    %20 = arith.addf %15, %19 : vector<16x256xf32>
    %c0_18 = arith.constant 0 : index
    %c0_19 = arith.constant 0 : index
    %21 = vector.load %arg8[%c0_18, %c0_19] : memref<16x256xf32, #tpu.memory_space<vmem>>, vector<16x256xf32>
    tpu.vector_store %arg8[%c0_18, %c0_19], %20 {strides = array<i32>} : memref<16x256xf32, #tpu.memory_space<vmem>>, vector<16x256xf32>,
    %c2_i32 = arith.constant 2 : i32
    %22 = arith.cmpi eq, %arg2, %c2_i32 : i32
    %23 = arith.extui %22 : i1 to i32
    %c0_i32_20 = arith.constant 0 : i32
    %24 = arith.cmpi ne, %23, %c0_i32_20 : i32
    scf.if %24 {
      %c0_21 = arith.constant 0 : index
      %c0_22 = arith.constant 0 : index
      %25 = vector.load %arg8[%c0_21, %c0_22] : memref<16x256xf32, #tpu.memory_space<vmem>>, vector<16x256xf32>
      %c0_23 = arith.constant 0 : index
      %c0_24 = arith.constant 0 : index
      %26 = vector.load %arg5[%c0_23, %c0_24] : memref<1x256xf32, #tpu.memory_space<vmem>>, vector<1x256xf32>
      %27 = vector.broadcast %26 : vector<1x256xf32> to vector<16x256xf32>
      %28 = arith.addf %25, %27 : vector<16x256xf32>
      %29 = arith.truncf %28 : vector<16x256xf32> to vector<16x256xbf16>
      %30 = vector.shape_cast %29 : vector<16x256xbf16> to vector<1x1x16x256xbf16>
      %c0_25 = arith.constant 0 : index
      %c0_26 = arith.constant 0 : index
      %c0_27 = arith.constant 0 : index
      %c0_28 = arith.constant 0 : index
      %31 = vector.load %arg6[%c0_25, %c0_26, %c0_27, %c0_28] : memref<1x1x16x256xbf16, #tpu.memory_space<vmem>>, vector<1x1x16x256xbf16>
      tpu.vector_store %arg6[%c0_25, %c0_26, %c0_27, %c0_28], %30 {strides = array<i32>} : memref<1x1x16x256xbf16, #tpu.memory_space<vmem>>, vector<1x1x16x256xbf16>,
      %cst_29 = arith.constant dense<0.000000e+00> : vector<256xf32>
      %32 = vector.multi_reduction <add>, %28, %cst_29 [0] : vector<16x256xf32> to vector<256xf32>
      %33 = vector.shape_cast %32 : vector<256xf32> to vector<1x256xf32>
      %34 = arith.mulf %28, %28 : vector<16x256xf32>
      %cst_30 = arith.constant dense<0.000000e+00> : vector<256xf32>
      %35 = vector.multi_reduction <add>, %34, %cst_30 [0] : vector<16x256xf32> to vector<256xf32>
      %36 = vector.shape_cast %35 : vector<256xf32> to vector<1x256xf32>
      %37 = tpu.concatenate %33, %36 in 0 : vector<1x256xf32>, vector<1x256xf32> -> vector<2x256xf32>
      %38 = vector.shape_cast %37 : vector<2x256xf32> to vector<1x1x2x256xf32>
      %c0_31 = arith.constant 0 : index
      %c0_32 = arith.constant 0 : index
      %c0_33 = arith.constant 0 : index
      %c0_34 = arith.constant 0 : index
      %39 = vector.load %arg7[%c0_31, %c0_32, %c0_33, %c0_34] : memref<1x1x2x256xf32, #tpu.memory_space<vmem>>, vector<1x1x2x256xf32>
      tpu.vector_store %arg7[%c0_31, %c0_32, %c0_33, %c0_34], %38 {strides = array<i32>} : memref<1x1x2x256xf32, #tpu.memory_space<vmem>>, vector<1x1x2x256xf32>,
    } else {
    }
    return
  }
  func.func @transform_0(%arg0: i32, %arg1: i32, %arg2: i32) -> (i32, i32, i32, i32) {
    %0 = arith.addi %arg1, %arg2 : i32
    %c0_i32 = arith.constant 0 : i32
    %c0_i32_0 = arith.constant 0 : i32
    %c0_i32_1 = arith.constant 0 : i32
    return %arg0, %0, %c0_i32, %c0_i32_0 : i32, i32, i32, i32
  }
  func.func @transform_1(%arg0: i32, %arg1: i32, %arg2: i32) -> (i32, i32, i32, i32) {
    %c0_i32 = arith.constant 0 : i32
    %c0_i32_0 = arith.constant 0 : i32
    %c0_i32_1 = arith.constant 0 : i32
    %c0_i32_2 = arith.constant 0 : i32
    return %arg2, %c0_i32, %c0_i32_0, %c0_i32_1 : i32, i32, i32, i32
  }
  func.func @transform_2(%arg0: i32, %arg1: i32, %arg2: i32) -> (i32, i32) {
    %c0_i32 = arith.constant 0 : i32
    %c0_i32_0 = arith.constant 0 : i32
    %c0_i32_1 = arith.constant 0 : i32
    return %c0_i32, %c0_i32_0 : i32, i32
  }
  func.func @transform_3(%arg0: i32, %arg1: i32, %arg2: i32) -> (i32, i32, i32, i32) {
    %c0_i32 = arith.constant 0 : i32
    %c0_i32_0 = arith.constant 0 : i32
    %c0_i32_1 = arith.constant 0 : i32
    return %arg0, %arg1, %c0_i32, %c0_i32_0 : i32, i32, i32, i32
  }
  func.func @transform_4(%arg0: i32, %arg1: i32, %arg2: i32) -> (i32, i32, i32, i32) {
    %c0_i32 = arith.constant 0 : i32
    %c0_i32_0 = arith.constant 0 : i32
    %c0_i32_1 = arith.constant 0 : i32
    return %arg0, %arg1, %c0_i32, %c0_i32_0 : i32, i32, i32, i32
  }
}

module attributes {stable_mosaic.version = 11 : i64} {
  func.func @_merge_kernel(%arg0: i32, %arg1: memref<64x256xbf16, #tpu.memory_space<vmem>>, %arg2: memref<64x128xbf16, #tpu.memory_space<vmem>>, %arg3: memref<128x256xbf16, #tpu.memory_space<vmem>>, %arg4: memref<1x256xf32, #tpu.memory_space<vmem>>, %arg5: memref<1x256xf32, #tpu.memory_space<vmem>>, %arg6: memref<1x256xf32, #tpu.memory_space<vmem>>, %arg7: memref<1x256xf32, #tpu.memory_space<vmem>>, %arg8: memref<1x256xf32, #tpu.memory_space<vmem>>, %arg9: memref<64x256xbf16, #tpu.memory_space<vmem>>) attributes {dimension_semantics = [#tpu.dimension_semantics<parallel>], iteration_bounds = array<i64: 1>, scalar_prefetch = 0 : i64, scratch_operands = 0 : i64, tpu.core_type = #tpu.core_type<tc>, window_params = [{transform_indices = @transform_0, window_bounds = array<i64: 64, 256>}, {transform_indices = @transform_1, window_bounds = array<i64: 64, 128>}, {pipeline_mode = #tpu.pipeline_mode<synchronous>, transform_indices = @transform_2, window_bounds = array<i64: 128, 256>}, {pipeline_mode = #tpu.pipeline_mode<synchronous>, transform_indices = @transform_3, window_bounds = array<i64: 1, 256>}, {pipeline_mode = #tpu.pipeline_mode<synchronous>, transform_indices = @transform_4, window_bounds = array<i64: 1, 256>}, {pipeline_mode = #tpu.pipeline_mode<synchronous>, transform_indices = @transform_5, window_bounds = array<i64: 1, 256>}, {pipeline_mode = #tpu.pipeline_mode<synchronous>, transform_indices = @transform_6, window_bounds = array<i64: 1, 256>}, {pipeline_mode = #tpu.pipeline_mode<synchronous>, transform_indices = @transform_7, window_bounds = array<i64: 1, 256>}, {transform_indices = @transform_8, window_bounds = array<i64: 64, 256>}]} {
    %c0 = arith.constant 0 : index
    %c0_0 = arith.constant 0 : index
    %0 = vector.load %arg1[%c0, %c0_0] : memref<64x256xbf16, #tpu.memory_space<vmem>>, vector<64x256xbf16>
    %1 = arith.extf %0 : vector<64x256xbf16> to vector<64x256xf32>
    %c0_1 = arith.constant 0 : index
    %c0_2 = arith.constant 0 : index
    %2 = vector.load %arg5[%c0_1, %c0_2] : memref<1x256xf32, #tpu.memory_space<vmem>>, vector<1x256xf32>
    %3 = vector.broadcast %2 : vector<1x256xf32> to vector<64x256xf32>
    %4 = arith.mulf %1, %3 : vector<64x256xf32>
    %c0_3 = arith.constant 0 : index
    %c0_4 = arith.constant 0 : index
    %5 = vector.load %arg6[%c0_3, %c0_4] : memref<1x256xf32, #tpu.memory_space<vmem>>, vector<1x256xf32>
    %6 = vector.broadcast %5 : vector<1x256xf32> to vector<64x256xf32>
    %7 = arith.addf %4, %6 : vector<64x256xf32>
    %c0_5 = arith.constant 0 : index
    %c0_6 = arith.constant 0 : index
    %8 = vector.load %arg2[%c0_5, %c0_6] : memref<64x128xbf16, #tpu.memory_space<vmem>>, vector<64x128xbf16>
    %c0_7 = arith.constant 0 : index
    %c0_8 = arith.constant 0 : index
    %9 = vector.load %arg3[%c0_7, %c0_8] : memref<128x256xbf16, #tpu.memory_space<vmem>>, vector<128x256xbf16>
    %cst = arith.constant dense<0.000000e+00> : vector<64x256xf32>
    %10 = tpu.matmul %8, %9, %cst {dimension_numbers = #tpu.dot_dimension_numbers<[1], [0], [0], [1], [0, 0, 1, 1], [], []>} : vector<64x128xbf16>, vector<128x256xbf16>, vector<64x256xf32> -> vector<64x256xf32>
    %c0_9 = arith.constant 0 : index
    %c0_10 = arith.constant 0 : index
    %11 = vector.load %arg4[%c0_9, %c0_10] : memref<1x256xf32, #tpu.memory_space<vmem>>, vector<1x256xf32>
    %12 = vector.broadcast %11 : vector<1x256xf32> to vector<64x256xf32>
    %13 = arith.addf %10, %12 : vector<64x256xf32>
    %c0_11 = arith.constant 0 : index
    %c0_12 = arith.constant 0 : index
    %14 = vector.load %arg7[%c0_11, %c0_12] : memref<1x256xf32, #tpu.memory_space<vmem>>, vector<1x256xf32>
    %15 = vector.broadcast %14 : vector<1x256xf32> to vector<64x256xf32>
    %16 = arith.mulf %13, %15 : vector<64x256xf32>
    %17 = arith.addf %7, %16 : vector<64x256xf32>
    %c0_13 = arith.constant 0 : index
    %c0_14 = arith.constant 0 : index
    %18 = vector.load %arg8[%c0_13, %c0_14] : memref<1x256xf32, #tpu.memory_space<vmem>>, vector<1x256xf32>
    %19 = vector.broadcast %18 : vector<1x256xf32> to vector<64x256xf32>
    %20 = arith.addf %17, %19 : vector<64x256xf32>
    %cst_15 = arith.constant 0.000000e+00 : f32
    %21 = vector.broadcast %cst_15 : f32 to vector<64x256xf32>
    %22 = arith.maximumf %20, %21 : vector<64x256xf32>
    %23 = arith.truncf %22 : vector<64x256xf32> to vector<64x256xbf16>
    %c0_16 = arith.constant 0 : index
    %c0_17 = arith.constant 0 : index
    %24 = vector.load %arg9[%c0_16, %c0_17] : memref<64x256xbf16, #tpu.memory_space<vmem>>, vector<64x256xbf16>
    tpu.vector_store %arg9[%c0_16, %c0_17], %23 {strides = array<i32>} : memref<64x256xbf16, #tpu.memory_space<vmem>>, vector<64x256xbf16>,
    return
  }
  func.func @transform_0(%arg0: i32) -> (i32, i32) {
    %c0_i32 = arith.constant 0 : i32
    %c0_i32_0 = arith.constant 0 : i32
    return %arg0, %c0_i32 : i32, i32
  }
  func.func @transform_1(%arg0: i32) -> (i32, i32) {
    %c0_i32 = arith.constant 0 : i32
    %c0_i32_0 = arith.constant 0 : i32
    return %arg0, %c0_i32 : i32, i32
  }
  func.func @transform_2(%arg0: i32) -> (i32, i32) {
    %c0_i32 = arith.constant 0 : i32
    %c0_i32_0 = arith.constant 0 : i32
    %c0_i32_1 = arith.constant 0 : i32
    return %c0_i32, %c0_i32_0 : i32, i32
  }
  func.func @transform_3(%arg0: i32) -> (i32, i32) {
    %c0_i32 = arith.constant 0 : i32
    %c0_i32_0 = arith.constant 0 : i32
    %c0_i32_1 = arith.constant 0 : i32
    return %c0_i32, %c0_i32_0 : i32, i32
  }
  func.func @transform_4(%arg0: i32) -> (i32, i32) {
    %c0_i32 = arith.constant 0 : i32
    %c0_i32_0 = arith.constant 0 : i32
    %c0_i32_1 = arith.constant 0 : i32
    return %c0_i32, %c0_i32_0 : i32, i32
  }
  func.func @transform_5(%arg0: i32) -> (i32, i32) {
    %c0_i32 = arith.constant 0 : i32
    %c0_i32_0 = arith.constant 0 : i32
    %c0_i32_1 = arith.constant 0 : i32
    return %c0_i32, %c0_i32_0 : i32, i32
  }
  func.func @transform_6(%arg0: i32) -> (i32, i32) {
    %c0_i32 = arith.constant 0 : i32
    %c0_i32_0 = arith.constant 0 : i32
    %c0_i32_1 = arith.constant 0 : i32
    return %c0_i32, %c0_i32_0 : i32, i32
  }
  func.func @transform_7(%arg0: i32) -> (i32, i32) {
    %c0_i32 = arith.constant 0 : i32
    %c0_i32_0 = arith.constant 0 : i32
    %c0_i32_1 = arith.constant 0 : i32
    return %c0_i32, %c0_i32_0 : i32, i32
  }
  func.func @transform_8(%arg0: i32) -> (i32, i32) {
    %c0_i32 = arith.constant 0 : i32
    %c0_i32_0 = arith.constant 0 : i32
    return %arg0, %c0_i32 : i32, i32
  }
}

module attributes {stable_mosaic.version = 11 : i64} {
  func.func @_maxpool_kernel(%arg0: i32, %arg1: memref<2x2x8x512xbf16, #tpu.memory_space<vmem>>, %arg2: memref<2x8x256xbf16, #tpu.memory_space<vmem>>) attributes {dimension_semantics = [#tpu.dimension_semantics<parallel>], iteration_bounds = array<i64: 1>, scalar_prefetch = 0 : i64, scratch_operands = 0 : i64, tpu.core_type = #tpu.core_type<tc>, window_params = [{transform_indices = @transform_0, window_bounds = array<i64: 2, 2, 8, 512>}, {transform_indices = @transform_1, window_bounds = array<i64: 2, 8, 256>}]} {
    %c0 = arith.constant 0 : index
    %c0_0 = arith.constant 0 : index
    %c0_1 = arith.constant 0 : index
    %c0_2 = arith.constant 0 : index
    %0 = vector.load %arg1[%c0, %c0_0, %c0_1, %c0_2] : memref<2x2x8x512xbf16, #tpu.memory_space<vmem>>, vector<2x2x8x512xbf16>
    %1 = vector.extract_strided_slice %0 {offsets = [0, 0, 0, 0], sizes = [2, 2, 8, 256], strides = [1, 1, 1, 1]} : vector<2x2x8x512xbf16> to vector<2x2x8x256xbf16>
    %2 = vector.extract_strided_slice %0 {offsets = [0, 0, 0, 256], sizes = [2, 2, 8, 256], strides = [1, 1, 1, 1]} : vector<2x2x8x512xbf16> to vector<2x2x8x256xbf16>
    %3 = arith.maximumf %1, %2 : vector<2x2x8x256xbf16>
    %4 = vector.extract_strided_slice %3 {offsets = [0, 0, 0, 0], sizes = [2, 1, 8, 256], strides = [1, 1, 1, 1]} : vector<2x2x8x256xbf16> to vector<2x1x8x256xbf16>
    %5 = vector.shape_cast %4 : vector<2x1x8x256xbf16> to vector<2x8x256xbf16>
    %6 = vector.extract_strided_slice %3 {offsets = [0, 1, 0, 0], sizes = [2, 1, 8, 256], strides = [1, 1, 1, 1]} : vector<2x2x8x256xbf16> to vector<2x1x8x256xbf16>
    %7 = vector.shape_cast %6 : vector<2x1x8x256xbf16> to vector<2x8x256xbf16>
    %8 = arith.maximumf %5, %7 : vector<2x8x256xbf16>
    %c0_3 = arith.constant 0 : index
    %c0_4 = arith.constant 0 : index
    %c0_5 = arith.constant 0 : index
    %9 = vector.load %arg2[%c0_3, %c0_4, %c0_5] : memref<2x8x256xbf16, #tpu.memory_space<vmem>>, vector<2x8x256xbf16>
    tpu.vector_store %arg2[%c0_3, %c0_4, %c0_5], %8 {strides = array<i32>} : memref<2x8x256xbf16, #tpu.memory_space<vmem>>, vector<2x8x256xbf16>,
    return
  }
  func.func @transform_0(%arg0: i32) -> (i32, i32, i32, i32) {
    %c0_i32 = arith.constant 0 : i32
    %c0_i32_0 = arith.constant 0 : i32
    %c0_i32_1 = arith.constant 0 : i32
    %c0_i32_2 = arith.constant 0 : i32
    return %arg0, %c0_i32, %c0_i32_0, %c0_i32_1 : i32, i32, i32, i32
  }
  func.func @transform_1(%arg0: i32) -> (i32, i32, i32) {
    %c0_i32 = arith.constant 0 : i32
    %c0_i32_0 = arith.constant 0 : i32
    %c0_i32_1 = arith.constant 0 : i32
    return %arg0, %c0_i32, %c0_i32_0 : i32, i32, i32
  }
}

</mosaic_0001>

<bundles_post_ra>
// kernel: point_pillars_forward.17
= control target key start
LH: loop header
LB: loop body
LE: loop exit
PB: predicated region body
PF: predicated region fallthrough
CT: control target
= control target key end

     0   :  { %s1431_s12 = smov 0   ;;  %s1815_s0 = inlined_call_operand.vmem [shape: bf16[1024,16], index: 0, kind: input, shape index: {}]   ;;  %s1816_s1 = inlined_call_operand.vmem [shape: bf16[16,32], index: 1, kind: input, shape index: {}]   ;;  %s1817_s2 = inlined_call_operand.vmem [shape: f32[1,32], index: 2, kind: input, shape index: {}]   ;;  %s1818_s3 = inlined_call_operand.vmem [shape: f32[2,2,32], index: 3, kind: output, shape index: {}]  }
   0x1 LB: > { %s1437_s13 = sadd.s32 4294967295, %s1409_s12   ;;  %p1189_p0 = scmp.ge.s32.totalorder %s1409_s12, 1  ;;  %s1409_s12 = sphi %s1431_s12, %s13_s12  }
   0x2   : > { %p138_p1 = scmp.lt.s32.totalorder %s1409_s12, 3 }
   0x4   : > { %p139_p2 = pnand %p1189_p0, %p138_p1 }
   0x5   : > { %v1370_v0 = vld [vmem:[%s1816_s1] sm:$0xff] (!%p139_p2)   ;;  %s1190_s16 = sshll.u32 (!%p139_p2), %s1437_s13, 6  ;;  %vm411_vm0 = vcmask (!%p139_p2), 130048   ;;  %vm797_vm1 = vcmask (!%p139_p2), 261120   ;;  %p167_p4 = scmp.lt.s32.totalorder (!%p139_p2), %s1437_s13, 1  ;;  %vm1128_vm2 = vcmask (!%p139_p2), 1040384  }
   0x6   : > { %142 = sbr.rel (%p139_p2) target bundleno = 378 (0x17a), region = 32  ;;  %p162_p3 = scmp.lt.s32.totalorder (!%p139_p2), %s1190_s16, 127  ;;  %1294 = vmatprep.subr.bf16.mxu0 (!%p139_p2), %v1370_v0  ;;  %1360 = vmatprep.subr.bf16.mxu1 (!%p139_p2), %v1370_v0  ;;  %v1517_v33 = vld [vmem:[%s1817_s2] ss:$0 sm:$0xff] (!%p139_p2)  ;;  %vm1130_vm3 = vcmask (!%p139_p2), 254976  }
   0x7   : > { %1295 = vmatpush3.bf16.msra.mxu0 (!%p139_p2), %v1370_v0  ;;  %1361 = vmatpush3.bf16.msra.mxu1 (!%p139_p2), %v1370_v0 }
   0xd   : > { %s1820_s16 = smov (!%p162_p3, %s1190_s16), 127  ;;  %s1822_s13 = smov (!%p167_p4, %s1437_s13), 1 }
   0xe   : > { %s1191_s17 = sshll.u32 %s1820_s16, 2  ;;  %s1192_s23 = sshll.u32 %s1822_s13, 1 }
   0xf   : > { %s1448_s20 = scalar_lea.vmem %s1815_s0, %s1191_s17  ;;  %s170_s26 = scalar_lea.vmem %s1818_s3, %s1192_s23 }
  0x10   : > { %v1371_v1 = vld [vmem:[%s1448_s20] sm:$0xff]   ;;  %v1372_v2 = vld [vmem:[%s1448_s20 + $0x8] sm:$0xff]   ;;  %v1373_v3 = vld [vmem:[%s1448_s20 + $0x10] sm:$0xff]  }
  0x11   : > { %1296 = vmatprep.mubr.msk.bf16.mxu0 %vm411_vm0, %v1371_v1  ;;  %v1374_v4 = vld [vmem:[%s1448_s20 + $0x18] sm:$0xff]   ;;  %v1375_v5 = vld [vmem:[%s1448_s20 + $0x20] sm:$0xff]   ;;  %v1376_v6 = vld [vmem:[%s1448_s20 + $0x28] sm:$0xff]  }
  0x12   : > { %1297 = vmatmul.mubr.msk.bf16.vlgmr.msra.gmra.mrb[0].mxu0 %vm411_vm0, %v1372_v2  ;;  %v1377_v7 = vld [vmem:[%s1448_s20 + $0x30] sm:$0xff]   ;;  %v1387_v8 = vld [vmem:[%s1448_s20 + $0x80] sm:$0xff]   ;;  %v1388_v9 = vld [vmem:[%s1448_s20 + $0x88] sm:$0xff]  }
  0x13   : > { %1300 = vmatprep.mubr.msk.bf16.mxu0 %vm411_vm0, %v1373_v3  ;;  %1328 = vmatprep.mubr.msk.bf16.mxu1 %vm411_vm0, %v1387_v8  ;;  %v1389_v10 = vld [vmem:[%s1448_s20 + $0x90] sm:$0xff]   ;;  %v1378_v11 = vld [vmem:[%s1448_s20 + $0x38] sm:$0xff]   ;;  %v1379_v12 = vld [vmem:[%s1448_s20 + $0x40] sm:$0xff]  }
  0x14   : > { %1329 = vmatmul.mubr.msk.bf16.vlgmr.msra.gmra.mrb[0].mxu1 %vm411_vm0, %v1388_v9  ;;  %v1390_v13 = vld [vmem:[%s1448_s20 + $0x98] sm:$0xff]   ;;  %v1391_v14 = vld [vmem:[%s1448_s20 + $0xa0] sm:$0xff]   ;;  %v1380_v15 = vld [vmem:[%s1448_s20 + $0x48] sm:$0xff]  }
  0x15   : > { %1332 = vmatprep.mubr.msk.bf16.mxu1 %vm411_vm0, %v1389_v10  ;;  %v1392_v16 = vld [vmem:[%s1448_s20 + $0xa8] sm:$0xff]   ;;  %v1381_v17 = vld [vmem:[%s1448_s20 + $0x50] sm:$0xff]   ;;  %v1382_v19 = vld [vmem:[%s1448_s20 + $0x58] sm:$0xff]  }
  0x16   : > { %v1393_v18 = vld [vmem:[%s1448_s20 + $0xb0] sm:$0xff]   ;;  %v1394_v20 = vld [vmem:[%s1448_s20 + $0xb8] sm:$0xff]   ;;  %v1383_v21 = vld [vmem:[%s1448_s20 + $0x60] sm:$0xff]  }
  0x17   : > { %v1395_v22 = vld [vmem:[%s1448_s20 + $0xc0] sm:$0xff]   ;;  %v1384_v23 = vld [vmem:[%s1448_s20 + $0x68] sm:$0xff]   ;;  %v1385_v25 = vld [vmem:[%s1448_s20 + $0x70] sm:$0xff]  }
  0x18   : > { %v1396_v24 = vld [vmem:[%s1448_s20 + $0xc8] sm:$0xff]   ;;  %v1397_v26 = vld [vmem:[%s1448_s20 + $0xd0] sm:$0xff]   ;;  %v1386_v27 = vld [vmem:[%s1448_s20 + $0x78] sm:$0xff]  }
  0x19   : > { %v1398_v28 = vld [vmem:[%s1448_s20 + $0xd8] sm:$0xff]   ;;  %v1399_v29 = vld [vmem:[%s1448_s20 + $0xe0] sm:$0xff]   ;;  %v1400_v30 = vld [vmem:[%s1448_s20 + $0xe8] sm:$0xff]  }
  0x1a   : > { %1301 = vmatmul.mubr.msk.bf16.gmra.mrb[4].mxu0 %vm411_vm0, %v1374_v4  ;;  %v1401_v31 = vld [vmem:[%s1448_s20 + $0xf0] sm:$0xff]   ;;  %v1402_v32 = vld [vmem:[%s1448_s20 + $0xf8] sm:$0xff]  }
  0x1b   : > { %1304 = vmatprep.mubr.msk.bf16.mxu0 %vm411_vm0, %v1375_v5 }
  0x1c   : > { %1333 = vmatmul.mubr.msk.bf16.gmra.mrb[4].mxu1 %vm411_vm0, %v1390_v13 }
  0x1d   : > { %1336 = vmatprep.mubr.msk.bf16.mxu1 %vm411_vm0, %v1391_v14 }
  0x22   : > { %1305 = vmatmul.mubr.msk.bf16.gmra.mrb[8].mxu0 %vm411_vm0, %v1376_v6 }
  0x23   : > { %1308 = vmatprep.mubr.msk.bf16.mxu0 %vm411_vm0, %v1377_v7 }
  0x24   : > { %1337 = vmatmul.mubr.msk.bf16.gmra.mrb[8].mxu1 %vm411_vm0, %v1392_v16 }
  0x25   : > { %1340 = vmatprep.mubr.msk.bf16.mxu1 %vm411_vm0, %v1393_v18 }
  0x2a   : > { %1309 = vmatmul.mubr.msk.bf16.gmra.mrb[12].mxu0 %vm411_vm0, %v1378_v11 }
  0x2b   : > { %1312 = vmatprep.mubr.msk.bf16.mxu0 %vm411_vm0, %v1379_v12 }
  0x2c   : > { %1341 = vmatmul.mubr.msk.bf16.gmra.mrb[12].mxu1 %vm411_vm0, %v1394_v20 }
  0x2d   : > { %1344 = vmatprep.mubr.msk.bf16.mxu1 %vm411_vm0, %v1395_v22 }
  0x32   : > { %1313 = vmatmul.mubr.msk.bf16.gmra.mrb[16].mxu0 %vm411_vm0, %v1380_v15 }
  0x33   : > { %1316 = vmatprep.mubr.msk.bf16.mxu0 %vm411_vm0, %v1381_v17 }
  0x34   : > { %1345 = vmatmul.mubr.msk.bf16.gmra.mrb[16].mxu1 %vm411_vm0, %v1396_v24 }
  0x35   : > { %1348 = vmatprep.mubr.msk.bf16.mxu1 %vm411_vm0, %v1397_v26 }
  0x3a   : > { %1317 = vmatmul.mubr.msk.bf16.gmra.mrb[20].mxu0 %vm411_vm0, %v1382_v19 }
  0x3b   : > { %1320 = vmatprep.mubr.msk.bf16.mxu0 %vm411_vm0, %v1383_v21 }
  0x3c   : > { %1349 = vmatmul.mubr.msk.bf16.gmra.mrb[20].mxu1 %vm411_vm0, %v1398_v28 }
  0x3d   : > { %1352 = vmatprep.mubr.msk.bf16.mxu1 %vm411_vm0, %v1399_v29 }
  0x42   : > { %1321 = vmatmul.mubr.msk.bf16.gmra.mrb[24].mxu0 %vm411_vm0, %v1384_v23 }
  0x43   : > { %1324 = vmatprep.mubr.msk.bf16.mxu0 %vm411_vm0, %v1385_v25 }
  0x44   : > { %1353 = vmatmul.mubr.msk.bf16.gmra.mrb[24].mxu1 %vm411_vm0, %v1400_v30 }
  0x45   : > { %1356 = vmatprep.mubr.msk.bf16.mxu1 %vm411_vm0, %v1401_v31 }
  0x4a   : > { %1325 = vmatmul.mubr.msk.bf16.gmra.mrb[28].mxu0 %vm411_vm0, %v1386_v27 }
  0x4c   : > { %1357 = vmatmul.mubr.msk.bf16.gmra.mrb[28].mxu1 %vm411_vm0, %v1402_v32 }
  0xe5   : > { %v1298_v34 = vpop.f32.mrb[0].mxu0 }
  0xe6   : > { %v542_v35 = vpop.f32.mrb[1].mxu0  ;;  %v551_v36 = vadd.f32 %v1298_v34, %v1517_v33 }
  0xe7   : > { %v543_v37 = vadd.f32 %v1517_v33, %v542_v35  ;;  %v1299_v38 = vpop.f32.mrb[2].mxu0  ;;  %v1539_v15 = vpop.f32.mrb[0].mxu1 }
  0xe8   : > { %v545_v39 = vpop.f32.mrb[3].mxu0  ;;  %v554_v41 = vadd.f32 %v1299_v38, %v1517_v33  ;;  %v933_v43 = vmul.f32 %v551_v36, %v551_v36  ;;  %v801_v48 = vsel %vm797_vm1, %v551_v36, 0.0  ;;  %v1542_v20 = vpop.f32.mrb[1].mxu1 }
  0xe9   : > { %v931_v40 = vmul.f32 %v543_v37, %v543_v37  ;;  %v546_v42 = vadd.f32 %v1517_v33, %v545_v39  ;;  %v798_v44 = vsel %vm797_vm1, %v543_v37, 0.0  ;;  %v1546_v25 = vpop.f32.mrb[2].mxu1 }
  0xea   : > { %v934_v50 = vmul.f32 %v554_v41, %v554_v41  ;;  %v998_v56 = vsel %vm797_vm1, %v933_v43, 0.0  ;;  %v803_v57 = vsel %vm797_vm1, %v554_v41, 0.0  ;;  %v1550_v30 = vpop.f32.mrb[3].mxu1 }
  0xeb   : > { %v799_v45 = vsel %vm797_vm1, %v546_v42, 0.0  ;;  %v932_v46 = vmul.f32 %v546_v42, %v546_v42  ;;  %v995_v49 = vsel %vm797_vm1, %v931_v40, 0.0 }
  0xec   : > { %v800_v47 = vadd.f32 %v799_v45, %v798_v44  ;;  %v1000_v0 = vsel %vm797_vm1, %v934_v50, 0.0 }
  0xed   : > { %v996_v51 = vsel %vm797_vm1, %v932_v46, 0.0  ;;  %v1302_v52 = vpop.f32.mrb[4].mxu0 }
  0xee   : > { %v802_v53 = vadd.f32 %v801_v48, %v800_v47  ;;  %v997_v54 = vadd.f32 %v996_v51, %v995_v49  ;;  %v558_v55 = vpop.f32.mrb[5].mxu0  ;;  %v567_v61 = vadd.f32 %v1302_v52, %v1517_v33 }
  0xef   : > { %v559_v58 = vadd.f32 %v1517_v33, %v558_v55  ;;  %v1303_v59 = vpop.f32.mrb[6].mxu0  ;;  %v1560_v49 = vpop.f32.mrb[4].mxu1 }
  0xf0   : > { %v999_v60 = vadd.f32 %v998_v56, %v997_v54  ;;  %v804_v62 = vadd.f32 %v803_v57, %v802_v53  ;;  %v561_v63 = vpop.f32.mrb[7].mxu0  ;;  %v570_v6 = vadd.f32 %v1303_v59, %v1517_v33  ;;  %v937_v9 = vmul.f32 %v567_v61, %v567_v61  ;;  %v1562_v53 = vpop.f32.mrb[5].mxu1 }
  0xf1   : > { %v805_v1 = vsel %vm797_vm1, %v559_v58, 0.0  ;;  %v935_v2 = vmul.f32 %v559_v58, %v559_v58  ;;  %v562_v3 = vadd.f32 %v1517_v33, %v561_v63  ;;  %v809_v13 = vsel %vm797_vm1, %v567_v61, 0.0  ;;  %v1566_v58 = vpop.f32.mrb[6].mxu1 }
  0xf2   : > { %v806_v4 = vadd.f32 %v805_v1, %v804_v62  ;;  %v1001_v5 = vadd.f32 %v1000_v0, %v999_v60  ;;  %v938_v16 = vmul.f32 %v570_v6, %v570_v6  ;;  %v811_v21 = vsel %vm797_vm1, %v570_v6, 0.0  ;;  %v1570_v63 = vpop.f32.mrb[7].mxu1 }
  0xf3   : > { %v1002_v7 = vsel %vm797_vm1, %v935_v2, 0.0  ;;  %v807_v8 = vsel %vm797_vm1, %v562_v3, 0.0  ;;  %v936_v12 = vmul.f32 %v562_v3, %v562_v3  ;;  %v1006_v26 = vsel %vm797_vm1, %v937_v9, 0.0 }
  0xf4   : > { %v1003_v10 = vadd.f32 %v1002_v7, %v1001_v5  ;;  %v808_v11 = vadd.f32 %v807_v8, %v806_v4  ;;  %v1008_v36 = vsel %vm797_vm1, %v938_v16, 0.0 }
  0xf5   : > { %v1306_v14 = vpop.f32.mrb[8].mxu0  ;;  %v1004_v18 = vsel %vm797_vm1, %v936_v12, 0.0 }
  0xf6   : > { %v810_v17 = vadd.f32 %v809_v13, %v808_v11  ;;  %v574_v19 = vpop.f32.mrb[9].mxu0  ;;  %v1005_v22 = vadd.f32 %v1004_v18, %v1003_v10  ;;  %v583_v27 = vadd.f32 %v1306_v14, %v1517_v33 }
  0xf7   : > { %v575_v23 = vadd.f32 %v1517_v33, %v574_v19  ;;  %v1307_v24 = vpop.f32.mrb[10].mxu0  ;;  %v1580_v18 = vpop.f32.mrb[8].mxu1 }
  0xf8   : > { %v812_v28 = vadd.f32 %v811_v21, %v810_v17  ;;  %v577_v29 = vpop.f32.mrb[11].mxu0  ;;  %v1007_v31 = vadd.f32 %v1006_v26, %v1005_v22  ;;  %v586_v38 = vadd.f32 %v1307_v24, %v1517_v33  ;;  %v941_v43 = vmul.f32 %v583_v27, %v583_v27 }
  0xf9   : > { %v813_v32 = vsel %vm797_vm1, %v575_v23, 0.0  ;;  %v939_v34 = vmul.f32 %v575_v23, %v575_v23  ;;  %v578_v35 = vadd.f32 %v1517_v33, %v577_v29  ;;  %v817_v45 = vsel %vm797_vm1, %v583_v27, 0.0  ;;  %v1582_v23 = vpop.f32.mrb[9].mxu1 }
  0xfa   : > { %v814_v37 = vadd.f32 %v813_v32, %v812_v28  ;;  %v1009_v39 = vadd.f32 %v1008_v36, %v1007_v31  ;;  %v942_v50 = vmul.f32 %v586_v38, %v586_v38  ;;  %v819_v54 = vsel %vm797_vm1, %v586_v38, 0.0  ;;  %v1586_v29 = vpop.f32.mrb[10].mxu1 }
  0xfb   : > { %v1010_v40 = vsel %vm797_vm1, %v939_v34, 0.0  ;;  %v815_v41 = vsel %vm797_vm1, %v578_v35, 0.0  ;;  %v940_v42 = vmul.f32 %v578_v35, %v578_v35  ;;  %v1014_v59 = vsel %vm797_vm1, %v941_v43, 0.0  ;;  %v1590_v36 = vpop.f32.mrb[11].mxu1 }
  0xfc   : > { %v816_v44 = vadd.f32 %v815_v41, %v814_v37  ;;  %v1011_v46 = vadd.f32 %v1010_v40, %v1009_v39  ;;  %v1016_v4 = vsel %vm797_vm1, %v942_v50, 0.0 }
  0xfd   : > { %v1012_v47 = vsel %vm797_vm1, %v940_v42, 0.0  ;;  %v1310_v48 = vpop.f32.mrb[12].mxu0 }
  0xfe   : > { %v818_v51 = vadd.f32 %v817_v45, %v816_v44  ;;  %v590_v52 = vpop.f32.mrb[13].mxu0  ;;  %v1013_v55 = vadd.f32 %v1012_v47, %v1011_v46  ;;  %v599_v60 = vadd.f32 %v1310_v48, %v1517_v33 }
  0xff   : > { %v591_v56 = vadd.f32 %v1517_v33, %v590_v52  ;;  %v1311_v57 = vpop.f32.mrb[14].mxu0 }
 0x100   : > { %v820_v61 = vadd.f32 %v819_v54, %v818_v51  ;;  %v593_v62 = vpop.f32.mrb[15].mxu0  ;;  %v1015_v0 = vadd.f32 %v1014_v59, %v1013_v55  ;;  %v602_v6 = vadd.f32 %v1311_v57, %v1517_v33  ;;  %v945_v11 = vmul.f32 %v599_v60, %v599_v60 }
 0x101   : > { %v821_v1 = vsel %vm797_vm1, %v591_v56, 0.0  ;;  %v943_v2 = vmul.f32 %v591_v56, %v591_v56  ;;  %v594_v3 = vadd.f32 %v1517_v33, %v593_v62  ;;  %v825_v13 = vsel %vm797_vm1, %v599_v60, 0.0  ;;  %v1600_v56 = vpop.f32.mrb[12].mxu1 }
 0x102   : > { %v822_v5 = vadd.f32 %v821_v1, %v820_v61  ;;  %v1017_v7 = vadd.f32 %v1016_v4, %v1015_v0  ;;  %v946_v19 = vmul.f32 %v602_v6, %v602_v6  ;;  %v827_v24 = vsel %vm797_vm1, %v602_v6, 0.0  ;;  %v1602_v61 = vpop.f32.mrb[13].mxu1 }
 0x103   : > { %v1018_v8 = vsel %vm797_vm1, %v943_v2, 0.0  ;;  %v823_v9 = vsel %vm797_vm1, %v594_v3, 0.0  ;;  %v944_v10 = vmul.f32 %v594_v3, %v594_v3  ;;  %v1022_v31 = vsel %vm797_vm1, %v945_v11, 0.0  ;;  %v1606_v3 = vpop.f32.mrb[14].mxu1 }
 0x104   : > { %v824_v12 = vadd.f32 %v823_v9, %v822_v5  ;;  %v1019_v14 = vadd.f32 %v1018_v8, %v1017_v7  ;;  %v1024_v41 = vsel %vm797_vm1, %v946_v19, 0.0  ;;  %v1610_v8 = vpop.f32.mrb[15].mxu1 }
 0x105   : > { %v1020_v16 = vsel %vm797_vm1, %v944_v10, 0.0  ;;  %v1314_v17 = vpop.f32.mrb[16].mxu0 }
 0x106   : > { %v826_v21 = vadd.f32 %v825_v13, %v824_v12  ;;  %v606_v22 = vpop.f32.mrb[17].mxu0  ;;  %v1021_v26 = vadd.f32 %v1020_v16, %v1019_v14  ;;  %v615_v32 = vadd.f32 %v1314_v17, %v1517_v33 }
 0x107   : > { %v607_v27 = vadd.f32 %v1517_v33, %v606_v22  ;;  %v1315_v28 = vpop.f32.mrb[18].mxu0 }
 0x108   : > { %v828_v34 = vadd.f32 %v827_v24, %v826_v21  ;;  %v609_v35 = vpop.f32.mrb[19].mxu0  ;;  %v1023_v37 = vadd.f32 %v1022_v31, %v1021_v26  ;;  %v618_v43 = vadd.f32 %v1315_v28, %v1517_v33  ;;  %v949_v48 = vmul.f32 %v615_v32, %v615_v32 }
 0x109   : > { %v829_v38 = vsel %vm797_vm1, %v607_v27, 0.0  ;;  %v947_v39 = vmul.f32 %v607_v27, %v607_v27  ;;  %v610_v40 = vadd.f32 %v1517_v33, %v609_v35  ;;  %v833_v51 = vsel %vm797_vm1, %v615_v32, 0.0 }
 0x10a   : > { %v830_v42 = vadd.f32 %v829_v38, %v828_v34  ;;  %v1025_v44 = vadd.f32 %v1024_v41, %v1023_v37  ;;  %v950_v57 = vmul.f32 %v618_v43, %v618_v43  ;;  %v835_v62 = vsel %vm797_vm1, %v618_v43, 0.0  ;;  %v1620_v34 = vpop.f32.mrb[16].mxu1 }
 0x10b   : > { %v1026_v45 = vsel %vm797_vm1, %v947_v39, 0.0  ;;  %v831_v46 = vsel %vm797_vm1, %v610_v40, 0.0  ;;  %v948_v47 = vmul.f32 %v610_v40, %v610_v40  ;;  %v1030_v4 = vsel %vm797_vm1, %v949_v48, 0.0  ;;  %v1622_v39 = vpop.f32.mrb[17].mxu1 }
 0x10c   : > { %v832_v50 = vadd.f32 %v831_v46, %v830_v42  ;;  %v1027_v52 = vadd.f32 %v1026_v45, %v1025_v44  ;;  %v1032_v13 = vsel %vm797_vm1, %v950_v57, 0.0  ;;  %v1626_v44 = vpop.f32.mrb[18].mxu1 }
 0x10d   : > { %v1028_v54 = vsel %vm797_vm1, %v948_v47, 0.0  ;;  %v1318_v55 = vpop.f32.mrb[20].mxu0 }
 0x10e   : > { %v834_v59 = vadd.f32 %v833_v51, %v832_v50  ;;  %v622_v60 = vpop.f32.mrb[21].mxu0  ;;  %v1029_v0 = vadd.f32 %v1028_v54, %v1027_v52  ;;  %v631_v5 = vadd.f32 %v1318_v55, %v1517_v33  ;;  %v1630_v50 = vpop.f32.mrb[19].mxu1 }
 0x10f   : > { %v623_v1 = vadd.f32 %v1517_v33, %v622_v60  ;;  %v1319_v2 = vpop.f32.mrb[22].mxu0 }
 0x110   : > { %v836_v6 = vadd.f32 %v835_v62, %v834_v59  ;;  %v625_v7 = vpop.f32.mrb[23].mxu0  ;;  %v1031_v9 = vadd.f32 %v1030_v4, %v1029_v0  ;;  %v634_v16 = vadd.f32 %v1319_v2, %v1517_v33  ;;  %v953_v24 = vmul.f32 %v631_v5, %v631_v5 }
 0x111   : > { %v837_v10 = vsel %vm797_vm1, %v623_v1, 0.0  ;;  %v951_v11 = vmul.f32 %v623_v1, %v623_v1  ;;  %v626_v12 = vadd.f32 %v1517_v33, %v625_v7  ;;  %v841_v27 = vsel %vm797_vm1, %v631_v5, 0.0 }
 0x112   : > { %v838_v14 = vadd.f32 %v837_v10, %v836_v6  ;;  %v1033_v17 = vadd.f32 %v1032_v13, %v1031_v9  ;;  %v954_v35 = vmul.f32 %v634_v16, %v634_v16  ;;  %v843_v40 = vsel %vm797_vm1, %v634_v16, 0.0 }
 0x113   : > { %v1034_v19 = vsel %vm797_vm1, %v951_v11, 0.0  ;;  %v839_v21 = vsel %vm797_vm1, %v626_v12, 0.0  ;;  %v952_v22 = vmul.f32 %v626_v12, %v626_v12  ;;  %v1038_v45 = vsel %vm797_vm1, %v953_v24, 0.0  ;;  %v1640_v11 = vpop.f32.mrb[20].mxu1 }
 0x114   : > { %v840_v26 = vadd.f32 %v839_v21, %v838_v14  ;;  %v1035_v28 = vadd.f32 %v1034_v19, %v1033_v17  ;;  %v1040_v57 = vsel %vm797_vm1, %v954_v35, 0.0  ;;  %v1642_v16 = vpop.f32.mrb[21].mxu1 }
 0x115   : > { %v1036_v31 = vsel %vm797_vm1, %v952_v22, 0.0  ;;  %v1322_v32 = vpop.f32.mrb[24].mxu0  ;;  %v1646_v24 = vpop.f32.mrb[22].mxu1 }
 0x116   : > { %v842_v37 = vadd.f32 %v841_v27, %v840_v26  ;;  %v638_v38 = vpop.f32.mrb[25].mxu0  ;;  %v1037_v41 = vadd.f32 %v1036_v31, %v1035_v28  ;;  %v647_v46 = vadd.f32 %v1322_v32, %v1517_v33  ;;  %v671_v32 = vadd.f32 %v1517_v33, %v1542_v20  ;;  %v1652_v35 = vpop.f32.mrb[23].mxu1 }
 0x117   : > { %v639_v42 = vadd.f32 %v1517_v33, %v638_v38  ;;  %v1323_v43 = vpop.f32.mrb[26].mxu0 }
 0x118   : > { %v844_v47 = vadd.f32 %v843_v40, %v842_v37  ;;  %v641_v48 = vpop.f32.mrb[27].mxu0  ;;  %v1039_v51 = vadd.f32 %v1038_v45, %v1037_v41  ;;  %v650_v60 = vadd.f32 %v1323_v43, %v1517_v33  ;;  %v957_v4 = vmul.f32 %v647_v46, %v647_v46 }
 0x119   : > { %v845_v52 = vsel %vm797_vm1, %v639_v42, 0.0  ;;  %v955_v54 = vmul.f32 %v639_v42, %v639_v42  ;;  %v642_v55 = vadd.f32 %v1517_v33, %v641_v48  ;;  %v849_v6 = vsel %vm797_vm1, %v647_v46, 0.0 }
 0x11a   : > { %v846_v59 = vadd.f32 %v845_v52, %v844_v47  ;;  %v1041_v62 = vadd.f32 %v1040_v57, %v1039_v51  ;;  %v958_v12 = vmul.f32 %v650_v60, %v650_v60  ;;  %v851_v17 = vsel %vm797_vm1, %v650_v60, 0.0  ;;  %v1662_v60 = vpop.f32.mrb[24].mxu1 }
 0x11b   : > { %v1042_v0 = vsel %vm797_vm1, %v955_v54, 0.0  ;;  %v847_v1 = vsel %vm797_vm1, %v642_v55, 0.0  ;;  %v956_v2 = vmul.f32 %v642_v55, %v642_v55  ;;  %v1046_v26 = vsel %vm797_vm1, %v957_v4, 0.0 }
 0x11c   : > { %v848_v5 = vadd.f32 %v847_v1, %v846_v59  ;;  %v1043_v7 = vadd.f32 %v1042_v0, %v1041_v62  ;;  %v1048_v42 = vsel %vm797_vm1, %v958_v12, 0.0  ;;  %v963_v59 = vmul.f32 %v671_v32, %v671_v32 }
 0x11d   : > { %v1044_v9 = vsel %vm797_vm1, %v956_v2, 0.0  ;;  %v1326_v10 = vpop.f32.mrb[28].mxu0  ;;  %v674_v1 = vadd.f32 %v1517_v33, %v1550_v30  ;;  %v1666_v2 = vpop.f32.mrb[25].mxu1 }
 0x11e   : > { %v850_v13 = vadd.f32 %v849_v6, %v848_v5  ;;  %v654_v14 = vpop.f32.mrb[29].mxu0  ;;  %v1045_v19 = vadd.f32 %v1044_v9, %v1043_v7  ;;  %v663_v27 = vadd.f32 %v1326_v10, %v1517_v33  ;;  %v861_v6 = vsel %vm797_vm1, %v671_v32, 0.0  ;;  %v1670_v7 = vpop.f32.mrb[26].mxu1 }
 0x11f   : > { %v655_v21 = vadd.f32 %v1517_v33, %v654_v14  ;;  %v1327_v22 = vpop.f32.mrb[30].mxu0  ;;  %v679_v10 = vadd.f32 %v1539_v15, %v1517_v33  ;;  %v1058_v30 = vsel %vm797_vm1, %v963_v59, 0.0 }
 0x120   : > { %v852_v28 = vadd.f32 %v851_v17, %v850_v13  ;;  %v657_v31 = vpop.f32.mrb[31].mxu0  ;;  %v1047_v37 = vadd.f32 %v1046_v26, %v1045_v19  ;;  %v666_v45 = vadd.f32 %v1327_v22, %v1517_v33  ;;  %v961_v20 = vmul.f32 %v663_v27, %v663_v27  ;;  %v1675_v13 = vpop.f32.mrb[27].mxu1 }
 0x121   : > { %v853_v38 = vsel %vm797_vm1, %v655_v21, 0.0  ;;  %v959_v40 = vmul.f32 %v655_v21, %v655_v21  ;;  %v658_v41 = vadd.f32 %v1517_v33, %v657_v31  ;;  %v857_v54 = vsel %vm797_vm1, %v663_v27, 0.0 }
 0x122   : > { %v854_v43 = vadd.f32 %v853_v38, %v852_v28  ;;  %v1049_v46 = vadd.f32 %v1048_v42, %v1047_v37  ;;  %v962_v62 = vmul.f32 %v666_v45, %v666_v45  ;;  %v859_v4 = vsel %vm797_vm1, %v666_v45, 0.0 }
 0x123   : > { %v1050_v47 = vsel %vm797_vm1, %v959_v40, 0.0  ;;  %v855_v48 = vsel %vm797_vm1, %v658_v41, 0.0  ;;  %v960_v51 = vmul.f32 %v658_v41, %v658_v41  ;;  %v1054_v9 = vsel %vm797_vm1, %v961_v20, 0.0  ;;  %v1685_v40 = vpop.f32.mrb[28].mxu1 }
 0x124   : > { %v856_v52 = vadd.f32 %v855_v48, %v854_v43  ;;  %v1051_v55 = vadd.f32 %v1050_v47, %v1049_v46  ;;  %v682_v17 = vadd.f32 %v1546_v25, %v1517_v33  ;;  %v1056_v19 = vsel %vm797_vm1, %v962_v62, 0.0  ;;  %v1690_v45 = vpop.f32.mrb[29].mxu1 }
 0x125   : > { %v1052_v57 = vsel %vm797_vm1, %v960_v51, 0.0  ;;  %v964_v22 = vmul.f32 %v674_v1, %v674_v1  ;;  %v687_v26 = vadd.f32 %v1517_v33, %v1562_v53  ;;  %v863_v28 = vsel %vm797_vm1, %v674_v1, 0.0  ;;  %v1694_v48 = vpop.f32.mrb[30].mxu1 }
 0x126   : > { %v858_v0 = vadd.f32 %v857_v54, %v856_v52  ;;  %v1053_v5 = vadd.f32 %v1052_v57, %v1051_v55  ;;  %v965_v15 = vmul.f32 %v679_v10, %v679_v10  ;;  %v865_v32 = vsel %vm797_vm1, %v679_v10, 0.0  ;;  %v1699_v54 = vpop.f32.mrb[31].mxu1 }
 0x127   : > { %v966_v38 = vmul.f32 %v682_v17, %v682_v17  ;;  %v1060_v25 = vsel %vm797_vm1, %v964_v22, 0.0  ;;  %v967_v42 = vmul.f32 %v687_v26, %v687_v26  ;;  %v690_v43 = vadd.f32 %v1517_v33, %v1570_v63 }
 0x128   : > { %v860_v12 = vadd.f32 %v859_v4, %v858_v0  ;;  %v1055_v14 = vadd.f32 %v1054_v9, %v1053_v5  ;;  %v867_v53 = vsel %vm797_vm1, %v682_v17, 0.0  ;;  %v869_v47 = vsel %vm797_vm1, %v687_v26, 0.0 }
 0x129   : > { %v1062_v51 = vsel %vm797_vm1, %v965_v15, 0.0  ;;  %v695_v20 = vadd.f32 %v1560_v49, %v1517_v33  ;;  %v1064_v55 = vsel %vm797_vm1, %v966_v38, 0.0  ;;  %v698_v57 = vadd.f32 %v1566_v58, %v1517_v33 }
 0x12a   : > { %v862_v21 = vadd.f32 %v861_v6, %v860_v12  ;;  %v1057_v27 = vadd.f32 %v1056_v19, %v1055_v14  ;;  %v1066_v62 = vsel %vm797_vm1, %v967_v42, 0.0  ;;  %v968_v0 = vmul.f32 %v690_v43, %v690_v43 }
 0x12b   : > { %v703_v1 = vadd.f32 %v1517_v33, %v1582_v23  ;;  %v871_v5 = vsel %vm797_vm1, %v690_v43, 0.0  ;;  %v969_v49 = vmul.f32 %v695_v20, %v695_v20  ;;  %v873_v9 = vsel %vm797_vm1, %v695_v20, 0.0 }
 0x12c   : > { %v864_v31 = vadd.f32 %v863_v28, %v862_v21  ;;  %v1059_v37 = vadd.f32 %v1058_v30, %v1057_v27  ;;  %v970_v12 = vmul.f32 %v698_v57, %v698_v57  ;;  %v1068_v30 = vsel %vm797_vm1, %v968_v0, 0.0 }
 0x12d   : > { %v971_v58 = vmul.f32 %v703_v1, %v703_v1  ;;  %v706_v17 = vadd.f32 %v1517_v33, %v1590_v36  ;;  %v875_v19 = vsel %vm797_vm1, %v698_v57, 0.0  ;;  %v877_v23 = vsel %vm797_vm1, %v703_v1, 0.0 }
 0x12e   : > { %v866_v41 = vadd.f32 %v865_v32, %v864_v31  ;;  %v1061_v46 = vadd.f32 %v1060_v25, %v1059_v37  ;;  %v1070_v22 = vsel %vm797_vm1, %v969_v49, 0.0  ;;  %v711_v26 = vadd.f32 %v1580_v18, %v1517_v33 }
 0x12f   : > { %v1072_v28 = vsel %vm797_vm1, %v970_v12, 0.0  ;;  %v714_v31 = vadd.f32 %v1586_v29, %v1517_v33  ;;  %v1074_v36 = vsel %vm797_vm1, %v971_v58, 0.0  ;;  %v972_v37 = vmul.f32 %v706_v17, %v706_v17 }
 0x130   : > { %v868_v52 = vadd.f32 %v867_v53, %v866_v41  ;;  %v1063_v63 = vadd.f32 %v1062_v51, %v1061_v46  ;;  %v719_v38 = vadd.f32 %v1517_v33, %v1602_v61  ;;  %v879_v25 = vsel %vm797_vm1, %v706_v17, 0.0 }
 0x131   : > { %v973_v42 = vmul.f32 %v711_v26, %v711_v26  ;;  %v881_v18 = vsel %vm797_vm1, %v711_v26, 0.0  ;;  %v974_v46 = vmul.f32 %v714_v31, %v714_v31  ;;  %v1076_v51 = vsel %vm797_vm1, %v972_v37, 0.0 }
 0x132   : > { %v870_v59 = vadd.f32 %v869_v47, %v868_v52  ;;  %v1065_v4 = vadd.f32 %v1064_v55, %v1063_v63  ;;  %v975_v29 = vmul.f32 %v719_v38, %v719_v38  ;;  %v722_v20 = vadd.f32 %v1517_v33, %v1610_v8 }
 0x133   : > { %v883_v52 = vsel %vm797_vm1, %v714_v31, 0.0  ;;  %v885_v61 = vsel %vm797_vm1, %v719_v38, 0.0  ;;  %v1078_v63 = vsel %vm797_vm1, %v973_v42, 0.0  ;;  %v727_v57 = vadd.f32 %v1600_v56, %v1517_v33 }
 0x134   : > { %v872_v6 = vadd.f32 %v871_v5, %v870_v59  ;;  %v1067_v10 = vadd.f32 %v1066_v62, %v1065_v4  ;;  %v1080_v62 = vsel %vm797_vm1, %v974_v46, 0.0  ;;  %v730_v1 = vadd.f32 %v1606_v3, %v1517_v33 }
 0x135   : > { %v1082_v8 = vsel %vm797_vm1, %v975_v29, 0.0  ;;  %v976_v5 = vmul.f32 %v722_v20, %v722_v20  ;;  %v735_v49 = vadd.f32 %v1517_v33, %v1622_v39  ;;  %v889_v56 = vsel %vm797_vm1, %v727_v57, 0.0 }
 0x136   : > { %v874_v14 = vadd.f32 %v873_v9, %v872_v6  ;;  %v1069_v21 = vadd.f32 %v1068_v30, %v1067_v10  ;;  %v887_v9 = vsel %vm797_vm1, %v722_v20, 0.0  ;;  %v977_v10 = vmul.f32 %v727_v57, %v727_v57 }
 0x137   : > { %v978_v30 = vmul.f32 %v730_v1, %v730_v1  ;;  %v1084_v17 = vsel %vm797_vm1, %v976_v5, 0.0  ;;  %v979_v3 = vmul.f32 %v735_v49, %v735_v49  ;;  %v893_v39 = vsel %vm797_vm1, %v735_v49, 0.0 }
 0x138   : > { %v876_v27 = vadd.f32 %v875_v19, %v874_v14  ;;  %v1071_v15 = vadd.f32 %v1070_v22, %v1069_v21  ;;  %v738_v19 = vadd.f32 %v1517_v33, %v1630_v50  ;;  %v891_v21 = vsel %vm797_vm1, %v730_v1, 0.0 }
 0x139   : > { %v1086_v22 = vsel %vm797_vm1, %v977_v10, 0.0  ;;  %v743_v26 = vadd.f32 %v1620_v34, %v1517_v33  ;;  %v746_v31 = vadd.f32 %v1626_v44, %v1517_v33  ;;  %v1090_v50 = vsel %vm797_vm1, %v979_v3, 0.0 }
 0x13a   : > { %v878_v32 = vadd.f32 %v877_v23, %v876_v27  ;;  %v1073_v41 = vadd.f32 %v1072_v28, %v1071_v15  ;;  %v1088_v28 = vsel %vm797_vm1, %v978_v30, 0.0  ;;  %v751_v37 = vadd.f32 %v1517_v33, %v1642_v16 }
 0x13b   : > { %v897_v34 = vsel %vm797_vm1, %v743_v26, 0.0  ;;  %v762_v57 = vadd.f32 %v1646_v24, %v1517_v33 }
 0x13c   : > { %v880_v43 = vadd.f32 %v879_v25, %v878_v32  ;;  %v1075_v53 = vadd.f32 %v1074_v36, %v1073_v41  ;;  %v980_v36 = vmul.f32 %v738_v19, %v738_v19  ;;  %v895_v41 = vsel %vm797_vm1, %v738_v19, 0.0 }
 0x13d   : > { %v981_v25 = vmul.f32 %v743_v26, %v743_v26  ;;  %v983_v44 = vmul.f32 %v751_v37, %v751_v37  ;;  %v901_v16 = vsel %vm797_vm1, %v751_v37, 0.0  ;;  %v786_v37 = vadd.f32 %v1517_v33, %v1699_v54 }
 0x13e   : > { %v882_v47 = vadd.f32 %v881_v18, %v880_v43  ;;  %v1077_v55 = vadd.f32 %v1076_v51, %v1075_v53  ;;  %v982_v18 = vmul.f32 %v746_v31, %v746_v31  ;;  %v1092_v46 = vsel %vm797_vm1, %v980_v36, 0.0 }
 0x13f   : > { %v899_v51 = vsel %vm797_vm1, %v746_v31, 0.0  ;;  %v1094_v20 = vsel %vm797_vm1, %v981_v25, 0.0  ;;  %v794_v54 = vadd.f32 %v1694_v48, %v1517_v33 }
 0x140   : > { %v884_v59 = vadd.f32 %v883_v52, %v882_v47  ;;  %v1079_v0 = vadd.f32 %v1078_v63, %v1077_v55  ;;  %v754_v47 = vadd.f32 %v1517_v33, %v1652_v35  ;;  %v759_v52 = vadd.f32 %v1640_v11, %v1517_v33 }
 0x141   : > { %v1098_v35 = vsel %vm797_vm1, %v983_v44, 0.0  ;;  %v992_v44 = vmul.f32 %v786_v37, %v786_v37 }
 0x142   : > { %v886_v4 = vadd.f32 %v885_v61, %v884_v59  ;;  %v1081_v6 = vadd.f32 %v1080_v62, %v1079_v0  ;;  %v1096_v61 = vsel %vm797_vm1, %v982_v18, 0.0  ;;  %v984_v62 = vmul.f32 %v754_v47, %v754_v47 }
 0x143   : > { %v767_v0 = vadd.f32 %v1517_v33, %v1666_v2  ;;  %v905_v11 = vsel %vm797_vm1, %v759_v52, 0.0 }
 0x144   : > { %v888_v12 = vadd.f32 %v887_v9, %v886_v4  ;;  %v1083_v14 = vadd.f32 %v1082_v8, %v1081_v6  ;;  %v903_v4 = vsel %vm797_vm1, %v754_v47, 0.0  ;;  %v985_v8 = vmul.f32 %v759_v52, %v759_v52 }
 0x145   : > { %v986_v6 = vmul.f32 %v762_v57, %v762_v57  ;;  %v1100_v10 = vsel %vm797_vm1, %v984_v62, 0.0  ;;  %v987_v24 = vmul.f32 %v767_v0, %v767_v0  ;;  %v909_v2 = vsel %vm797_vm1, %v767_v0, 0.0 }
 0x146   : > { %v890_v58 = vadd.f32 %v889_v56, %v888_v12  ;;  %v1085_v23 = vadd.f32 %v1084_v17, %v1083_v14  ;;  %v770_v12 = vadd.f32 %v1517_v33, %v1675_v13  ;;  %v907_v56 = vsel %vm797_vm1, %v762_v57, 0.0 }
 0x147   : > { %v1102_v30 = vsel %vm797_vm1, %v985_v8, 0.0  ;;  %v1104_v3 = vsel %vm797_vm1, %v986_v6, 0.0  ;;  %v1106_v13 = vsel %vm797_vm1, %v987_v24, 0.0  ;;  %v994_v52 = vmul.f32 %v794_v54, %v794_v54 }
 0x148   : > { %v892_v27 = vadd.f32 %v891_v21, %v890_v58  ;;  %v1087_v15 = vadd.f32 %v1086_v22, %v1085_v23  ;;  %v775_v58 = vadd.f32 %v1662_v60, %v1517_v33  ;;  %v778_v21 = vadd.f32 %v1670_v7, %v1517_v33 }
 0x149   : > { %v783_v22 = vadd.f32 %v1517_v33, %v1690_v45 }
 0x14a   : > { %v894_v32 = vadd.f32 %v893_v39, %v892_v27  ;;  %v1089_v38 = vadd.f32 %v1088_v28, %v1087_v15  ;;  %v988_v39 = vmul.f32 %v770_v12, %v770_v12  ;;  %v911_v27 = vsel %vm797_vm1, %v770_v12, 0.0 }
 0x14b   : > { %v989_v28 = vmul.f32 %v775_v58, %v775_v58  ;;  %v913_v60 = vsel %vm797_vm1, %v775_v58, 0.0  ;;  %v991_v7 = vmul.f32 %v783_v22, %v783_v22  ;;  %v917_v45 = vsel %vm797_vm1, %v783_v22, 0.0 }
 0x14c   : > { %v896_v42 = vadd.f32 %v895_v41, %v894_v32  ;;  %v1091_v43 = vadd.f32 %v1090_v50, %v1089_v38  ;;  %v990_v32 = vmul.f32 %v778_v21, %v778_v21  ;;  %v1108_v36 = vsel %vm797_vm1, %v988_v39, 0.0 }
 0x14d   : > { %v915_v38 = vsel %vm797_vm1, %v778_v21, 0.0  ;;  %v1110_v25 = vsel %vm797_vm1, %v989_v28, 0.0 }
 0x14e   : > { %v898_v53 = vadd.f32 %v897_v34, %v896_v42  ;;  %v1093_v29 = vadd.f32 %v1092_v46, %v1091_v43  ;;  %v791_v42 = vadd.f32 %v1685_v40, %v1517_v33  ;;  %v1112_v43 = vsel %vm797_vm1, %v990_v32, 0.0 }
 0x14f   : > { %v1114_v46 = vsel %vm797_vm1, %v991_v7, 0.0 }
 0x150   : > { %v900_v55 = vadd.f32 %v899_v51, %v898_v53  ;;  %v1095_v63 = vadd.f32 %v1094_v20, %v1093_v29  ;;  %v919_v51 = vsel %vm797_vm1, %v786_v37, 0.0  ;;  %v993_v29 = vmul.f32 %v791_v42, %v791_v42 }
 0x151   : > { %v921_v20 = vsel %vm797_vm1, %v791_v42, 0.0 }
 0x152   : > { %v902_v59 = vadd.f32 %v901_v16, %v900_v55  ;;  %v1097_v1 = vadd.f32 %v1096_v61, %v1095_v63  ;;  %v1116_v61 = vsel %vm797_vm1, %v992_v44, 0.0  ;;  %v923_v63 = vsel %vm797_vm1, %v794_v54, 0.0 }
 0x153   : > { %v1118_v33 = vsel %vm797_vm1, %v993_v29, 0.0 }
 0x154   : > { %v904_v5 = vadd.f32 %v903_v4, %v902_v59  ;;  %v1099_v49 = vadd.f32 %v1098_v35, %v1097_v1  ;;  %v1120_v35 = vsel %vm797_vm1, %v994_v52, 0.0 }
 0x156   : > { %v906_v9 = vadd.f32 %v905_v11, %v904_v5  ;;  %v1101_v14 = vadd.f32 %v1100_v10, %v1099_v49 }
 0x158   : > { %v908_v17 = vadd.f32 %v907_v56, %v906_v9  ;;  %v1103_v19 = vadd.f32 %v1102_v30, %v1101_v14 }
 0x15a   : > { %v910_v23 = vadd.f32 %v909_v2, %v908_v17  ;;  %v1105_v26 = vadd.f32 %v1104_v3, %v1103_v19 }
 0x15c   : > { %v912_v15 = vadd.f32 %v911_v27, %v910_v23  ;;  %v1107_v31 = vadd.f32 %v1106_v13, %v1105_v26 }
 0x15e   : > { %v914_v50 = vadd.f32 %v913_v60, %v912_v15  ;;  %v1109_v41 = vadd.f32 %v1108_v36, %v1107_v31 }
 0x160   : > { %v916_v34 = vadd.f32 %v915_v38, %v914_v50  ;;  %v1111_v18 = vadd.f32 %v1110_v25, %v1109_v41 }
 0x162   : > { %v918_v53 = vadd.f32 %v917_v45, %v916_v34  ;;  %v1113_v47 = vadd.f32 %v1112_v43, %v1111_v18 }
 0x164   : > { %v920_v16 = vadd.f32 %v919_v51, %v918_v53  ;;  %v1115_v40 = vadd.f32 %v1114_v46, %v1113_v47 }
 0x166   : > { %v922_v55 = vadd.f32 %v921_v20, %v920_v16  ;;  %v1117_v57 = vadd.f32 %v1116_v61, %v1115_v40 }
 0x168   : > { %v924_v48 = vadd.f32 %v923_v63, %v922_v55  ;;  %v1119_v59 = vadd.f32 %v1118_v33, %v1117_v57 }
 0x16a   : > { %v925_v62 = vrot.slane %v924_v48, 4  ;;  %v1121_v0 = vadd.f32 %v1120_v35, %v1119_v59 }
 0x16c   : > { %v926_v1 = vadd.f32 %v925_v62, %v924_v48  ;;  %v1122_v4 = vrot.slane %v1121_v0, 4 }
 0x16e   : > { %v927_v8 = vrot.slane %v926_v1, 2  ;;  %v1123_v5 = vadd.f32 %v1122_v4, %v1121_v0 }
 0x170   : > { %v928_v11 = vadd.f32 %v927_v8, %v926_v1  ;;  %v1124_v49 = vrot.slane %v1123_v5, 2 }
 0x172   : > { %v929_v6 = vrot.slane %v928_v11, 1  ;;  %v1125_v9 = vadd.f32 %v1124_v49, %v1123_v5 }
 0x174   : > { %v1126_v10 = vrot.slane %v1125_v9, 1  ;;  %v930_v24 = vadd.f32 %v929_v6, %v928_v11 }
 0x176   : > { %v1127_v12 = vadd.f32 %v1126_v10, %v1125_v9 }
 0x178   : > { %v1129_v56 = vsel %vm1128_vm2, %v930_v24, %v1127_v12 }
 0x179   : > { %1131 = vst.msk [vmem:[%s170_s26] sm:$0x3] %vm1130_vm3, %v1129_v56 }
 0x17a PF: > { %s13_s12 = sadd.s32 1, %s1409_s12  }
 0x17b   : > { %p10_p5 = scmp.ge.s32.totalorder %s13_s12, 4  }
 0x17d   :  { %12 = sbr.rel (!%p10_p5) target bundleno = 1 (0x1), region = 62 }

// kernel: point_pillars_forward.18
= control target key start
LH: loop header
LB: loop body
LE: loop exit
PB: predicated region body
PF: predicated region fallthrough
CT: control target
= control target key end

     0   :  { %s2877_s27 = smov 0   ;;  %s3547_s0 = inlined_call_operand.vmem [shape: bf16[1024,16], index: 0, kind: input, shape index: {}]   ;;  %s3548_s1 = inlined_call_operand.vmem [shape: bf16[16,32], index: 1, kind: input, shape index: {}]   ;;  %s3549_s2 = inlined_call_operand.vmem [shape: f32[1,32], index: 2, kind: input, shape index: {}]   ;;  %s3550_s3 = inlined_call_operand.vmem [shape: f32[1,32], index: 3, kind: input, shape index: {}]   ;;  %s3551_s4 = inlined_call_operand.vmem [shape: f32[1,32], index: 4, kind: input, shape index: {}]   ;;  %s3552_s5 = inlined_call_operand.vmem [shape: bf16[32,64], index: 5, kind: input, shape index: {}]   ;;  %s3553_s6 = inlined_call_operand.vmem [shape: f32[1,64], index: 6, kind: input, shape index: {}]   ;;  %s3554_s7 = inlined_call_operand.vmem [shape: bf16[1024,64], index: 7, kind: output, shape index: {0}]   ;;  %s3555_s8 = inlined_call_operand.vmem [shape: f32[2,2,64], index: 8, kind: output, shape index: {1}]  }
   0x1 LB: > { %s2883_s28 = sadd.s32 4294967295, %s2830_s27   ;;  %p2340_p0 = scmp.ge.s32.totalorder %s2830_s27, 1  ;;  %s2830_s27 = sphi %s2877_s27, %s19_s27  }
   0x2   : > { %p266_p1 = scmp.lt.s32.totalorder %s2830_s27, 3 }
   0x4   : > { %p267_p2 = pnand %p2340_p0, %p266_p1 }
   0x5   : > { %v2788_v0 = vld [vmem:[%s3548_s1] sm:$0xff] (!%p267_p2)   ;;  %s2341_s9 = sshll.u32 (!%p267_p2), %s2883_s28, 6  ;;  %vm560_vm0 = vcmask (!%p267_p2), 130048   ;;  %v2822_v28 = vld [vmem:[%s3552_s5 + $0x8] sm:$0xff] (!%p267_p2)   ;;  %vm1207_vm1 = vcmask (!%p267_p2), 261120   ;;  %vm1849_vm2 = vcmask (!%p267_p2), 519168  }
   0x6   : > { %270 = sbr.rel (%p267_p2) target bundleno = 604 (0x25c), region = 48  ;;  %p305_p3 = scmp.lt.s32.totalorder (!%p267_p2), %s2341_s9, 127  ;;  %2646 = vmatprep.subr.bf16.mxu0 (!%p267_p2), %v2788_v0  ;;  %v2821_v26 = vld [vmem:[%s3552_s5] sm:$0xff] (!%p267_p2)   ;;  %vm1914_vm3 = vcmask (!%p267_p2), 523264   ;;  %vm2245_vm4 = vcmask (!%p267_p2), 1040384   ;;  %vm2247_vm5 = vcmask (!%p267_p2), 517120  }
   0x7   : > { %2647 = vmatpush3.bf16.msra.mxu0 (!%p267_p2), %v2788_v0  ;;  %2712 = vmatprep.subr.bf16.mxu1 (!%p267_p2), %v2821_v26  ;;  %v2974_v35 = vld [vmem:[%s3549_s2] ss:$0 sm:$0xff] (!%p267_p2)  ;;  %p316_p4 = scmp.lt.s32.totalorder (!%p267_p2), %s2883_s28, 1 }
   0x8   : > { %2713 = vmatpush3.bf16.msra.mxu1 (!%p267_p2), %v2821_v26  ;;  %v2979_v37 = vld [vmem:[%s3550_s3] ss:$0 sm:$0xff] (!%p267_p2) }
   0x9   : > { %2714 = vmatprep.subr.bf16.mxu1 (!%p267_p2), %v2822_v28  ;;  %v2985_v40 = vld [vmem:[%s3551_s4] ss:$0 sm:$0xff] (!%p267_p2) }
   0xc   : > { %2715 = vmatpush3.bf16.msra.mxu1 (!%p267_p2), %v2822_v28 }
   0xd   : > { %s3557_s9 = smov (!%p305_p3, %s2341_s9), 127  ;;  %s3559_s28 = smov (!%p316_p4, %s2883_s28), 1 }
   0xe   : > { %s2342_s10 = sshll.u32 %s3557_s9, 2  ;;  %s2345_s11 = sshll.u32 %s3559_s28, 1 }
   0xf   : > { %s2899_s13 = scalar_lea.vmem %s3547_s0, %s2342_s10  ;;  %s3221_s30 = scalar_lea.vmem %s3554_s7, %s2342_s10 }
  0x10   : > { %v2789_v1 = vld [vmem:[%s2899_s13] sm:$0xff]   ;;  %v2790_v2 = vld [vmem:[%s2899_s13 + $0x8] sm:$0xff]   ;;  %v2791_v3 = vld [vmem:[%s2899_s13 + $0x10] sm:$0xff]   ;;  %s319_s14 = scalar_lea.vmem %s3555_s8, %s2345_s11 }
  0x11   : > { %2648 = vmatprep.mubr.msk.bf16.mxu0 %vm560_vm0, %v2789_v1  ;;  %v2792_v4 = vld [vmem:[%s2899_s13 + $0x18] sm:$0xff]   ;;  %v2793_v5 = vld [vmem:[%s2899_s13 + $0x20] sm:$0xff]   ;;  %v2794_v6 = vld [vmem:[%s2899_s13 + $0x28] sm:$0xff]  }
  0x12   : > { %2649 = vmatmul.mubr.msk.bf16.vlgmr.msra.gmra.mrb[0].mxu0 %vm560_vm0, %v2790_v2  ;;  %v2795_v7 = vld [vmem:[%s2899_s13 + $0x30] sm:$0xff]   ;;  %v2796_v8 = vld [vmem:[%s2899_s13 + $0x38] sm:$0xff]   ;;  %v2797_v9 = vld [vmem:[%s2899_s13 + $0x40] sm:$0xff]  }
  0x13   : > { %2652 = vmatprep.mubr.msk.bf16.mxu0 %vm560_vm0, %v2791_v3  ;;  %v2798_v10 = vld [vmem:[%s2899_s13 + $0x48] sm:$0xff]   ;;  %v2799_v11 = vld [vmem:[%s2899_s13 + $0x50] sm:$0xff]   ;;  %v2800_v12 = vld [vmem:[%s2899_s13 + $0x58] sm:$0xff]  }
  0x14   : > { %v2801_v13 = vld [vmem:[%s2899_s13 + $0x60] sm:$0xff]   ;;  %v2802_v14 = vld [vmem:[%s2899_s13 + $0x68] sm:$0xff]   ;;  %v2803_v15 = vld [vmem:[%s2899_s13 + $0x70] sm:$0xff]  }
  0x15   : > { %v2804_v16 = vld [vmem:[%s2899_s13 + $0x78] sm:$0xff]   ;;  %v2805_v17 = vld [vmem:[%s2899_s13 + $0x80] sm:$0xff]   ;;  %v2806_v18 = vld [vmem:[%s2899_s13 + $0x88] sm:$0xff]  }
  0x16   : > { %v2807_v19 = vld [vmem:[%s2899_s13 + $0x90] sm:$0xff]   ;;  %v2808_v20 = vld [vmem:[%s2899_s13 + $0x98] sm:$0xff]   ;;  %v2809_v21 = vld [vmem:[%s2899_s13 + $0xa0] sm:$0xff]  }
  0x17   : > { %v2810_v22 = vld [vmem:[%s2899_s13 + $0xa8] sm:$0xff]   ;;  %v2811_v23 = vld [vmem:[%s2899_s13 + $0xb0] sm:$0xff]   ;;  %v2812_v24 = vld [vmem:[%s2899_s13 + $0xb8] sm:$0xff]  }
  0x18   : > { %v2813_v25 = vld [vmem:[%s2899_s13 + $0xc0] sm:$0xff]   ;;  %v2814_v27 = vld [vmem:[%s2899_s13 + $0xc8] sm:$0xff]   ;;  %v2815_v29 = vld [vmem:[%s2899_s13 + $0xd0] sm:$0xff]  }
  0x19   : > { %v2816_v30 = vld [vmem:[%s2899_s13 + $0xd8] sm:$0xff]   ;;  %v2817_v31 = vld [vmem:[%s2899_s13 + $0xe0] sm:$0xff]   ;;  %v2818_v32 = vld [vmem:[%s2899_s13 + $0xe8] sm:$0xff]  }
  0x1a   : > { %2653 = vmatmul.mubr.msk.bf16.gmra.mrb[4].mxu0 %vm560_vm0, %v2792_v4  ;;  %v2819_v33 = vld [vmem:[%s2899_s13 + $0xf0] sm:$0xff]   ;;  %v2820_v34 = vld [vmem:[%s2899_s13 + $0xf8] sm:$0xff]  }
  0x1b   : > { %2656 = vmatprep.mubr.msk.bf16.mxu0 %vm560_vm0, %v2793_v5 }
  0x22   : > { %2657 = vmatmul.mubr.msk.bf16.gmra.mrb[8].mxu0 %vm560_vm0, %v2794_v6 }
  0x23   : > { %2660 = vmatprep.mubr.msk.bf16.mxu0 %vm560_vm0, %v2795_v7 }
  0x2a   : > { %2661 = vmatmul.mubr.msk.bf16.gmra.mrb[12].mxu0 %vm560_vm0, %v2796_v8 }
  0x2b   : > { %2664 = vmatprep.mubr.msk.bf16.mxu0 %vm560_vm0, %v2797_v9 }
  0x32   : > { %2665 = vmatmul.mubr.msk.bf16.gmra.mrb[16].mxu0 %vm560_vm0, %v2798_v10 }
  0x33   : > { %2668 = vmatprep.mubr.msk.bf16.mxu0 %vm560_vm0, %v2799_v11 }
  0x3a   : > { %2669 = vmatmul.mubr.msk.bf16.gmra.mrb[20].mxu0 %vm560_vm0, %v2800_v12 }
  0x3b   : > { %2672 = vmatprep.mubr.msk.bf16.mxu0 %vm560_vm0, %v2801_v13 }
  0x42   : > { %2673 = vmatmul.mubr.msk.bf16.gmra.mrb[24].mxu0 %vm560_vm0, %v2802_v14 }
  0x43   : > { %2676 = vmatprep.mubr.msk.bf16.mxu0 %vm560_vm0, %v2803_v15 }
  0x4a   : > { %2677 = vmatmul.mubr.msk.bf16.gmra.mrb[28].mxu0 %vm560_vm0, %v2804_v16 }
  0x4b   : > { %2680 = vmatprep.mubr.msk.bf16.mxu0 %vm560_vm0, %v2805_v17 }
  0x52   : > { %2681 = vmatmul.mubr.msk.bf16.gmra.mrb[32].mxu0 %vm560_vm0, %v2806_v18 }
  0x53   : > { %2684 = vmatprep.mubr.msk.bf16.mxu0 %vm560_vm0, %v2807_v19 }
  0x5a   : > { %2685 = vmatmul.mubr.msk.bf16.gmra.mrb[36].mxu0 %vm560_vm0, %v2808_v20 }
  0x5b   : > { %2688 = vmatprep.mubr.msk.bf16.mxu0 %vm560_vm0, %v2809_v21 }
  0x62   : > { %2689 = vmatmul.mubr.msk.bf16.gmra.mrb[40].mxu0 %vm560_vm0, %v2810_v22 }
  0x63   : > { %2692 = vmatprep.mubr.msk.bf16.mxu0 %vm560_vm0, %v2811_v23 }
  0x6a   : > { %2693 = vmatmul.mubr.msk.bf16.gmra.mrb[44].mxu0 %vm560_vm0, %v2812_v24 }
  0x6b   : > { %2696 = vmatprep.mubr.msk.bf16.mxu0 %vm560_vm0, %v2813_v25 }
  0x72   : > { %2697 = vmatmul.mubr.msk.bf16.gmra.mrb[48].mxu0 %vm560_vm0, %v2814_v27 }
  0x73   : > { %2700 = vmatprep.mubr.msk.bf16.mxu0 %vm560_vm0, %v2815_v29 }
  0x7a   : > { %2701 = vmatmul.mubr.msk.bf16.gmra.mrb[52].mxu0 %vm560_vm0, %v2816_v30 }
  0x7b   : > { %2704 = vmatprep.mubr.msk.bf16.mxu0 %vm560_vm0, %v2817_v31 }
  0x82   : > { %2705 = vmatmul.mubr.msk.bf16.gmra.mrb[56].mxu0 %vm560_vm0, %v2818_v32 }
  0x83   : > { %2708 = vmatprep.mubr.msk.bf16.mxu0 %vm560_vm0, %v2819_v33 }
  0x8a   : > { %2709 = vmatmul.mubr.msk.bf16.gmra.mrb[60].mxu0 %vm560_vm0, %v2820_v34 }
  0xe5   : > { %v2650_v36 = vpop.f32.mrb[0].mxu0 }
  0xe6   : > { %v700_v38 = vadd.f32 %v2650_v36, %v2974_v35  ;;  %v691_v39 = vpop.f32.mrb[1].mxu0 }
  0xe7   : > { %v692_v41 = vadd.f32 %v2974_v35, %v691_v39  ;;  %v2651_v42 = vpop.f32.mrb[2].mxu0 }
  0xe8   : > { %v955_v43 = vmul.f32 %v2979_v37, %v700_v38  ;;  %v703_v44 = vadd.f32 %v2651_v42, %v2974_v35  ;;  %v694_v45 = vpop.f32.mrb[3].mxu0 }
  0xe9   : > { %v953_v46 = vmul.f32 %v2979_v37, %v692_v41  ;;  %v695_v47 = vadd.f32 %v2974_v35, %v694_v45 }
  0xea   : > { %v1026_v48 = vadd.f32 %v2985_v40, %v955_v43  ;;  %v956_v49 = vmul.f32 %v2979_v37, %v703_v44 }
  0xeb   : > { %v954_v50 = vmul.f32 %v2979_v37, %v695_v47  ;;  %v1024_v51 = vadd.f32 %v2985_v40, %v953_v46 }
  0xec   : > { %v1027_v52 = vadd.f32 %v2985_v40, %v956_v49  ;;  %v1090_v55 = vmax.f32 %v1026_v48, 0.0 }
  0xed   : > { %v2654_v53 = vpop.f32.mrb[4].mxu0  ;;  %v1025_v54 = vadd.f32 %v2985_v40, %v954_v50  ;;  %v1088_v61 = vmax.f32 %v1024_v51, 0.0 }
  0xee   : > { %v1091_v56 = vmax.f32 %v1027_v52, 0.0  ;;  %v716_v57 = vadd.f32 %v2654_v53, %v2974_v35  ;;  %v707_v58 = vpop.f32.mrb[5].mxu0 }
  0xef   : > { %v708_v59 = vadd.f32 %v2974_v35, %v707_v58  ;;  %v2655_v60 = vpop.f32.mrb[6].mxu0  ;;  %v1089_v62 = vmax.f32 %v1025_v54, 0.0 }
  0xf0   : > { %v1153_v63 = vpack.c.bf16 %v1091_v56, %v1090_v55  ;;  %v959_v0 = vmul.f32 %v2979_v37, %v716_v57  ;;  %v719_v1 = vadd.f32 %v2655_v60, %v2974_v35  ;;  %v710_v2 = vpop.f32.mrb[7].mxu0 }
  0xf1   : > { %v957_v3 = vmul.f32 %v2979_v37, %v708_v59  ;;  %v711_v4 = vadd.f32 %v2974_v35, %v710_v2  ;;  %v1152_v5 = vpack.c.bf16 %v1089_v62, %v1088_v61 }
  0xf2   : > { %v1030_v6 = vadd.f32 %v2985_v40, %v959_v0  ;;  %v960_v7 = vmul.f32 %v2979_v37, %v719_v1 }
  0xf3   : > { %v1028_v8 = vadd.f32 %v2985_v40, %v957_v3  ;;  %v958_v9 = vmul.f32 %v2979_v37, %v711_v4  ;;  %2716 = vmatprep.mubr.msk.bf16.mxu1 %vm1207_vm1, %v1152_v5 }
  0xf4   : > { %v1031_v10 = vadd.f32 %v2985_v40, %v960_v7  ;;  %2717 = vmatmul.mubr.msk.bf16.vlgmr.msra.gmra.mrb[0].mxu1 %vm1207_vm1, %v1153_v63  ;;  %v1094_v13 = vmax.f32 %v1030_v6, 0.0 }
  0xf5   : > { %v1029_v11 = vadd.f32 %v2985_v40, %v958_v9  ;;  %v2658_v12 = vpop.f32.mrb[8].mxu0  ;;  %v1092_v17 = vmax.f32 %v1028_v8, 0.0 }
  0xf6   : > { %v1095_v14 = vmax.f32 %v1031_v10, 0.0  ;;  %v732_v15 = vadd.f32 %v2658_v12, %v2974_v35  ;;  %v723_v16 = vpop.f32.mrb[9].mxu0 }
  0xf7   : > { %v1093_v18 = vmax.f32 %v1029_v11, 0.0  ;;  %v724_v19 = vadd.f32 %v2974_v35, %v723_v16  ;;  %v2659_v20 = vpop.f32.mrb[10].mxu0 }
  0xf8   : > { %v1155_v21 = vpack.c.bf16 %v1095_v14, %v1094_v13  ;;  %v963_v22 = vmul.f32 %v2979_v37, %v732_v15  ;;  %v735_v23 = vadd.f32 %v2659_v20, %v2974_v35  ;;  %v726_v24 = vpop.f32.mrb[11].mxu0 }
  0xf9   : > { %v1154_v25 = vpack.c.bf16 %v1093_v18, %v1092_v17  ;;  %v961_v26 = vmul.f32 %v2979_v37, %v724_v19  ;;  %v727_v27 = vadd.f32 %v2974_v35, %v726_v24 }
  0xfa   : > { %v1034_v28 = vadd.f32 %v2985_v40, %v963_v22  ;;  %v964_v29 = vmul.f32 %v2979_v37, %v735_v23 }
  0xfb   : > { %v1032_v30 = vadd.f32 %v2985_v40, %v961_v26  ;;  %v962_v31 = vmul.f32 %v2979_v37, %v727_v27  ;;  %2720 = vmatprep.mubr.msk.bf16.mxu1 %vm1207_vm1, %v1154_v25 }
  0xfc   : > { %v1035_v32 = vadd.f32 %v2985_v40, %v964_v29  ;;  %2721 = vmatmul.mubr.msk.bf16.gmra.mrb[4].mxu1 %vm1207_vm1, %v1155_v21  ;;  %v1098_v36 = vmax.f32 %v1034_v28, 0.0 }
  0xfd   : > { %v1033_v33 = vadd.f32 %v2985_v40, %v962_v31  ;;  %v2662_v34 = vpop.f32.mrb[12].mxu0  ;;  %v1096_v42 = vmax.f32 %v1032_v30, 0.0 }
  0xfe   : > { %v1099_v38 = vmax.f32 %v1035_v32, 0.0  ;;  %v748_v39 = vadd.f32 %v2662_v34, %v2974_v35  ;;  %v739_v41 = vpop.f32.mrb[13].mxu0 }
  0xff   : > { %v1097_v43 = vmax.f32 %v1033_v33, 0.0  ;;  %v740_v44 = vadd.f32 %v2974_v35, %v739_v41  ;;  %v2663_v45 = vpop.f32.mrb[14].mxu0 }
 0x100   : > { %v1157_v46 = vpack.c.bf16 %v1099_v38, %v1098_v36  ;;  %v967_v47 = vmul.f32 %v2979_v37, %v748_v39  ;;  %v751_v48 = vadd.f32 %v2663_v45, %v2974_v35  ;;  %v742_v49 = vpop.f32.mrb[15].mxu0 }
 0x101   : > { %v1156_v50 = vpack.c.bf16 %v1097_v43, %v1096_v42  ;;  %v965_v51 = vmul.f32 %v2979_v37, %v740_v44  ;;  %v743_v52 = vadd.f32 %v2974_v35, %v742_v49 }
 0x102   : > { %v1038_v53 = vadd.f32 %v2985_v40, %v967_v47  ;;  %v968_v54 = vmul.f32 %v2979_v37, %v751_v48 }
 0x103   : > { %v1036_v55 = vadd.f32 %v2985_v40, %v965_v51  ;;  %v966_v56 = vmul.f32 %v2979_v37, %v743_v52  ;;  %2724 = vmatprep.mubr.msk.bf16.mxu1 %vm1207_vm1, %v1156_v50 }
 0x104   : > { %v1039_v57 = vadd.f32 %v2985_v40, %v968_v54  ;;  %2725 = vmatmul.mubr.msk.bf16.gmra.mrb[8].mxu1 %vm1207_vm1, %v1157_v46  ;;  %v1102_v60 = vmax.f32 %v1038_v53, 0.0 }
 0x105   : > { %v1037_v58 = vadd.f32 %v2985_v40, %v966_v56  ;;  %v2666_v59 = vpop.f32.mrb[16].mxu0  ;;  %v1100_v0 = vmax.f32 %v1036_v55, 0.0 }
 0x106   : > { %v1103_v61 = vmax.f32 %v1039_v57, 0.0  ;;  %v764_v62 = vadd.f32 %v2666_v59, %v2974_v35  ;;  %v755_v63 = vpop.f32.mrb[17].mxu0 }
 0x107   : > { %v1101_v1 = vmax.f32 %v1037_v58, 0.0  ;;  %v756_v2 = vadd.f32 %v2974_v35, %v755_v63  ;;  %v2667_v3 = vpop.f32.mrb[18].mxu0 }
 0x108   : > { %v1159_v4 = vpack.c.bf16 %v1103_v61, %v1102_v60  ;;  %v971_v5 = vmul.f32 %v2979_v37, %v764_v62  ;;  %v767_v6 = vadd.f32 %v2667_v3, %v2974_v35  ;;  %v758_v7 = vpop.f32.mrb[19].mxu0 }
 0x109   : > { %v1158_v8 = vpack.c.bf16 %v1101_v1, %v1100_v0  ;;  %v969_v9 = vmul.f32 %v2979_v37, %v756_v2  ;;  %v759_v10 = vadd.f32 %v2974_v35, %v758_v7 }
 0x10a   : > { %v1042_v11 = vadd.f32 %v2985_v40, %v971_v5  ;;  %v972_v12 = vmul.f32 %v2979_v37, %v767_v6 }
 0x10b   : > { %v1040_v13 = vadd.f32 %v2985_v40, %v969_v9  ;;  %v970_v14 = vmul.f32 %v2979_v37, %v759_v10  ;;  %2728 = vmatprep.mubr.msk.bf16.mxu1 %vm1207_vm1, %v1158_v8 }
 0x10c   : > { %v1043_v15 = vadd.f32 %v2985_v40, %v972_v12  ;;  %2729 = vmatmul.mubr.msk.bf16.gmra.mrb[12].mxu1 %vm1207_vm1, %v1159_v4  ;;  %v1106_v18 = vmax.f32 %v1042_v11, 0.0 }
 0x10d   : > { %v1041_v16 = vadd.f32 %v2985_v40, %v970_v14  ;;  %v2670_v17 = vpop.f32.mrb[20].mxu0  ;;  %v1104_v22 = vmax.f32 %v1040_v13, 0.0 }
 0x10e   : > { %v1107_v19 = vmax.f32 %v1043_v15, 0.0  ;;  %v780_v20 = vadd.f32 %v2670_v17, %v2974_v35  ;;  %v771_v21 = vpop.f32.mrb[21].mxu0 }
 0x10f   : > { %v1105_v23 = vmax.f32 %v1041_v16, 0.0  ;;  %v772_v24 = vadd.f32 %v2974_v35, %v771_v21  ;;  %v2671_v25 = vpop.f32.mrb[22].mxu0 }
 0x110   : > { %v1161_v26 = vpack.c.bf16 %v1107_v19, %v1106_v18  ;;  %v975_v27 = vmul.f32 %v2979_v37, %v780_v20  ;;  %v783_v28 = vadd.f32 %v2671_v25, %v2974_v35  ;;  %v774_v29 = vpop.f32.mrb[23].mxu0 }
 0x111   : > { %v1160_v30 = vpack.c.bf16 %v1105_v23, %v1104_v22  ;;  %v973_v31 = vmul.f32 %v2979_v37, %v772_v24  ;;  %v775_v32 = vadd.f32 %v2974_v35, %v774_v29 }
 0x112   : > { %v1046_v33 = vadd.f32 %v2985_v40, %v975_v27  ;;  %v976_v34 = vmul.f32 %v2979_v37, %v783_v28 }
 0x113   : > { %v1044_v36 = vadd.f32 %v2985_v40, %v973_v31  ;;  %v974_v38 = vmul.f32 %v2979_v37, %v775_v32  ;;  %2732 = vmatprep.mubr.msk.bf16.mxu1 %vm1207_vm1, %v1160_v30 }
 0x114   : > { %v1047_v39 = vadd.f32 %v2985_v40, %v976_v34  ;;  %2733 = vmatmul.mubr.msk.bf16.gmra.mrb[16].mxu1 %vm1207_vm1, %v1161_v26  ;;  %v1110_v43 = vmax.f32 %v1046_v33, 0.0 }
 0x115   : > { %v1045_v41 = vadd.f32 %v2985_v40, %v974_v38  ;;  %v2674_v42 = vpop.f32.mrb[24].mxu0  ;;  %v1108_v47 = vmax.f32 %v1044_v36, 0.0 }
 0x116   : > { %v1111_v44 = vmax.f32 %v1047_v39, 0.0  ;;  %v796_v45 = vadd.f32 %v2674_v42, %v2974_v35  ;;  %v787_v46 = vpop.f32.mrb[25].mxu0 }
 0x117   : > { %v1109_v48 = vmax.f32 %v1045_v41, 0.0  ;;  %v788_v49 = vadd.f32 %v2974_v35, %v787_v46  ;;  %v2675_v50 = vpop.f32.mrb[26].mxu0 }
 0x118   : > { %v1163_v51 = vpack.c.bf16 %v1111_v44, %v1110_v43  ;;  %v979_v52 = vmul.f32 %v2979_v37, %v796_v45  ;;  %v799_v53 = vadd.f32 %v2675_v50, %v2974_v35  ;;  %v790_v54 = vpop.f32.mrb[27].mxu0 }
 0x119   : > { %v1162_v55 = vpack.c.bf16 %v1109_v48, %v1108_v47  ;;  %v977_v56 = vmul.f32 %v2979_v37, %v788_v49  ;;  %v791_v57 = vadd.f32 %v2974_v35, %v790_v54 }
 0x11a   : > { %v1050_v58 = vadd.f32 %v2985_v40, %v979_v52  ;;  %v980_v59 = vmul.f32 %v2979_v37, %v799_v53 }
 0x11b   : > { %v1048_v60 = vadd.f32 %v2985_v40, %v977_v56  ;;  %v978_v61 = vmul.f32 %v2979_v37, %v791_v57  ;;  %2736 = vmatprep.mubr.msk.bf16.mxu1 %vm1207_vm1, %v1162_v55 }
 0x11c   : > { %v1051_v62 = vadd.f32 %v2985_v40, %v980_v59  ;;  %2737 = vmatmul.mubr.msk.bf16.gmra.mrb[20].mxu1 %vm1207_vm1, %v1163_v51  ;;  %v1114_v1 = vmax.f32 %v1050_v58, 0.0 }
 0x11d   : > { %v1049_v63 = vadd.f32 %v2985_v40, %v978_v61  ;;  %v2678_v0 = vpop.f32.mrb[28].mxu0  ;;  %v1112_v5 = vmax.f32 %v1048_v60, 0.0 }
 0x11e   : > { %v1115_v2 = vmax.f32 %v1051_v62, 0.0  ;;  %v812_v3 = vadd.f32 %v2678_v0, %v2974_v35  ;;  %v803_v4 = vpop.f32.mrb[29].mxu0 }
 0x11f   : > { %v1113_v6 = vmax.f32 %v1049_v63, 0.0  ;;  %v804_v7 = vadd.f32 %v2974_v35, %v803_v4  ;;  %v2679_v8 = vpop.f32.mrb[30].mxu0 }
 0x120   : > { %v1165_v9 = vpack.c.bf16 %v1115_v2, %v1114_v1  ;;  %v983_v10 = vmul.f32 %v2979_v37, %v812_v3  ;;  %v815_v11 = vadd.f32 %v2679_v8, %v2974_v35  ;;  %v806_v12 = vpop.f32.mrb[31].mxu0 }
 0x121   : > { %v1164_v13 = vpack.c.bf16 %v1113_v6, %v1112_v5  ;;  %v981_v14 = vmul.f32 %v2979_v37, %v804_v7  ;;  %v807_v15 = vadd.f32 %v2974_v35, %v806_v12 }
 0x122   : > { %v1054_v16 = vadd.f32 %v2985_v40, %v983_v10  ;;  %v984_v17 = vmul.f32 %v2979_v37, %v815_v11 }
 0x123   : > { %v1052_v18 = vadd.f32 %v2985_v40, %v981_v14  ;;  %v982_v19 = vmul.f32 %v2979_v37, %v807_v15  ;;  %2740 = vmatprep.mubr.msk.bf16.mxu1 %vm1207_vm1, %v1164_v13 }
 0x124   : > { %v1055_v20 = vadd.f32 %v2985_v40, %v984_v17  ;;  %2741 = vmatmul.mubr.msk.bf16.gmra.mrb[24].mxu1 %vm1207_vm1, %v1165_v9  ;;  %v1118_v23 = vmax.f32 %v1054_v16, 0.0 }
 0x125   : > { %v1053_v21 = vadd.f32 %v2985_v40, %v982_v19  ;;  %v2682_v22 = vpop.f32.mrb[32].mxu0  ;;  %v1116_v27 = vmax.f32 %v1052_v18, 0.0 }
 0x126   : > { %v1119_v24 = vmax.f32 %v1055_v20, 0.0  ;;  %v828_v25 = vadd.f32 %v2682_v22, %v2974_v35  ;;  %v819_v26 = vpop.f32.mrb[33].mxu0 }
 0x127   : > { %v1117_v28 = vmax.f32 %v1053_v21, 0.0  ;;  %v820_v29 = vadd.f32 %v2974_v35, %v819_v26  ;;  %v2683_v30 = vpop.f32.mrb[34].mxu0 }
 0x128   : > { %v1167_v31 = vpack.c.bf16 %v1119_v24, %v1118_v23  ;;  %v987_v32 = vmul.f32 %v2979_v37, %v828_v25  ;;  %v831_v33 = vadd.f32 %v2683_v30, %v2974_v35  ;;  %v822_v34 = vpop.f32.mrb[35].mxu0 }
 0x129   : > { %v1166_v36 = vpack.c.bf16 %v1117_v28, %v1116_v27  ;;  %v985_v38 = vmul.f32 %v2979_v37, %v820_v29  ;;  %v823_v39 = vadd.f32 %v2974_v35, %v822_v34 }
 0x12a   : > { %v1058_v41 = vadd.f32 %v2985_v40, %v987_v32  ;;  %v988_v42 = vmul.f32 %v2979_v37, %v831_v33 }
 0x12b   : > { %v1056_v43 = vadd.f32 %v2985_v40, %v985_v38  ;;  %v986_v44 = vmul.f32 %v2979_v37, %v823_v39  ;;  %2744 = vmatprep.mubr.msk.bf16.mxu1 %vm1207_vm1, %v1166_v36 }
 0x12c   : > { %v1059_v45 = vadd.f32 %v2985_v40, %v988_v42  ;;  %2745 = vmatmul.mubr.msk.bf16.gmra.mrb[28].mxu1 %vm1207_vm1, %v1167_v31  ;;  %v1122_v48 = vmax.f32 %v1058_v41, 0.0 }
 0x12d   : > { %v1057_v46 = vadd.f32 %v2985_v40, %v986_v44  ;;  %v2686_v47 = vpop.f32.mrb[36].mxu0  ;;  %v1120_v52 = vmax.f32 %v1056_v43, 0.0 }
 0x12e   : > { %v1123_v49 = vmax.f32 %v1059_v45, 0.0  ;;  %v844_v50 = vadd.f32 %v2686_v47, %v2974_v35  ;;  %v835_v51 = vpop.f32.mrb[37].mxu0 }
 0x12f   : > { %v1121_v53 = vmax.f32 %v1057_v46, 0.0  ;;  %v836_v54 = vadd.f32 %v2974_v35, %v835_v51  ;;  %v2687_v55 = vpop.f32.mrb[38].mxu0 }
 0x130   : > { %v1169_v56 = vpack.c.bf16 %v1123_v49, %v1122_v48  ;;  %v991_v57 = vmul.f32 %v2979_v37, %v844_v50  ;;  %v847_v58 = vadd.f32 %v2687_v55, %v2974_v35  ;;  %v838_v59 = vpop.f32.mrb[39].mxu0 }
 0x131   : > { %v1168_v60 = vpack.c.bf16 %v1121_v53, %v1120_v52  ;;  %v989_v61 = vmul.f32 %v2979_v37, %v836_v54  ;;  %v839_v62 = vadd.f32 %v2974_v35, %v838_v59 }
 0x132   : > { %v1062_v63 = vadd.f32 %v2985_v40, %v991_v57  ;;  %v992_v0 = vmul.f32 %v2979_v37, %v847_v58 }
 0x133   : > { %v1060_v1 = vadd.f32 %v2985_v40, %v989_v61  ;;  %v990_v2 = vmul.f32 %v2979_v37, %v839_v62  ;;  %2748 = vmatprep.mubr.msk.bf16.mxu1 %vm1207_vm1, %v1168_v60 }
 0x134   : > { %v1063_v3 = vadd.f32 %v2985_v40, %v992_v0  ;;  %2749 = vmatmul.mubr.msk.bf16.gmra.mrb[32].mxu1 %vm1207_vm1, %v1169_v56  ;;  %v1126_v6 = vmax.f32 %v1062_v63, 0.0 }
 0x135   : > { %v1061_v4 = vadd.f32 %v2985_v40, %v990_v2  ;;  %v2690_v5 = vpop.f32.mrb[40].mxu0  ;;  %v1124_v10 = vmax.f32 %v1060_v1, 0.0 }
 0x136   : > { %v1127_v7 = vmax.f32 %v1063_v3, 0.0  ;;  %v860_v8 = vadd.f32 %v2690_v5, %v2974_v35  ;;  %v851_v9 = vpop.f32.mrb[41].mxu0 }
 0x137   : > { %v1125_v11 = vmax.f32 %v1061_v4, 0.0  ;;  %v852_v12 = vadd.f32 %v2974_v35, %v851_v9  ;;  %v2691_v13 = vpop.f32.mrb[42].mxu0 }
 0x138   : > { %v1171_v14 = vpack.c.bf16 %v1127_v7, %v1126_v6  ;;  %v995_v15 = vmul.f32 %v2979_v37, %v860_v8  ;;  %v863_v16 = vadd.f32 %v2691_v13, %v2974_v35  ;;  %v854_v17 = vpop.f32.mrb[43].mxu0 }
 0x139   : > { %v1170_v18 = vpack.c.bf16 %v1125_v11, %v1124_v10  ;;  %v993_v19 = vmul.f32 %v2979_v37, %v852_v12  ;;  %v855_v20 = vadd.f32 %v2974_v35, %v854_v17 }
 0x13a   : > { %v1066_v21 = vadd.f32 %v2985_v40, %v995_v15  ;;  %v996_v22 = vmul.f32 %v2979_v37, %v863_v16 }
 0x13b   : > { %v1064_v23 = vadd.f32 %v2985_v40, %v993_v19  ;;  %v994_v24 = vmul.f32 %v2979_v37, %v855_v20  ;;  %2752 = vmatprep.mubr.msk.bf16.mxu1 %vm1207_vm1, %v1170_v18 }
 0x13c   : > { %v1067_v25 = vadd.f32 %v2985_v40, %v996_v22  ;;  %2753 = vmatmul.mubr.msk.bf16.gmra.mrb[36].mxu1 %vm1207_vm1, %v1171_v14  ;;  %v1130_v28 = vmax.f32 %v1066_v21, 0.0 }
 0x13d   : > { %v1065_v26 = vadd.f32 %v2985_v40, %v994_v24  ;;  %v2694_v27 = vpop.f32.mrb[44].mxu0  ;;  %v1128_v32 = vmax.f32 %v1064_v23, 0.0 }
 0x13e   : > { %v1131_v29 = vmax.f32 %v1067_v25, 0.0  ;;  %v876_v30 = vadd.f32 %v2694_v27, %v2974_v35  ;;  %v867_v31 = vpop.f32.mrb[45].mxu0 }
 0x13f   : > { %v1129_v33 = vmax.f32 %v1065_v26, 0.0  ;;  %v868_v34 = vadd.f32 %v2974_v35, %v867_v31  ;;  %v2695_v36 = vpop.f32.mrb[46].mxu0 }
 0x140   : > { %v1173_v38 = vpack.c.bf16 %v1131_v29, %v1130_v28  ;;  %v999_v39 = vmul.f32 %v2979_v37, %v876_v30  ;;  %v879_v41 = vadd.f32 %v2695_v36, %v2974_v35  ;;  %v870_v42 = vpop.f32.mrb[47].mxu0 }
 0x141   : > { %v1172_v43 = vpack.c.bf16 %v1129_v33, %v1128_v32  ;;  %v997_v44 = vmul.f32 %v2979_v37, %v868_v34  ;;  %v871_v45 = vadd.f32 %v2974_v35, %v870_v42 }
 0x142   : > { %v1070_v46 = vadd.f32 %v2985_v40, %v999_v39  ;;  %v1000_v47 = vmul.f32 %v2979_v37, %v879_v41 }
 0x143   : > { %v1068_v48 = vadd.f32 %v2985_v40, %v997_v44  ;;  %v998_v49 = vmul.f32 %v2979_v37, %v871_v45  ;;  %2756 = vmatprep.mubr.msk.bf16.mxu1 %vm1207_vm1, %v1172_v43 }
 0x144   : > { %v1071_v50 = vadd.f32 %v2985_v40, %v1000_v47  ;;  %2757 = vmatmul.mubr.msk.bf16.gmra.mrb[40].mxu1 %vm1207_vm1, %v1173_v38  ;;  %v1134_v53 = vmax.f32 %v1070_v46, 0.0 }
 0x145   : > { %v1069_v51 = vadd.f32 %v2985_v40, %v998_v49  ;;  %v2698_v52 = vpop.f32.mrb[48].mxu0  ;;  %v1132_v57 = vmax.f32 %v1068_v48, 0.0 }
 0x146   : > { %v1135_v54 = vmax.f32 %v1071_v50, 0.0  ;;  %v892_v55 = vadd.f32 %v2698_v52, %v2974_v35  ;;  %v883_v56 = vpop.f32.mrb[49].mxu0 }
 0x147   : > { %v1133_v58 = vmax.f32 %v1069_v51, 0.0  ;;  %v884_v59 = vadd.f32 %v2974_v35, %v883_v56  ;;  %v2699_v60 = vpop.f32.mrb[50].mxu0 }
 0x148   : > { %v1175_v61 = vpack.c.bf16 %v1135_v54, %v1134_v53  ;;  %v1003_v62 = vmul.f32 %v2979_v37, %v892_v55  ;;  %v895_v63 = vadd.f32 %v2699_v60, %v2974_v35  ;;  %v886_v0 = vpop.f32.mrb[51].mxu0 }
 0x149   : > { %v1174_v1 = vpack.c.bf16 %v1133_v58, %v1132_v57  ;;  %v1001_v2 = vmul.f32 %v2979_v37, %v884_v59  ;;  %v887_v3 = vadd.f32 %v2974_v35, %v886_v0 }
 0x14a   : > { %v1074_v4 = vadd.f32 %v2985_v40, %v1003_v62  ;;  %v1004_v5 = vmul.f32 %v2979_v37, %v895_v63 }
 0x14b   : > { %v1072_v6 = vadd.f32 %v2985_v40, %v1001_v2  ;;  %v1002_v7 = vmul.f32 %v2979_v37, %v887_v3  ;;  %2760 = vmatprep.mubr.msk.bf16.mxu1 %vm1207_vm1, %v1174_v1 }
 0x14c   : > { %v1075_v8 = vadd.f32 %v2985_v40, %v1004_v5  ;;  %2761 = vmatmul.mubr.msk.bf16.gmra.mrb[44].mxu1 %vm1207_vm1, %v1175_v61  ;;  %v1138_v11 = vmax.f32 %v1074_v4, 0.0 }
 0x14d   : > { %v1073_v9 = vadd.f32 %v2985_v40, %v1002_v7  ;;  %v2702_v10 = vpop.f32.mrb[52].mxu0  ;;  %v1136_v15 = vmax.f32 %v1072_v6, 0.0 }
 0x14e   : > { %v1139_v12 = vmax.f32 %v1075_v8, 0.0  ;;  %v908_v13 = vadd.f32 %v2702_v10, %v2974_v35  ;;  %v899_v14 = vpop.f32.mrb[53].mxu0 }
 0x14f   : > { %v1137_v16 = vmax.f32 %v1073_v9, 0.0  ;;  %v900_v17 = vadd.f32 %v2974_v35, %v899_v14  ;;  %v2703_v18 = vpop.f32.mrb[54].mxu0 }
 0x150   : > { %v1177_v19 = vpack.c.bf16 %v1139_v12, %v1138_v11  ;;  %v1007_v20 = vmul.f32 %v2979_v37, %v908_v13  ;;  %v911_v21 = vadd.f32 %v2703_v18, %v2974_v35  ;;  %v902_v22 = vpop.f32.mrb[55].mxu0 }
 0x151   : > { %v1176_v23 = vpack.c.bf16 %v1137_v16, %v1136_v15  ;;  %v1005_v24 = vmul.f32 %v2979_v37, %v900_v17  ;;  %v903_v25 = vadd.f32 %v2974_v35, %v902_v22 }
 0x152   : > { %v1078_v26 = vadd.f32 %v2985_v40, %v1007_v20  ;;  %v1008_v27 = vmul.f32 %v2979_v37, %v911_v21 }
 0x153   : > { %v1076_v28 = vadd.f32 %v2985_v40, %v1005_v24  ;;  %v1006_v29 = vmul.f32 %v2979_v37, %v903_v25  ;;  %2764 = vmatprep.mubr.msk.bf16.mxu1 %vm1207_vm1, %v1176_v23 }
 0x154   : > { %v1079_v30 = vadd.f32 %v2985_v40, %v1008_v27  ;;  %2765 = vmatmul.mubr.msk.bf16.gmra.mrb[48].mxu1 %vm1207_vm1, %v1177_v19  ;;  %v1142_v33 = vmax.f32 %v1078_v26, 0.0 }
 0x155   : > { %v1077_v31 = vadd.f32 %v2985_v40, %v1006_v29  ;;  %v2706_v32 = vpop.f32.mrb[56].mxu0  ;;  %v1140_v39 = vmax.f32 %v1076_v28, 0.0 }
 0x156   : > { %v1143_v34 = vmax.f32 %v1079_v30, 0.0  ;;  %v924_v36 = vadd.f32 %v2706_v32, %v2974_v35  ;;  %v915_v38 = vpop.f32.mrb[57].mxu0 }
 0x157   : > { %v1141_v41 = vmax.f32 %v1077_v31, 0.0  ;;  %v916_v42 = vadd.f32 %v2974_v35, %v915_v38  ;;  %v2707_v43 = vpop.f32.mrb[58].mxu0 }
 0x158   : > { %v1179_v44 = vpack.c.bf16 %v1143_v34, %v1142_v33  ;;  %v1011_v45 = vmul.f32 %v2979_v37, %v924_v36  ;;  %v927_v46 = vadd.f32 %v2707_v43, %v2974_v35  ;;  %v918_v47 = vpop.f32.mrb[59].mxu0 }
 0x159   : > { %v1178_v48 = vpack.c.bf16 %v1141_v41, %v1140_v39  ;;  %v1009_v49 = vmul.f32 %v2979_v37, %v916_v42  ;;  %v919_v50 = vadd.f32 %v2974_v35, %v918_v47 }
 0x15a   : > { %v1082_v51 = vadd.f32 %v2985_v40, %v1011_v45  ;;  %v1012_v52 = vmul.f32 %v2979_v37, %v927_v46 }
 0x15b   : > { %v1080_v53 = vadd.f32 %v2985_v40, %v1009_v49  ;;  %v1010_v54 = vmul.f32 %v2979_v37, %v919_v50  ;;  %2768 = vmatprep.mubr.msk.bf16.mxu1 %vm1207_vm1, %v1178_v48 }
 0x15c   : > { %v1083_v55 = vadd.f32 %v2985_v40, %v1012_v52  ;;  %2769 = vmatmul.mubr.msk.bf16.gmra.mrb[52].mxu1 %vm1207_vm1, %v1179_v44  ;;  %v1146_v58 = vmax.f32 %v1082_v51, 0.0 }
 0x15d   : > { %v1081_v56 = vadd.f32 %v2985_v40, %v1010_v54  ;;  %v2710_v57 = vpop.f32.mrb[60].mxu0  ;;  %v1144_v62 = vmax.f32 %v1080_v53, 0.0 }
 0x15e   : > { %v1147_v59 = vmax.f32 %v1083_v55, 0.0  ;;  %v940_v60 = vadd.f32 %v2710_v57, %v2974_v35  ;;  %v931_v61 = vpop.f32.mrb[61].mxu0 }
 0x15f   : > { %v1145_v63 = vmax.f32 %v1081_v56, 0.0  ;;  %v932_v0 = vadd.f32 %v2974_v35, %v931_v61  ;;  %v2711_v1 = vpop.f32.mrb[62].mxu0 }
 0x160   : > { %v1181_v2 = vpack.c.bf16 %v1147_v59, %v1146_v58  ;;  %v1015_v3 = vmul.f32 %v2979_v37, %v940_v60  ;;  %v943_v4 = vadd.f32 %v2711_v1, %v2974_v35  ;;  %v934_v5 = vpop.f32.mrb[63].mxu0 }
 0x161   : > { %v1180_v6 = vpack.c.bf16 %v1145_v63, %v1144_v62  ;;  %v1013_v7 = vmul.f32 %v2979_v37, %v932_v0  ;;  %v935_v8 = vadd.f32 %v2974_v35, %v934_v5 }
 0x162   : > { %v1086_v9 = vadd.f32 %v2985_v40, %v1015_v3  ;;  %v1016_v10 = vmul.f32 %v2979_v37, %v943_v4 }
 0x163   : > { %v1084_v11 = vadd.f32 %v2985_v40, %v1013_v7  ;;  %v1014_v12 = vmul.f32 %v2979_v37, %v935_v8  ;;  %2772 = vmatprep.mubr.msk.bf16.mxu1 %vm1207_vm1, %v1180_v6  ;;  %v3213_v37 = vld [vmem:[%s3553_s6] ss:$0 sm:$0xff] }
 0x164   : > { %v1087_v13 = vadd.f32 %v2985_v40, %v1016_v10  ;;  %2773 = vmatmul.mubr.msk.bf16.gmra.mrb[56].mxu1 %vm1207_vm1, %v1181_v2  ;;  %v1150_v15 = vmax.f32 %v1086_v9, 0.0 }
 0x165   : > { %v1085_v14 = vadd.f32 %v2985_v40, %v1014_v12  ;;  %v1148_v35 = vmax.f32 %v1084_v11, 0.0 }
 0x166   : > { %v1151_v16 = vmax.f32 %v1087_v13, 0.0 }
 0x167   : > { %v1149_v17 = vmax.f32 %v1085_v14, 0.0 }
 0x168   : > { %v1183_v18 = vpack.c.bf16 %v1151_v16, %v1150_v15 }
 0x169   : > { %v1182_v19 = vpack.c.bf16 %v1149_v17, %v1148_v35 }
 0x16b   : > { %2776 = vmatprep.mubr.msk.bf16.mxu1 %vm1207_vm1, %v1182_v19 }
 0x16c   : > { %2777 = vmatmul.mubr.msk.bf16.gmra.mrb[60].mxu1 %vm1207_vm1, %v1183_v18 }
 0x1c7   : > { %v2718_v20 = vpop.f32.mrb[0].mxu1 }
 0x1c8   : > { %v1347_v21 = vadd.f32 %v2718_v20, %v3213_v37  ;;  %v1338_v22 = vpop.f32.mrb[1].mxu1 }
 0x1c9   : > { %v1339_v40 = vadd.f32 %v3213_v37, %v1338_v22  ;;  %v2719_v23 = vpop.f32.mrb[2].mxu1 }
 0x1ca   : > { %v2517_v24 = vpack.c.bf16 %v1347_v21, %v1347_v21  ;;  %v1350_v25 = vadd.f32 %v2719_v23, %v3213_v37  ;;  %v1341_v26 = vpop.f32.mrb[3].mxu1  ;;  %v2050_v30 = vmul.f32 %v1347_v21, %v1347_v21  ;;  %v1918_v41 = vsel %vm1914_vm3, %v1347_v21, 0.0 }
 0x1cb   : > { %v2515_v27 = vpack.c.bf16 %v1339_v40, %v1339_v40  ;;  %v2048_v28 = vmul.f32 %v1339_v40, %v1339_v40  ;;  %v1342_v29 = vadd.f32 %v3213_v37, %v1341_v26  ;;  %v1915_v32 = vsel %vm1914_vm3, %v1339_v40, 0.0 }
 0x1cc   : > { %1852 = vst.msk [vmem:[%s3221_s30 + $0x8] sm:$0xf] %vm1849_vm2, %v2517_v24  ;;  %v2518_v31 = vpack.c.bf16 %v1350_v25, %v1350_v25  ;;  %v2051_v38 = vmul.f32 %v1350_v25, %v1350_v25  ;;  %v2115_v49 = vsel %vm1914_vm3, %v2050_v30, 0.0  ;;  %v1920_v52 = vsel %vm1914_vm3, %v1350_v25, 0.0 }
 0x1cd   : > { %1850 = vst.msk [vmem:[%s3221_s30] sm:$0xf] %vm1849_vm2, %v2515_v27  ;;  %v2516_v33 = vpack.c.bf16 %v1342_v29, %v1342_v29  ;;  %v1916_v34 = vsel %vm1914_vm3, %v1342_v29, 0.0  ;;  %v2049_v36 = vmul.f32 %v1342_v29, %v1342_v29  ;;  %v2112_v42 = vsel %vm1914_vm3, %v2048_v28, 0.0 }
 0x1ce   : > { %1853 = vst.msk [vmem:[%s3221_s30 + $0xc] sm:$0xf] %vm1849_vm2, %v2518_v31  ;;  %v1917_v39 = vadd.f32 %v1916_v34, %v1915_v32  ;;  %v2117_v53 = vsel %vm1914_vm3, %v2051_v38, 0.0 }
 0x1cf   : > { %1851 = vst.msk [vmem:[%s3221_s30 + $0x4] sm:$0xf] %vm1849_vm2, %v2516_v33  ;;  %v2113_v43 = vsel %vm1914_vm3, %v2049_v36, 0.0  ;;  %v2722_v44 = vpop.f32.mrb[4].mxu1 }
 0x1d0   : > { %v1919_v45 = vadd.f32 %v1918_v41, %v1917_v39  ;;  %v2114_v46 = vadd.f32 %v2113_v43, %v2112_v42  ;;  %v1363_v47 = vadd.f32 %v2722_v44, %v3213_v37  ;;  %v1354_v48 = vpop.f32.mrb[5].mxu1 }
 0x1d1   : > { %v1355_v50 = vadd.f32 %v3213_v37, %v1354_v48  ;;  %v2723_v51 = vpop.f32.mrb[6].mxu1 }
 0x1d2   : > { %v2116_v54 = vadd.f32 %v2115_v49, %v2114_v46  ;;  %v2521_v55 = vpack.c.bf16 %v1363_v47, %v1363_v47  ;;  %v1357_v56 = vpop.f32.mrb[7].mxu1  ;;  %v1921_v58 = vadd.f32 %v1920_v52, %v1919_v45  ;;  %v1366_v62 = vadd.f32 %v2723_v51, %v3213_v37 }
 0x1d3   : > { %v2519_v57 = vpack.c.bf16 %v1355_v50, %v1355_v50  ;;  %v1922_v59 = vsel %vm1914_vm3, %v1355_v50, 0.0  ;;  %v2052_v60 = vmul.f32 %v1355_v50, %v1355_v50  ;;  %v1358_v63 = vadd.f32 %v3213_v37, %v1357_v56 }
 0x1d4   : > { %1856 = vst.msk [vmem:[%s3221_s30 + $0x18] sm:$0xf] %vm1849_vm2, %v2521_v55  ;;  %v2118_v61 = vadd.f32 %v2117_v53, %v2116_v54  ;;  %v1923_v0 = vadd.f32 %v1922_v59, %v1921_v58  ;;  %v2054_v2 = vmul.f32 %v1363_v47, %v1363_v47  ;;  %v2522_v4 = vpack.c.bf16 %v1366_v62, %v1366_v62 }
 0x1d5   : > { %1854 = vst.msk [vmem:[%s3221_s30 + $0x10] sm:$0xf] %vm1849_vm2, %v2519_v57  ;;  %v2119_v1 = vsel %vm1914_vm3, %v2052_v60, 0.0  ;;  %v2520_v5 = vpack.c.bf16 %v1358_v63, %v1358_v63  ;;  %v1924_v6 = vsel %vm1914_vm3, %v1358_v63, 0.0  ;;  %v2053_v7 = vmul.f32 %v1358_v63, %v1358_v63 }
 0x1d6   : > { %v2120_v3 = vadd.f32 %v2119_v1, %v2118_v61  ;;  %1857 = vst.msk [vmem:[%s3221_s30 + $0x1c] sm:$0xf] %vm1849_vm2, %v2522_v4  ;;  %v1925_v9 = vadd.f32 %v1924_v6, %v1923_v0  ;;  %v1926_v12 = vsel %vm1914_vm3, %v1363_v47, 0.0  ;;  %v2055_v13 = vmul.f32 %v1366_v62, %v1366_v62 }
 0x1d7   : > { %v2726_v8 = vpop.f32.mrb[8].mxu1  ;;  %1855 = vst.msk [vmem:[%s3221_s30 + $0x14] sm:$0xf] %vm1849_vm2, %v2520_v5  ;;  %v2121_v14 = vsel %vm1914_vm3, %v2053_v7, 0.0  ;;  %v2123_v35 = vsel %vm1914_vm3, %v2054_v2, 0.0  ;;  %v1928_v21 = vsel %vm1914_vm3, %v1366_v62, 0.0 }
 0x1d8   : > { %v1379_v10 = vadd.f32 %v2726_v8, %v3213_v37  ;;  %v1370_v11 = vpop.f32.mrb[9].mxu1  ;;  %v1927_v17 = vadd.f32 %v1926_v12, %v1925_v9  ;;  %v2122_v18 = vadd.f32 %v2121_v14, %v2120_v3  ;;  %v2125_v28 = vsel %vm1914_vm3, %v2055_v13, 0.0 }
 0x1d9   : > { %v1371_v15 = vadd.f32 %v3213_v37, %v1370_v11  ;;  %v2727_v16 = vpop.f32.mrb[10].mxu1 }
 0x1da   : > { %v2525_v19 = vpack.c.bf16 %v1379_v10, %v1379_v10  ;;  %v1373_v20 = vpop.f32.mrb[11].mxu1  ;;  %v2124_v24 = vadd.f32 %v2123_v35, %v2122_v18  ;;  %v1929_v25 = vadd.f32 %v1928_v21, %v1927_v17  ;;  %v1382_v26 = vadd.f32 %v2727_v16, %v3213_v37 }
 0x1db   : > { %v2523_v22 = vpack.c.bf16 %v1371_v15, %v1371_v15  ;;  %v1930_v40 = vsel %vm1914_vm3, %v1371_v15, 0.0  ;;  %v2056_v23 = vmul.f32 %v1371_v15, %v1371_v15  ;;  %v1374_v27 = vadd.f32 %v3213_v37, %v1373_v20 }
 0x1dc   : > { %1860 = vst.msk [vmem:[%s3221_s30 + $0x28] sm:$0xf] %vm1849_vm2, %v2525_v19  ;;  %v2058_v30 = vmul.f32 %v1379_v10, %v1379_v10  ;;  %v1931_v31 = vadd.f32 %v1930_v40, %v1929_v25  ;;  %v2126_v32 = vadd.f32 %v2125_v28, %v2124_v24  ;;  %v2526_v33 = vpack.c.bf16 %v1382_v26, %v1382_v26 }
 0x1dd   : > { %1858 = vst.msk [vmem:[%s3221_s30 + $0x20] sm:$0xf] %vm1849_vm2, %v2523_v22  ;;  %v2127_v29 = vsel %vm1914_vm3, %v2056_v23, 0.0  ;;  %v2524_v34 = vpack.c.bf16 %v1374_v27, %v1374_v27  ;;  %v1932_v36 = vsel %vm1914_vm3, %v1374_v27, 0.0  ;;  %v2057_v38 = vmul.f32 %v1374_v27, %v1374_v27 }
 0x1de   : > { %v2128_v41 = vadd.f32 %v2127_v29, %v2126_v32  ;;  %1861 = vst.msk [vmem:[%s3221_s30 + $0x2c] sm:$0xf] %vm1849_vm2, %v2526_v33  ;;  %v1933_v42 = vadd.f32 %v1932_v36, %v1931_v31  ;;  %v1934_v45 = vsel %vm1914_vm3, %v1379_v10, 0.0  ;;  %v2059_v46 = vmul.f32 %v1382_v26, %v1382_v26 }
 0x1df   : > { %v2730_v39 = vpop.f32.mrb[12].mxu1  ;;  %1859 = vst.msk [vmem:[%s3221_s30 + $0x24] sm:$0xf] %vm1849_vm2, %v2524_v34  ;;  %v2129_v47 = vsel %vm1914_vm3, %v2057_v38, 0.0  ;;  %v2131_v50 = vsel %vm1914_vm3, %v2058_v30, 0.0  ;;  %v1936_v55 = vsel %vm1914_vm3, %v1382_v26, 0.0 }
 0x1e0   : > { %v1395_v43 = vadd.f32 %v2730_v39, %v3213_v37  ;;  %v1386_v44 = vpop.f32.mrb[13].mxu1  ;;  %v1935_v51 = vadd.f32 %v1934_v45, %v1933_v42  ;;  %v2130_v52 = vadd.f32 %v2129_v47, %v2128_v41  ;;  %v2133_v63 = vsel %vm1914_vm3, %v2059_v46, 0.0 }
 0x1e1   : > { %v1387_v48 = vadd.f32 %v3213_v37, %v1386_v44  ;;  %v2731_v49 = vpop.f32.mrb[14].mxu1 }
 0x1e2   : > { %v2529_v53 = vpack.c.bf16 %v1395_v43, %v1395_v43  ;;  %v1389_v54 = vpop.f32.mrb[15].mxu1  ;;  %v2132_v59 = vadd.f32 %v2131_v50, %v2130_v52  ;;  %v1937_v60 = vadd.f32 %v1936_v55, %v1935_v51  ;;  %v1398_v61 = vadd.f32 %v2731_v49, %v3213_v37 }
 0x1e3   : > { %v2527_v56 = vpack.c.bf16 %v1387_v48, %v1387_v48  ;;  %v1938_v57 = vsel %vm1914_vm3, %v1387_v48, 0.0  ;;  %v2060_v58 = vmul.f32 %v1387_v48, %v1387_v48  ;;  %v1390_v62 = vadd.f32 %v3213_v37, %v1389_v54 }
 0x1e4   : > { %1864 = vst.msk [vmem:[%s3221_s30 + $0x38] sm:$0xf] %vm1849_vm2, %v2529_v53  ;;  %v2062_v1 = vmul.f32 %v1395_v43, %v1395_v43  ;;  %v1939_v2 = vadd.f32 %v1938_v57, %v1937_v60  ;;  %v2134_v3 = vadd.f32 %v2133_v63, %v2132_v59  ;;  %v2530_v4 = vpack.c.bf16 %v1398_v61, %v1398_v61 }
 0x1e5   : > { %1862 = vst.msk [vmem:[%s3221_s30 + $0x30] sm:$0xf] %vm1849_vm2, %v2527_v56  ;;  %v2135_v0 = vsel %vm1914_vm3, %v2060_v58, 0.0  ;;  %v2528_v5 = vpack.c.bf16 %v1390_v62, %v1390_v62  ;;  %v1940_v6 = vsel %vm1914_vm3, %v1390_v62, 0.0  ;;  %v2061_v7 = vmul.f32 %v1390_v62, %v1390_v62 }
 0x1e6   : > { %v2136_v9 = vadd.f32 %v2135_v0, %v2134_v3  ;;  %1865 = vst.msk [vmem:[%s3221_s30 + $0x3c] sm:$0xf] %vm1849_vm2, %v2530_v4  ;;  %v1941_v10 = vadd.f32 %v1940_v6, %v1939_v2  ;;  %v1942_v13 = vsel %vm1914_vm3, %v1395_v43, 0.0  ;;  %v2063_v14 = vmul.f32 %v1398_v61, %v1398_v61 }
 0x1e7   : > { %v2734_v8 = vpop.f32.mrb[16].mxu1  ;;  %1863 = vst.msk [vmem:[%s3221_s30 + $0x34] sm:$0xf] %vm1849_vm2, %v2528_v5  ;;  %v2137_v15 = vsel %vm1914_vm3, %v2061_v7, 0.0  ;;  %v2139_v17 = vsel %vm1914_vm3, %v2062_v1, 0.0  ;;  %v1944_v22 = vsel %vm1914_vm3, %v1398_v61, 0.0 }
 0x1e8   : > { %v1411_v11 = vadd.f32 %v2734_v8, %v3213_v37  ;;  %v1402_v12 = vpop.f32.mrb[17].mxu1  ;;  %v1943_v18 = vadd.f32 %v1942_v13, %v1941_v10  ;;  %v2138_v19 = vadd.f32 %v2137_v15, %v2136_v9  ;;  %v2141_v29 = vsel %vm1914_vm3, %v2063_v14, 0.0 }
 0x1e9   : > { %v1403_v16 = vadd.f32 %v3213_v37, %v1402_v12  ;;  %v2735_v35 = vpop.f32.mrb[18].mxu1 }
 0x1ea   : > { %v2533_v20 = vpack.c.bf16 %v1411_v11, %v1411_v11  ;;  %v1405_v21 = vpop.f32.mrb[19].mxu1  ;;  %v2140_v25 = vadd.f32 %v2139_v17, %v2138_v19  ;;  %v1945_v26 = vadd.f32 %v1944_v22, %v1943_v18  ;;  %v1414_v27 = vadd.f32 %v2735_v35, %v3213_v37 }
 0x1eb   : > { %v2531_v40 = vpack.c.bf16 %v1403_v16, %v1403_v16  ;;  %v1946_v23 = vsel %vm1914_vm3, %v1403_v16, 0.0  ;;  %v2064_v24 = vmul.f32 %v1403_v16, %v1403_v16  ;;  %v1406_v28 = vadd.f32 %v3213_v37, %v1405_v21 }
 0x1ec   : > { %1868 = vst.msk [vmem:[%s3221_s30 + $0x48] sm:$0xf] %vm1849_vm2, %v2533_v20  ;;  %v2066_v31 = vmul.f32 %v1411_v11, %v1411_v11  ;;  %v1947_v32 = vadd.f32 %v1946_v23, %v1945_v26  ;;  %v2142_v33 = vadd.f32 %v2141_v29, %v2140_v25  ;;  %v2534_v34 = vpack.c.bf16 %v1414_v27, %v1414_v27 }
 0x1ed   : > { %1866 = vst.msk [vmem:[%s3221_s30 + $0x40] sm:$0xf] %vm1849_vm2, %v2531_v40  ;;  %v2143_v30 = vsel %vm1914_vm3, %v2064_v24, 0.0  ;;  %v2532_v36 = vpack.c.bf16 %v1406_v28, %v1406_v28  ;;  %v1948_v38 = vsel %vm1914_vm3, %v1406_v28, 0.0  ;;  %v2065_v39 = vmul.f32 %v1406_v28, %v1406_v28 }
 0x1ee   : > { %v2144_v42 = vadd.f32 %v2143_v30, %v2142_v33  ;;  %1869 = vst.msk [vmem:[%s3221_s30 + $0x4c] sm:$0xf] %vm1849_vm2, %v2534_v34  ;;  %v1949_v43 = vadd.f32 %v1948_v38, %v1947_v32  ;;  %v1950_v46 = vsel %vm1914_vm3, %v1411_v11, 0.0  ;;  %v2067_v47 = vmul.f32 %v1414_v27, %v1414_v27 }
 0x1ef   : > { %v2738_v41 = vpop.f32.mrb[20].mxu1  ;;  %1867 = vst.msk [vmem:[%s3221_s30 + $0x44] sm:$0xf] %vm1849_vm2, %v2532_v36  ;;  %v2145_v48 = vsel %vm1914_vm3, %v2065_v39, 0.0  ;;  %v2147_v51 = vsel %vm1914_vm3, %v2066_v31, 0.0  ;;  %v1952_v56 = vsel %vm1914_vm3, %v1414_v27, 0.0 }
 0x1f0   : > { %v1427_v44 = vadd.f32 %v2738_v41, %v3213_v37  ;;  %v1418_v45 = vpop.f32.mrb[21].mxu1  ;;  %v1951_v52 = vadd.f32 %v1950_v46, %v1949_v43  ;;  %v2146_v53 = vadd.f32 %v2145_v48, %v2144_v42  ;;  %v2149_v0 = vsel %vm1914_vm3, %v2067_v47, 0.0 }
 0x1f1   : > { %v1419_v49 = vadd.f32 %v3213_v37, %v1418_v45  ;;  %v2739_v50 = vpop.f32.mrb[22].mxu1 }
 0x1f2   : > { %v2537_v54 = vpack.c.bf16 %v1427_v44, %v1427_v44  ;;  %v1421_v55 = vpop.f32.mrb[23].mxu1  ;;  %v2148_v60 = vadd.f32 %v2147_v51, %v2146_v53  ;;  %v1953_v61 = vadd.f32 %v1952_v56, %v1951_v52  ;;  %v1430_v62 = vadd.f32 %v2739_v50, %v3213_v37 }
 0x1f3   : > { %v2535_v57 = vpack.c.bf16 %v1419_v49, %v1419_v49  ;;  %v1954_v58 = vsel %vm1914_vm3, %v1419_v49, 0.0  ;;  %v2068_v59 = vmul.f32 %v1419_v49, %v1419_v49  ;;  %v1422_v63 = vadd.f32 %v3213_v37, %v1421_v55 }
 0x1f4   : > { %1872 = vst.msk [vmem:[%s3221_s30 + $0x58] sm:$0xf] %vm1849_vm2, %v2537_v54  ;;  %v2070_v2 = vmul.f32 %v1427_v44, %v1427_v44  ;;  %v1955_v3 = vadd.f32 %v1954_v58, %v1953_v61  ;;  %v2150_v4 = vadd.f32 %v2149_v0, %v2148_v60  ;;  %v2538_v5 = vpack.c.bf16 %v1430_v62, %v1430_v62 }
 0x1f5   : > { %1870 = vst.msk [vmem:[%s3221_s30 + $0x50] sm:$0xf] %vm1849_vm2, %v2535_v57  ;;  %v2151_v1 = vsel %vm1914_vm3, %v2068_v59, 0.0  ;;  %v2536_v6 = vpack.c.bf16 %v1422_v63, %v1422_v63  ;;  %v1956_v7 = vsel %vm1914_vm3, %v1422_v63, 0.0  ;;  %v2069_v8 = vmul.f32 %v1422_v63, %v1422_v63 }
 0x1f6   : > { %v2152_v10 = vadd.f32 %v2151_v1, %v2150_v4  ;;  %1873 = vst.msk [vmem:[%s3221_s30 + $0x5c] sm:$0xf] %vm1849_vm2, %v2538_v5  ;;  %v1957_v11 = vadd.f32 %v1956_v7, %v1955_v3  ;;  %v1958_v14 = vsel %vm1914_vm3, %v1427_v44, 0.0  ;;  %v2071_v15 = vmul.f32 %v1430_v62, %v1430_v62 }
 0x1f7   : > { %v2742_v9 = vpop.f32.mrb[24].mxu1  ;;  %1871 = vst.msk [vmem:[%s3221_s30 + $0x54] sm:$0xf] %vm1849_vm2, %v2536_v6  ;;  %v2153_v16 = vsel %vm1914_vm3, %v2069_v8, 0.0  ;;  %v2155_v18 = vsel %vm1914_vm3, %v2070_v2, 0.0  ;;  %v1960_v40 = vsel %vm1914_vm3, %v1430_v62, 0.0 }
 0x1f8   : > { %v1443_v12 = vadd.f32 %v2742_v9, %v3213_v37  ;;  %v1434_v13 = vpop.f32.mrb[25].mxu1  ;;  %v1959_v19 = vadd.f32 %v1958_v14, %v1957_v11  ;;  %v2154_v20 = vadd.f32 %v2153_v16, %v2152_v10  ;;  %v2157_v30 = vsel %vm1914_vm3, %v2071_v15, 0.0 }
 0x1f9   : > { %v1435_v35 = vadd.f32 %v3213_v37, %v1434_v13  ;;  %v2743_v17 = vpop.f32.mrb[26].mxu1 }
 0x1fa   : > { %v2541_v21 = vpack.c.bf16 %v1443_v12, %v1443_v12  ;;  %v1437_v22 = vpop.f32.mrb[27].mxu1  ;;  %v2156_v26 = vadd.f32 %v2155_v18, %v2154_v20  ;;  %v1961_v27 = vadd.f32 %v1960_v40, %v1959_v19  ;;  %v1446_v28 = vadd.f32 %v2743_v17, %v3213_v37 }
 0x1fb   : > { %v2539_v23 = vpack.c.bf16 %v1435_v35, %v1435_v35  ;;  %v1962_v24 = vsel %vm1914_vm3, %v1435_v35, 0.0  ;;  %v2072_v25 = vmul.f32 %v1435_v35, %v1435_v35  ;;  %v1438_v29 = vadd.f32 %v3213_v37, %v1437_v22 }
 0x1fc   : > { %1876 = vst.msk [vmem:[%s3221_s30 + $0x68] sm:$0xf] %vm1849_vm2, %v2541_v21  ;;  %v2074_v32 = vmul.f32 %v1443_v12, %v1443_v12  ;;  %v1963_v33 = vadd.f32 %v1962_v24, %v1961_v27  ;;  %v2158_v34 = vadd.f32 %v2157_v30, %v2156_v26  ;;  %v2542_v36 = vpack.c.bf16 %v1446_v28, %v1446_v28 }
 0x1fd   : > { %1874 = vst.msk [vmem:[%s3221_s30 + $0x60] sm:$0xf] %vm1849_vm2, %v2539_v23  ;;  %v2159_v31 = vsel %vm1914_vm3, %v2072_v25, 0.0  ;;  %v2540_v38 = vpack.c.bf16 %v1438_v29, %v1438_v29  ;;  %v1964_v39 = vsel %vm1914_vm3, %v1438_v29, 0.0  ;;  %v2073_v41 = vmul.f32 %v1438_v29, %v1438_v29 }
 0x1fe   : > { %v2160_v43 = vadd.f32 %v2159_v31, %v2158_v34  ;;  %1877 = vst.msk [vmem:[%s3221_s30 + $0x6c] sm:$0xf] %vm1849_vm2, %v2542_v36  ;;  %v1965_v44 = vadd.f32 %v1964_v39, %v1963_v33  ;;  %v1966_v47 = vsel %vm1914_vm3, %v1443_v12, 0.0  ;;  %v2075_v48 = vmul.f32 %v1446_v28, %v1446_v28 }
 0x1ff   : > { %v2746_v42 = vpop.f32.mrb[28].mxu1  ;;  %1875 = vst.msk [vmem:[%s3221_s30 + $0x64] sm:$0xf] %vm1849_vm2, %v2540_v38  ;;  %v2161_v49 = vsel %vm1914_vm3, %v2073_v41, 0.0  ;;  %v2163_v52 = vsel %vm1914_vm3, %v2074_v32, 0.0  ;;  %v1968_v57 = vsel %vm1914_vm3, %v1446_v28, 0.0 }
 0x200   : > { %v1459_v45 = vadd.f32 %v2746_v42, %v3213_v37  ;;  %v1450_v46 = vpop.f32.mrb[29].mxu1  ;;  %v1967_v53 = vadd.f32 %v1966_v47, %v1965_v44  ;;  %v2162_v54 = vadd.f32 %v2161_v49, %v2160_v43  ;;  %v2165_v1 = vsel %vm1914_vm3, %v2075_v48, 0.0 }
 0x201   : > { %v1451_v50 = vadd.f32 %v3213_v37, %v1450_v46  ;;  %v2747_v51 = vpop.f32.mrb[30].mxu1 }
 0x202   : > { %v2545_v55 = vpack.c.bf16 %v1459_v45, %v1459_v45  ;;  %v1453_v56 = vpop.f32.mrb[31].mxu1  ;;  %v2164_v61 = vadd.f32 %v2163_v52, %v2162_v54  ;;  %v1969_v62 = vadd.f32 %v1968_v57, %v1967_v53  ;;  %v1462_v63 = vadd.f32 %v2747_v51, %v3213_v37 }
 0x203   : > { %v2543_v58 = vpack.c.bf16 %v1451_v50, %v1451_v50  ;;  %v1970_v59 = vsel %vm1914_vm3, %v1451_v50, 0.0  ;;  %v2076_v60 = vmul.f32 %v1451_v50, %v1451_v50  ;;  %v1454_v0 = vadd.f32 %v3213_v37, %v1453_v56 }
 0x204   : > { %1880 = vst.msk [vmem:[%s3221_s30 + $0x78] sm:$0xf] %vm1849_vm2, %v2545_v55  ;;  %v2078_v3 = vmul.f32 %v1459_v45, %v1459_v45  ;;  %v1971_v4 = vadd.f32 %v1970_v59, %v1969_v62  ;;  %v2166_v5 = vadd.f32 %v2165_v1, %v2164_v61  ;;  %v2546_v6 = vpack.c.bf16 %v1462_v63, %v1462_v63 }
 0x205   : > { %1878 = vst.msk [vmem:[%s3221_s30 + $0x70] sm:$0xf] %vm1849_vm2, %v2543_v58  ;;  %v2167_v2 = vsel %vm1914_vm3, %v2076_v60, 0.0  ;;  %v2544_v7 = vpack.c.bf16 %v1454_v0, %v1454_v0  ;;  %v1972_v8 = vsel %vm1914_vm3, %v1454_v0, 0.0  ;;  %v2077_v9 = vmul.f32 %v1454_v0, %v1454_v0 }
 0x206   : > { %v2168_v11 = vadd.f32 %v2167_v2, %v2166_v5  ;;  %1881 = vst.msk [vmem:[%s3221_s30 + $0x7c] sm:$0xf] %vm1849_vm2, %v2546_v6  ;;  %v1973_v12 = vadd.f32 %v1972_v8, %v1971_v4  ;;  %v1974_v15 = vsel %vm1914_vm3, %v1459_v45, 0.0  ;;  %v2079_v16 = vmul.f32 %v1462_v63, %v1462_v63 }
 0x207   : > { %v2750_v10 = vpop.f32.mrb[32].mxu1  ;;  %1879 = vst.msk [vmem:[%s3221_s30 + $0x74] sm:$0xf] %vm1849_vm2, %v2544_v7  ;;  %v2169_v35 = vsel %vm1914_vm3, %v2077_v9, 0.0  ;;  %v2171_v19 = vsel %vm1914_vm3, %v2078_v3, 0.0  ;;  %v1976_v23 = vsel %vm1914_vm3, %v1462_v63, 0.0 }
 0x208   : > { %v1475_v13 = vadd.f32 %v2750_v10, %v3213_v37  ;;  %v1466_v14 = vpop.f32.mrb[33].mxu1  ;;  %v1975_v20 = vadd.f32 %v1974_v15, %v1973_v12  ;;  %v2170_v21 = vadd.f32 %v2169_v35, %v2168_v11  ;;  %v2173_v31 = vsel %vm1914_vm3, %v2079_v16, 0.0 }
 0x209   : > { %v1467_v17 = vadd.f32 %v3213_v37, %v1466_v14  ;;  %v2751_v18 = vpop.f32.mrb[34].mxu1 }
 0x20a   : > { %v2549_v22 = vpack.c.bf16 %v1475_v13, %v1475_v13  ;;  %v1469_v40 = vpop.f32.mrb[35].mxu1  ;;  %v2172_v27 = vadd.f32 %v2171_v19, %v2170_v21  ;;  %v1977_v28 = vadd.f32 %v1976_v23, %v1975_v20  ;;  %v1478_v29 = vadd.f32 %v2751_v18, %v3213_v37 }
 0x20b   : > { %v2547_v24 = vpack.c.bf16 %v1467_v17, %v1467_v17  ;;  %v1978_v25 = vsel %vm1914_vm3, %v1467_v17, 0.0  ;;  %v2080_v26 = vmul.f32 %v1467_v17, %v1467_v17  ;;  %v1470_v30 = vadd.f32 %v3213_v37, %v1469_v40 }
 0x20c   : > { %1884 = vst.msk [vmem:[%s3221_s30 + $0x88] sm:$0xf] %vm1849_vm2, %v2549_v22  ;;  %v2082_v33 = vmul.f32 %v1475_v13, %v1475_v13  ;;  %v1979_v34 = vadd.f32 %v1978_v25, %v1977_v28  ;;  %v2174_v36 = vadd.f32 %v2173_v31, %v2172_v27  ;;  %v2550_v38 = vpack.c.bf16 %v1478_v29, %v1478_v29 }
 0x20d   : > { %1882 = vst.msk [vmem:[%s3221_s30 + $0x80] sm:$0xf] %vm1849_vm2, %v2547_v24  ;;  %v2175_v32 = vsel %vm1914_vm3, %v2080_v26, 0.0  ;;  %v2548_v39 = vpack.c.bf16 %v1470_v30, %v1470_v30  ;;  %v1980_v41 = vsel %vm1914_vm3, %v1470_v30, 0.0  ;;  %v2081_v42 = vmul.f32 %v1470_v30, %v1470_v30 }
 0x20e   : > { %v2176_v44 = vadd.f32 %v2175_v32, %v2174_v36  ;;  %1885 = vst.msk [vmem:[%s3221_s30 + $0x8c] sm:$0xf] %vm1849_vm2, %v2550_v38  ;;  %v1981_v45 = vadd.f32 %v1980_v41, %v1979_v34  ;;  %v1982_v48 = vsel %vm1914_vm3, %v1475_v13, 0.0  ;;  %v2083_v49 = vmul.f32 %v1478_v29, %v1478_v29 }
 0x20f   : > { %v2754_v43 = vpop.f32.mrb[36].mxu1  ;;  %1883 = vst.msk [vmem:[%s3221_s30 + $0x84] sm:$0xf] %vm1849_vm2, %v2548_v39  ;;  %v2177_v50 = vsel %vm1914_vm3, %v2081_v42, 0.0  ;;  %v2179_v53 = vsel %vm1914_vm3, %v2082_v33, 0.0  ;;  %v1984_v58 = vsel %vm1914_vm3, %v1478_v29, 0.0 }
 0x210   : > { %v1491_v46 = vadd.f32 %v2754_v43, %v3213_v37  ;;  %v1482_v47 = vpop.f32.mrb[37].mxu1  ;;  %v1983_v54 = vadd.f32 %v1982_v48, %v1981_v45  ;;  %v2178_v55 = vadd.f32 %v2177_v50, %v2176_v44  ;;  %v2181_v2 = vsel %vm1914_vm3, %v2083_v49, 0.0 }
 0x211   : > { %v1483_v51 = vadd.f32 %v3213_v37, %v1482_v47  ;;  %v2755_v52 = vpop.f32.mrb[38].mxu1 }
 0x212   : > { %v2553_v56 = vpack.c.bf16 %v1491_v46, %v1491_v46  ;;  %v1485_v57 = vpop.f32.mrb[39].mxu1  ;;  %v2180_v62 = vadd.f32 %v2179_v53, %v2178_v55  ;;  %v1985_v63 = vadd.f32 %v1984_v58, %v1983_v54  ;;  %v1494_v0 = vadd.f32 %v2755_v52, %v3213_v37 }
 0x213   : > { %v2551_v59 = vpack.c.bf16 %v1483_v51, %v1483_v51  ;;  %v1986_v60 = vsel %vm1914_vm3, %v1483_v51, 0.0  ;;  %v2084_v61 = vmul.f32 %v1483_v51, %v1483_v51  ;;  %v1486_v1 = vadd.f32 %v3213_v37, %v1485_v57 }
 0x214   : > { %1888 = vst.msk [vmem:[%s3221_s30 + $0x98] sm:$0xf] %vm1849_vm2, %v2553_v56  ;;  %v2086_v4 = vmul.f32 %v1491_v46, %v1491_v46  ;;  %v1987_v5 = vadd.f32 %v1986_v60, %v1985_v63  ;;  %v2182_v6 = vadd.f32 %v2181_v2, %v2180_v62  ;;  %v2554_v7 = vpack.c.bf16 %v1494_v0, %v1494_v0 }
 0x215   : > { %1886 = vst.msk [vmem:[%s3221_s30 + $0x90] sm:$0xf] %vm1849_vm2, %v2551_v59  ;;  %v2183_v3 = vsel %vm1914_vm3, %v2084_v61, 0.0  ;;  %v2552_v8 = vpack.c.bf16 %v1486_v1, %v1486_v1  ;;  %v1988_v9 = vsel %vm1914_vm3, %v1486_v1, 0.0  ;;  %v2085_v10 = vmul.f32 %v1486_v1, %v1486_v1 }
 0x216   : > { %v2184_v12 = vadd.f32 %v2183_v3, %v2182_v6  ;;  %1889 = vst.msk [vmem:[%s3221_s30 + $0x9c] sm:$0xf] %vm1849_vm2, %v2554_v7  ;;  %v1989_v13 = vadd.f32 %v1988_v9, %v1987_v5  ;;  %v1990_v16 = vsel %vm1914_vm3, %v1491_v46, 0.0  ;;  %v2087_v35 = vmul.f32 %v1494_v0, %v1494_v0 }
 0x217   : > { %v2758_v11 = vpop.f32.mrb[40].mxu1  ;;  %1887 = vst.msk [vmem:[%s3221_s30 + $0x94] sm:$0xf] %vm1849_vm2, %v2552_v8  ;;  %v2185_v17 = vsel %vm1914_vm3, %v2085_v10, 0.0  ;;  %v2187_v20 = vsel %vm1914_vm3, %v2086_v4, 0.0  ;;  %v1992_v24 = vsel %vm1914_vm3, %v1494_v0, 0.0 }
 0x218   : > { %v1507_v14 = vadd.f32 %v2758_v11, %v3213_v37  ;;  %v1498_v15 = vpop.f32.mrb[41].mxu1  ;;  %v1991_v21 = vadd.f32 %v1990_v16, %v1989_v13  ;;  %v2186_v22 = vadd.f32 %v2185_v17, %v2184_v12  ;;  %v2189_v32 = vsel %vm1914_vm3, %v2087_v35, 0.0 }
 0x219   : > { %v1499_v18 = vadd.f32 %v3213_v37, %v1498_v15  ;;  %v2759_v19 = vpop.f32.mrb[42].mxu1 }
 0x21a   : > { %v2557_v40 = vpack.c.bf16 %v1507_v14, %v1507_v14  ;;  %v1501_v23 = vpop.f32.mrb[43].mxu1  ;;  %v2188_v28 = vadd.f32 %v2187_v20, %v2186_v22  ;;  %v1993_v29 = vadd.f32 %v1992_v24, %v1991_v21  ;;  %v1510_v30 = vadd.f32 %v2759_v19, %v3213_v37 }
 0x21b   : > { %v2555_v25 = vpack.c.bf16 %v1499_v18, %v1499_v18  ;;  %v1994_v26 = vsel %vm1914_vm3, %v1499_v18, 0.0  ;;  %v2088_v27 = vmul.f32 %v1499_v18, %v1499_v18  ;;  %v1502_v31 = vadd.f32 %v3213_v37, %v1501_v23 }
 0x21c   : > { %1892 = vst.msk [vmem:[%s3221_s30 + $0xa8] sm:$0xf] %vm1849_vm2, %v2557_v40  ;;  %v2090_v34 = vmul.f32 %v1507_v14, %v1507_v14  ;;  %v1995_v36 = vadd.f32 %v1994_v26, %v1993_v29  ;;  %v2190_v38 = vadd.f32 %v2189_v32, %v2188_v28  ;;  %v2558_v39 = vpack.c.bf16 %v1510_v30, %v1510_v30 }
 0x21d   : > { %1890 = vst.msk [vmem:[%s3221_s30 + $0xa0] sm:$0xf] %vm1849_vm2, %v2555_v25  ;;  %v2191_v33 = vsel %vm1914_vm3, %v2088_v27, 0.0  ;;  %v2556_v41 = vpack.c.bf16 %v1502_v31, %v1502_v31  ;;  %v1996_v42 = vsel %vm1914_vm3, %v1502_v31, 0.0  ;;  %v2089_v43 = vmul.f32 %v1502_v31, %v1502_v31 }
 0x21e   : > { %v2192_v45 = vadd.f32 %v2191_v33, %v2190_v38  ;;  %1893 = vst.msk [vmem:[%s3221_s30 + $0xac] sm:$0xf] %vm1849_vm2, %v2558_v39  ;;  %v1997_v46 = vadd.f32 %v1996_v42, %v1995_v36  ;;  %v1998_v49 = vsel %vm1914_vm3, %v1507_v14, 0.0  ;;  %v2091_v50 = vmul.f32 %v1510_v30, %v1510_v30 }
 0x21f   : > { %v2762_v44 = vpop.f32.mrb[44].mxu1  ;;  %1891 = vst.msk [vmem:[%s3221_s30 + $0xa4] sm:$0xf] %vm1849_vm2, %v2556_v41  ;;  %v2193_v51 = vsel %vm1914_vm3, %v2089_v43, 0.0  ;;  %v2195_v54 = vsel %vm1914_vm3, %v2090_v34, 0.0  ;;  %v2000_v59 = vsel %vm1914_vm3, %v1510_v30, 0.0 }
 0x220   : > { %v1523_v47 = vadd.f32 %v2762_v44, %v3213_v37  ;;  %v1514_v48 = vpop.f32.mrb[45].mxu1  ;;  %v1999_v55 = vadd.f32 %v1998_v49, %v1997_v46  ;;  %v2194_v56 = vadd.f32 %v2193_v51, %v2192_v45  ;;  %v2197_v3 = vsel %vm1914_vm3, %v2091_v50, 0.0 }
 0x221   : > { %v1515_v52 = vadd.f32 %v3213_v37, %v1514_v48  ;;  %v2763_v53 = vpop.f32.mrb[46].mxu1 }
 0x222   : > { %v2561_v57 = vpack.c.bf16 %v1523_v47, %v1523_v47  ;;  %v1517_v58 = vpop.f32.mrb[47].mxu1  ;;  %v2196_v63 = vadd.f32 %v2195_v54, %v2194_v56  ;;  %v2001_v0 = vadd.f32 %v2000_v59, %v1999_v55  ;;  %v1526_v1 = vadd.f32 %v2763_v53, %v3213_v37 }
 0x223   : > { %v2559_v60 = vpack.c.bf16 %v1515_v52, %v1515_v52  ;;  %v2002_v61 = vsel %vm1914_vm3, %v1515_v52, 0.0  ;;  %v2092_v62 = vmul.f32 %v1515_v52, %v1515_v52  ;;  %v1518_v2 = vadd.f32 %v3213_v37, %v1517_v58 }
 0x224   : > { %1896 = vst.msk [vmem:[%s3221_s30 + $0xb8] sm:$0xf] %vm1849_vm2, %v2561_v57  ;;  %v2094_v5 = vmul.f32 %v1523_v47, %v1523_v47  ;;  %v2003_v6 = vadd.f32 %v2002_v61, %v2001_v0  ;;  %v2198_v7 = vadd.f32 %v2197_v3, %v2196_v63  ;;  %v2562_v8 = vpack.c.bf16 %v1526_v1, %v1526_v1 }
 0x225   : > { %1894 = vst.msk [vmem:[%s3221_s30 + $0xb0] sm:$0xf] %vm1849_vm2, %v2559_v60  ;;  %v2199_v4 = vsel %vm1914_vm3, %v2092_v62, 0.0  ;;  %v2560_v9 = vpack.c.bf16 %v1518_v2, %v1518_v2  ;;  %v2004_v10 = vsel %vm1914_vm3, %v1518_v2, 0.0  ;;  %v2093_v11 = vmul.f32 %v1518_v2, %v1518_v2 }
 0x226   : > { %v2200_v13 = vadd.f32 %v2199_v4, %v2198_v7  ;;  %1897 = vst.msk [vmem:[%s3221_s30 + $0xbc] sm:$0xf] %vm1849_vm2, %v2562_v8  ;;  %v2005_v14 = vadd.f32 %v2004_v10, %v2003_v6  ;;  %v2006_v35 = vsel %vm1914_vm3, %v1523_v47, 0.0  ;;  %v2095_v17 = vmul.f32 %v1526_v1, %v1526_v1 }
 0x227   : > { %v2766_v12 = vpop.f32.mrb[48].mxu1  ;;  %1895 = vst.msk [vmem:[%s3221_s30 + $0xb4] sm:$0xf] %vm1849_vm2, %v2560_v9  ;;  %v2201_v18 = vsel %vm1914_vm3, %v2093_v11, 0.0  ;;  %v2203_v21 = vsel %vm1914_vm3, %v2094_v5, 0.0  ;;  %v2008_v25 = vsel %vm1914_vm3, %v1526_v1, 0.0 }
 0x228   : > { %v1539_v15 = vadd.f32 %v2766_v12, %v3213_v37  ;;  %v1530_v16 = vpop.f32.mrb[49].mxu1  ;;  %v2007_v22 = vadd.f32 %v2006_v35, %v2005_v14  ;;  %v2202_v40 = vadd.f32 %v2201_v18, %v2200_v13  ;;  %v2205_v33 = vsel %vm1914_vm3, %v2095_v17, 0.0 }
 0x229   : > { %v1531_v19 = vadd.f32 %v3213_v37, %v1530_v16  ;;  %v2767_v20 = vpop.f32.mrb[50].mxu1 }
 0x22a   : > { %v2565_v23 = vpack.c.bf16 %v1539_v15, %v1539_v15  ;;  %v1533_v24 = vpop.f32.mrb[51].mxu1  ;;  %v2204_v29 = vadd.f32 %v2203_v21, %v2202_v40  ;;  %v2009_v30 = vadd.f32 %v2008_v25, %v2007_v22  ;;  %v1542_v31 = vadd.f32 %v2767_v20, %v3213_v37 }
 0x22b   : > { %v2563_v26 = vpack.c.bf16 %v1531_v19, %v1531_v19  ;;  %v2010_v27 = vsel %vm1914_vm3, %v1531_v19, 0.0  ;;  %v2096_v28 = vmul.f32 %v1531_v19, %v1531_v19  ;;  %v1534_v32 = vadd.f32 %v3213_v37, %v1533_v24 }
 0x22c   : > { %1900 = vst.msk [vmem:[%s3221_s30 + $0xc8] sm:$0xf] %vm1849_vm2, %v2565_v23  ;;  %v2098_v36 = vmul.f32 %v1539_v15, %v1539_v15  ;;  %v2011_v38 = vadd.f32 %v2010_v27, %v2009_v30  ;;  %v2206_v39 = vadd.f32 %v2205_v33, %v2204_v29  ;;  %v2566_v41 = vpack.c.bf16 %v1542_v31, %v1542_v31 }
 0x22d   : > { %1898 = vst.msk [vmem:[%s3221_s30 + $0xc0] sm:$0xf] %vm1849_vm2, %v2563_v26  ;;  %v2207_v34 = vsel %vm1914_vm3, %v2096_v28, 0.0  ;;  %v2564_v42 = vpack.c.bf16 %v1534_v32, %v1534_v32  ;;  %v2012_v43 = vsel %vm1914_vm3, %v1534_v32, 0.0  ;;  %v2097_v44 = vmul.f32 %v1534_v32, %v1534_v32 }
 0x22e   : > { %v2208_v46 = vadd.f32 %v2207_v34, %v2206_v39  ;;  %1901 = vst.msk [vmem:[%s3221_s30 + $0xcc] sm:$0xf] %vm1849_vm2, %v2566_v41  ;;  %v2013_v47 = vadd.f32 %v2012_v43, %v2011_v38  ;;  %v2014_v50 = vsel %vm1914_vm3, %v1539_v15, 0.0  ;;  %v2099_v51 = vmul.f32 %v1542_v31, %v1542_v31 }
 0x22f   : > { %v2770_v45 = vpop.f32.mrb[52].mxu1  ;;  %1899 = vst.msk [vmem:[%s3221_s30 + $0xc4] sm:$0xf] %vm1849_vm2, %v2564_v42  ;;  %v2209_v52 = vsel %vm1914_vm3, %v2097_v44, 0.0  ;;  %v2211_v55 = vsel %vm1914_vm3, %v2098_v36, 0.0  ;;  %v2016_v60 = vsel %vm1914_vm3, %v1542_v31, 0.0 }
 0x230   : > { %v1555_v48 = vadd.f32 %v2770_v45, %v3213_v37  ;;  %v1546_v49 = vpop.f32.mrb[53].mxu1  ;;  %v2015_v56 = vadd.f32 %v2014_v50, %v2013_v47  ;;  %v2210_v57 = vadd.f32 %v2209_v52, %v2208_v46  ;;  %v2213_v4 = vsel %vm1914_vm3, %v2099_v51, 0.0 }
 0x231   : > { %v1547_v53 = vadd.f32 %v3213_v37, %v1546_v49  ;;  %v2771_v54 = vpop.f32.mrb[54].mxu1 }
 0x232   : > { %v2569_v58 = vpack.c.bf16 %v1555_v48, %v1555_v48  ;;  %v1549_v59 = vpop.f32.mrb[55].mxu1  ;;  %v2212_v0 = vadd.f32 %v2211_v55, %v2210_v57  ;;  %v2017_v1 = vadd.f32 %v2016_v60, %v2015_v56  ;;  %v1558_v2 = vadd.f32 %v2771_v54, %v3213_v37 }
 0x233   : > { %v2567_v61 = vpack.c.bf16 %v1547_v53, %v1547_v53  ;;  %v2018_v62 = vsel %vm1914_vm3, %v1547_v53, 0.0  ;;  %v2100_v63 = vmul.f32 %v1547_v53, %v1547_v53  ;;  %v1550_v3 = vadd.f32 %v3213_v37, %v1549_v59 }
 0x234   : > { %1904 = vst.msk [vmem:[%s3221_s30 + $0xd8] sm:$0xf] %vm1849_vm2, %v2569_v58  ;;  %v2102_v6 = vmul.f32 %v1555_v48, %v1555_v48  ;;  %v2019_v7 = vadd.f32 %v2018_v62, %v2017_v1  ;;  %v2214_v8 = vadd.f32 %v2213_v4, %v2212_v0  ;;  %v2570_v9 = vpack.c.bf16 %v1558_v2, %v1558_v2 }
 0x235   : > { %1902 = vst.msk [vmem:[%s3221_s30 + $0xd0] sm:$0xf] %vm1849_vm2, %v2567_v61  ;;  %v2215_v5 = vsel %vm1914_vm3, %v2100_v63, 0.0  ;;  %v2568_v10 = vpack.c.bf16 %v1550_v3, %v1550_v3  ;;  %v2020_v11 = vsel %vm1914_vm3, %v1550_v3, 0.0  ;;  %v2101_v12 = vmul.f32 %v1550_v3, %v1550_v3 }
 0x236   : > { %v2216_v14 = vadd.f32 %v2215_v5, %v2214_v8  ;;  %1905 = vst.msk [vmem:[%s3221_s30 + $0xdc] sm:$0xf] %vm1849_vm2, %v2570_v9  ;;  %v2021_v15 = vadd.f32 %v2020_v11, %v2019_v7  ;;  %v2022_v17 = vsel %vm1914_vm3, %v1555_v48, 0.0  ;;  %v2103_v18 = vmul.f32 %v1558_v2, %v1558_v2 }
 0x237   : > { %v2774_v13 = vpop.f32.mrb[56].mxu1  ;;  %1903 = vst.msk [vmem:[%s3221_s30 + $0xd4] sm:$0xf] %vm1849_vm2, %v2568_v10  ;;  %v2217_v19 = vsel %vm1914_vm3, %v2101_v12, 0.0  ;;  %v2219_v22 = vsel %vm1914_vm3, %v2102_v6, 0.0  ;;  %v2024_v26 = vsel %vm1914_vm3, %v1558_v2, 0.0 }
 0x238   : > { %v1571_v16 = vadd.f32 %v2774_v13, %v3213_v37  ;;  %v1562_v35 = vpop.f32.mrb[57].mxu1  ;;  %v2023_v40 = vadd.f32 %v2022_v17, %v2021_v15  ;;  %v2218_v23 = vadd.f32 %v2217_v19, %v2216_v14  ;;  %v2221_v34 = vsel %vm1914_vm3, %v2103_v18, 0.0 }
 0x239   : > { %v1563_v20 = vadd.f32 %v3213_v37, %v1562_v35  ;;  %v2775_v21 = vpop.f32.mrb[58].mxu1  ;;  %v2823_v37 = vld [vmem:[%s3553_s6] ss:$0 sm:$0xff] }
 0x23a   : > { %v2573_v24 = vpack.c.bf16 %v1571_v16, %v1571_v16  ;;  %v1565_v25 = vpop.f32.mrb[59].mxu1  ;;  %v2220_v30 = vadd.f32 %v2219_v22, %v2218_v23  ;;  %v2025_v31 = vadd.f32 %v2024_v26, %v2023_v40  ;;  %v1574_v32 = vadd.f32 %v2823_v37, %v2775_v21 }
 0x23b   : > { %v2571_v27 = vpack.c.bf16 %v1563_v20, %v1563_v20  ;;  %v2026_v28 = vsel %vm1914_vm3, %v1563_v20, 0.0  ;;  %v2104_v29 = vmul.f32 %v1563_v20, %v1563_v20  ;;  %v1566_v33 = vadd.f32 %v2823_v37, %v1565_v25 }
 0x23c   : > { %1908 = vst.msk [vmem:[%s3221_s30 + $0xe8] sm:$0xf] %vm1849_vm2, %v2573_v24  ;;  %v2106_v38 = vmul.f32 %v1571_v16, %v1571_v16  ;;  %v2027_v39 = vadd.f32 %v2026_v28, %v2025_v31  ;;  %v2222_v41 = vadd.f32 %v2221_v34, %v2220_v30  ;;  %v2574_v42 = vpack.c.bf16 %v1574_v32, %v1574_v32 }
 0x23d   : > { %1906 = vst.msk [vmem:[%s3221_s30 + $0xe0] sm:$0xf] %vm1849_vm2, %v2571_v27  ;;  %v2223_v36 = vsel %vm1914_vm3, %v2104_v29, 0.0  ;;  %v2572_v43 = vpack.c.bf16 %v1566_v33, %v1566_v33  ;;  %v2028_v44 = vsel %vm1914_vm3, %v1566_v33, 0.0  ;;  %v2105_v45 = vmul.f32 %v1566_v33, %v1566_v33 }
 0x23e   : > { %v2224_v47 = vadd.f32 %v2223_v36, %v2222_v41  ;;  %1909 = vst.msk [vmem:[%s3221_s30 + $0xec] sm:$0xf] %vm1849_vm2, %v2574_v42  ;;  %v2029_v48 = vadd.f32 %v2028_v44, %v2027_v39  ;;  %v2030_v51 = vsel %vm1914_vm3, %v1571_v16, 0.0  ;;  %v2107_v52 = vmul.f32 %v1574_v32, %v1574_v32 }
 0x23f   : > { %v2778_v46 = vpop.f32.mrb[60].mxu1  ;;  %1907 = vst.msk [vmem:[%s3221_s30 + $0xe4] sm:$0xf] %vm1849_vm2, %v2572_v43  ;;  %v2225_v53 = vsel %vm1914_vm3, %v2105_v45, 0.0  ;;  %v2227_v56 = vsel %vm1914_vm3, %v2106_v38, 0.0  ;;  %v2032_v61 = vsel %vm1914_vm3, %v1574_v32, 0.0 }
 0x240   : > { %v1587_v49 = vadd.f32 %v2823_v37, %v2778_v46  ;;  %v1578_v50 = vpop.f32.mrb[61].mxu1  ;;  %v2031_v57 = vadd.f32 %v2030_v51, %v2029_v48  ;;  %v2226_v58 = vadd.f32 %v2225_v53, %v2224_v47  ;;  %v2229_v5 = vsel %vm1914_vm3, %v2107_v52, 0.0 }
 0x241   : > { %v1579_v54 = vadd.f32 %v2823_v37, %v1578_v50  ;;  %v2779_v55 = vpop.f32.mrb[62].mxu1 }
 0x242   : > { %v2577_v59 = vpack.c.bf16 %v1587_v49, %v1587_v49  ;;  %v1581_v60 = vpop.f32.mrb[63].mxu1  ;;  %v2228_v1 = vadd.f32 %v2227_v56, %v2226_v58  ;;  %v2033_v2 = vadd.f32 %v2032_v61, %v2031_v57  ;;  %v1590_v3 = vadd.f32 %v2823_v37, %v2779_v55 }
 0x243   : > { %v2575_v62 = vpack.c.bf16 %v1579_v54, %v1579_v54  ;;  %v2034_v63 = vsel %vm1914_vm3, %v1579_v54, 0.0  ;;  %v2108_v0 = vmul.f32 %v1579_v54, %v1579_v54  ;;  %v1582_v4 = vadd.f32 %v2823_v37, %v1581_v60 }
 0x244   : > { %1912 = vst.msk [vmem:[%s3221_s30 + $0xf8] sm:$0xf] %vm1849_vm2, %v2577_v59  ;;  %v2035_v7 = vadd.f32 %v2034_v63, %v2033_v2  ;;  %v2230_v8 = vadd.f32 %v2229_v5, %v2228_v1  ;;  %v2578_v9 = vpack.c.bf16 %v1590_v3, %v1590_v3  ;;  %v2110_v10 = vmul.f32 %v1587_v49, %v1587_v49 }
 0x245   : > { %1910 = vst.msk [vmem:[%s3221_s30 + $0xf0] sm:$0xf] %vm1849_vm2, %v2575_v62  ;;  %v2231_v6 = vsel %vm1914_vm3, %v2108_v0, 0.0  ;;  %v2576_v11 = vpack.c.bf16 %v1582_v4, %v1582_v4  ;;  %v2036_v12 = vsel %vm1914_vm3, %v1582_v4, 0.0  ;;  %v2109_v13 = vmul.f32 %v1582_v4, %v1582_v4 }
 0x246   : > { %v2232_v14 = vadd.f32 %v2231_v6, %v2230_v8  ;;  %1913 = vst.msk [vmem:[%s3221_s30 + $0xfc] sm:$0xf] %vm1849_vm2, %v2578_v9  ;;  %v2037_v15 = vadd.f32 %v2036_v12, %v2035_v7  ;;  %v2038_v16 = vsel %vm1914_vm3, %v1587_v49, 0.0  ;;  %v2111_v35 = vmul.f32 %v1590_v3, %v1590_v3 }
 0x247   : > { %1911 = vst.msk [vmem:[%s3221_s30 + $0xf4] sm:$0xf] %vm1849_vm2, %v2576_v11  ;;  %v2233_v17 = vsel %vm1914_vm3, %v2109_v13, 0.0  ;;  %v2235_v20 = vsel %vm1914_vm3, %v2110_v10, 0.0  ;;  %v2040_v21 = vsel %vm1914_vm3, %v1590_v3, 0.0 }
 0x248   : > { %v2039_v18 = vadd.f32 %v2038_v16, %v2037_v15  ;;  %v2234_v19 = vadd.f32 %v2233_v17, %v2232_v14  ;;  %v2237_v23 = vsel %vm1914_vm3, %v2111_v35, 0.0 }
 0x24a   : > { %v2041_v22 = vadd.f32 %v2040_v21, %v2039_v18  ;;  %v2236_v40 = vadd.f32 %v2235_v20, %v2234_v19 }
 0x24c   : > { %v2042_v24 = vrot.slane %v2041_v22, 4  ;;  %v2238_v25 = vadd.f32 %v2237_v23, %v2236_v40 }
 0x24e   : > { %v2043_v26 = vadd.f32 %v2042_v24, %v2041_v22  ;;  %v2239_v27 = vrot.slane %v2238_v25, 4 }
 0x250   : > { %v2044_v28 = vrot.slane %v2043_v26, 2  ;;  %v2240_v29 = vadd.f32 %v2239_v27, %v2238_v25 }
 0x252   : > { %v2045_v30 = vadd.f32 %v2044_v28, %v2043_v26  ;;  %v2241_v31 = vrot.slane %v2240_v29, 2 }
 0x254   : > { %v2046_v37 = vrot.slane %v2045_v30, 1  ;;  %v2242_v32 = vadd.f32 %v2241_v31, %v2240_v29 }
 0x256   : > { %v2243_v33 = vrot.slane %v2242_v32, 1  ;;  %v2047_v34 = vadd.f32 %v2046_v37, %v2045_v30 }
 0x258   : > { %v2244_v36 = vadd.f32 %v2243_v33, %v2242_v32 }
 0x25a   : > { %v2246_v38 = vsel %vm2245_vm4, %v2047_v34, %v2244_v36 }
 0x25b   : > { %2248 = vst.msk [vmem:[%s319_s14] sm:$0x3] %vm2247_vm5, %v2246_v38 }
 0x25c PF: > { %s19_s27 = sadd.s32 1, %s2830_s27  }
 0x25d   : > { %p16_p5 = scmp.ge.s32.totalorder %s19_s27, 4  }
 0x25f   :  { %18 = sbr.rel (!%p16_p5) target bundleno = 1 (0x1), region = 90 }

// kernel: point_pillars_forward.19
= control target key start
LH: loop header
LB: loop body
LE: loop exit
PB: predicated region body
PF: predicated region fallthrough
CT: control target
= control target key end

     0   :  { %s1502_s0 = inlined_call_operand.vmem [shape: bf16[512,128], index: 0, kind: input, shape index: {}]   ;;  %s1503_s1 = inlined_call_operand.vmem [shape: f32[1,128], index: 1, kind: input, shape index: {}]   ;;  %s1504_s2 = inlined_call_operand.vmem [shape: f32[1,128], index: 2, kind: input, shape index: {}]   ;;  %s1505_s3 = inlined_call_operand.vmem [shape: bf16[512,128], index: 3, kind: output, shape index: {}]  }
   0x1   :  { %v803_v0 = vld [vmem:[%s1502_s0] sm:$0xff]   ;;  %v1090_v4 = vld [vmem:[%s1502_s0 + $0x8] sm:$0xff]   ;;  %v1091_v5 = vld [vmem:[%s1502_s0 + $0x10] sm:$0xff]  }
   0x2   :  { %v1178_v1 = vld [vmem:[%s1503_s1] ss:$0 sm:$0xff]  ;;  %v804_v2 = vunpack.c.l.bf16 %v803_v0  ;;  %v805_v3 = vunpack.c.h.bf16 %v803_v0  ;;  %v1092_v6 = vld [vmem:[%s1502_s0 + $0x18] sm:$0xff]   ;;  %v808_v8 = vunpack.c.l.bf16 %v1090_v4  ;;  %v809_v9 = vunpack.c.h.bf16 %v1090_v4  ;;  %v1094_v33 = vld [vmem:[%s1502_s0 + $0x28] sm:$0xff]  }
   0x3   :  { %v1192_v7 = vld [vmem:[%s1504_s2] ss:$0 sm:$0xff]  ;;  %v812_v10 = vunpack.c.l.bf16 %v1091_v5  ;;  %v813_v11 = vunpack.c.h.bf16 %v1091_v5  ;;  %v816_v14 = vunpack.c.l.bf16 %v1092_v6  ;;  %v817_v15 = vunpack.c.h.bf16 %v1092_v6  ;;  %v1095_v38 = vld [vmem:[%s1502_s0 + $0x30] sm:$0xff]   ;;  %v1096_v43 = vld [vmem:[%s1502_s0 + $0x38] sm:$0xff]  }
   0x4   :  { %v149_v12 = vmul.f32 %v804_v2, %v1178_v1  ;;  %v150_v13 = vmul.f32 %v805_v3, %v1178_v1  ;;  %v151_v16 = vmul.f32 %v808_v8, %v1178_v1  ;;  %v152_v17 = vmul.f32 %v809_v9, %v1178_v1  ;;  %v1093_v28 = vld [vmem:[%s1502_s0 + $0x20] sm:$0xff]  }
   0x5   :  { %v153_v18 = vmul.f32 %v812_v10, %v1178_v1  ;;  %v154_v19 = vmul.f32 %v813_v11, %v1178_v1  ;;  %v155_v22 = vmul.f32 %v816_v14, %v1178_v1  ;;  %v156_v23 = vmul.f32 %v817_v15, %v1178_v1  ;;  %v1097_v0 = vld [vmem:[%s1502_s0 + $0x40] sm:$0xff]   ;;  %v1098_v11 = vld [vmem:[%s1502_s0 + $0x48] sm:$0xff]  }
   0x6   :  { %v220_v20 = vadd.f32 %v1192_v7, %v149_v12  ;;  %v221_v21 = vadd.f32 %v1192_v7, %v150_v13  ;;  %v222_v24 = vadd.f32 %v1192_v7, %v151_v16  ;;  %v223_v25 = vadd.f32 %v1192_v7, %v152_v17  ;;  %v1099_v16 = vld [vmem:[%s1502_s0 + $0x50] sm:$0xff]  }
   0x7   :  { %v224_v26 = vadd.f32 %v1192_v7, %v153_v18  ;;  %v225_v27 = vadd.f32 %v1192_v7, %v154_v19  ;;  %v226_v31 = vadd.f32 %v1192_v7, %v155_v22  ;;  %v227_v32 = vadd.f32 %v1192_v7, %v156_v23 }
   0x8   :  { %v284_v29 = vmax.f32 %v220_v20, 0.0  ;;  %v285_v30 = vmax.f32 %v221_v21, 0.0  ;;  %v286_v34 = vmax.f32 %v222_v24, 0.0  ;;  %v287_v35 = vmax.f32 %v223_v25, 0.0  ;;  %v1100_v25 = vld [vmem:[%s1502_s0 + $0x58] sm:$0xff]  }
   0x9   :  { %v288_v36 = vmax.f32 %v224_v26, 0.0  ;;  %v289_v37 = vmax.f32 %v225_v27, 0.0  ;;  %v290_v40 = vmax.f32 %v226_v31, 0.0  ;;  %v291_v41 = vmax.f32 %v227_v32, 0.0 }
   0xa   :  { %v933_v39 = vpack.c.bf16 %v285_v30, %v284_v29  ;;  %v820_v42 = vunpack.c.l.bf16 %v1093_v28  ;;  %v938_v44 = vpack.c.bf16 %v287_v35, %v286_v34  ;;  %v821_v46 = vunpack.c.h.bf16 %v1093_v28 }
   0xb   :  { %v943_v45 = vpack.c.bf16 %v289_v37, %v288_v36  ;;  %v824_v47 = vunpack.c.l.bf16 %v1094_v33  ;;  %v948_v48 = vpack.c.bf16 %v291_v41, %v290_v40  ;;  %v825_v50 = vunpack.c.h.bf16 %v1094_v33 }
   0xc   :  { %934 = vst [vmem:[%s1505_s3] sm:$0xff] %v933_v39   ;;  %v157_v49 = vmul.f32 %v820_v42, %v1178_v1  ;;  %v828_v51 = vunpack.c.l.bf16 %v1095_v38  ;;  %1121 = vst [vmem:[%s1505_s3 + $0x8] sm:$0xff] %v938_v44   ;;  %v158_v52 = vmul.f32 %v821_v46, %v1178_v1  ;;  %v829_v54 = vunpack.c.h.bf16 %v1095_v38  ;;  %v1101_v38 = vld [vmem:[%s1502_s0 + $0x60] sm:$0xff]  }
   0xd   :  { %1122 = vst [vmem:[%s1505_s3 + $0x10] sm:$0xff] %v943_v45   ;;  %v159_v53 = vmul.f32 %v824_v47, %v1178_v1  ;;  %v832_v55 = vunpack.c.l.bf16 %v1096_v43  ;;  %1123 = vst [vmem:[%s1505_s3 + $0x18] sm:$0xff] %v948_v48   ;;  %v160_v57 = vmul.f32 %v825_v50, %v1178_v1  ;;  %v833_v59 = vunpack.c.h.bf16 %v1096_v43 }
   0xe   :  { %v228_v56 = vadd.f32 %v1192_v7, %v157_v49  ;;  %v161_v58 = vmul.f32 %v828_v51, %v1178_v1  ;;  %v229_v60 = vadd.f32 %v1192_v7, %v158_v52  ;;  %v162_v62 = vmul.f32 %v829_v54, %v1178_v1  ;;  %v1102_v51 = vld [vmem:[%s1502_s0 + $0x68] sm:$0xff]  }
   0xf   :  { %v230_v61 = vadd.f32 %v1192_v7, %v159_v53  ;;  %v163_v63 = vmul.f32 %v832_v55, %v1178_v1  ;;  %v231_v3 = vadd.f32 %v1192_v7, %v160_v57  ;;  %v164_v5 = vmul.f32 %v833_v59, %v1178_v1 }
  0x10   :  { %v292_v2 = vmax.f32 %v228_v56, 0.0  ;;  %v232_v4 = vadd.f32 %v1192_v7, %v161_v58  ;;  %v293_v6 = vmax.f32 %v229_v60, 0.0  ;;  %v233_v9 = vadd.f32 %v1192_v7, %v162_v62  ;;  %v1103_v60 = vld [vmem:[%s1502_s0 + $0x70] sm:$0xff]  }
  0x11   :  { %v294_v8 = vmax.f32 %v230_v61, 0.0  ;;  %v234_v10 = vadd.f32 %v1192_v7, %v163_v63  ;;  %v295_v12 = vmax.f32 %v231_v3, 0.0  ;;  %v235_v14 = vadd.f32 %v1192_v7, %v164_v5 }
  0x12   :  { %v296_v13 = vmax.f32 %v232_v4, 0.0  ;;  %v836_v15 = vunpack.c.l.bf16 %v1097_v0  ;;  %v953_v17 = vpack.c.bf16 %v293_v6, %v292_v2  ;;  %v297_v18 = vmax.f32 %v233_v9, 0.0  ;;  %v1104_v2 = vld [vmem:[%s1502_s0 + $0x78] sm:$0xff]  }
  0x13   :  { %v298_v19 = vmax.f32 %v234_v10, 0.0  ;;  %v837_v20 = vunpack.c.h.bf16 %v1097_v0  ;;  %v958_v21 = vpack.c.bf16 %v295_v12, %v294_v8  ;;  %v299_v22 = vmax.f32 %v235_v14, 0.0  ;;  %v1105_v12 = vld [vmem:[%s1502_s0 + $0x80] sm:$0xff]  }
  0x14   :  { %v165_v23 = vmul.f32 %v836_v15, %v1178_v1  ;;  %v840_v24 = vunpack.c.l.bf16 %v1098_v11  ;;  %1124 = vst [vmem:[%s1505_s3 + $0x20] sm:$0xff] %v953_v17   ;;  %v963_v26 = vpack.c.bf16 %v297_v18, %v296_v13  ;;  %v841_v28 = vunpack.c.h.bf16 %v1098_v11 }
  0x15   :  { %v166_v27 = vmul.f32 %v837_v20, %v1178_v1  ;;  %v844_v29 = vunpack.c.l.bf16 %v1099_v16  ;;  %1125 = vst [vmem:[%s1505_s3 + $0x28] sm:$0xff] %v958_v21   ;;  %v968_v30 = vpack.c.bf16 %v299_v22, %v298_v19  ;;  %v845_v33 = vunpack.c.h.bf16 %v1099_v16 }
  0x16   :  { %v236_v31 = vadd.f32 %v1192_v7, %v165_v23  ;;  %v167_v32 = vmul.f32 %v840_v24, %v1178_v1  ;;  %1126 = vst [vmem:[%s1505_s3 + $0x30] sm:$0xff] %v963_v26   ;;  %v168_v35 = vmul.f32 %v841_v28, %v1178_v1  ;;  %v848_v37 = vunpack.c.l.bf16 %v1100_v25 }
  0x17   :  { %v237_v34 = vadd.f32 %v1192_v7, %v166_v27  ;;  %v169_v36 = vmul.f32 %v844_v29, %v1178_v1  ;;  %1127 = vst [vmem:[%s1505_s3 + $0x38] sm:$0xff] %v968_v30   ;;  %v170_v41 = vmul.f32 %v845_v33, %v1178_v1  ;;  %v849_v42 = vunpack.c.h.bf16 %v1100_v25  ;;  %v1106_v29 = vld [vmem:[%s1502_s0 + $0x88] sm:$0xff]  }
  0x18   :  { %v300_v39 = vmax.f32 %v236_v31, 0.0  ;;  %v238_v40 = vadd.f32 %v1192_v7, %v167_v32  ;;  %v239_v44 = vadd.f32 %v1192_v7, %v168_v35  ;;  %v171_v46 = vmul.f32 %v848_v37, %v1178_v1 }
  0x19   :  { %v301_v43 = vmax.f32 %v237_v34, 0.0  ;;  %v240_v45 = vadd.f32 %v1192_v7, %v169_v36  ;;  %v241_v48 = vadd.f32 %v1192_v7, %v170_v41  ;;  %v172_v49 = vmul.f32 %v849_v42, %v1178_v1  ;;  %v1107_v34 = vld [vmem:[%s1502_s0 + $0x90] sm:$0xff]  }
  0x1a   :  { %v302_v47 = vmax.f32 %v238_v40, 0.0  ;;  %v852_v50 = vunpack.c.l.bf16 %v1101_v38  ;;  %v303_v53 = vmax.f32 %v239_v44, 0.0  ;;  %v242_v55 = vadd.f32 %v1192_v7, %v171_v46 }
  0x1b   :  { %v973_v52 = vpack.c.bf16 %v301_v43, %v300_v39  ;;  %v304_v54 = vmax.f32 %v240_v45, 0.0  ;;  %v305_v56 = vmax.f32 %v241_v48, 0.0  ;;  %v243_v57 = vadd.f32 %v1192_v7, %v172_v49  ;;  %v1108_v43 = vld [vmem:[%s1502_s0 + $0x98] sm:$0xff]  }
  0x1c   :  { %v853_v58 = vunpack.c.h.bf16 %v1101_v38  ;;  %v173_v59 = vmul.f32 %v852_v50, %v1178_v1  ;;  %v978_v61 = vpack.c.bf16 %v303_v53, %v302_v47  ;;  %v306_v62 = vmax.f32 %v242_v55, 0.0 }
  0x1d   :  { %1128 = vst [vmem:[%s1505_s3 + $0x40] sm:$0xff] %v973_v52   ;;  %v856_v63 = vunpack.c.l.bf16 %v1102_v51  ;;  %v857_v0 = vunpack.c.h.bf16 %v1102_v51  ;;  %v983_v3 = vpack.c.bf16 %v305_v56, %v304_v54  ;;  %v307_v4 = vmax.f32 %v243_v57, 0.0  ;;  %v1109_v56 = vld [vmem:[%s1502_s0 + $0xa0] sm:$0xff]  }
  0x1e   :  { %v174_v5 = vmul.f32 %v853_v58, %v1178_v1  ;;  %v244_v6 = vadd.f32 %v1192_v7, %v173_v59  ;;  %1129 = vst [vmem:[%s1505_s3 + $0x48] sm:$0xff] %v978_v61   ;;  %v860_v10 = vunpack.c.l.bf16 %v1103_v60  ;;  %v861_v11 = vunpack.c.h.bf16 %v1103_v60 }
  0x1f   :  { %v175_v8 = vmul.f32 %v856_v63, %v1178_v1  ;;  %v176_v9 = vmul.f32 %v857_v0, %v1178_v1  ;;  %1130 = vst [vmem:[%s1505_s3 + $0x50] sm:$0xff] %v983_v3   ;;  %v988_v13 = vpack.c.bf16 %v307_v4, %v306_v62  ;;  %v864_v16 = vunpack.c.l.bf16 %v1104_v2 }
  0x20   :  { %v245_v14 = vadd.f32 %v1192_v7, %v174_v5  ;;  %v308_v15 = vmax.f32 %v244_v6, 0.0  ;;  %v177_v19 = vmul.f32 %v860_v10, %v1178_v1  ;;  %v178_v20 = vmul.f32 %v861_v11, %v1178_v1 }
  0x21   :  { %v246_v17 = vadd.f32 %v1192_v7, %v175_v8  ;;  %v247_v18 = vadd.f32 %v1192_v7, %v176_v9  ;;  %1131 = vst [vmem:[%s1505_s3 + $0x58] sm:$0xff] %v988_v13   ;;  %v865_v22 = vunpack.c.h.bf16 %v1104_v2  ;;  %v179_v23 = vmul.f32 %v864_v16, %v1178_v1  ;;  %v1110_v2 = vld [vmem:[%s1502_s0 + $0xa8] sm:$0xff]   ;;  %v1111_v16 = vld [vmem:[%s1502_s0 + $0xb0] sm:$0xff]  }
  0x22   :  { %v309_v21 = vmax.f32 %v245_v14, 0.0  ;;  %v868_v24 = vunpack.c.l.bf16 %v1105_v12  ;;  %v248_v27 = vadd.f32 %v1192_v7, %v177_v19  ;;  %v249_v28 = vadd.f32 %v1192_v7, %v178_v20 }
  0x23   :  { %v310_v25 = vmax.f32 %v246_v17, 0.0  ;;  %v311_v26 = vmax.f32 %v247_v18, 0.0  ;;  %v180_v31 = vmul.f32 %v865_v22, %v1178_v1  ;;  %v250_v32 = vadd.f32 %v1192_v7, %v179_v23 }
  0x24   :  { %v993_v30 = vpack.c.bf16 %v309_v21, %v308_v15  ;;  %v869_v33 = vunpack.c.h.bf16 %v1105_v12  ;;  %v312_v36 = vmax.f32 %v248_v27, 0.0  ;;  %v313_v37 = vmax.f32 %v249_v28, 0.0  ;;  %v1112_v21 = vld [vmem:[%s1502_s0 + $0xb8] sm:$0xff]  }
  0x25   :  { %v998_v35 = vpack.c.bf16 %v311_v26, %v310_v25  ;;  %v181_v38 = vmul.f32 %v868_v24, %v1178_v1  ;;  %v251_v39 = vadd.f32 %v1192_v7, %v180_v31  ;;  %v314_v40 = vmax.f32 %v250_v32, 0.0 }
  0x26   :  { %1132 = vst [vmem:[%s1505_s3 + $0x60] sm:$0xff] %v993_v30   ;;  %v182_v41 = vmul.f32 %v869_v33, %v1178_v1  ;;  %v872_v42 = vunpack.c.l.bf16 %v1106_v29  ;;  %v1003_v44 = vpack.c.bf16 %v313_v37, %v312_v36  ;;  %v873_v46 = vunpack.c.h.bf16 %v1106_v29 }
  0x27   :  { %1133 = vst [vmem:[%s1505_s3 + $0x68] sm:$0xff] %v998_v35   ;;  %v252_v45 = vadd.f32 %v1192_v7, %v181_v38  ;;  %v876_v47 = vunpack.c.l.bf16 %v1107_v34  ;;  %v315_v48 = vmax.f32 %v251_v39, 0.0  ;;  %v877_v51 = vunpack.c.h.bf16 %v1107_v34  ;;  %v1113_v34 = vld [vmem:[%s1502_s0 + $0xc0] sm:$0xff]  }
  0x28   :  { %v253_v49 = vadd.f32 %v1192_v7, %v182_v41  ;;  %v183_v50 = vmul.f32 %v872_v42, %v1178_v1  ;;  %1134 = vst [vmem:[%s1505_s3 + $0x70] sm:$0xff] %v1003_v44   ;;  %v184_v53 = vmul.f32 %v873_v46, %v1178_v1  ;;  %v880_v55 = vunpack.c.l.bf16 %v1108_v43 }
  0x29   :  { %v316_v52 = vmax.f32 %v252_v45, 0.0  ;;  %v185_v54 = vmul.f32 %v876_v47, %v1178_v1  ;;  %v1008_v57 = vpack.c.bf16 %v315_v48, %v314_v40  ;;  %v186_v60 = vmul.f32 %v877_v51, %v1178_v1  ;;  %v1114_v47 = vld [vmem:[%s1502_s0 + $0xc8] sm:$0xff]  }
  0x2a   :  { %v317_v58 = vmax.f32 %v253_v49, 0.0  ;;  %v254_v59 = vadd.f32 %v1192_v7, %v183_v50  ;;  %v255_v61 = vadd.f32 %v1192_v7, %v184_v53  ;;  %v881_v63 = vunpack.c.h.bf16 %v1108_v43 }
  0x2b   :  { %v256_v62 = vadd.f32 %v1192_v7, %v185_v54  ;;  %v187_v0 = vmul.f32 %v880_v55, %v1178_v1  ;;  %1135 = vst [vmem:[%s1505_s3 + $0x78] sm:$0xff] %v1008_v57   ;;  %v257_v5 = vadd.f32 %v1192_v7, %v186_v60  ;;  %v884_v6 = vunpack.c.l.bf16 %v1109_v56 }
  0x2c   :  { %v1013_v3 = vpack.c.bf16 %v317_v58, %v316_v52  ;;  %v318_v4 = vmax.f32 %v254_v59, 0.0  ;;  %v319_v8 = vmax.f32 %v255_v61, 0.0  ;;  %v188_v10 = vmul.f32 %v881_v63, %v1178_v1  ;;  %v1115_v52 = vld [vmem:[%s1502_s0 + $0xd0] sm:$0xff]   ;;  %v1116_v61 = vld [vmem:[%s1502_s0 + $0xd8] sm:$0xff]  }
  0x2d   :  { %v320_v9 = vmax.f32 %v256_v62, 0.0  ;;  %v258_v11 = vadd.f32 %v1192_v7, %v187_v0  ;;  %v321_v12 = vmax.f32 %v257_v5, 0.0  ;;  %v885_v13 = vunpack.c.h.bf16 %v1109_v56 }
  0x2e   :  { %1136 = vst [vmem:[%s1505_s3 + $0x80] sm:$0xff] %v1013_v3   ;;  %v189_v14 = vmul.f32 %v884_v6, %v1178_v1  ;;  %v888_v15 = vunpack.c.l.bf16 %v1110_v2  ;;  %v1018_v17 = vpack.c.bf16 %v319_v8, %v318_v4  ;;  %v259_v18 = vadd.f32 %v1192_v7, %v188_v10 }
  0x2f   :  { %v322_v19 = vmax.f32 %v258_v11, 0.0  ;;  %v889_v20 = vunpack.c.h.bf16 %v1110_v2  ;;  %v1023_v22 = vpack.c.bf16 %v321_v12, %v320_v9  ;;  %v190_v23 = vmul.f32 %v885_v13, %v1178_v1  ;;  %v1117_v12 = vld [vmem:[%s1502_s0 + $0xe0] sm:$0xff]  }
  0x30   :  { %v260_v24 = vadd.f32 %v1192_v7, %v189_v14  ;;  %v191_v25 = vmul.f32 %v888_v15, %v1178_v1  ;;  %1137 = vst [vmem:[%s1505_s3 + $0x88] sm:$0xff] %v1018_v17   ;;  %v323_v26 = vmax.f32 %v259_v18, 0.0  ;;  %v892_v28 = vunpack.c.l.bf16 %v1111_v16 }
  0x31   :  { %v192_v27 = vmul.f32 %v889_v20, %v1178_v1  ;;  %v893_v29 = vunpack.c.h.bf16 %v1111_v16  ;;  %1138 = vst [vmem:[%s1505_s3 + $0x90] sm:$0xff] %v1023_v22   ;;  %v261_v30 = vadd.f32 %v1192_v7, %v190_v23  ;;  %v896_v33 = vunpack.c.l.bf16 %v1112_v21 }
  0x32   :  { %v324_v31 = vmax.f32 %v260_v24, 0.0  ;;  %v262_v32 = vadd.f32 %v1192_v7, %v191_v25  ;;  %v1028_v35 = vpack.c.bf16 %v323_v26, %v322_v19  ;;  %v193_v37 = vmul.f32 %v892_v28, %v1178_v1 }
  0x33   :  { %v263_v36 = vadd.f32 %v1192_v7, %v192_v27  ;;  %v194_v38 = vmul.f32 %v893_v29, %v1178_v1  ;;  %v325_v39 = vmax.f32 %v261_v30, 0.0  ;;  %v897_v41 = vunpack.c.h.bf16 %v1112_v21  ;;  %v1118_v21 = vld [vmem:[%s1502_s0 + $0xe8] sm:$0xff]  }
  0x34   :  { %v326_v40 = vmax.f32 %v262_v32, 0.0  ;;  %v195_v42 = vmul.f32 %v896_v33, %v1178_v1  ;;  %1139 = vst [vmem:[%s1505_s3 + $0x98] sm:$0xff] %v1028_v35   ;;  %v264_v44 = vadd.f32 %v1192_v7, %v193_v37  ;;  %v900_v46 = vunpack.c.l.bf16 %v1113_v34 }
  0x35   :  { %v327_v43 = vmax.f32 %v263_v36, 0.0  ;;  %v265_v45 = vadd.f32 %v1192_v7, %v194_v38  ;;  %v1033_v48 = vpack.c.bf16 %v325_v39, %v324_v31  ;;  %v196_v49 = vmul.f32 %v897_v41, %v1178_v1  ;;  %v1120_v39 = vld [vmem:[%s1502_s0 + $0xf8] sm:$0xff]  }
  0x36   :  { %v266_v50 = vadd.f32 %v1192_v7, %v195_v42  ;;  %v901_v51 = vunpack.c.h.bf16 %v1113_v34  ;;  %v328_v54 = vmax.f32 %v264_v44, 0.0  ;;  %v197_v56 = vmul.f32 %v900_v46, %v1178_v1  ;;  %v1119_v34 = vld [vmem:[%s1502_s0 + $0xf0] sm:$0xff]  }
  0x37   :  { %v1038_v53 = vpack.c.bf16 %v327_v43, %v326_v40  ;;  %v329_v55 = vmax.f32 %v265_v45, 0.0  ;;  %1140 = vst [vmem:[%s1505_s3 + $0xa0] sm:$0xff] %v1033_v48   ;;  %v267_v57 = vadd.f32 %v1192_v7, %v196_v49  ;;  %v904_v60 = vunpack.c.l.bf16 %v1114_v47 }
  0x38   :  { %v330_v58 = vmax.f32 %v266_v50, 0.0  ;;  %v198_v59 = vmul.f32 %v901_v51, %v1178_v1  ;;  %v268_v63 = vadd.f32 %v1192_v7, %v197_v56  ;;  %v905_v0 = vunpack.c.h.bf16 %v1114_v47 }
  0x39   :  { %1141 = vst [vmem:[%s1505_s3 + $0xa8] sm:$0xff] %v1038_v53   ;;  %v1043_v62 = vpack.c.bf16 %v329_v55, %v328_v54  ;;  %v908_v2 = vunpack.c.l.bf16 %v1115_v52  ;;  %v331_v3 = vmax.f32 %v267_v57, 0.0  ;;  %v199_v5 = vmul.f32 %v904_v60, %v1178_v1 }
  0x3a   :  { %v269_v4 = vadd.f32 %v1192_v7, %v198_v59  ;;  %v909_v6 = vunpack.c.h.bf16 %v1115_v52  ;;  %v332_v8 = vmax.f32 %v268_v63, 0.0  ;;  %v200_v9 = vmul.f32 %v905_v0, %v1178_v1 }
  0x3b   :  { %1142 = vst [vmem:[%s1505_s3 + $0xb0] sm:$0xff] %v1043_v62   ;;  %v201_v10 = vmul.f32 %v908_v2, %v1178_v1  ;;  %v912_v11 = vunpack.c.l.bf16 %v1116_v61  ;;  %v1048_v13 = vpack.c.bf16 %v331_v3, %v330_v58  ;;  %v270_v15 = vadd.f32 %v1192_v7, %v199_v5 }
  0x3c   :  { %v333_v14 = vmax.f32 %v269_v4, 0.0  ;;  %v202_v16 = vmul.f32 %v909_v6, %v1178_v1  ;;  %v271_v17 = vadd.f32 %v1192_v7, %v200_v9  ;;  %v913_v19 = vunpack.c.h.bf16 %v1116_v61 }
  0x3d   :  { %v272_v18 = vadd.f32 %v1192_v7, %v201_v10  ;;  %v203_v20 = vmul.f32 %v912_v11, %v1178_v1  ;;  %1143 = vst [vmem:[%s1505_s3 + $0xb8] sm:$0xff] %v1048_v13   ;;  %v334_v23 = vmax.f32 %v270_v15, 0.0  ;;  %v916_v25 = vunpack.c.l.bf16 %v1117_v12 }
  0x3e   :  { %v1053_v22 = vpack.c.bf16 %v333_v14, %v332_v8  ;;  %v273_v24 = vadd.f32 %v1192_v7, %v202_v16  ;;  %v335_v26 = vmax.f32 %v271_v17, 0.0  ;;  %v204_v28 = vmul.f32 %v913_v19, %v1178_v1 }
  0x3f   :  { %v336_v27 = vmax.f32 %v272_v18, 0.0  ;;  %v274_v29 = vadd.f32 %v1192_v7, %v203_v20  ;;  %v917_v31 = vunpack.c.h.bf16 %v1117_v12  ;;  %v205_v32 = vmul.f32 %v916_v25, %v1178_v1 }
  0x40   :  { %1144 = vst [vmem:[%s1505_s3 + $0xc0] sm:$0xff] %v1053_v22   ;;  %v337_v30 = vmax.f32 %v273_v24, 0.0  ;;  %v920_v33 = vunpack.c.l.bf16 %v1118_v21  ;;  %v1058_v35 = vpack.c.bf16 %v335_v26, %v334_v23  ;;  %v275_v36 = vadd.f32 %v1192_v7, %v204_v28 }
  0x41   :  { %v338_v37 = vmax.f32 %v274_v29, 0.0  ;;  %v921_v38 = vunpack.c.h.bf16 %v1118_v21  ;;  %v206_v41 = vmul.f32 %v917_v31, %v1178_v1  ;;  %v276_v42 = vadd.f32 %v1192_v7, %v205_v32 }
  0x42   :  { %v1063_v40 = vpack.c.bf16 %v337_v30, %v336_v27  ;;  %v207_v43 = vmul.f32 %v920_v33, %v1178_v1  ;;  %1145 = vst [vmem:[%s1505_s3 + $0xc8] sm:$0xff] %v1058_v35   ;;  %v339_v44 = vmax.f32 %v275_v36, 0.0  ;;  %v924_v46 = vunpack.c.l.bf16 %v1119_v34 }
  0x43   :  { %v208_v45 = vmul.f32 %v921_v38, %v1178_v1  ;;  %v925_v47 = vunpack.c.h.bf16 %v1119_v34  ;;  %v277_v48 = vadd.f32 %v1192_v7, %v206_v41  ;;  %v340_v49 = vmax.f32 %v276_v42, 0.0 }
  0x44   :  { %1146 = vst [vmem:[%s1505_s3 + $0xd0] sm:$0xff] %v1063_v40   ;;  %v278_v50 = vadd.f32 %v1192_v7, %v207_v43  ;;  %v928_v51 = vunpack.c.l.bf16 %v1120_v39  ;;  %v1068_v52 = vpack.c.bf16 %v339_v44, %v338_v37  ;;  %v209_v54 = vmul.f32 %v924_v46, %v1178_v1 }
  0x45   :  { %v279_v53 = vadd.f32 %v1192_v7, %v208_v45  ;;  %v210_v55 = vmul.f32 %v925_v47, %v1178_v1  ;;  %v341_v56 = vmax.f32 %v277_v48, 0.0  ;;  %v929_v58 = vunpack.c.h.bf16 %v1120_v39 }
  0x46   :  { %v342_v57 = vmax.f32 %v278_v50, 0.0  ;;  %v211_v59 = vmul.f32 %v928_v51, %v1178_v1  ;;  %1147 = vst [vmem:[%s1505_s3 + $0xd8] sm:$0xff] %v1068_v52   ;;  %v280_v61 = vadd.f32 %v1192_v7, %v209_v54 }
  0x47   :  { %v343_v60 = vmax.f32 %v279_v53, 0.0  ;;  %v281_v62 = vadd.f32 %v1192_v7, %v210_v55  ;;  %v1073_v63 = vpack.c.bf16 %v341_v56, %v340_v49  ;;  %v212_v0 = vmul.f32 %v929_v58, %v1178_v1 }
  0x48   :  { %v282_v2 = vadd.f32 %v1192_v7, %v211_v59  ;;  %v344_v4 = vmax.f32 %v280_v61, 0.0 }
  0x49   :  { %v1078_v3 = vpack.c.bf16 %v343_v60, %v342_v57  ;;  %v345_v5 = vmax.f32 %v281_v62, 0.0  ;;  %1148 = vst [vmem:[%s1505_s3 + $0xe0] sm:$0xff] %v1073_v63   ;;  %v283_v6 = vadd.f32 %v1192_v7, %v212_v0 }
  0x4a   :  { %v346_v8 = vmax.f32 %v282_v2, 0.0 }
  0x4b   :  { %1149 = vst [vmem:[%s1505_s3 + $0xe8] sm:$0xff] %v1078_v3   ;;  %v1083_v9 = vpack.c.bf16 %v345_v5, %v344_v4  ;;  %v347_v10 = vmax.f32 %v283_v6, 0.0 }
  0x4d   :  { %1150 = vst [vmem:[%s1505_s3 + $0xf0] sm:$0xff] %v1083_v9   ;;  %v1088_v1 = vpack.c.bf16 %v347_v10, %v346_v8 }
  0x4f   :  { %1151 = vst [vmem:[%s1505_s3 + $0xf8] sm:$0xff] %v1088_v1  }

// kernel: point_pillars_forward.21
= control target key start
LH: loop header
LB: loop body
LE: loop exit
PB: predicated region body
PF: predicated region fallthrough
CT: control target
= control target key end

     0   :  { %s422_s0 = inlined_call_operand.vmem [shape: bf16[128,128], index: 0, kind: input, shape index: {}]   ;;  %s423_s1 = inlined_call_operand.vmem [shape: f32[1,128], index: 1, kind: input, shape index: {}]   ;;  %s424_s2 = inlined_call_operand.vmem [shape: f32[1,128], index: 2, kind: input, shape index: {}]   ;;  %s425_s3 = inlined_call_operand.vmem [shape: bf16[128,128], index: 3, kind: output, shape index: {}]  }
   0x1   :  { %v227_v0 = vld [vmem:[%s422_s0] sm:$0xff]   ;;  %v298_v4 = vld [vmem:[%s422_s0 + $0x8] sm:$0xff]   ;;  %v299_v5 = vld [vmem:[%s422_s0 + $0x10] sm:$0xff]  }
   0x2   :  { %v338_v1 = vld [vmem:[%s423_s1] ss:$0 sm:$0xff]  ;;  %v228_v2 = vunpack.c.l.bf16 %v227_v0  ;;  %v229_v3 = vunpack.c.h.bf16 %v227_v0  ;;  %v300_v6 = vld [vmem:[%s422_s0 + $0x18] sm:$0xff]   ;;  %v232_v8 = vunpack.c.l.bf16 %v298_v4  ;;  %v233_v9 = vunpack.c.h.bf16 %v298_v4  ;;  %v302_v33 = vld [vmem:[%s422_s0 + $0x28] sm:$0xff]  }
   0x3   :  { %v352_v7 = vld [vmem:[%s424_s2] ss:$0 sm:$0xff]  ;;  %v236_v10 = vunpack.c.l.bf16 %v299_v5  ;;  %v237_v11 = vunpack.c.h.bf16 %v299_v5  ;;  %v240_v14 = vunpack.c.l.bf16 %v300_v6  ;;  %v241_v15 = vunpack.c.h.bf16 %v300_v6  ;;  %v303_v38 = vld [vmem:[%s422_s0 + $0x30] sm:$0xff]   ;;  %v304_v43 = vld [vmem:[%s422_s0 + $0x38] sm:$0xff]  }
   0x4   :  { %v53_v12 = vmul.f32 %v228_v2, %v338_v1  ;;  %v54_v13 = vmul.f32 %v229_v3, %v338_v1  ;;  %v55_v16 = vmul.f32 %v232_v8, %v338_v1  ;;  %v56_v17 = vmul.f32 %v233_v9, %v338_v1  ;;  %v301_v28 = vld [vmem:[%s422_s0 + $0x20] sm:$0xff]  }
   0x5   :  { %v57_v18 = vmul.f32 %v236_v10, %v338_v1  ;;  %v58_v19 = vmul.f32 %v237_v11, %v338_v1  ;;  %v59_v22 = vmul.f32 %v240_v14, %v338_v1  ;;  %v60_v23 = vmul.f32 %v241_v15, %v338_v1 }
   0x6   :  { %v76_v20 = vadd.f32 %v352_v7, %v53_v12  ;;  %v77_v21 = vadd.f32 %v352_v7, %v54_v13  ;;  %v78_v24 = vadd.f32 %v352_v7, %v55_v16  ;;  %v79_v25 = vadd.f32 %v352_v7, %v56_v17 }
   0x7   :  { %v80_v26 = vadd.f32 %v352_v7, %v57_v18  ;;  %v81_v27 = vadd.f32 %v352_v7, %v58_v19  ;;  %v82_v31 = vadd.f32 %v352_v7, %v59_v22  ;;  %v83_v32 = vadd.f32 %v352_v7, %v60_v23 }
   0x8   :  { %v92_v29 = vmax.f32 %v76_v20, 0.0  ;;  %v93_v30 = vmax.f32 %v77_v21, 0.0  ;;  %v94_v34 = vmax.f32 %v78_v24, 0.0  ;;  %v95_v35 = vmax.f32 %v79_v25, 0.0 }
   0x9   :  { %v96_v36 = vmax.f32 %v80_v26, 0.0  ;;  %v97_v37 = vmax.f32 %v81_v27, 0.0  ;;  %v98_v40 = vmax.f32 %v82_v31, 0.0  ;;  %v99_v41 = vmax.f32 %v83_v32, 0.0 }
   0xa   :  { %v261_v39 = vpack.c.bf16 %v93_v30, %v92_v29  ;;  %v244_v42 = vunpack.c.l.bf16 %v301_v28  ;;  %v266_v44 = vpack.c.bf16 %v95_v35, %v94_v34  ;;  %v245_v46 = vunpack.c.h.bf16 %v301_v28 }
   0xb   :  { %v271_v45 = vpack.c.bf16 %v97_v37, %v96_v36  ;;  %v248_v47 = vunpack.c.l.bf16 %v302_v33  ;;  %v276_v48 = vpack.c.bf16 %v99_v41, %v98_v40  ;;  %v249_v50 = vunpack.c.h.bf16 %v302_v33 }
   0xc   :  { %262 = vst [vmem:[%s425_s3] sm:$0xff] %v261_v39   ;;  %v61_v49 = vmul.f32 %v244_v42, %v338_v1  ;;  %v252_v51 = vunpack.c.l.bf16 %v303_v38  ;;  %305 = vst [vmem:[%s425_s3 + $0x8] sm:$0xff] %v266_v44   ;;  %v62_v52 = vmul.f32 %v245_v46, %v338_v1  ;;  %v253_v54 = vunpack.c.h.bf16 %v303_v38 }
   0xd   :  { %306 = vst [vmem:[%s425_s3 + $0x10] sm:$0xff] %v271_v45   ;;  %v63_v53 = vmul.f32 %v248_v47, %v338_v1  ;;  %v256_v55 = vunpack.c.l.bf16 %v304_v43  ;;  %307 = vst [vmem:[%s425_s3 + $0x18] sm:$0xff] %v276_v48   ;;  %v64_v57 = vmul.f32 %v249_v50, %v338_v1  ;;  %v257_v59 = vunpack.c.h.bf16 %v304_v43 }
   0xe   :  { %v84_v56 = vadd.f32 %v352_v7, %v61_v49  ;;  %v65_v58 = vmul.f32 %v252_v51, %v338_v1  ;;  %v85_v60 = vadd.f32 %v352_v7, %v62_v52  ;;  %v66_v62 = vmul.f32 %v253_v54, %v338_v1 }
   0xf   :  { %v86_v61 = vadd.f32 %v352_v7, %v63_v53  ;;  %v67_v63 = vmul.f32 %v256_v55, %v338_v1  ;;  %v87_v2 = vadd.f32 %v352_v7, %v64_v57  ;;  %v68_v4 = vmul.f32 %v257_v59, %v338_v1 }
  0x10   :  { %v100_v0 = vmax.f32 %v84_v56, 0.0  ;;  %v88_v3 = vadd.f32 %v352_v7, %v65_v58  ;;  %v101_v5 = vmax.f32 %v85_v60, 0.0  ;;  %v89_v8 = vadd.f32 %v352_v7, %v66_v62 }
  0x11   :  { %v102_v6 = vmax.f32 %v86_v61, 0.0  ;;  %v90_v9 = vadd.f32 %v352_v7, %v67_v63  ;;  %v103_v10 = vmax.f32 %v87_v2, 0.0  ;;  %v91_v12 = vadd.f32 %v352_v7, %v68_v4 }
  0x12   :  { %v104_v11 = vmax.f32 %v88_v3, 0.0  ;;  %v281_v13 = vpack.c.bf16 %v101_v5, %v100_v0  ;;  %v105_v14 = vmax.f32 %v89_v8, 0.0 }
  0x13   :  { %v106_v15 = vmax.f32 %v90_v9, 0.0  ;;  %v286_v16 = vpack.c.bf16 %v103_v10, %v102_v6  ;;  %v107_v17 = vmax.f32 %v91_v12, 0.0 }
  0x14   :  { %308 = vst [vmem:[%s425_s3 + $0x20] sm:$0xff] %v281_v13   ;;  %v291_v1 = vpack.c.bf16 %v105_v14, %v104_v11 }
  0x15   :  { %309 = vst [vmem:[%s425_s3 + $0x28] sm:$0xff] %v286_v16   ;;  %v296_v18 = vpack.c.bf16 %v107_v17, %v106_v15 }
  0x16   :  { %310 = vst [vmem:[%s425_s3 + $0x30] sm:$0xff] %v291_v1  }
  0x17   :  { %311 = vst [vmem:[%s425_s3 + $0x38] sm:$0xff] %v296_v18  }

// kernel: point_pillars_forward.20
= control target key start
LH: loop header
LB: loop body
LE: loop exit
PB: predicated region body
PF: predicated region fallthrough
CT: control target
= control target key end

     0   :  { %vm808_vm0 = vcmask 523264   ;;  %vm1468_vm1 = vcmask 519168   ;;  %vm1671_vm2 = vcmask 1040384   ;;  %vm1673_vm3 = vcmask 517120   ;;  %s3117_s1 = inlined_call_operand.vmem [shape: bf16[576,64], index: 1, kind: input, shape index: {}]   ;;  %s3118_s0 = inlined_call_operand.vmem [shape: bf16[256,576], index: 0, kind: input, shape index: {}]   ;;  %s3119_s2 = inlined_call_operand.vmem [shape: f32[1,64], index: 2, kind: input, shape index: {}]   ;;  %s3120_s3 = inlined_call_operand.vmem [shape: bf16[256,64], index: 3, kind: output, shape index: {0}]   ;;  %s3121_s4 = inlined_call_operand.vmem [shape: f32[1,2,64], index: 4, kind: output, shape index: {1}]  }
   0x1   :  { %v2180_v0 = vld [vmem:[%s3117_s1 + $0x40] sm:$0xff]   ;;  %v2182_v2 = vld [vmem:[%s3117_s1 + $0x48] sm:$0xff]   ;;  %v2184_v4 = vld [vmem:[%s3117_s1 + $0x50] sm:$0xff]  }
   0x2   :  { %v2181_v1 = vld [vmem:[%s3117_s1] sm:$0xff]   ;;  %1880 = vmatprep.subr.bf16.mxu0 %v2180_v0  ;;  %2164 = vmatprep.subr.bf16.mxu1 %v2180_v0  ;;  %v2183_v3 = vld [vmem:[%s3117_s1 + $0x8] sm:$0xff]   ;;  %v2185_v5 = vld [vmem:[%s3117_s1 + $0x10] sm:$0xff]  }
   0x3   :  { %1881 = vmatpush3.bf16.msra.mxu0 %v2181_v1  ;;  %2172 = vmatpush3.bf16.msra.mxu1 %v2181_v1  ;;  %v2186_v6 = vld [vmem:[%s3117_s1 + $0x58] sm:$0xff]   ;;  %v2188_v8 = vld [vmem:[%s3117_s1 + $0x60] sm:$0xff]   ;;  %v2190_v10 = vld [vmem:[%s3117_s1 + $0x68] sm:$0xff]  }
   0x4   :  { %1882 = vmatprep.subr.bf16.mxu0 %v2182_v2  ;;  %2165 = vmatprep.subr.bf16.mxu1 %v2182_v2  ;;  %v2187_v7 = vld [vmem:[%s3117_s1 + $0x18] sm:$0xff]   ;;  %v2189_v9 = vld [vmem:[%s3117_s1 + $0x20] sm:$0xff]   ;;  %v2191_v13 = vld [vmem:[%s3117_s1 + $0x28] sm:$0xff]  }
   0x5   :  { %v2198_v11 = vld [vmem:[%s3118_s0 + $0x4] ss:$20 sps:$4 sm:$0xff]   ;;  %v2192_v14 = vld [vmem:[%s3117_s1 + $0x70] sm:$0xff]   ;;  %v2205_v23 = vld [vmem:[%s3117_s1 + $0xc8] sm:$0xff]  }
   0x6   :  { %v2201_v12 = vld [vmem:[%s3118_s0 + $0x1e4] ss:$20 sps:$4 sm:$0xff]   ;;  %889 = vmatprep.mubr.bf16.mxu0 %v2198_v11  ;;  %v2193_v15 = vld [vmem:[%s3117_s1 + $0x30] sm:$0xff]   ;;  %v2207_v24 = vld [vmem:[%s3118_s0 + $0x2c] ss:$20 sps:$4 sm:$0xff]  }
   0x7   :  { %1883 = vmatpush3.bf16.msra.mxu0 %v2183_v3  ;;  %2173 = vmatpush3.bf16.msra.mxu1 %v2183_v3  ;;  %v2194_v16 = vld [vmem:[%s3117_s1 + $0x78] sm:$0xff]   ;;  %v2202_v18 = vld [vmem:[%s3117_s1 + $0xc0] sm:$0xff]   ;;  %v2206_v26 = vld [vmem:[%s3117_s1 + $0x88] sm:$0xff]  }
   0x8   :  { %1884 = vmatprep.subr.bf16.mxu0 %v2184_v4  ;;  %2166 = vmatprep.subr.bf16.mxu1 %v2184_v4  ;;  %v2195_v17 = vld [vmem:[%s3117_s1 + $0x38] sm:$0xff]   ;;  %v2203_v19 = vld [vmem:[%s3117_s1 + $0x100] sm:$0xff]   ;;  %v2213_v28 = vld [vmem:[%s3117_s1 + $0xd0] sm:$0xff]  }
   0x9   :  { %985 = vmatprep.mubr.bf16.mxu1 %v2201_v12  ;;  %v2196_v20 = vld [vmem:[%s3118_s0] ss:$20 sps:$4 sm:$0xff]   ;;  %v2211_v27 = vld [vmem:[%s3118_s0 + $0x28] ss:$20 sps:$4 sm:$0xff]   ;;  %v2221_v36 = vld [vmem:[%s3118_s0 + $0x50] ss:$20 sps:$4 sm:$0xff]  }
   0xa   :  { %v2199_v21 = vld [vmem:[%s3118_s0 + $0x1e0] ss:$20 sps:$4 sm:$0xff]   ;;  %v2212_v29 = vld [vmem:[%s3118_s0 + $0x208] ss:$20 sps:$4 sm:$0xff]   ;;  %v2222_v38 = vld [vmem:[%s3118_s0 + $0x230] ss:$20 sps:$4 sm:$0xff]  }
   0xb   :  { %1885 = vmatpush3.bf16.msra.mxu0 %v2185_v5  ;;  %2174 = vmatpush3.bf16.msra.mxu1 %v2185_v5  ;;  %v2204_v22 = vld [vmem:[%s3117_s1 + $0x80] sm:$0xff]   ;;  %v2214_v30 = vld [vmem:[%s3117_s1 + $0x90] sm:$0xff]   ;;  %v2215_v31 = vld [vmem:[%s3117_s1 + $0xd8] sm:$0xff]  }
   0xc   :  { %1886 = vmatprep.subr.bf16.mxu0 %v2186_v6  ;;  %2167 = vmatprep.subr.bf16.mxu1 %v2186_v6  ;;  %v2209_v25 = vld [vmem:[%s3118_s0 + $0x20c] ss:$20 sps:$4 sm:$0xff]   ;;  %v2217_v32 = vld [vmem:[%s3118_s0 + $0x54] ss:$20 sps:$4 sm:$0xff]   ;;  %v2216_v35 = vld [vmem:[%s3117_s1 + $0x98] sm:$0xff]  }
   0xd   :  { %v2219_v33 = vld [vmem:[%s3118_s0 + $0x234] ss:$20 sps:$4 sm:$0xff]   ;;  %v2223_v37 = vld [vmem:[%s3117_s1 + $0xe0] sm:$0xff]   ;;  %v2227_v41 = vld [vmem:[%s3118_s0 + $0x7c] ss:$20 sps:$4 sm:$0xff]  }
   0xe   :  { %v2234_v34 = vld [vmem:[%s3117_s1 + $0x108] sm:$0xff]   ;;  %v2224_v39 = vld [vmem:[%s3117_s1 + $0xa0] sm:$0xff]   ;;  %v2229_v42 = vld [vmem:[%s3118_s0 + $0x25c] ss:$20 sps:$4 sm:$0xff]  }
   0xf   :  { %1887 = vmatpush3.bf16.msra.mxu0 %v2187_v7  ;;  %2175 = vmatpush3.bf16.msra.mxu1 %v2187_v7  ;;  %v2225_v40 = vld [vmem:[%s3117_s1 + $0xe8] sm:$0xff]   ;;  %v2233_v46 = vld [vmem:[%s3117_s1 + $0xf0] sm:$0xff]   ;;  %v2236_v49 = vld [vmem:[%s3117_s1 + $0xf8] sm:$0xff]  }
  0x10   :  { %1888 = vmatprep.subr.bf16.mxu0 %v2188_v8  ;;  %2168 = vmatprep.subr.bf16.mxu1 %v2188_v8  ;;  %v2226_v43 = vld [vmem:[%s3117_s1 + $0xa8] sm:$0xff]   ;;  %v2256_v47 = vld [vmem:[%s3117_s1 + $0x110] sm:$0xff]   ;;  %v2238_v50 = vld [vmem:[%s3118_s0 + $0xa4] ss:$20 sps:$4 sm:$0xff]  }
  0x11   :  { %v2231_v44 = vld [vmem:[%s3118_s0 + $0x78] ss:$20 sps:$4 sm:$0xff]   ;;  %v2235_v48 = vld [vmem:[%s3117_s1 + $0xb0] sm:$0xff]   ;;  %v2240_v53 = vld [vmem:[%s3118_s0 + $0x8] ss:$20 sps:$4 sm:$0xff]  }
  0x12   :  { %v2232_v45 = vld [vmem:[%s3118_s0 + $0x258] ss:$20 sps:$4 sm:$0xff]   ;;  %v2243_v54 = vld [vmem:[%s3118_s0 + $0xa0] ss:$20 sps:$4 sm:$0xff]   ;;  %v2248_v58 = vld [vmem:[%s3118_s0 + $0xc8] ss:$20 sps:$4 sm:$0xff]  }
  0x13   :  { %1889 = vmatpush3.bf16.msra.mxu0 %v2189_v9  ;;  %2176 = vmatpush3.bf16.msra.mxu1 %v2189_v9  ;;  %v2242_v51 = vld [vmem:[%s3118_s0 + $0xc] ss:$20 sps:$4 sm:$0xff]   ;;  %v2237_v52 = vld [vmem:[%s3117_s1 + $0xb8] sm:$0xff]   ;;  %v2246_v57 = vld [vmem:[%s3118_s0 + $0x34] ss:$20 sps:$4 sm:$0xff]  }
  0x14   :  { %1890 = vmatprep.subr.bf16.mxu0 %v2190_v10  ;;  %2169 = vmatprep.subr.bf16.mxu1 %v2190_v10  ;;  %v2244_v55 = vld [vmem:[%s3118_s0 + $0xcc] ss:$20 sps:$4 sm:$0xff]   ;;  %v2275_v56 = vld [vmem:[%s3117_s1 + $0x118] sm:$0xff]   ;;  %v2249_v59 = vld [vmem:[%s3118_s0 + $0x30] ss:$20 sps:$4 sm:$0xff]  }
  0x15   :  { %v2250_v60 = vld [vmem:[%s3118_s0 + $0xf4] ss:$20 sps:$4 sm:$0xff]   ;;  %v2252_v61 = vld [vmem:[%s3118_s0 + $0x5c] ss:$20 sps:$4 sm:$0xff]   ;;  %v2255_v63 = vld [vmem:[%s3118_s0 + $0x58] ss:$20 sps:$4 sm:$0xff]  }
  0x16   :  { %v2254_v62 = vld [vmem:[%s3118_s0 + $0xf0] ss:$20 sps:$4 sm:$0xff]   ;;  %v2261_v2 = vld [vmem:[%s3118_s0 + $0x118] ss:$20 sps:$4 sm:$0xff]   ;;  %v2262_v3 = vld [vmem:[%s3118_s0 + $0x80] ss:$20 sps:$4 sm:$0xff]  }
  0x17   :  { %1891 = vmatpush3.bf16.msra.mxu0 %v2191_v13  ;;  %2177 = vmatpush3.bf16.msra.mxu1 %v2191_v13  ;;  %v2257_v0 = vld [vmem:[%s3118_s0 + $0x11c] ss:$20 sps:$4 sm:$0xff]   ;;  %v2259_v1 = vld [vmem:[%s3118_s0 + $0x84] ss:$20 sps:$4 sm:$0xff]   ;;  %v2265_v5 = vld [vmem:[%s3118_s0 + $0xac] ss:$20 sps:$4 sm:$0xff]  }
  0x18   :  { %1892 = vmatprep.subr.bf16.mxu0 %v2192_v14  ;;  %2170 = vmatprep.subr.bf16.mxu1 %v2192_v14  ;;  %v2263_v4 = vld [vmem:[%s3118_s0 + $0x144] ss:$20 sps:$4 sm:$0xff]   ;;  %v2267_v6 = vld [vmem:[%s3118_s0 + $0x140] ss:$20 sps:$4 sm:$0xff]   ;;  %v2268_v7 = vld [vmem:[%s3118_s0 + $0xa8] ss:$20 sps:$4 sm:$0xff]  }
  0x19   :  { %v2269_v8 = vld [vmem:[%s3118_s0 + $0x16c] ss:$20 sps:$4 sm:$0xff]   ;;  %v2271_v9 = vld [vmem:[%s3118_s0 + $0xd4] ss:$20 sps:$4 sm:$0xff]   ;;  %v2274_v11 = vld [vmem:[%s3118_s0 + $0xd0] ss:$20 sps:$4 sm:$0xff]  }
  0x1a   :  { %v2273_v10 = vld [vmem:[%s3118_s0 + $0x168] ss:$20 sps:$4 sm:$0xff]   ;;  %v2280_v14 = vld [vmem:[%s3118_s0 + $0x190] ss:$20 sps:$4 sm:$0xff]  }
  0x1b   :  { %1893 = vmatpush3.bf16.msra.mxu0 %v2193_v15  ;;  %2178 = vmatpush3.bf16.msra.mxu1 %v2193_v15  ;;  %v2276_v12 = vld [vmem:[%s3118_s0 + $0x194] ss:$20 sps:$4 sm:$0xff]   ;;  %v2278_v13 = vld [vmem:[%s3118_s0 + $0xfc] ss:$20 sps:$4 sm:$0xff]   ;;  %v2281_v15 = vld [vmem:[%s3118_s0 + $0xf8] ss:$20 sps:$4 sm:$0xff]  }
  0x1c   :  { %1894 = vmatprep.subr.bf16.mxu0 %v2194_v16  ;;  %2171 = vmatprep.subr.bf16.mxu1 %v2194_v16  ;;  %v2282_v16 = vld [vmem:[%s3118_s0 + $0x1bc] ss:$20 sps:$4 sm:$0xff]  }
  0x1f   :  { %1895 = vmatpush3.bf16.msra.mxu0 %v2195_v17  ;;  %2179 = vmatpush3.bf16.msra.mxu1 %v2195_v17  ;;  %v2284_v17 = vld [vmem:[%s3118_s0 + $0x124] ss:$20 sps:$4 sm:$0xff]  }
  0x20   :  { %1992 = vmatprep.subr.bf16.mxu1 %v2202_v18  ;;  %2124 = vmatprep.subr.bf16.mxu0 %v2203_v19  ;;  %v2286_v18 = vld [vmem:[%s3118_s0 + $0x1b8] ss:$20 sps:$4 sm:$0xff]  }
  0x22   :  { %890 = vmatmul.mubr.bf16.vlgmr.msra.gmra.mrb[0].mxu0 %v2196_v20  ;;  %986 = vmatmul.mubr.bf16.vlgmr.msra.gmra.mrb[0].mxu1 %v2199_v21  ;;  %v2288_v20 = vld [vmem:[%s3118_s0 + $0x14c] ss:$20 sps:$4 sm:$0xff]   ;;  %v2290_v21 = vld [vmem:[%s3118_s0 + $0x10] ss:$20 sps:$4 sm:$0xff]  }
  0x23   :  { %1993 = vmatpush3.bf16.msra.mxu1 %v2204_v22  ;;  %2125 = vmatpush3.bf16.msra.mxu0 %v2203_v19  ;;  %v2287_v19 = vld [vmem:[%s3118_s0 + $0x120] ss:$20 sps:$4 sm:$0xff]   ;;  %v2291_v22 = vld [vmem:[%s3118_s0 + $0x148] ss:$20 sps:$4 sm:$0xff]  }
  0x24   :  { %1994 = vmatprep.subr.bf16.mxu1 %v2205_v23  ;;  %897 = vmatprep.mubr.bf16.mxu0 %v2207_v24  ;;  %v2292_v23 = vld [vmem:[%s3118_s0 + $0x38] ss:$20 sps:$4 sm:$0xff]   ;;  %v2293_v24 = vld [vmem:[%s3118_s0 + $0x174] ss:$20 sps:$4 sm:$0xff]  }
  0x25   :  { %993 = vmatprep.mubr.bf16.mxu1 %v2209_v25  ;;  %2126 = vmatprep.subr.bf16.mxu0 %v2234_v34  ;;  %v2295_v25 = vld [vmem:[%s3118_s0 + $0x60] ss:$20 sps:$4 sm:$0xff]  }
  0x27   :  { %1995 = vmatpush3.bf16.msra.mxu1 %v2206_v26  ;;  %2127 = vmatpush3.bf16.msra.mxu0 %v2234_v34  ;;  %v2296_v26 = vld [vmem:[%s3118_s0 + $0x170] ss:$20 sps:$4 sm:$0xff]   ;;  %v2306_v34 = vld [vmem:[%s3118_s0 + $0x1c0] ss:$20 sps:$4 sm:$0xff]  }
  0x28   :  { %1996 = vmatprep.subr.bf16.mxu1 %v2213_v28  ;;  %2128 = vmatprep.subr.bf16.mxu0 %v2256_v47  ;;  %v2298_v28 = vld [vmem:[%s3118_s0 + $0x19c] ss:$20 sps:$4 sm:$0xff]  }
  0x2a   :  { %898 = vmatmul.mubr.bf16.gmra.mrb[4].mxu0 %v2211_v27  ;;  %994 = vmatmul.mubr.bf16.gmra.mrb[4].mxu1 %v2212_v29  ;;  %v2297_v27 = vld [vmem:[%s3118_s0 + $0x88] ss:$20 sps:$4 sm:$0xff]   ;;  %v2300_v29 = vld [vmem:[%s3118_s0 + $0xb0] ss:$20 sps:$4 sm:$0xff]  }
  0x2b   :  { %1997 = vmatpush3.bf16.msra.mxu1 %v2214_v30  ;;  %905 = vmatprep.mubr.bf16.mxu0 %v2217_v32  ;;  %v2301_v30 = vld [vmem:[%s3118_s0 + $0x198] ss:$20 sps:$4 sm:$0xff]  }
  0x2c   :  { %1998 = vmatprep.subr.bf16.mxu1 %v2215_v31  ;;  %1001 = vmatprep.mubr.bf16.mxu1 %v2219_v33  ;;  %v2302_v31 = vld [vmem:[%s3118_s0 + $0xd8] ss:$20 sps:$4 sm:$0xff]   ;;  %v2305_v33 = vld [vmem:[%s3118_s0 + $0x100] ss:$20 sps:$4 sm:$0xff]  }
  0x2d   :  { %2129 = vmatpush3.bf16.msra.mxu0 %v2256_v47  ;;  %v2303_v32 = vld [vmem:[%s3118_s0 + $0x1c4] ss:$20 sps:$4 sm:$0xff]  }
  0x2e   :  { %2130 = vmatprep.subr.bf16.mxu0 %v2275_v56  ;;  %v2322_v47 = vld [vmem:[%s3118_s0 + $0x218] ss:$20 sps:$4 sm:$0xff]  }
  0x2f   :  { %1999 = vmatpush3.bf16.msra.mxu1 %v2216_v35  ;;  %v2307_v35 = vld [vmem:[%s3118_s0 + $0x128] ss:$20 sps:$4 sm:$0xff]  }
  0x30   :  { %2000 = vmatprep.subr.bf16.mxu1 %v2223_v37  ;;  %v2310_v37 = vld [vmem:[%s3118_s0 + $0x150] ss:$20 sps:$4 sm:$0xff]  }
  0x31   :  { %2131 = vmatpush3.bf16.msra.mxu0 %v2275_v56 }
  0x32   :  { %906 = vmatmul.mubr.bf16.gmra.mrb[8].mxu0 %v2221_v36  ;;  %1002 = vmatmul.mubr.bf16.gmra.mrb[8].mxu1 %v2222_v38  ;;  %v2308_v36 = vld [vmem:[%s3118_s0 + $0x1ec] ss:$20 sps:$4 sm:$0xff]   ;;  %v2311_v38 = vld [vmem:[%s3118_s0 + $0x1e8] ss:$20 sps:$4 sm:$0xff]  }
  0x33   :  { %2001 = vmatpush3.bf16.msra.mxu1 %v2224_v39  ;;  %913 = vmatprep.mubr.bf16.mxu0 %v2227_v41  ;;  %v2312_v39 = vld [vmem:[%s3118_s0 + $0x178] ss:$20 sps:$4 sm:$0xff]   ;;  %v2315_v41 = vld [vmem:[%s3118_s0 + $0x1a0] ss:$20 sps:$4 sm:$0xff]  }
  0x34   :  { %2002 = vmatprep.subr.bf16.mxu1 %v2225_v40  ;;  %1009 = vmatprep.mubr.bf16.mxu1 %v2229_v42  ;;  %v2313_v40 = vld [vmem:[%s3118_s0 + $0x214] ss:$20 sps:$4 sm:$0xff]   ;;  %v2316_v42 = vld [vmem:[%s3118_s0 + $0x210] ss:$20 sps:$4 sm:$0xff]  }
  0x37   :  { %2003 = vmatpush3.bf16.msra.mxu1 %v2226_v43  ;;  %v2317_v43 = vld [vmem:[%s3118_s0 + $0x1c8] ss:$20 sps:$4 sm:$0xff]  }
  0x38   :  { %2004 = vmatprep.subr.bf16.mxu1 %v2233_v46  ;;  %v2321_v46 = vld [vmem:[%s3118_s0 + $0x238] ss:$20 sps:$4 sm:$0xff]  }
  0x3a   :  { %914 = vmatmul.mubr.bf16.gmra.mrb[12].mxu0 %v2231_v44  ;;  %1010 = vmatmul.mubr.bf16.gmra.mrb[12].mxu1 %v2232_v45  ;;  %v2318_v44 = vld [vmem:[%s3118_s0 + $0x23c] ss:$20 sps:$4 sm:$0xff]  }
  0x3b   :  { %2005 = vmatpush3.bf16.msra.mxu1 %v2235_v48  ;;  %921 = vmatprep.mubr.bf16.mxu0 %v2238_v50  ;;  %v2320_v45 = vld [vmem:[%s3118_s0 + $0x1f0] ss:$20 sps:$4 sm:$0xff]   ;;  %v2326_v50 = vld [vmem:[%s3118_s0 + $0x260] ss:$20 sps:$4 sm:$0xff]  }
  0x3c   :  { %2006 = vmatprep.subr.bf16.mxu1 %v2236_v49  ;;  %1050 = vmatprep.mubr.bf16.mxu1 %v2242_v51  ;;  %v2323_v48 = vld [vmem:[%s3118_s0 + $0x264] ss:$20 sps:$4 sm:$0xff]   ;;  %v2325_v49 = vld [vmem:[%s3118_s0 + $0x240] ss:$20 sps:$4 sm:$0xff]   ;;  %v2327_v51 = vld [vmem:[%s3118_s0 + $0x268] ss:$20 sps:$4 sm:$0xff]  }
  0x3f   :  { %2007 = vmatpush3.bf16.msra.mxu1 %v2237_v52 }
  0x42   :  { %922 = vmatmul.mubr.bf16.gmra.mrb[16].mxu0 %v2243_v54  ;;  %1051 = vmatmul.mubr.bf16.vlgmr.msra.gmra.mrb[16].mxu1 %v2240_v53 }
  0x43   :  { %929 = vmatprep.mubr.bf16.mxu0 %v2244_v55  ;;  %1058 = vmatprep.mubr.bf16.mxu1 %v2246_v57 }
  0x4a   :  { %930 = vmatmul.mubr.bf16.gmra.mrb[20].mxu0 %v2248_v58  ;;  %1059 = vmatmul.mubr.bf16.gmra.mrb[20].mxu1 %v2249_v59 }
  0x4b   :  { %937 = vmatprep.mubr.bf16.mxu0 %v2250_v60  ;;  %1066 = vmatprep.mubr.bf16.mxu1 %v2252_v61 }
  0x52   :  { %938 = vmatmul.mubr.bf16.gmra.mrb[24].mxu0 %v2254_v62  ;;  %1067 = vmatmul.mubr.bf16.gmra.mrb[24].mxu1 %v2255_v63 }
  0x53   :  { %945 = vmatprep.mubr.bf16.mxu0 %v2257_v0  ;;  %1074 = vmatprep.mubr.bf16.mxu1 %v2259_v1 }
  0x5a   :  { %946 = vmatmul.mubr.bf16.gmra.mrb[28].mxu0 %v2261_v2  ;;  %1075 = vmatmul.mubr.bf16.gmra.mrb[28].mxu1 %v2262_v3 }
  0x5b   :  { %953 = vmatprep.mubr.bf16.mxu0 %v2263_v4  ;;  %1082 = vmatprep.mubr.bf16.mxu1 %v2265_v5 }
  0x62   :  { %954 = vmatmul.mubr.bf16.gmra.mrb[32].mxu0 %v2267_v6  ;;  %1083 = vmatmul.mubr.bf16.gmra.mrb[32].mxu1 %v2268_v7 }
  0x63   :  { %961 = vmatprep.mubr.bf16.mxu0 %v2269_v8  ;;  %1090 = vmatprep.mubr.bf16.mxu1 %v2271_v9 }
  0x6a   :  { %962 = vmatmul.mubr.bf16.gmra.mrb[36].mxu0 %v2273_v10  ;;  %1091 = vmatmul.mubr.bf16.gmra.mrb[36].mxu1 %v2274_v11 }
  0x6b   :  { %969 = vmatprep.mubr.bf16.mxu0 %v2276_v12  ;;  %1098 = vmatprep.mubr.bf16.mxu1 %v2278_v13 }
  0x72   :  { %970 = vmatmul.mubr.bf16.gmra.mrb[40].mxu0 %v2280_v14  ;;  %1099 = vmatmul.mubr.bf16.gmra.mrb[40].mxu1 %v2281_v15 }
  0x73   :  { %977 = vmatprep.mubr.bf16.mxu0 %v2282_v16  ;;  %1106 = vmatprep.mubr.bf16.mxu1 %v2284_v17 }
  0x7a   :  { %978 = vmatmul.mubr.bf16.gmra.mrb[44].mxu0 %v2286_v18  ;;  %1107 = vmatmul.mubr.bf16.gmra.mrb[44].mxu1 %v2287_v19 }
  0x7b   :  { %1114 = vmatprep.mubr.bf16.mxu1 %v2288_v20  ;;  %2132 = vmatprep.mubr.msk.bf16.mxu0 %vm808_vm0, %v2290_v21 }
  0x82   :  { %1115 = vmatmul.mubr.bf16.gmra.mrb[48].mxu1 %v2291_v22  ;;  %2133 = vmatmul.mubr.msk.bf16.vlgmr.msra.gmra.mrb[48].mxu0 %vm808_vm0, %v2292_v23 }
  0x83   :  { %1122 = vmatprep.mubr.bf16.mxu1 %v2293_v24  ;;  %2136 = vmatprep.mubr.msk.bf16.mxu0 %vm808_vm0, %v2295_v25 }
  0x8a   :  { %1123 = vmatmul.mubr.bf16.gmra.mrb[52].mxu1 %v2296_v26  ;;  %2137 = vmatmul.mubr.msk.bf16.gmra.mrb[52].mxu0 %vm808_vm0, %v2297_v27 }
  0x8b   :  { %1130 = vmatprep.mubr.bf16.mxu1 %v2298_v28  ;;  %2140 = vmatprep.mubr.msk.bf16.mxu0 %vm808_vm0, %v2300_v29 }
  0x92   :  { %1131 = vmatmul.mubr.bf16.gmra.mrb[56].mxu1 %v2301_v30  ;;  %2141 = vmatmul.mubr.msk.bf16.gmra.mrb[56].mxu0 %vm808_vm0, %v2302_v31 }
  0x93   :  { %1138 = vmatprep.mubr.bf16.mxu1 %v2303_v32  ;;  %2144 = vmatprep.mubr.msk.bf16.mxu0 %vm808_vm0, %v2305_v33 }
  0x9a   :  { %1139 = vmatmul.mubr.bf16.gmra.mrb[60].mxu1 %v2306_v34  ;;  %2145 = vmatmul.mubr.msk.bf16.gmra.mrb[60].mxu0 %vm808_vm0, %v2307_v35 }
  0x9b   :  { %1146 = vmatprep.mubr.bf16.mxu1 %v2308_v36  ;;  %2148 = vmatprep.mubr.msk.bf16.mxu0 %vm808_vm0, %v2310_v37  ;;  %v2736_v36 = vld [vmem:[%s3119_s2] ss:$0 sm:$0xff] }
  0xa2   :  { %1147 = vmatmul.mubr.bf16.gmra.mrb[64].mxu1 %v2311_v38  ;;  %2149 = vmatmul.mubr.msk.bf16.gmra.mrb[64].mxu0 %vm808_vm0, %v2312_v39 }
  0xa3   :  { %1154 = vmatprep.mubr.bf16.mxu1 %v2313_v40  ;;  %2152 = vmatprep.mubr.msk.bf16.mxu0 %vm808_vm0, %v2315_v41 }
  0xaa   :  { %1155 = vmatmul.mubr.bf16.gmra.mrb[68].mxu1 %v2316_v42  ;;  %2153 = vmatmul.mubr.msk.bf16.gmra.mrb[68].mxu0 %vm808_vm0, %v2317_v43 }
  0xab   :  { %1162 = vmatprep.mubr.bf16.mxu1 %v2318_v44  ;;  %2156 = vmatprep.mubr.msk.bf16.mxu0 %vm808_vm0, %v2320_v45 }
  0xb2   :  { %1163 = vmatmul.mubr.bf16.gmra.mrb[72].mxu1 %v2321_v46  ;;  %2157 = vmatmul.mubr.msk.bf16.gmra.mrb[72].mxu0 %vm808_vm0, %v2322_v47 }
  0xb3   :  { %1170 = vmatprep.mubr.bf16.mxu1 %v2323_v48  ;;  %2160 = vmatprep.mubr.msk.bf16.mxu0 %vm808_vm0, %v2325_v49 }
  0xba   :  { %1171 = vmatmul.mubr.bf16.gmra.mrb[76].mxu1 %v2326_v50  ;;  %2161 = vmatmul.mubr.msk.bf16.gmra.mrb[76].mxu0 %vm808_vm0, %v2327_v51 }
  0xf5   :  { %v1896_v52 = vpop.f32.mrb[0].mxu0  ;;  %v1968_v53 = vpop.f32.mrb[0].mxu1 }
  0xf6   :  { %v1897_v54 = vpop.f32.mrb[1].mxu0  ;;  %v1969_v55 = vpop.f32.mrb[1].mxu1 }
  0xf7   :  { %v1898_v56 = vadd.f32 %v1897_v54, %v1896_v52  ;;  %v2717_v57 = vadd.f32 %v1969_v55, %v1968_v53  ;;  %v1899_v58 = vpop.f32.mrb[2].mxu0  ;;  %v1971_v59 = vpop.f32.mrb[2].mxu1 }
  0xf8   :  { %v1900_v60 = vpop.f32.mrb[3].mxu0  ;;  %v1972_v61 = vpop.f32.mrb[3].mxu1 }
  0xf9   :  { %v1901_v62 = vadd.f32 %v1900_v60, %v1899_v58  ;;  %v2719_v63 = vadd.f32 %v1972_v61, %v1971_v59  ;;  %v892_v42 = vadd.f32 %v1898_v56, %v2736_v36 }
  0xfb   :  { %v895_v49 = vadd.f32 %v1901_v62, %v2736_v36 }
  0xfd   :  { %v1902_v0 = vpop.f32.mrb[4].mxu0  ;;  %v1974_v1 = vpop.f32.mrb[4].mxu1 }
  0xfe   :  { %v1903_v2 = vpop.f32.mrb[5].mxu0  ;;  %v1975_v3 = vpop.f32.mrb[5].mxu1 }
  0xff   :  { %v1904_v4 = vadd.f32 %v1903_v2, %v1902_v0  ;;  %v2721_v5 = vadd.f32 %v1975_v3, %v1974_v1  ;;  %v1905_v6 = vpop.f32.mrb[6].mxu0  ;;  %v1977_v7 = vpop.f32.mrb[6].mxu1 }
 0x100   :  { %v1906_v8 = vpop.f32.mrb[7].mxu0  ;;  %v1978_v9 = vpop.f32.mrb[7].mxu1 }
 0x101   :  { %v1907_v10 = vadd.f32 %v1906_v8, %v1905_v6  ;;  %v2723_v11 = vadd.f32 %v1978_v9, %v1977_v7  ;;  %v900_v59 = vadd.f32 %v1904_v4, %v2736_v36 }
 0x103   :  { %v903_v3 = vadd.f32 %v1907_v10, %v2736_v36 }
 0x105   :  { %v1908_v12 = vpop.f32.mrb[8].mxu0  ;;  %v1980_v13 = vpop.f32.mrb[8].mxu1 }
 0x106   :  { %v1909_v14 = vpop.f32.mrb[9].mxu0  ;;  %v1981_v15 = vpop.f32.mrb[9].mxu1 }
 0x107   :  { %v1910_v16 = vadd.f32 %v1909_v14, %v1908_v12  ;;  %v2725_v17 = vadd.f32 %v1981_v15, %v1980_v13  ;;  %v1911_v18 = vpop.f32.mrb[10].mxu0  ;;  %v1983_v19 = vpop.f32.mrb[10].mxu1 }
 0x108   :  { %v1912_v20 = vpop.f32.mrb[11].mxu0  ;;  %v1984_v21 = vpop.f32.mrb[11].mxu1 }
 0x109   :  { %v1913_v22 = vadd.f32 %v1912_v20, %v1911_v18  ;;  %v2727_v23 = vadd.f32 %v1984_v21, %v1983_v19  ;;  %v908_v15 = vadd.f32 %v1910_v16, %v2736_v36 }
 0x10d   :  { %v1914_v24 = vpop.f32.mrb[12].mxu0  ;;  %v1986_v25 = vpop.f32.mrb[12].mxu1 }
 0x10e   :  { %v1915_v26 = vpop.f32.mrb[13].mxu0  ;;  %v1987_v27 = vpop.f32.mrb[13].mxu1 }
 0x10f   :  { %v1916_v28 = vadd.f32 %v1915_v26, %v1914_v24  ;;  %v2729_v29 = vadd.f32 %v1987_v27, %v1986_v25  ;;  %v1917_v30 = vpop.f32.mrb[14].mxu0  ;;  %v1989_v31 = vpop.f32.mrb[14].mxu1  ;;  %v911_v25 = vadd.f32 %v1913_v22, %v2736_v36 }
 0x110   :  { %v1918_v32 = vpop.f32.mrb[15].mxu0  ;;  %v1990_v33 = vpop.f32.mrb[15].mxu1 }
 0x111   :  { %v2731_v34 = vadd.f32 %v1918_v32, %v1917_v30  ;;  %v1991_v35 = vadd.f32 %v1990_v33, %v1989_v31 }
 0x113   :  { %v2739_v37 = vadd.f32 %v1991_v35, %v2736_v36 }
 0x115   :  { %v1920_v38 = vpop.f32.mrb[16].mxu0  ;;  %v2008_v39 = vpop.f32.mrb[16].mxu1 }
 0x116   :  { %v1921_v40 = vpop.f32.mrb[17].mxu0  ;;  %v2009_v41 = vpop.f32.mrb[17].mxu1 }
 0x117   :  { %v2742_v43 = vadd.f32 %v1921_v40, %v1920_v38  ;;  %v2010_v44 = vadd.f32 %v2009_v41, %v2008_v39  ;;  %v1923_v45 = vpop.f32.mrb[18].mxu0  ;;  %v2011_v46 = vpop.f32.mrb[18].mxu1  ;;  %v916_v38 = vadd.f32 %v1916_v28, %v2736_v36 }
 0x118   :  { %v1924_v47 = vpop.f32.mrb[19].mxu0  ;;  %v2012_v48 = vpop.f32.mrb[19].mxu1 }
 0x119   :  { %v2745_v50 = vadd.f32 %v1924_v47, %v1923_v45  ;;  %v2013_v51 = vadd.f32 %v2012_v48, %v2011_v46  ;;  %v2747_v52 = vadd.f32 %v2010_v44, %v892_v42  ;;  %v919_v45 = vadd.f32 %v2731_v34, %v2736_v36 }
 0x11b   :  { %v2749_v53 = vadd.f32 %v2013_v51, %v895_v49 }
 0x11d   :  { %v1926_v54 = vpop.f32.mrb[20].mxu0  ;;  %v2014_v55 = vpop.f32.mrb[20].mxu1 }
 0x11e   :  { %v1927_v58 = vpop.f32.mrb[21].mxu0  ;;  %v2015_v56 = vpop.f32.mrb[21].mxu1 }
 0x11f   :  { %v2752_v60 = vadd.f32 %v1927_v58, %v1926_v54  ;;  %v2016_v61 = vadd.f32 %v2015_v56, %v2014_v55  ;;  %v1929_v0 = vpop.f32.mrb[22].mxu0  ;;  %v2017_v1 = vpop.f32.mrb[22].mxu1  ;;  %v924_v58 = vadd.f32 %v2742_v43, %v2736_v36 }
 0x120   :  { %v1930_v2 = vpop.f32.mrb[23].mxu0  ;;  %v2018_v62 = vpop.f32.mrb[23].mxu1 }
 0x121   :  { %v2755_v6 = vadd.f32 %v1930_v2, %v1929_v0  ;;  %v2019_v7 = vadd.f32 %v2018_v62, %v2017_v1  ;;  %v2757_v8 = vadd.f32 %v2016_v61, %v900_v59  ;;  %v927_v2 = vadd.f32 %v2745_v50, %v2736_v36 }
 0x123   :  { %v2759_v9 = vadd.f32 %v2019_v7, %v903_v3 }
 0x125   :  { %v1932_v12 = vpop.f32.mrb[24].mxu0  ;;  %v2020_v13 = vpop.f32.mrb[24].mxu1 }
 0x126   :  { %v1933_v14 = vpop.f32.mrb[25].mxu0  ;;  %v2021_v4 = vpop.f32.mrb[25].mxu1 }
 0x127   :  { %v2762_v18 = vadd.f32 %v1933_v14, %v1932_v12  ;;  %v2022_v19 = vadd.f32 %v2021_v4, %v2020_v13  ;;  %v1935_v20 = vpop.f32.mrb[26].mxu0  ;;  %v2023_v21 = vpop.f32.mrb[26].mxu1 }
 0x128   :  { %v1936_v24 = vpop.f32.mrb[27].mxu0  ;;  %v2024_v10 = vpop.f32.mrb[27].mxu1 }
 0x129   :  { %v2765_v26 = vadd.f32 %v1936_v24, %v1935_v20  ;;  %v2025_v27 = vadd.f32 %v2024_v10, %v2023_v21  ;;  %v2767_v30 = vadd.f32 %v2022_v19, %v908_v15  ;;  %v932_v15 = vadd.f32 %v2752_v60, %v2736_v36 }
 0x12b   :  { %v2769_v31 = vadd.f32 %v2025_v27, %v911_v25  ;;  %v935_v25 = vadd.f32 %v2755_v6, %v2736_v36  ;;  %v943_v6 = vadd.f32 %v2765_v26, %v2736_v36 }
 0x12d   :  { %v1938_v32 = vpop.f32.mrb[28].mxu0  ;;  %v2026_v33 = vpop.f32.mrb[28].mxu1 }
 0x12e   :  { %v1939_v35 = vpop.f32.mrb[29].mxu0  ;;  %v2027_v16 = vpop.f32.mrb[29].mxu1 }
 0x12f   :  { %v2772_v39 = vadd.f32 %v1939_v35, %v1938_v32  ;;  %v2028_v40 = vadd.f32 %v2027_v16, %v2026_v33  ;;  %v1941_v41 = vpop.f32.mrb[30].mxu0  ;;  %v2029_v42 = vpop.f32.mrb[30].mxu1 }
 0x130   :  { %v1942_v44 = vpop.f32.mrb[31].mxu0  ;;  %v2030_v22 = vpop.f32.mrb[31].mxu1 }
 0x131   :  { %v2776_v46 = vadd.f32 %v1942_v44, %v1941_v41  ;;  %v2031_v47 = vadd.f32 %v2030_v22, %v2029_v42  ;;  %v2778_v48 = vadd.f32 %v2028_v40, %v916_v38  ;;  %v940_v41 = vadd.f32 %v2762_v18, %v2736_v36 }
 0x132   :  { %v948_v18 = vadd.f32 %v2772_v39, %v2736_v36  ;;  %v2822_v39 = vadd.f32 %v2717_v57, %v2736_v36 }
 0x133   :  { %v2780_v49 = vadd.f32 %v2031_v47, %v919_v45  ;;  %v951_v26 = vadd.f32 %v2776_v46, %v2736_v36 }
 0x135   :  { %v1944_v51 = vpop.f32.mrb[32].mxu0  ;;  %v2032_v54 = vpop.f32.mrb[32].mxu1 }
 0x136   :  { %v1945_v28 = vpop.f32.mrb[33].mxu0  ;;  %v2033_v55 = vpop.f32.mrb[33].mxu1 }
 0x137   :  { %v2784_v56 = vadd.f32 %v1945_v28, %v1944_v51  ;;  %v2034_v59 = vadd.f32 %v2033_v55, %v2032_v54  ;;  %v1947_v61 = vpop.f32.mrb[34].mxu0  ;;  %v2035_v0 = vpop.f32.mrb[34].mxu1 }
 0x138   :  { %v1948_v34 = vpop.f32.mrb[35].mxu0  ;;  %v2036_v1 = vpop.f32.mrb[35].mxu1 }
 0x139   :  { %v2788_v62 = vadd.f32 %v1948_v34, %v1947_v61  ;;  %v2037_v3 = vadd.f32 %v2036_v1, %v2035_v0  ;;  %v2790_v7 = vadd.f32 %v2034_v59, %v924_v58 }
 0x13b   :  { %v2792_v12 = vadd.f32 %v2037_v3, %v927_v2 }
 0x13d   :  { %v1950_v13 = vpop.f32.mrb[36].mxu0  ;;  %v2038_v14 = vpop.f32.mrb[36].mxu1 }
 0x13e   :  { %v1951_v43 = vpop.f32.mrb[37].mxu0  ;;  %v2039_v4 = vpop.f32.mrb[37].mxu1 }
 0x13f   :  { %v2796_v19 = vadd.f32 %v1951_v43, %v1950_v13  ;;  %v2040_v20 = vadd.f32 %v2039_v4, %v2038_v14  ;;  %v1953_v21 = vpop.f32.mrb[38].mxu0  ;;  %v2041_v24 = vpop.f32.mrb[38].mxu1 }
 0x140   :  { %v1954_v50 = vpop.f32.mrb[39].mxu0  ;;  %v2042_v10 = vpop.f32.mrb[39].mxu1 }
 0x141   :  { %v1955_v27 = vadd.f32 %v1954_v50, %v1953_v21  ;;  %v2043_v32 = vadd.f32 %v2042_v10, %v2041_v24  ;;  %v2800_v33 = vadd.f32 %v2040_v20, %v932_v15  ;;  %v2826_v10 = vadd.f32 %v2719_v63, %v2736_v36 }
 0x142   :  { %v2840_v63 = vadd.f32 %v2725_v17, %v2736_v36  ;;  %v964_v17 = vadd.f32 %v2796_v19, %v2736_v36 }
 0x143   :  { %v2802_v35 = vadd.f32 %v2043_v32, %v935_v25 }
 0x145   :  { %v1956_v16 = vpop.f32.mrb[40].mxu0  ;;  %v2044_v38 = vpop.f32.mrb[40].mxu1 }
 0x146   :  { %v1957_v40 = vpop.f32.mrb[41].mxu0  ;;  %v2045_v60 = vpop.f32.mrb[41].mxu1 }
 0x147   :  { %v1958_v42 = vadd.f32 %v1957_v40, %v1956_v16  ;;  %v2046_v44 = vadd.f32 %v2045_v60, %v2044_v38  ;;  %v1959_v22 = vpop.f32.mrb[42].mxu0  ;;  %v2047_v45 = vpop.f32.mrb[42].mxu1  ;;  %v2831_v16 = vadd.f32 %v2721_v5, %v2736_v36  ;;  %v2835_v38 = vadd.f32 %v2723_v11, %v2736_v36 }
 0x148   :  { %v1960_v47 = vpop.f32.mrb[43].mxu0  ;;  %v2048_v51 = vpop.f32.mrb[43].mxu1  ;;  %v956_v11 = vadd.f32 %v2784_v56, %v2736_v36 }
 0x149   :  { %v1961_v54 = vadd.f32 %v1960_v47, %v1959_v22  ;;  %v2049_v28 = vadd.f32 %v2048_v51, %v2047_v45  ;;  %v2808_v55 = vadd.f32 %v2046_v44, %v940_v41 }
 0x14b   :  { %v2810_v58 = vadd.f32 %v2049_v28, %v943_v6  ;;  %v2854_v6 = vadd.f32 %v1955_v27, %v2736_v36 }
 0x14d   :  { %v1962_v59 = vpop.f32.mrb[44].mxu0  ;;  %v2050_v61 = vpop.f32.mrb[44].mxu1 }
 0x14e   :  { %v1963_v0 = vpop.f32.mrb[45].mxu0  ;;  %v2051_v34 = vpop.f32.mrb[45].mxu1 }
 0x14f   :  { %v1964_v1 = vadd.f32 %v1963_v0, %v1962_v59  ;;  %v2052_v2 = vadd.f32 %v2051_v34, %v2050_v61  ;;  %v1965_v3 = vpop.f32.mrb[46].mxu0  ;;  %v2053_v13 = vpop.f32.mrb[46].mxu1 }
 0x150   :  { %v1966_v14 = vpop.f32.mrb[47].mxu0  ;;  %v2054_v43 = vpop.f32.mrb[47].mxu1 }
 0x151   :  { %v1967_v4 = vadd.f32 %v1966_v14, %v1965_v3  ;;  %v2055_v15 = vadd.f32 %v2054_v43, %v2053_v13  ;;  %v2816_v20 = vadd.f32 %v2052_v2, %v948_v18  ;;  %v2876_v28 = vadd.f32 %v1964_v1, %v2736_v36 }
 0x153   :  { %v2818_v21 = vadd.f32 %v2055_v15, %v951_v26  ;;  %v2879_v59 = vadd.f32 %v1967_v4, %v2736_v36 }
 0x155   :  { %v2056_v24 = vpop.f32.mrb[48].mxu1  ;;  %v2134_v50 = vpop.f32.mrb[48].mxu0 }
 0x156   :  { %v1222_v25 = vadd.f32 %v2134_v50, %v2757_v8  ;;  %v2057_v46 = vpop.f32.mrb[49].mxu1  ;;  %v1213_v32 = vpop.f32.mrb[49].mxu0  ;;  %v2844_v8 = vadd.f32 %v2727_v23, %v2736_v36  ;;  %v2857_v23 = vadd.f32 %v1958_v42, %v2736_v36  ;;  %v2873_v42 = vadd.f32 %v1961_v54, %v2736_v36 }
 0x157   :  { %v2058_v40 = vadd.f32 %v2057_v46, %v2056_v24  ;;  %v1214_v57 = vadd.f32 %v1213_v32, %v2747_v52  ;;  %v2059_v60 = vpop.f32.mrb[50].mxu1  ;;  %v2135_v41 = vpop.f32.mrb[50].mxu0  ;;  %v959_v52 = vadd.f32 %v2788_v62, %v2736_v36 }
 0x158   :  { %v1850_v44 = vpack.c.bf16 %v1222_v25, %v1222_v25  ;;  %v1225_v5 = vadd.f32 %v2135_v41, %v2759_v9  ;;  %v2060_v22 = vpop.f32.mrb[51].mxu1  ;;  %v1216_v45 = vpop.f32.mrb[51].mxu0  ;;  %v1572_v61 = vmul.f32 %v1222_v25, %v1222_v25  ;;  %v1504_v1 = vsel %vm808_vm0, %v1222_v25, 0.0 }
 0x159   :  { %v1848_v47 = vpack.c.bf16 %v1214_v57, %v1214_v57  ;;  %v2061_v51 = vadd.f32 %v2060_v22, %v2059_v60  ;;  %v1570_v56 = vmul.f32 %v1214_v57, %v1214_v57  ;;  %v1217_v62 = vadd.f32 %v1216_v45, %v2749_v53 }
 0x15a   :  { %1471 = vst.msk [vmem:[%s3120_s3 + $0x8] sm:$0xf] %vm1468_vm1, %v1850_v44  ;;  %v1851_v9 = vpack.c.bf16 %v1225_v5, %v1225_v5  ;;  %v2868_v19 = vadd.f32 %v2058_v40, %v956_v11  ;;  %v1501_v53 = vsel %vm808_vm0, %v1214_v57, 0.0  ;;  %v1573_v3 = vmul.f32 %v1225_v5, %v1225_v5 }
 0x15b   :  { %1469 = vst.msk [vmem:[%s3120_s3] sm:$0xf] %vm1468_vm1, %v1848_v47  ;;  %v2870_v27 = vadd.f32 %v2061_v51, %v959_v52  ;;  %v1849_v0 = vpack.c.bf16 %v1217_v62, %v1217_v62  ;;  %v1502_v34 = vsel %vm808_vm0, %v1217_v62, 0.0  ;;  %v1571_v18 = vmul.f32 %v1217_v62, %v1217_v62 }
 0x15c   :  { %1472 = vst.msk [vmem:[%s3120_s3 + $0xc] sm:$0xf] %vm1468_vm1, %v1851_v9  ;;  %v1503_v13 = vadd.f32 %v1502_v34, %v1501_v53  ;;  %v1602_v4 = vsel %vm808_vm0, %v1570_v56, 0.0  ;;  %v1605_v32 = vsel %vm808_vm0, %v1572_v61, 0.0  ;;  %v1506_v44 = vsel %vm808_vm0, %v1225_v5, 0.0 }
 0x15d   :  { %v2062_v54 = vpop.f32.mrb[52].mxu1  ;;  %v2138_v2 = vpop.f32.mrb[52].mxu0  ;;  %1470 = vst.msk [vmem:[%s3120_s3 + $0x4] sm:$0xf] %vm1468_vm1, %v1849_v0  ;;  %v1603_v15 = vsel %vm808_vm0, %v1571_v18, 0.0  ;;  %v1607_v9 = vsel %vm808_vm0, %v1573_v3, 0.0 }
 0x15e   :  { %v1238_v14 = vadd.f32 %v2138_v2, %v2778_v48  ;;  %v2063_v43 = vpop.f32.mrb[53].mxu1  ;;  %v1229_v26 = vpop.f32.mrb[53].mxu0  ;;  %v1505_v40 = vadd.f32 %v1504_v1, %v1503_v13  ;;  %v1604_v48 = vadd.f32 %v1603_v15, %v1602_v4 }
 0x15f   :  { %v2064_v24 = vadd.f32 %v2063_v43, %v2062_v54  ;;  %v1230_v50 = vadd.f32 %v1229_v26, %v2767_v30  ;;  %v2065_v46 = vpop.f32.mrb[54].mxu1  ;;  %v2139_v25 = vpop.f32.mrb[54].mxu0 }
 0x160   :  { %v1854_v57 = vpack.c.bf16 %v1238_v14, %v1238_v14  ;;  %v2066_v60 = vpop.f32.mrb[55].mxu1  ;;  %v1232_v41 = vpop.f32.mrb[55].mxu0  ;;  %v1606_v52 = vadd.f32 %v1605_v32, %v1604_v48  ;;  %v1507_v30 = vadd.f32 %v1506_v44, %v1505_v40  ;;  %v1241_v47 = vadd.f32 %v2139_v25, %v2780_v49 }
 0x161   :  { %v1852_v22 = vpack.c.bf16 %v1230_v50, %v1230_v50  ;;  %v1508_v45 = vsel %vm808_vm0, %v1230_v50, 0.0  ;;  %v1574_v11 = vmul.f32 %v1230_v50, %v1230_v50  ;;  %v2067_v51 = vadd.f32 %v2066_v60, %v2065_v46 }
 0x162   :  { %1475 = vst.msk [vmem:[%s3120_s3 + $0x18] sm:$0xf] %vm1468_vm1, %v1854_v57  ;;  %v1233_v56 = vadd.f32 %v1232_v41, %v2769_v31  ;;  %v2911_v62 = vadd.f32 %v2064_v24, %v964_v17  ;;  %v1576_v61 = vmul.f32 %v1238_v14, %v1238_v14  ;;  %v1509_v53 = vadd.f32 %v1508_v45, %v1507_v30 }
 0x163   :  { %1473 = vst.msk [vmem:[%s3120_s3 + $0x10] sm:$0xf] %vm1468_vm1, %v1852_v22  ;;  %v1609_v5 = vsel %vm808_vm0, %v1574_v11, 0.0  ;;  %v1608_v0 = vadd.f32 %v1607_v9, %v1606_v52  ;;  %v1855_v34 = vpack.c.bf16 %v1241_v47, %v1241_v47  ;;  %v1512_v49 = vsel %vm808_vm0, %v1238_v14, 0.0 }
 0x164   :  { %v1853_v18 = vpack.c.bf16 %v1233_v56, %v1233_v56  ;;  %v1510_v54 = vsel %vm808_vm0, %v1233_v56, 0.0  ;;  %v1575_v2 = vmul.f32 %v1233_v56, %v1233_v56  ;;  %v2921_v4 = vadd.f32 %v2067_v51, %v2854_v6 }
 0x165   :  { %v2068_v1 = vpop.f32.mrb[56].mxu1  ;;  %v2142_v3 = vpop.f32.mrb[56].mxu0  ;;  %v1610_v13 = vadd.f32 %v1609_v5, %v1608_v0  ;;  %1476 = vst.msk [vmem:[%s3120_s3 + $0x1c] sm:$0xf] %vm1468_vm1, %v1855_v34  ;;  %v1511_v31 = vadd.f32 %v1510_v54, %v1509_v53  ;;  %v1577_v14 = vmul.f32 %v1241_v47, %v1241_v47  ;;  %v1514_v60 = vsel %vm808_vm0, %v1241_v47, 0.0 }
 0x166   :  { %v1254_v17 = vadd.f32 %v2142_v3, %v2800_v33  ;;  %v2069_v43 = vpop.f32.mrb[57].mxu1  ;;  %v1245_v26 = vpop.f32.mrb[57].mxu0  ;;  %1474 = vst.msk [vmem:[%s3120_s3 + $0x14] sm:$0xf] %vm1468_vm1, %v1853_v18  ;;  %v1611_v15 = vsel %vm808_vm0, %v1575_v2, 0.0  ;;  %v1613_v33 = vsel %vm808_vm0, %v1576_v61, 0.0 }
 0x167   :  { %v2070_v24 = vadd.f32 %v2069_v43, %v2068_v1  ;;  %v1246_v50 = vadd.f32 %v1245_v26, %v2790_v7  ;;  %v2071_v46 = vpop.f32.mrb[58].mxu1  ;;  %v2143_v25 = vpop.f32.mrb[58].mxu0  ;;  %v1513_v32 = vadd.f32 %v1512_v49, %v1511_v31  ;;  %v1612_v40 = vadd.f32 %v1611_v15, %v1610_v13 }
 0x168   :  { %v1858_v48 = vpack.c.bf16 %v1254_v17, %v1254_v17  ;;  %v2072_v6 = vpop.f32.mrb[59].mxu1  ;;  %v1248_v57 = vpop.f32.mrb[59].mxu0  ;;  %v1257_v11 = vadd.f32 %v2143_v25, %v2802_v35  ;;  %v1615_v30 = vsel %vm808_vm0, %v1577_v14, 0.0  ;;  %v1580_v5 = vmul.f32 %v1254_v17, %v1254_v17 }
 0x169   :  { %v1856_v41 = vpack.c.bf16 %v1246_v50, %v1246_v50  ;;  %v1516_v44 = vsel %vm808_vm0, %v1246_v50, 0.0  ;;  %v1578_v22 = vmul.f32 %v1246_v50, %v1246_v50  ;;  %v1614_v45 = vadd.f32 %v1613_v33, %v1612_v40 }
 0x16a   :  { %1479 = vst.msk [vmem:[%s3120_s3 + $0x28] sm:$0xf] %vm1468_vm1, %v1858_v48  ;;  %v1515_v7 = vadd.f32 %v1514_v60, %v1513_v32  ;;  %v2073_v52 = vadd.f32 %v2072_v6, %v2071_v46  ;;  %v1249_v51 = vadd.f32 %v1248_v57, %v2792_v12  ;;  %v2945_v9 = vadd.f32 %v2070_v24, %v2857_v23 }
 0x16b   :  { %1477 = vst.msk [vmem:[%s3120_s3 + $0x20] sm:$0xf] %vm1468_vm1, %v1856_v41  ;;  %v1617_v47 = vsel %vm808_vm0, %v1578_v22, 0.0  ;;  %v1616_v61 = vadd.f32 %v1615_v30, %v1614_v45  ;;  %v1859_v53 = vpack.c.bf16 %v1257_v11, %v1257_v11  ;;  %v1520_v35 = vsel %vm808_vm0, %v1254_v17, 0.0 }
 0x16c   :  { %v1517_v56 = vadd.f32 %v1516_v44, %v1515_v7  ;;  %v1857_v0 = vpack.c.bf16 %v1249_v51, %v1249_v51  ;;  %v1518_v34 = vsel %vm808_vm0, %v1249_v51, 0.0  ;;  %v1579_v49 = vmul.f32 %v1249_v51, %v1249_v51 }
 0x16d   :  { %v2074_v18 = vpop.f32.mrb[60].mxu1  ;;  %v2146_v54 = vpop.f32.mrb[60].mxu0  ;;  %v1618_v2 = vadd.f32 %v1617_v47, %v1616_v61  ;;  %1480 = vst.msk [vmem:[%s3120_s3 + $0x2c] sm:$0xf] %vm1468_vm1, %v1859_v53  ;;  %v2955_v13 = vadd.f32 %v2073_v52, %v2873_v42  ;;  %v1581_v31 = vmul.f32 %v1257_v11, %v1257_v11  ;;  %v1522_v33 = vsel %vm808_vm0, %v1257_v11, 0.0 }
 0x16e   :  { %v1519_v12 = vadd.f32 %v1518_v34, %v1517_v56  ;;  %v1270_v23 = vadd.f32 %v2146_v54, %v2816_v20  ;;  %v2075_v1 = vpop.f32.mrb[61].mxu1  ;;  %v1261_v3 = vpop.f32.mrb[61].mxu0  ;;  %1478 = vst.msk [vmem:[%s3120_s3 + $0x24] sm:$0xf] %vm1468_vm1, %v1857_v0  ;;  %v1619_v17 = vsel %vm808_vm0, %v1579_v49, 0.0  ;;  %v1621_v20 = vsel %vm808_vm0, %v1580_v5, 0.0 }
 0x16f   :  { %v2076_v43 = vadd.f32 %v2075_v1, %v2074_v18  ;;  %v1262_v26 = vadd.f32 %v1261_v3, %v2808_v55  ;;  %v2077_v14 = vpop.f32.mrb[62].mxu1  ;;  %v2147_v15 = vpop.f32.mrb[62].mxu0  ;;  %v1620_v50 = vadd.f32 %v1619_v17, %v1618_v2  ;;  %v1623_v41 = vsel %vm808_vm0, %v1581_v31, 0.0 }
 0x170   :  { %v1521_v24 = vadd.f32 %v1520_v35, %v1519_v12  ;;  %v1862_v46 = vpack.c.bf16 %v1270_v23, %v1270_v23  ;;  %v2078_v42 = vpop.f32.mrb[63].mxu1  ;;  %v1264_v25 = vpop.f32.mrb[63].mxu0  ;;  %v1273_v57 = vadd.f32 %v2147_v15, %v2818_v21  ;;  %v1584_v7 = vmul.f32 %v1270_v23, %v1270_v23 }
 0x171   :  { %v1860_v32 = vpack.c.bf16 %v1262_v26, %v1262_v26  ;;  %v1524_v40 = vsel %vm808_vm0, %v1262_v26, 0.0  ;;  %v1582_v48 = vmul.f32 %v1262_v26, %v1262_v26  ;;  %v1622_v6 = vadd.f32 %v1621_v20, %v1620_v50 }
 0x172   :  { %1483 = vst.msk [vmem:[%s3120_s3 + $0x38] sm:$0xf] %vm1468_vm1, %v1862_v46  ;;  %v1523_v55 = vadd.f32 %v1522_v33, %v1521_v24  ;;  %v2079_v60 = vadd.f32 %v2078_v42, %v2077_v14  ;;  %v1265_v22 = vadd.f32 %v1264_v25, %v2810_v58  ;;  %v1141_v45 = vadd.f32 %v2076_v43, %v2876_v28 }
 0x173   :  { %1481 = vst.msk [vmem:[%s3120_s3 + $0x30] sm:$0xf] %vm1468_vm1, %v1860_v32  ;;  %v1625_v44 = vsel %vm808_vm0, %v1582_v48, 0.0  ;;  %v1624_v52 = vadd.f32 %v1623_v41, %v1622_v6  ;;  %v1863_v30 = vpack.c.bf16 %v1273_v57, %v1273_v57  ;;  %v1528_v21 = vsel %vm808_vm0, %v1270_v23, 0.0 }
 0x174   :  { %v1525_v11 = vadd.f32 %v1524_v40, %v1523_v55  ;;  %v1861_v47 = vpack.c.bf16 %v1265_v22, %v1265_v22  ;;  %v1526_v51 = vsel %vm808_vm0, %v1265_v22, 0.0  ;;  %v1583_v5 = vmul.f32 %v1265_v22, %v1265_v22 }
 0x175   :  { %v2080_v56 = vpop.f32.mrb[64].mxu1  ;;  %v2150_v61 = vpop.f32.mrb[64].mxu0  ;;  %v1626_v53 = vadd.f32 %v1625_v44, %v1624_v52  ;;  %1484 = vst.msk [vmem:[%s3120_s3 + $0x3c] sm:$0xf] %vm1468_vm1, %v1863_v30  ;;  %v2987_v34 = vadd.f32 %v2079_v60, %v2879_v59  ;;  %v1585_v49 = vmul.f32 %v1273_v57, %v1273_v57  ;;  %v1530_v43 = vsel %vm808_vm0, %v1273_v57, 0.0 }
 0x176   :  { %v1527_v58 = vadd.f32 %v1526_v51, %v1525_v11  ;;  %v1286_v28 = vadd.f32 %v2150_v61, %v2911_v62  ;;  %v2081_v35 = vpop.f32.mrb[65].mxu1  ;;  %v1277_v0 = vpop.f32.mrb[65].mxu0  ;;  %1482 = vst.msk [vmem:[%s3120_s3 + $0x34] sm:$0xf] %vm1468_vm1, %v1861_v47  ;;  %v1627_v18 = vsel %vm808_vm0, %v1583_v5, 0.0  ;;  %v1629_v62 = vsel %vm808_vm0, %v1584_v7, 0.0 }
 0x177   :  { %v2082_v54 = vadd.f32 %v2081_v35, %v2080_v56  ;;  %v1278_v2 = vadd.f32 %v1277_v0, %v2868_v19  ;;  %v2083_v12 = vpop.f32.mrb[66].mxu1  ;;  %v2151_v23 = vpop.f32.mrb[66].mxu0  ;;  %v1628_v3 = vadd.f32 %v1627_v18, %v1626_v53  ;;  %v1631_v46 = vsel %vm808_vm0, %v1585_v49, 0.0 }
 0x178   :  { %v1529_v1 = vadd.f32 %v1528_v21, %v1527_v58  ;;  %v1866_v31 = vpack.c.bf16 %v1286_v28, %v1286_v28  ;;  %v2084_v59 = vpop.f32.mrb[67].mxu1  ;;  %v1280_v17 = vpop.f32.mrb[67].mxu0  ;;  %v1289_v24 = vadd.f32 %v2151_v23, %v2921_v4  ;;  %v1588_v32 = vmul.f32 %v1286_v28, %v1286_v28 }
 0x179   :  { %v1864_v26 = vpack.c.bf16 %v1278_v2, %v1278_v2  ;;  %v1532_v14 = vsel %vm808_vm0, %v1278_v2, 0.0  ;;  %v1586_v15 = vmul.f32 %v1278_v2, %v1278_v2  ;;  %v1630_v20 = vadd.f32 %v1629_v62, %v1628_v3 }
 0x17a   :  { %1487 = vst.msk [vmem:[%s3120_s3 + $0x48] sm:$0xf] %vm1468_vm1, %v1866_v31  ;;  %v1531_v19 = vadd.f32 %v1530_v43, %v1529_v1  ;;  %v2085_v50 = vadd.f32 %v2084_v59, %v2083_v12  ;;  %v1281_v25 = vadd.f32 %v1280_v17, %v2870_v27  ;;  %v3011_v33 = vadd.f32 %v2082_v54, %v2822_v39 }
 0x17b   :  { %1485 = vst.msk [vmem:[%s3120_s3 + $0x40] sm:$0xf] %vm1468_vm1, %v1864_v26  ;;  %v1633_v42 = vsel %vm808_vm0, %v1586_v15, 0.0  ;;  %v1632_v48 = vadd.f32 %v1631_v46, %v1630_v20  ;;  %v1867_v6 = vpack.c.bf16 %v1289_v24, %v1289_v24  ;;  %v1536_v4 = vsel %vm808_vm0, %v1286_v28, 0.0 }
 0x17c   :  { %v1533_v40 = vadd.f32 %v1532_v14, %v1531_v19  ;;  %v1865_v55 = vpack.c.bf16 %v1281_v25, %v1281_v25  ;;  %v1534_v57 = vsel %vm808_vm0, %v1281_v25, 0.0  ;;  %v1587_v60 = vmul.f32 %v1281_v25, %v1281_v25 }
 0x17d   :  { %v2086_v41 = vpop.f32.mrb[68].mxu1  ;;  %v2154_v44 = vpop.f32.mrb[68].mxu0  ;;  %v1634_v22 = vadd.f32 %v1633_v42, %v1632_v48  ;;  %1488 = vst.msk [vmem:[%s3120_s3 + $0x4c] sm:$0xf] %vm1468_vm1, %v1867_v6  ;;  %v3020_v52 = vadd.f32 %v2085_v50, %v2826_v10  ;;  %v1589_v30 = vmul.f32 %v1289_v24, %v1289_v24  ;;  %v1538_v35 = vsel %vm808_vm0, %v1289_v24, 0.0 }
 0x17e   :  { %v1535_v39 = vadd.f32 %v1534_v57, %v1533_v40  ;;  %v1302_v27 = vadd.f32 %v2154_v44, %v1141_v45  ;;  %v2087_v7 = vpop.f32.mrb[69].mxu1  ;;  %v1293_v11 = vpop.f32.mrb[69].mxu0  ;;  %1486 = vst.msk [vmem:[%s3120_s3 + $0x44] sm:$0xf] %vm1468_vm1, %v1865_v55  ;;  %v1635_v21 = vsel %vm808_vm0, %v1587_v60, 0.0  ;;  %v1637_v45 = vsel %vm808_vm0, %v1588_v32, 0.0 }
 0x17f   :  { %v2088_v47 = vadd.f32 %v2087_v7, %v2086_v41  ;;  %v1294_v51 = vadd.f32 %v1293_v11, %v2945_v9  ;;  %v2089_v5 = vpop.f32.mrb[70].mxu1  ;;  %v2155_v56 = vpop.f32.mrb[70].mxu0  ;;  %v1636_v53 = vadd.f32 %v1635_v21, %v1634_v22  ;;  %v1639_v23 = vsel %vm808_vm0, %v1589_v30, 0.0 }
 0x180   :  { %v1537_v61 = vadd.f32 %v1536_v4, %v1535_v39  ;;  %v1870_v58 = vpack.c.bf16 %v1302_v27, %v1302_v27  ;;  %v2090_v10 = vpop.f32.mrb[71].mxu1  ;;  %v1296_v28 = vpop.f32.mrb[71].mxu0  ;;  %v1305_v2 = vadd.f32 %v2155_v56, %v2987_v34  ;;  %v1592_v31 = vmul.f32 %v1302_v27, %v1302_v27 }
 0x181   :  { %v1868_v0 = vpack.c.bf16 %v1294_v51, %v1294_v51  ;;  %v1540_v49 = vsel %vm808_vm0, %v1294_v51, 0.0  ;;  %v1590_v18 = vmul.f32 %v1294_v51, %v1294_v51  ;;  %v1638_v54 = vadd.f32 %v1637_v45, %v1636_v53 }
 0x182   :  { %1491 = vst.msk [vmem:[%s3120_s3 + $0x58] sm:$0xf] %vm1468_vm1, %v1870_v58  ;;  %v1539_v9 = vadd.f32 %v1538_v35, %v1537_v61  ;;  %v2091_v12 = vadd.f32 %v2090_v10, %v2089_v5  ;;  %v1297_v1 = vadd.f32 %v1296_v28, %v2955_v13  ;;  %v1157_v3 = vadd.f32 %v2088_v47, %v2831_v16 }
 0x183   :  { %1489 = vst.msk [vmem:[%s3120_s3 + $0x50] sm:$0xf] %vm1468_vm1, %v1868_v0  ;;  %v1641_v62 = vsel %vm808_vm0, %v1590_v18, 0.0  ;;  %v1640_v17 = vadd.f32 %v1639_v23, %v1638_v54  ;;  %v1871_v43 = vpack.c.bf16 %v1305_v2, %v1305_v2  ;;  %v1544_v34 = vsel %vm808_vm0, %v1302_v27, 0.0 }
 0x184   :  { %v1541_v59 = vadd.f32 %v1540_v49, %v1539_v9  ;;  %v1869_v26 = vpack.c.bf16 %v1297_v1, %v1297_v1  ;;  %v1542_v14 = vsel %vm808_vm0, %v1297_v1, 0.0  ;;  %v1591_v15 = vmul.f32 %v1297_v1, %v1297_v1 }
 0x185   :  { %v2092_v20 = vpop.f32.mrb[72].mxu1  ;;  %v2158_v19 = vpop.f32.mrb[72].mxu0  ;;  %v1642_v24 = vadd.f32 %v1641_v62, %v1640_v17  ;;  %1492 = vst.msk [vmem:[%s3120_s3 + $0x5c] sm:$0xf] %vm1468_vm1, %v1871_v43  ;;  %v1160_v42 = vadd.f32 %v2091_v12, %v2835_v38  ;;  %v1593_v25 = vmul.f32 %v1305_v2, %v1305_v2  ;;  %v1645_v55 = vsel %vm808_vm0, %v1592_v31, 0.0 }
 0x186   :  { %v1543_v13 = vadd.f32 %v1542_v14, %v1541_v59  ;;  %v1318_v16 = vadd.f32 %v2158_v19, %v1157_v3  ;;  %v2093_v50 = vpop.f32.mrb[73].mxu1  ;;  %v1309_v46 = vpop.f32.mrb[73].mxu0  ;;  %1490 = vst.msk [vmem:[%s3120_s3 + $0x54] sm:$0xf] %vm1468_vm1, %v1869_v26  ;;  %v1643_v32 = vsel %vm808_vm0, %v1591_v15, 0.0  ;;  %v1546_v22 = vsel %vm808_vm0, %v1305_v2, 0.0 }
 0x187   :  { %v2094_v40 = vadd.f32 %v2093_v50, %v2092_v20  ;;  %v1310_v48 = vadd.f32 %v1309_v46, %v3011_v33  ;;  %v2095_v6 = vpop.f32.mrb[74].mxu1  ;;  %v2159_v4 = vpop.f32.mrb[74].mxu0  ;;  %v1644_v60 = vadd.f32 %v1643_v32, %v1642_v24  ;;  %v1647_v47 = vsel %vm808_vm0, %v1593_v25, 0.0 }
 0x188   :  { %v1545_v57 = vadd.f32 %v1544_v34, %v1543_v13  ;;  %v1874_v41 = vpack.c.bf16 %v1318_v16, %v1318_v16  ;;  %v2096_v44 = vpop.f32.mrb[75].mxu1  ;;  %v1312_v38 = vpop.f32.mrb[75].mxu0  ;;  %v1321_v30 = vadd.f32 %v2159_v4, %v1160_v42  ;;  %v1596_v45 = vmul.f32 %v1318_v16, %v1318_v16 }
 0x189   :  { %v1872_v39 = vpack.c.bf16 %v1310_v48, %v1310_v48  ;;  %v1548_v27 = vsel %vm808_vm0, %v1310_v48, 0.0  ;;  %v1594_v7 = vmul.f32 %v1310_v48, %v1310_v48  ;;  %v1646_v11 = vadd.f32 %v1645_v55, %v1644_v60 }
 0x18a   :  { %1495 = vst.msk [vmem:[%s3120_s3 + $0x68] sm:$0xf] %vm1468_vm1, %v1874_v41  ;;  %v1547_v33 = vadd.f32 %v1546_v22, %v1545_v57  ;;  %v2097_v21 = vadd.f32 %v2096_v44, %v2095_v6  ;;  %v1313_v5 = vadd.f32 %v1312_v38, %v3020_v52  ;;  %v1165_v56 = vadd.f32 %v2094_v40, %v2840_v63 }
 0x18b   :  { %1493 = vst.msk [vmem:[%s3120_s3 + $0x60] sm:$0xf] %vm1468_vm1, %v1872_v39  ;;  %v1649_v51 = vsel %vm808_vm0, %v1594_v7, 0.0  ;;  %v1648_v53 = vadd.f32 %v1647_v47, %v1646_v11  ;;  %v1875_v58 = vpack.c.bf16 %v1321_v30, %v1321_v30  ;;  %v1012_v10 = vadd.f32 %v2729_v29, %v2736_v36 }
 0x18c   :  { %v1549_v61 = vadd.f32 %v1548_v27, %v1547_v33  ;;  %v1873_v28 = vpack.c.bf16 %v1313_v5, %v1313_v5  ;;  %v1550_v35 = vsel %vm808_vm0, %v1313_v5, 0.0  ;;  %v1595_v0 = vmul.f32 %v1313_v5, %v1313_v5 }
 0x18d   :  { %v2098_v49 = vpop.f32.mrb[76].mxu1  ;;  %v2162_v18 = vpop.f32.mrb[76].mxu0  ;;  %v1552_v54 = vsel %vm808_vm0, %v1318_v16, 0.0  ;;  %v1650_v9 = vadd.f32 %v1649_v51, %v1648_v53  ;;  %1496 = vst.msk [vmem:[%s3120_s3 + $0x6c] sm:$0xf] %vm1468_vm1, %v1875_v58  ;;  %v1168_v12 = vadd.f32 %v2097_v21, %v2844_v8  ;;  %v1597_v29 = vmul.f32 %v1321_v30, %v1321_v30 }
 0x18e   :  { %v1551_v63 = vadd.f32 %v1550_v35, %v1549_v61  ;;  %v2099_v52 = vpop.f32.mrb[77].mxu1  ;;  %v1325_v2 = vpop.f32.mrb[77].mxu0  ;;  %1494 = vst.msk [vmem:[%s3120_s3 + $0x64] sm:$0xf] %vm1468_vm1, %v1873_v28  ;;  %v1651_v36 = vsel %vm808_vm0, %v1595_v0, 0.0  ;;  %v1653_v31 = vsel %vm808_vm0, %v1596_v45, 0.0 }
 0x18f   :  { %v2100_v23 = vadd.f32 %v2099_v52, %v2098_v49  ;;  %v1326_v62 = vadd.f32 %v1325_v2, %v1165_v56  ;;  %v2101_v1 = vpop.f32.mrb[78].mxu1  ;;  %v2163_v3 = vpop.f32.mrb[78].mxu0  ;;  %v1554_v59 = vsel %vm808_vm0, %v1321_v30, 0.0  ;;  %v1652_v43 = vadd.f32 %v1651_v36, %v1650_v9 }
 0x190   :  { %v1553_v17 = vadd.f32 %v1552_v54, %v1551_v63  ;;  %v2102_v34 = vpop.f32.mrb[79].mxu1  ;;  %v1328_v8 = vpop.f32.mrb[79].mxu0  ;;  %v1655_v50 = vsel %vm808_vm0, %v1597_v29, 0.0 }
 0x191   :  { %v1173_v26 = vadd.f32 %v2100_v23, %v1012_v10  ;;  %v1876_v14 = vpack.c.bf16 %v1326_v62, %v1326_v62  ;;  %v1556_v15 = vsel %vm808_vm0, %v1326_v62, 0.0  ;;  %v1598_v20 = vmul.f32 %v1326_v62, %v1326_v62 }
 0x192   :  { %v1654_v19 = vadd.f32 %v1653_v31, %v1652_v43  ;;  %v1555_v24 = vadd.f32 %v1554_v59, %v1553_v17  ;;  %v2103_v13 = vadd.f32 %v2102_v34, %v2101_v1  ;;  %v1329_v16 = vadd.f32 %v1328_v8, %v1168_v12 }
 0x193   :  { %v1334_v46 = vadd.f32 %v2162_v18, %v1173_v26  ;;  %1497 = vst.msk [vmem:[%s3120_s3 + $0x70] sm:$0xf] %vm1468_vm1, %v1876_v14  ;;  %v1657_v42 = vsel %vm808_vm0, %v1598_v20, 0.0 }
 0x194   :  { %v1557_v25 = vadd.f32 %v1556_v15, %v1555_v24  ;;  %v1656_v32 = vadd.f32 %v1655_v50, %v1654_v19  ;;  %v1176_v40 = vadd.f32 %v2103_v13, %v2739_v37  ;;  %v1877_v48 = vpack.c.bf16 %v1329_v16, %v1329_v16 }
 0x195   :  { %v1878_v6 = vpack.c.bf16 %v1334_v46, %v1334_v46  ;;  %v1600_v4 = vmul.f32 %v1334_v46, %v1334_v46  ;;  %v1558_v55 = vsel %vm808_vm0, %v1329_v16, 0.0  ;;  %v1560_v57 = vsel %vm808_vm0, %v1334_v46, 0.0 }
 0x196   :  { %v1658_v60 = vadd.f32 %v1657_v42, %v1656_v32  ;;  %v1337_v41 = vadd.f32 %v2163_v3, %v1176_v40  ;;  %1498 = vst.msk [vmem:[%s3120_s3 + $0x74] sm:$0xf] %vm1468_vm1, %v1877_v48  ;;  %v1559_v44 = vadd.f32 %v1558_v55, %v1557_v25  ;;  %v1599_v38 = vmul.f32 %v1329_v16, %v1329_v16 }
 0x197   :  { %1499 = vst.msk [vmem:[%s3120_s3 + $0x78] sm:$0xf] %vm1468_vm1, %v1878_v6  ;;  %v1661_v11 = vsel %vm808_vm0, %v1600_v4, 0.0 }
 0x198   :  { %v1879_v37 = vpack.c.bf16 %v1337_v41, %v1337_v41  ;;  %v1562_v22 = vsel %vm808_vm0, %v1337_v41, 0.0  ;;  %v1601_v39 = vmul.f32 %v1337_v41, %v1337_v41  ;;  %v1561_v27 = vadd.f32 %v1560_v57, %v1559_v44 }
 0x199   :  { %v1659_v7 = vsel %vm808_vm0, %v1599_v38, 0.0 }
 0x19a   :  { %1500 = vst.msk [vmem:[%s3120_s3 + $0x7c] sm:$0xf] %vm1468_vm1, %v1879_v37  ;;  %v1563_v33 = vadd.f32 %v1562_v22, %v1561_v27  ;;  %v1660_v30 = vadd.f32 %v1659_v7, %v1658_v60  ;;  %v1663_v21 = vsel %vm808_vm0, %v1601_v39, 0.0 }
 0x19c   :  { %v1564_v47 = vrot.slane %v1563_v33, 4  ;;  %v1662_v51 = vadd.f32 %v1661_v11, %v1660_v30 }
 0x19e   :  { %v1565_v5 = vadd.f32 %v1564_v47, %v1563_v33  ;;  %v1664_v56 = vadd.f32 %v1663_v21, %v1662_v51 }
 0x1a0   :  { %v1566_v45 = vrot.slane %v1565_v5, 2  ;;  %v1665_v61 = vrot.slane %v1664_v56, 4 }
 0x1a2   :  { %v1567_v53 = vadd.f32 %v1566_v45, %v1565_v5  ;;  %v1666_v58 = vadd.f32 %v1665_v61, %v1664_v56 }
 0x1a4   :  { %v1667_v10 = vrot.slane %v1666_v58, 2  ;;  %v1568_v28 = vrot.slane %v1567_v53, 1 }
 0x1a6   :  { %v1668_v35 = vadd.f32 %v1667_v10, %v1666_v58  ;;  %v1569_v49 = vadd.f32 %v1568_v28, %v1567_v53 }
 0x1a8   :  { %v1669_v0 = vrot.slane %v1668_v35, 1 }
 0x1aa   :  { %v1670_v18 = vadd.f32 %v1669_v0, %v1668_v35 }
 0x1ac   :  { %v1672_v54 = vsel %vm1671_vm2, %v1569_v49, %v1670_v18 }
 0x1ad   :  { %1674 = vst.msk [vmem:[%s3121_s4] sm:$0x3] %vm1673_vm3, %v1672_v54 }

// kernel: point_pillars_forward.22
= control target key start
LH: loop header
LB: loop body
LE: loop exit
PB: predicated region body
PF: predicated region fallthrough
CT: control target
= control target key end

     0   :  { %s1142_s15 = smov 0   ;;  %s1144_s16 = smov 0   ;;  %s1269_s0 = inlined_call_operand.vmem [shape: bf16[2,6,34,64], index: 0, kind: input, shape index: {}]   ;;  %s1270_s1 = inlined_call_operand.vmem [shape: bf16[3,3,64,128], index: 1, kind: input, shape index: {}]   ;;  %s1271_s2 = inlined_call_operand.vmem [shape: f32[1,128], index: 2, kind: input, shape index: {}]   ;;  %s1272_s3 = inlined_call_operand.vmem [shape: bf16[2,4,32,128], index: 3, kind: output, shape index: {0}]   ;;  %s1273_s4 = inlined_call_operand.vmem [shape: f32[2,4,2,128], index: 4, kind: output, shape index: {1}]  }
   0x1   :  { %s1146_s17 = smov 0   ;;  %s1148_s18 = smov 0  }
   0x2   :  { %s1150_s19 = smov 0   ;;  %s1152_s20 = smov 0  }
   0x3   :  { %s1154_s21 = smov 0  }
   0x4 LB: > { %s27_s22 = sadd.s32 1, %s1102_s18  ;;  %s30_s23 = sadd.s32 1, %s1106_s19  ;;  %s1114_s21 = sphi %s1154_s21, %s15_s21   ;;  %s1110_s20 = sphi %s1152_s20, %s1279_s20   ;;  %s1106_s19 = sphi %s1150_s19, %s1278_s19   ;;  %s1102_s18 = sphi %s1148_s18, %s1277_s18   ;;  %s1098_s17 = sphi %s1146_s17, %s1276_s17   ;;  %s1094_s16 = sphi %s1144_s16, %s1275_s16   ;;  %s1090_s15 = sphi %s1142_s15, %s1274_s15  }
   0x5   : > { %p28_p0 = scmp.ge.s32.totalorder %s27_s22, 3  ;;  %p853_p1 = scmp.ge.s32.totalorder %s1114_s21, 1 }
   0x6   : > { %p208_p2 = scmp.lt.s32.totalorder %s1114_s21, 25  ;;  %s34_s24 = sadd.s32 1, %s1110_s20 }
   0x7   : > { %s1281_s22 = smov (%p28_p0, %s27_s22), 0  ;;  %s1283_s23 = smov (!%p28_p0, %s30_s23), %s1106_s19 }
   0x8   : > { %p209_p3 = pnand %p853_p1, %p208_p2  ;;  %p32_p4 = scmp.ge.s32.totalorder %s1283_s23, 4 }
   0x9   : > { %s256_s25 = sadd.s32 (!%p209_p3), %s1090_s15, %s1094_s16  ;;  %p257_p6 = scmp.lt.s32.totalorder (!%p209_p3), %s1098_s17, 1 }
   0xa   : > { %s1285_s23 = smov (%p32_p4, %s1283_s23), 0  ;;  %s1287_s24 = smov (!%p32_p4, %s34_s24), %s1110_s20 }
   0xb   : > { %p36_p5 = scmp.ge.s32.totalorder %s1287_s24, 2  ;;  %212 = sbr.rel (%p209_p3) target bundleno = 317 (0x13d), region = 32 }
   0xc   : > { %p259_p7 = scmp.lt.s32.totalorder (!%p209_p3), %s256_s25, 5  ;;  %p267_p8 = scmp.lt.s32.totalorder (!%p209_p3), %s1090_s15, 2 }
   0xd   : > { %s1289_s24 = smov (%p36_p5, %s1287_s24), 0  ;;  %p274_p9 = scmp.lt.s32.totalorder (!%p209_p3), %s1094_s16, 3 }
   0xe   : > { %p861_p10 = scmp.ne.s32.totalorder (!%p209_p3), %s1090_s15, 0 }
  0x12   : > { %s1291_s17 = smov (!%p257_p6, %s1098_s17), 1  ;;  %s1293_s25 = smov (!%p259_p7, %s256_s25), 5 }
  0x13   : > { %s989_s26 = smul.u32 30, %s1291_s17  ;;  %s857_s30 = sshll.u32 %s1291_s17, 4  ;;  %v1116_v5 = vmov (!%p861_p10), 0.0  }
  0x14   : > { %s988_s27 = smul.u32 5, %s1293_s25  ;;  %s859_s10 = sshll.u32 %s1291_s17, 2  ;;  %299 = vst [vmem:[#allocation2] sm:$0xff] (!%p861_p10), %v1116_v5  ;;  %300 = vst [vmem:[#allocation2 + $0x8] sm:$0xff] (!%p861_p10), %v1116_v5 }
  0x15   : > { %s268_s28 = scalar_select %p267_p8, %s1090_s15, 2 }
  0x16   : > { %s263_s29 = sadd.s32 %s989_s26, %s988_s27  ;;  %s1295_s16 = smov (!%p274_p9, %s1094_s16), 3  ;;  %301 = vst [vmem:[#allocation2 + $0x10] sm:$0xff] (!%p861_p10), %v1116_v5  ;;  %302 = vst [vmem:[#allocation2 + $0x18] sm:$0xff] (!%p861_p10), %v1116_v5 }
  0x17   : > { %s854_s5 = sshll.u32 %s263_s29, 2  ;;  %s990_s6 = smul.u32 96, %s268_s28 }
  0x18   : > { %s265_s9 = scalar_lea.vmem %s1269_s0, %s854_s5  ;;  %s856_s14 = sshll.u32 %s1295_s16, 2 }
  0x19   : > { %s1199_s13 = scalar_lea.vmem %s1270_s1, %s990_s6  ;;  %v290_v0 = vld [vmem:[%s265_s9] sm:$0xf]  ;;  %v291_v1 = vld [vmem:[%s265_s9 + $0x4] sm:$0xf]  ;;  %v292_v2 = vld [vmem:[%s265_s9 + $0x8] sm:$0xf]  ;;  %s286_s25 = sadd.s32 %s859_s10, %s1295_s16 }
  0x1a   : > { %v293_v3 = vld [vmem:[%s265_s9 + $0xc] sm:$0xf]  ;;  %v294_v4 = vld [vmem:[%s265_s9 + $0x10] sm:$0x1]  ;;  %s278_s26 = sadd.s32 %s857_s30, %s856_s14  ;;  %s860_s27 = sshll.u32 %s286_s25, 1 }
  0x1b   : > { %s858_s28 = sshll.u32 %s278_s26, 2  ;;  %s1205_s17 = scalar_lea.vmem %s1273_s4, %s860_s27 }
  0x1c   : > { %s1210_s6 = scalar_lea.vmem %s1272_s3, %s858_s28  ;;  %298 = sbr.rel (%p861_p10) target bundleno = 35 (0x23), region = 36 }
  0x23 PF: > { %v1048_v6 = vld [vmem:[%s1199_s13 + $0x20] sm:$0xff]   ;;  %v862_v7 = vcombine.low %v290_v0, %v291_v1  ;;  %v1214_v8 = vcombine.low %v292_v2, %v293_v3  ;;  %v1049_v9 = vld [vmem:[%s1199_s13 + $0x28] sm:$0xff]   ;;  %vm349_vm0 = vcmask 523264   ;;  %v878_v13 = vcombine.low %v294_v4, %v294_v4  ;;  %v1050_v14 = vld [vmem:[%s1199_s13 + $0x30] sm:$0xff]   ;;  %p899_p11 = scmp.ne.s32.totalorder %s1090_s15, 2 }
  0x24   : > { %952 = vmatprep.subr.bf16.mxu0 %v1048_v6  ;;  %v1051_v11 = vld [vmem:[%s1199_s13] sm:$0xff]   ;;  %v1053_v16 = vld [vmem:[%s1199_s13 + $0x8] sm:$0xff]   ;;  %v1052_v18 = vld [vmem:[%s1199_s13 + $0x38] sm:$0xff]   ;;  %vm421_vm1 = vsmask.f32 7424  ;;  %vm532_vm2 = vcmask 1046528  }
  0x25   : > { %v422_v10 = vshrl.u32 %v862_v7, 16  ;;  %948 = vmatprep.mubr.msk.bf16.mxu1 %vm349_vm0, %v862_v7  ;;  %953 = vmatpush3.bf16.msra.mxu0 %v1048_v6  ;;  %v424_v12 = vshll.u32 %v862_v7, 16  ;;  %v428_v15 = vshll.u32 %v1214_v8, 16  ;;  %v432_v21 = vshrl.u32 %v1214_v8, 16  ;;  %v1055_v23 = vld [vmem:[%s1199_s13 + $0x10] sm:$0xff]   ;;  %v1057_v27 = vld [vmem:[%s1199_s13 + $0x18] sm:$0xff]  }
  0x26   : > { %954 = vmatprep.subr.bf16.mxu0 %v1049_v9  ;;  %940 = vmatprep.subr.bf16.mxu1 %v1051_v11  ;;  %v436_v22 = vshll.u32 %v878_v13, 16  ;;  %v1054_v28 = vld [vmem:[%s1199_s13 + $0x40] sm:$0xff]   ;;  %v533_v29 = vrot.slane %v862_v7, 1  ;;  %v534_v30 = vrot.slane %v1214_v8, 1  ;;  %v1056_v32 = vld [vmem:[%s1199_s13 + $0x48] sm:$0xff]   ;;  %v1058_v34 = vld [vmem:[%s1199_s13 + $0x50] sm:$0xff]  }
  0x27   : > { %v426_v17 = vrot.slane %v424_v12, 1  ;;  %941 = vmatpush3.bf16.msra.mxu1 %v1051_v11  ;;  %v430_v19 = vrot.slane %v428_v15, 1  ;;  %v1059_v35 = vld [vmem:[%s1199_s13 + $0x58] sm:$0xff]   ;;  %v536_v36 = vrot.slane %v878_v13, 1  ;;  %v305_v42 = vld [vmem:[#allocation2 + $0x10] sm:$0xff]  ;;  %v303_v43 = vld [vmem:[#allocation2] sm:$0xff] }
  0x28   : > { %942 = vmatprep.subr.bf16.mxu1 %v1053_v16  ;;  %v438_v26 = vrot.slane %v436_v22, 1  ;;  %v535_v33 = vsel %vm532_vm2, %v533_v29, %v534_v30  ;;  %v306_v46 = vld [vmem:[#allocation2 + $0x18] sm:$0xff]  ;;  %v304_v47 = vld [vmem:[#allocation2 + $0x8] sm:$0xff]  ;;  %v900_v60 = vld [vmem:[%s1271_s2] ss:$0 sm:$0xff] (!%p899_p11)  ;;  %vm686_vm3 = vcmask (!%p899_p11), 1040384  }
  0x29   : > { %955 = vmatpush3.bf16.msra.mxu0 %v1049_v9  ;;  %v427_v20 = vor.u32 %v426_v17, %v422_v10  ;;  %v434_v25 = vor.u32 %v432_v21, %v430_v19  ;;  %v537_v37 = vsel %vm532_vm2, %v534_v30, %v536_v36 }
  0x2a   : > { %956 = vmatprep.subr.bf16.mxu0 %v1050_v14 }
  0x2b   : > { %v431_v24 = vsel %vm421_vm1, %v427_v20, %v430_v19  ;;  %943 = vmatpush3.bf16.msra.mxu1 %v1053_v16  ;;  %v439_v31 = vsel %vm421_vm1, %v434_v25, %v438_v26 }
  0x2c   : > { %960 = vmatprep.mubr.msk.bf16.mxu0 %vm349_vm0, %v431_v24  ;;  %944 = vmatprep.subr.bf16.mxu1 %v1055_v23 }
  0x2d   : > { %957 = vmatpush3.bf16.msra.mxu0 %v1050_v14 }
  0x2e   : > { %958 = vmatprep.subr.bf16.mxu0 %v1052_v18 }
  0x2f   : > { %945 = vmatpush3.bf16.msra.mxu1 %v1055_v23 }
  0x30   : > { %946 = vmatprep.subr.bf16.mxu1 %v1057_v27 }
  0x31   : > { %959 = vmatpush3.bf16.msra.mxu0 %v1052_v18 }
  0x32   : > { %964 = vmatprep.subr.bf16.mxu0 %v1054_v28 }
  0x33   : > { %947 = vmatpush3.bf16.msra.mxu1 %v1057_v27 }
  0x34   : > { %961 = vmatmul.mubr.msk.bf16.vlgmr.msra.gmra.mrb[0].mxu0 %vm349_vm0, %v439_v31 }
  0x35   : > { %965 = vmatpush3.bf16.msra.mxu0 %v1054_v28  ;;  %972 = vmatprep.mubr.msk.bf16.mxu0 %vm349_vm0, %v535_v33 }
  0x36   : > { %966 = vmatprep.subr.bf16.mxu0 %v1056_v32  ;;  %949 = vmatmul.mubr.msk.bf16.vlgmr.msra.gmra.mrb[0].mxu1 %vm349_vm0, %v1214_v8 }
  0x39   : > { %967 = vmatpush3.bf16.msra.mxu0 %v1056_v32 }
  0x3a   : > { %968 = vmatprep.subr.bf16.mxu0 %v1058_v34 }
  0x3d   : > { %969 = vmatpush3.bf16.msra.mxu0 %v1058_v34 }
  0x3e   : > { %970 = vmatprep.subr.bf16.mxu0 %v1059_v35 }
  0x41   : > { %971 = vmatpush3.bf16.msra.mxu0 %v1059_v35 }
  0x44   : > { %973 = vmatmul.mubr.msk.bf16.vlgmr.msra.gmra.mrb[0].mxu0 %vm349_vm0, %v537_v37 }
 0x109   : > { %v950_v38 = vpop.f32.mrb[0].mxu1 }
 0x10a   : > { %v390_v39 = vpop.f32.mrb[1].mxu1  ;;  %v407_v44 = vadd.f32 %v950_v38, %v305_v42 }
 0x10b   : > { %v951_v40 = vpop.f32.mrb[2].mxu1  ;;  %v405_v45 = vadd.f32 %v390_v39, %v303_v43 }
 0x10c   : > { %v393_v41 = vpop.f32.mrb[3].mxu1  ;;  %v408_v49 = vadd.f32 %v951_v40, %v306_v46 }
 0x10d   : > { %v406_v52 = vadd.f32 %v393_v41, %v304_v47 }
 0x117   : > { %v974_v48 = vpop.f32.mrb[0].mxu0  ;;  %628 = sbr.rel (%p899_p11) target bundleno = 317 (0x13d), region = 40 }
 0x118   : > { %v977_v50 = vadd.f32 %v974_v48, %v407_v44  ;;  %v602_v51 = vpop.f32.mrb[1].mxu0 }
 0x119   : > { %v979_v53 = vadd.f32 %v602_v51, %v405_v45  ;;  %v975_v54 = vpop.f32.mrb[2].mxu0 }
 0x11a   : > { %623 = vst [vmem:[#allocation2 + $0x10] sm:$0xff] %v977_v50  ;;  %v981_v55 = vadd.f32 %v975_v54, %v408_v49  ;;  %v605_v56 = vpop.f32.mrb[3].mxu0 }
 0x11b   : > { %621 = vst [vmem:[#allocation2] sm:$0xff] %v979_v53  ;;  %v983_v57 = vadd.f32 %v605_v56, %v406_v52 }
 0x11c   : > { %624 = vst [vmem:[#allocation2 + $0x18] sm:$0xff] %v981_v55 }
 0x11d   : > { %622 = vst [vmem:[#allocation2 + $0x8] sm:$0xff] %v983_v57 }
 0x121   : > { %v631_v63 = vld [vmem:[#allocation2 + $0x10] sm:$0xff] }
 0x122   : > { %v629_v58 = vld [vmem:[#allocation2] sm:$0xff]  ;;  %v642_v1 = vadd.f32 %v900_v60, %v631_v63 }
 0x123   : > { %v640_v61 = vadd.f32 %v900_v60, %v629_v58  ;;  %v632_v0 = vld [vmem:[#allocation2 + $0x18] sm:$0xff] }
 0x124   : > { %v630_v59 = vld [vmem:[#allocation2 + $0x8] sm:$0xff]  ;;  %v643_v2 = vadd.f32 %v900_v60, %v632_v0  ;;  %v675_v8 = vmul.f32 %v642_v1, %v642_v1 }
 0x125   : > { %v641_v62 = vadd.f32 %v900_v60, %v630_v59  ;;  %v673_v5 = vmul.f32 %v640_v61, %v640_v61 }
 0x126   : > { %v919_v7 = vpack.c.bf16 %v643_v2, %v642_v1  ;;  %v676_v11 = vmul.f32 %v643_v2, %v643_v2 }
 0x127   : > { %v914_v3 = vpack.c.bf16 %v641_v62, %v640_v61  ;;  %v664_v4 = vadd.f32 %v641_v62, %v640_v61  ;;  %v674_v6 = vmul.f32 %v641_v62, %v641_v62 }
 0x128   : > { %921 = vst [vmem:[%s1210_s6 + $0x8] sm:$0xff] %v919_v7  }
 0x129   : > { %915 = vst [vmem:[%s1210_s6] sm:$0xff] %v914_v3   ;;  %v677_v9 = vadd.f32 %v674_v6, %v673_v5  ;;  %v665_v10 = vadd.f32 %v664_v4, %v642_v1 }
 0x12b   : > { %v666_v12 = vadd.f32 %v665_v10, %v643_v2  ;;  %v678_v13 = vadd.f32 %v677_v9, %v675_v8 }
 0x12d   : > { %v667_v14 = vrot.slane %v666_v12, 4  ;;  %v679_v15 = vadd.f32 %v678_v13, %v676_v11 }
 0x12f   : > { %v668_v16 = vadd.f32 %v667_v14, %v666_v12  ;;  %v680_v17 = vrot.slane %v679_v15, 4 }
 0x131   : > { %v669_v18 = vrot.slane %v668_v16, 2  ;;  %v681_v19 = vadd.f32 %v680_v17, %v679_v15 }
 0x133   : > { %v670_v20 = vadd.f32 %v669_v18, %v668_v16  ;;  %v682_v21 = vrot.slane %v681_v19, 2 }
 0x135   : > { %v671_v22 = vrot.slane %v670_v20, 1  ;;  %v683_v23 = vadd.f32 %v682_v21, %v681_v19 }
 0x137   : > { %v672_v24 = vadd.f32 %v671_v22, %v670_v20  ;;  %v684_v25 = vrot.slane %v683_v23, 1 }
 0x139   : > { %v685_v26 = vadd.f32 %v684_v25, %v683_v23 }
 0x13b   : > { %v687_v27 = vsel %vm686_vm3, %v672_v24, %v685_v26 }
 0x13c   : > { %688 = vst [vmem:[%s1205_s17] sm:$0x3] %v687_v27 }
 0x13d PF: > { %s15_s21 = sadd.s32 1, %s1114_s21   ;;  %s1274_s15 = smov %s1102_s18 }
 0x13e   : > { %p12_p12 = scmp.ge.s32.totalorder %s15_s21, 26   ;;  %s1275_s16 = smov %s1106_s19 }
 0x13f   : > { %s1276_s17 = smov %s1110_s20  ;;  %s1277_s18 = smov %s1281_s22 }
 0x140   : > { %s1278_s19 = smov %s1285_s23  ;;  %s1279_s20 = smov %s1289_s24 }
 0x141   :  { %14 = sbr.rel (!%p12_p12) target bundleno = 4 (0x4), region = 87 }

// kernel: point_pillars_forward.23
= control target key start
LH: loop header
LB: loop body
LE: loop exit
PB: predicated region body
PF: predicated region fallthrough
CT: control target
= control target key end

     0   :  { %s782_s0 = inlined_call_operand.vmem [shape: bf16[256,128], index: 0, kind: input, shape index: {}]   ;;  %s783_s1 = inlined_call_operand.vmem [shape: f32[1,128], index: 1, kind: input, shape index: {}]   ;;  %s784_s2 = inlined_call_operand.vmem [shape: f32[1,128], index: 2, kind: input, shape index: {}]   ;;  %s785_s3 = inlined_call_operand.vmem [shape: bf16[256,128], index: 3, kind: output, shape index: {}]  }
   0x1   :  { %v419_v0 = vld [vmem:[%s782_s0] sm:$0xff]   ;;  %v562_v4 = vld [vmem:[%s782_s0 + $0x8] sm:$0xff]   ;;  %v563_v5 = vld [vmem:[%s782_s0 + $0x10] sm:$0xff]  }
   0x2   :  { %v618_v1 = vld [vmem:[%s783_s1] ss:$0 sm:$0xff]  ;;  %v420_v2 = vunpack.c.l.bf16 %v419_v0  ;;  %v421_v3 = vunpack.c.h.bf16 %v419_v0  ;;  %v564_v6 = vld [vmem:[%s782_s0 + $0x18] sm:$0xff]   ;;  %v424_v8 = vunpack.c.l.bf16 %v562_v4  ;;  %v425_v9 = vunpack.c.h.bf16 %v562_v4  ;;  %v566_v33 = vld [vmem:[%s782_s0 + $0x28] sm:$0xff]  }
   0x3   :  { %v632_v7 = vld [vmem:[%s784_s2] ss:$0 sm:$0xff]  ;;  %v428_v10 = vunpack.c.l.bf16 %v563_v5  ;;  %v429_v11 = vunpack.c.h.bf16 %v563_v5  ;;  %v432_v14 = vunpack.c.l.bf16 %v564_v6  ;;  %v433_v15 = vunpack.c.h.bf16 %v564_v6  ;;  %v567_v38 = vld [vmem:[%s782_s0 + $0x30] sm:$0xff]   ;;  %v568_v43 = vld [vmem:[%s782_s0 + $0x38] sm:$0xff]  }
   0x4   :  { %v85_v12 = vmul.f32 %v420_v2, %v618_v1  ;;  %v86_v13 = vmul.f32 %v421_v3, %v618_v1  ;;  %v87_v16 = vmul.f32 %v424_v8, %v618_v1  ;;  %v88_v17 = vmul.f32 %v425_v9, %v618_v1  ;;  %v565_v28 = vld [vmem:[%s782_s0 + $0x20] sm:$0xff]  }
   0x5   :  { %v89_v18 = vmul.f32 %v428_v10, %v618_v1  ;;  %v90_v19 = vmul.f32 %v429_v11, %v618_v1  ;;  %v91_v22 = vmul.f32 %v432_v14, %v618_v1  ;;  %v92_v23 = vmul.f32 %v433_v15, %v618_v1  ;;  %v569_v0 = vld [vmem:[%s782_s0 + $0x40] sm:$0xff]   ;;  %v570_v11 = vld [vmem:[%s782_s0 + $0x48] sm:$0xff]  }
   0x6   :  { %v124_v20 = vadd.f32 %v632_v7, %v85_v12  ;;  %v125_v21 = vadd.f32 %v632_v7, %v86_v13  ;;  %v126_v24 = vadd.f32 %v632_v7, %v87_v16  ;;  %v127_v25 = vadd.f32 %v632_v7, %v88_v17  ;;  %v571_v16 = vld [vmem:[%s782_s0 + $0x50] sm:$0xff]  }
   0x7   :  { %v128_v26 = vadd.f32 %v632_v7, %v89_v18  ;;  %v129_v27 = vadd.f32 %v632_v7, %v90_v19  ;;  %v130_v31 = vadd.f32 %v632_v7, %v91_v22  ;;  %v131_v32 = vadd.f32 %v632_v7, %v92_v23 }
   0x8   :  { %v156_v29 = vmax.f32 %v124_v20, 0.0  ;;  %v157_v30 = vmax.f32 %v125_v21, 0.0  ;;  %v158_v34 = vmax.f32 %v126_v24, 0.0  ;;  %v159_v35 = vmax.f32 %v127_v25, 0.0  ;;  %v572_v25 = vld [vmem:[%s782_s0 + $0x58] sm:$0xff]  }
   0x9   :  { %v160_v36 = vmax.f32 %v128_v26, 0.0  ;;  %v161_v37 = vmax.f32 %v129_v27, 0.0  ;;  %v162_v40 = vmax.f32 %v130_v31, 0.0  ;;  %v163_v41 = vmax.f32 %v131_v32, 0.0 }
   0xa   :  { %v485_v39 = vpack.c.bf16 %v157_v30, %v156_v29  ;;  %v436_v42 = vunpack.c.l.bf16 %v565_v28  ;;  %v490_v44 = vpack.c.bf16 %v159_v35, %v158_v34  ;;  %v437_v46 = vunpack.c.h.bf16 %v565_v28 }
   0xb   :  { %v495_v45 = vpack.c.bf16 %v161_v37, %v160_v36  ;;  %v440_v47 = vunpack.c.l.bf16 %v566_v33  ;;  %v500_v48 = vpack.c.bf16 %v163_v41, %v162_v40  ;;  %v441_v50 = vunpack.c.h.bf16 %v566_v33 }
   0xc   :  { %486 = vst [vmem:[%s785_s3] sm:$0xff] %v485_v39   ;;  %v93_v49 = vmul.f32 %v436_v42, %v618_v1  ;;  %v444_v51 = vunpack.c.l.bf16 %v567_v38  ;;  %577 = vst [vmem:[%s785_s3 + $0x8] sm:$0xff] %v490_v44   ;;  %v94_v52 = vmul.f32 %v437_v46, %v618_v1  ;;  %v445_v54 = vunpack.c.h.bf16 %v567_v38  ;;  %v573_v38 = vld [vmem:[%s782_s0 + $0x60] sm:$0xff]  }
   0xd   :  { %578 = vst [vmem:[%s785_s3 + $0x10] sm:$0xff] %v495_v45   ;;  %v95_v53 = vmul.f32 %v440_v47, %v618_v1  ;;  %v448_v55 = vunpack.c.l.bf16 %v568_v43  ;;  %579 = vst [vmem:[%s785_s3 + $0x18] sm:$0xff] %v500_v48   ;;  %v96_v57 = vmul.f32 %v441_v50, %v618_v1  ;;  %v449_v59 = vunpack.c.h.bf16 %v568_v43 }
   0xe   :  { %v132_v56 = vadd.f32 %v632_v7, %v93_v49  ;;  %v97_v58 = vmul.f32 %v444_v51, %v618_v1  ;;  %v133_v60 = vadd.f32 %v632_v7, %v94_v52  ;;  %v98_v62 = vmul.f32 %v445_v54, %v618_v1  ;;  %v574_v51 = vld [vmem:[%s782_s0 + $0x68] sm:$0xff]  }
   0xf   :  { %v134_v61 = vadd.f32 %v632_v7, %v95_v53  ;;  %v99_v63 = vmul.f32 %v448_v55, %v618_v1  ;;  %v135_v3 = vadd.f32 %v632_v7, %v96_v57  ;;  %v100_v5 = vmul.f32 %v449_v59, %v618_v1 }
  0x10   :  { %v164_v2 = vmax.f32 %v132_v56, 0.0  ;;  %v136_v4 = vadd.f32 %v632_v7, %v97_v58  ;;  %v165_v6 = vmax.f32 %v133_v60, 0.0  ;;  %v137_v9 = vadd.f32 %v632_v7, %v98_v62  ;;  %v575_v60 = vld [vmem:[%s782_s0 + $0x70] sm:$0xff]  }
  0x11   :  { %v166_v8 = vmax.f32 %v134_v61, 0.0  ;;  %v138_v10 = vadd.f32 %v632_v7, %v99_v63  ;;  %v167_v12 = vmax.f32 %v135_v3, 0.0  ;;  %v139_v14 = vadd.f32 %v632_v7, %v100_v5 }
  0x12   :  { %v168_v13 = vmax.f32 %v136_v4, 0.0  ;;  %v452_v15 = vunpack.c.l.bf16 %v569_v0  ;;  %v505_v17 = vpack.c.bf16 %v165_v6, %v164_v2  ;;  %v169_v18 = vmax.f32 %v137_v9, 0.0  ;;  %v576_v2 = vld [vmem:[%s782_s0 + $0x78] sm:$0xff]  }
  0x13   :  { %v170_v19 = vmax.f32 %v138_v10, 0.0  ;;  %v453_v20 = vunpack.c.h.bf16 %v569_v0  ;;  %v510_v21 = vpack.c.bf16 %v167_v12, %v166_v8  ;;  %v171_v22 = vmax.f32 %v139_v14, 0.0 }
  0x14   :  { %v101_v23 = vmul.f32 %v452_v15, %v618_v1  ;;  %v456_v24 = vunpack.c.l.bf16 %v570_v11  ;;  %580 = vst [vmem:[%s785_s3 + $0x20] sm:$0xff] %v505_v17   ;;  %v515_v26 = vpack.c.bf16 %v169_v18, %v168_v13  ;;  %v457_v28 = vunpack.c.h.bf16 %v570_v11 }
  0x15   :  { %v102_v27 = vmul.f32 %v453_v20, %v618_v1  ;;  %v460_v29 = vunpack.c.l.bf16 %v571_v16  ;;  %581 = vst [vmem:[%s785_s3 + $0x28] sm:$0xff] %v510_v21   ;;  %v520_v30 = vpack.c.bf16 %v171_v22, %v170_v19  ;;  %v461_v33 = vunpack.c.h.bf16 %v571_v16 }
  0x16   :  { %v140_v31 = vadd.f32 %v632_v7, %v101_v23  ;;  %v103_v32 = vmul.f32 %v456_v24, %v618_v1  ;;  %582 = vst [vmem:[%s785_s3 + $0x30] sm:$0xff] %v515_v26   ;;  %v104_v35 = vmul.f32 %v457_v28, %v618_v1  ;;  %v464_v37 = vunpack.c.l.bf16 %v572_v25 }
  0x17   :  { %v141_v34 = vadd.f32 %v632_v7, %v102_v27  ;;  %v105_v36 = vmul.f32 %v460_v29, %v618_v1  ;;  %583 = vst [vmem:[%s785_s3 + $0x38] sm:$0xff] %v520_v30   ;;  %v106_v41 = vmul.f32 %v461_v33, %v618_v1  ;;  %v465_v42 = vunpack.c.h.bf16 %v572_v25 }
  0x18   :  { %v172_v39 = vmax.f32 %v140_v31, 0.0  ;;  %v142_v40 = vadd.f32 %v632_v7, %v103_v32  ;;  %v143_v44 = vadd.f32 %v632_v7, %v104_v35  ;;  %v107_v46 = vmul.f32 %v464_v37, %v618_v1 }
  0x19   :  { %v173_v43 = vmax.f32 %v141_v34, 0.0  ;;  %v144_v45 = vadd.f32 %v632_v7, %v105_v36  ;;  %v145_v48 = vadd.f32 %v632_v7, %v106_v41  ;;  %v108_v49 = vmul.f32 %v465_v42, %v618_v1 }
  0x1a   :  { %v174_v47 = vmax.f32 %v142_v40, 0.0  ;;  %v468_v50 = vunpack.c.l.bf16 %v573_v38  ;;  %v175_v53 = vmax.f32 %v143_v44, 0.0  ;;  %v146_v55 = vadd.f32 %v632_v7, %v107_v46 }
  0x1b   :  { %v525_v52 = vpack.c.bf16 %v173_v43, %v172_v39  ;;  %v176_v54 = vmax.f32 %v144_v45, 0.0  ;;  %v177_v56 = vmax.f32 %v145_v48, 0.0  ;;  %v147_v57 = vadd.f32 %v632_v7, %v108_v49 }
  0x1c   :  { %v469_v58 = vunpack.c.h.bf16 %v573_v38  ;;  %v109_v59 = vmul.f32 %v468_v50, %v618_v1  ;;  %v530_v61 = vpack.c.bf16 %v175_v53, %v174_v47  ;;  %v178_v62 = vmax.f32 %v146_v55, 0.0 }
  0x1d   :  { %584 = vst [vmem:[%s785_s3 + $0x40] sm:$0xff] %v525_v52   ;;  %v472_v63 = vunpack.c.l.bf16 %v574_v51  ;;  %v473_v0 = vunpack.c.h.bf16 %v574_v51  ;;  %v535_v3 = vpack.c.bf16 %v177_v56, %v176_v54  ;;  %v179_v4 = vmax.f32 %v147_v57, 0.0 }
  0x1e   :  { %v110_v5 = vmul.f32 %v469_v58, %v618_v1  ;;  %v148_v6 = vadd.f32 %v632_v7, %v109_v59  ;;  %585 = vst [vmem:[%s785_s3 + $0x48] sm:$0xff] %v530_v61   ;;  %v476_v10 = vunpack.c.l.bf16 %v575_v60  ;;  %v477_v11 = vunpack.c.h.bf16 %v575_v60 }
  0x1f   :  { %v111_v8 = vmul.f32 %v472_v63, %v618_v1  ;;  %v112_v9 = vmul.f32 %v473_v0, %v618_v1  ;;  %586 = vst [vmem:[%s785_s3 + $0x50] sm:$0xff] %v535_v3   ;;  %v540_v12 = vpack.c.bf16 %v179_v4, %v178_v62  ;;  %v480_v15 = vunpack.c.l.bf16 %v576_v2 }
  0x20   :  { %v149_v13 = vadd.f32 %v632_v7, %v110_v5  ;;  %v180_v14 = vmax.f32 %v148_v6, 0.0  ;;  %v113_v18 = vmul.f32 %v476_v10, %v618_v1  ;;  %v114_v19 = vmul.f32 %v477_v11, %v618_v1 }
  0x21   :  { %v150_v16 = vadd.f32 %v632_v7, %v111_v8  ;;  %v151_v17 = vadd.f32 %v632_v7, %v112_v9  ;;  %587 = vst [vmem:[%s785_s3 + $0x58] sm:$0xff] %v540_v12   ;;  %v481_v21 = vunpack.c.h.bf16 %v576_v2  ;;  %v115_v22 = vmul.f32 %v480_v15, %v618_v1 }
  0x22   :  { %v181_v20 = vmax.f32 %v149_v13, 0.0  ;;  %v152_v25 = vadd.f32 %v632_v7, %v113_v18  ;;  %v153_v26 = vadd.f32 %v632_v7, %v114_v19 }
  0x23   :  { %v182_v23 = vmax.f32 %v150_v16, 0.0  ;;  %v183_v24 = vmax.f32 %v151_v17, 0.0  ;;  %v116_v28 = vmul.f32 %v481_v21, %v618_v1  ;;  %v154_v29 = vadd.f32 %v632_v7, %v115_v22 }
  0x24   :  { %v545_v27 = vpack.c.bf16 %v181_v20, %v180_v14  ;;  %v184_v31 = vmax.f32 %v152_v25, 0.0  ;;  %v185_v32 = vmax.f32 %v153_v26, 0.0 }
  0x25   :  { %v550_v30 = vpack.c.bf16 %v183_v24, %v182_v23  ;;  %v155_v33 = vadd.f32 %v632_v7, %v116_v28  ;;  %v186_v34 = vmax.f32 %v154_v29, 0.0 }
  0x26   :  { %588 = vst [vmem:[%s785_s3 + $0x60] sm:$0xff] %v545_v27   ;;  %v555_v35 = vpack.c.bf16 %v185_v32, %v184_v31 }
  0x27   :  { %589 = vst [vmem:[%s785_s3 + $0x68] sm:$0xff] %v550_v30   ;;  %v187_v36 = vmax.f32 %v155_v33, 0.0 }
  0x28   :  { %590 = vst [vmem:[%s785_s3 + $0x70] sm:$0xff] %v555_v35  }
  0x29   :  { %v560_v1 = vpack.c.bf16 %v187_v36, %v186_v34 }
  0x2b   :  { %591 = vst [vmem:[%s785_s3 + $0x78] sm:$0xff] %v560_v1  }

// kernel: point_pillars_forward.25
= control target key start
LH: loop header
LB: loop body
LE: loop exit
PB: predicated region body
PF: predicated region fallthrough
CT: control target
= control target key end

     0   :  { %vm166_vm0 = vcmask 523264   ;;  %vm482_vm1 = vcmask 1040384   ;;  %s798_s1 = inlined_call_operand.vmem [shape: bf16[64,128], index: 1, kind: input, shape index: {}]   ;;  %s799_s0 = inlined_call_operand.vmem [shape: bf16[256,64], index: 0, kind: input, shape index: {}]   ;;  %s800_s2 = inlined_call_operand.vmem [shape: f32[1,128], index: 2, kind: input, shape index: {}]   ;;  %s801_s3 = inlined_call_operand.vmem [shape: f32[1,2,128], index: 3, kind: output, shape index: {}]  }
   0x1   :  { %v594_v0 = vld [vmem:[%s798_s1] sm:$0xff]   ;;  %v595_v1 = vld [vmem:[%s798_s1 + $0x8] sm:$0xff]   ;;  %v596_v2 = vld [vmem:[%s798_s1 + $0x10] sm:$0xff]  }
   0x2   :  { %546 = vmatprep.subr.bf16.mxu0 %v594_v0  ;;  %586 = vmatprep.subr.bf16.mxu1 %v594_v0  ;;  %v598_v3 = vld [vmem:[%s799_s0] sm:$0xff]   ;;  %v597_v4 = vld [vmem:[%s798_s1 + $0x18] sm:$0xff]   ;;  %v599_v5 = vld [vmem:[%s799_s0 + $0x8] sm:$0xff]  }
   0x3   :  { %547 = vmatpush3.bf16.msra.mxu0 %v594_v0  ;;  %590 = vmatpush3.bf16.msra.mxu1 %v594_v0  ;;  %v606_v6 = vld [vmem:[%s799_s0 + $0x40] sm:$0xff]   ;;  %v600_v7 = vld [vmem:[%s799_s0 + $0x10] sm:$0xff]   ;;  %v607_v8 = vld [vmem:[%s799_s0 + $0x48] sm:$0xff]  }
   0x4   :  { %548 = vmatprep.subr.bf16.mxu0 %v595_v1  ;;  %587 = vmatprep.subr.bf16.mxu1 %v595_v1  ;;  %v608_v9 = vld [vmem:[%s799_s0 + $0x50] sm:$0xff]   ;;  %v601_v10 = vld [vmem:[%s799_s0 + $0x18] sm:$0xff]   ;;  %v602_v12 = vld [vmem:[%s799_s0 + $0x20] sm:$0xff]  }
   0x5   :  { %554 = vmatprep.mubr.msk.bf16.mxu0 %vm166_vm0, %v598_v3  ;;  %570 = vmatprep.mubr.msk.bf16.mxu1 %vm166_vm0, %v606_v6  ;;  %v609_v11 = vld [vmem:[%s799_s0 + $0x58] sm:$0xff]   ;;  %v610_v13 = vld [vmem:[%s799_s0 + $0x60] sm:$0xff]   ;;  %v603_v14 = vld [vmem:[%s799_s0 + $0x28] sm:$0xff]  }
   0x6   :  { %v611_v15 = vld [vmem:[%s799_s0 + $0x68] sm:$0xff]   ;;  %v604_v16 = vld [vmem:[%s799_s0 + $0x30] sm:$0xff]   ;;  %v605_v18 = vld [vmem:[%s799_s0 + $0x38] sm:$0xff]  }
   0x7   :  { %549 = vmatpush3.bf16.msra.mxu0 %v595_v1  ;;  %591 = vmatpush3.bf16.msra.mxu1 %v595_v1  ;;  %v612_v17 = vld [vmem:[%s799_s0 + $0x70] sm:$0xff]   ;;  %v613_v19 = vld [vmem:[%s799_s0 + $0x78] sm:$0xff]   ;;  %v713_v20 = vld [vmem:[%s800_s2] ss:$0 sm:$0xff] }
   0x8   :  { %550 = vmatprep.subr.bf16.mxu0 %v596_v2  ;;  %588 = vmatprep.subr.bf16.mxu1 %v596_v2 }
   0xb   :  { %551 = vmatpush3.bf16.msra.mxu0 %v596_v2  ;;  %592 = vmatpush3.bf16.msra.mxu1 %v596_v2 }
   0xc   :  { %552 = vmatprep.subr.bf16.mxu0 %v597_v4  ;;  %589 = vmatprep.subr.bf16.mxu1 %v597_v4 }
   0xf   :  { %553 = vmatpush3.bf16.msra.mxu0 %v597_v4  ;;  %593 = vmatpush3.bf16.msra.mxu1 %v597_v4 }
  0x12   :  { %555 = vmatmul.mubr.msk.bf16.vlgmr.msra.gmra.mrb[0].mxu0 %vm166_vm0, %v599_v5  ;;  %571 = vmatmul.mubr.msk.bf16.vlgmr.msra.gmra.mrb[0].mxu1 %vm166_vm0, %v607_v8 }
  0x13   :  { %558 = vmatprep.mubr.msk.bf16.mxu0 %vm166_vm0, %v600_v7  ;;  %574 = vmatprep.mubr.msk.bf16.mxu1 %vm166_vm0, %v608_v9 }
  0x1a   :  { %559 = vmatmul.mubr.msk.bf16.gmra.mrb[4].mxu0 %vm166_vm0, %v601_v10  ;;  %575 = vmatmul.mubr.msk.bf16.gmra.mrb[4].mxu1 %vm166_vm0, %v609_v11 }
  0x1b   :  { %562 = vmatprep.mubr.msk.bf16.mxu0 %vm166_vm0, %v602_v12  ;;  %578 = vmatprep.mubr.msk.bf16.mxu1 %vm166_vm0, %v610_v13 }
  0x22   :  { %563 = vmatmul.mubr.msk.bf16.gmra.mrb[8].mxu0 %vm166_vm0, %v603_v14  ;;  %579 = vmatmul.mubr.msk.bf16.gmra.mrb[8].mxu1 %vm166_vm0, %v611_v15 }
  0x23   :  { %566 = vmatprep.mubr.msk.bf16.mxu0 %vm166_vm0, %v604_v16  ;;  %582 = vmatprep.mubr.msk.bf16.mxu1 %vm166_vm0, %v612_v17 }
  0x2a   :  { %567 = vmatmul.mubr.msk.bf16.gmra.mrb[12].mxu0 %vm166_vm0, %v605_v18  ;;  %583 = vmatmul.mubr.msk.bf16.gmra.mrb[12].mxu1 %vm166_vm0, %v613_v19 }
  0xe5   :  { %v556_v21 = vpop.f32.mrb[0].mxu0  ;;  %v715_v22 = vpop.f32.mrb[0].mxu1 }
  0xe6   :  { %v249_v23 = vpop.f32.mrb[1].mxu0  ;;  %v717_v24 = vpop.f32.mrb[1].mxu1  ;;  %v258_v30 = vadd.f32 %v556_v21, %v713_v20 }
  0xe7   :  { %v250_v25 = vadd.f32 %v713_v20, %v249_v23  ;;  %v557_v26 = vpop.f32.mrb[2].mxu0  ;;  %v720_v27 = vpop.f32.mrb[2].mxu1 }
  0xe8   :  { %v252_v28 = vpop.f32.mrb[3].mxu0  ;;  %v722_v29 = vpop.f32.mrb[3].mxu1  ;;  %v261_v33 = vadd.f32 %v557_v26, %v713_v20  ;;  %v415_v36 = vmul.f32 %v258_v30, %v258_v30 }
  0xe9   :  { %v253_v31 = vadd.f32 %v713_v20, %v252_v28  ;;  %v413_v32 = vmul.f32 %v250_v25, %v250_v25 }
  0xea   :  { %v416_v43 = vmul.f32 %v261_v33, %v261_v33 }
  0xeb   :  { %v376_v34 = vadd.f32 %v253_v31, %v250_v25  ;;  %v414_v35 = vmul.f32 %v253_v31, %v253_v31 }
  0xed   :  { %v377_v37 = vadd.f32 %v376_v34, %v258_v30  ;;  %v445_v38 = vadd.f32 %v414_v35, %v413_v32  ;;  %v560_v39 = vpop.f32.mrb[4].mxu0  ;;  %v727_v40 = vpop.f32.mrb[4].mxu1 }
  0xee   :  { %v265_v41 = vpop.f32.mrb[5].mxu0  ;;  %v729_v42 = vpop.f32.mrb[5].mxu1  ;;  %v274_v49 = vadd.f32 %v560_v39, %v713_v20 }
  0xef   :  { %v446_v44 = vadd.f32 %v445_v38, %v415_v36  ;;  %v266_v45 = vadd.f32 %v713_v20, %v265_v41  ;;  %v378_v46 = vadd.f32 %v377_v37, %v261_v33  ;;  %v561_v47 = vpop.f32.mrb[6].mxu0  ;;  %v732_v48 = vpop.f32.mrb[6].mxu1 }
  0xf0   :  { %v268_v50 = vpop.f32.mrb[7].mxu0  ;;  %v735_v51 = vpop.f32.mrb[7].mxu1  ;;  %v277_v57 = vadd.f32 %v561_v47, %v713_v20  ;;  %v419_v60 = vmul.f32 %v274_v49, %v274_v49  ;;  %v314_v47 = vadd.f32 %v713_v20, %v717_v24 }
  0xf1   :  { %v379_v52 = vadd.f32 %v378_v46, %v266_v45  ;;  %v417_v53 = vmul.f32 %v266_v45, %v266_v45  ;;  %v447_v54 = vadd.f32 %v446_v44, %v416_v43  ;;  %v269_v55 = vadd.f32 %v713_v20, %v268_v50 }
  0xf2   :  { %v420_v3 = vmul.f32 %v277_v57, %v277_v57 }
  0xf3   :  { %v448_v56 = vadd.f32 %v447_v54, %v417_v53  ;;  %v380_v58 = vadd.f32 %v379_v52, %v269_v55  ;;  %v418_v59 = vmul.f32 %v269_v55, %v269_v55 }
  0xf5   :  { %v381_v61 = vadd.f32 %v380_v58, %v274_v49  ;;  %v449_v62 = vadd.f32 %v448_v56, %v418_v59  ;;  %v564_v63 = vpop.f32.mrb[8].mxu0  ;;  %v739_v0 = vpop.f32.mrb[8].mxu1 }
  0xf6   :  { %v281_v1 = vpop.f32.mrb[9].mxu0  ;;  %v741_v2 = vpop.f32.mrb[9].mxu1  ;;  %v290_v9 = vadd.f32 %v564_v63, %v713_v20 }
  0xf7   :  { %v450_v4 = vadd.f32 %v449_v62, %v419_v60  ;;  %v282_v5 = vadd.f32 %v713_v20, %v281_v1  ;;  %v382_v6 = vadd.f32 %v381_v61, %v277_v57  ;;  %v565_v7 = vpop.f32.mrb[10].mxu0  ;;  %v744_v8 = vpop.f32.mrb[10].mxu1  ;;  %v429_v57 = vmul.f32 %v314_v47, %v314_v47 }
  0xf8   :  { %v284_v10 = vpop.f32.mrb[11].mxu0  ;;  %v747_v11 = vpop.f32.mrb[11].mxu1  ;;  %v293_v17 = vadd.f32 %v565_v7, %v713_v20  ;;  %v423_v21 = vmul.f32 %v290_v9, %v290_v9  ;;  %v317_v61 = vadd.f32 %v713_v20, %v722_v29  ;;  %v322_v62 = vadd.f32 %v715_v22, %v713_v20 }
  0xf9   :  { %v383_v12 = vadd.f32 %v382_v6, %v282_v5  ;;  %v421_v13 = vmul.f32 %v282_v5, %v282_v5  ;;  %v451_v14 = vadd.f32 %v450_v4, %v420_v3  ;;  %v285_v15 = vadd.f32 %v713_v20, %v284_v10 }
  0xfa   :  { %v424_v32 = vmul.f32 %v293_v17, %v293_v17  ;;  %v325_v1 = vadd.f32 %v720_v27, %v713_v20  ;;  %v430_v5 = vmul.f32 %v317_v61, %v317_v61  ;;  %v330_v6 = vadd.f32 %v713_v20, %v729_v42 }
  0xfb   :  { %v452_v16 = vadd.f32 %v451_v14, %v421_v13  ;;  %v384_v18 = vadd.f32 %v383_v12, %v285_v15  ;;  %v422_v19 = vmul.f32 %v285_v15, %v285_v15  ;;  %v431_v7 = vmul.f32 %v322_v62, %v322_v62 }
  0xfc   :  { %v432_v12 = vmul.f32 %v325_v1, %v325_v1  ;;  %v433_v14 = vmul.f32 %v330_v6, %v330_v6  ;;  %v333_v22 = vadd.f32 %v713_v20, %v735_v51  ;;  %v338_v15 = vadd.f32 %v727_v40, %v713_v20 }
  0xfd   :  { %v385_v23 = vadd.f32 %v384_v18, %v290_v9  ;;  %v453_v25 = vadd.f32 %v452_v16, %v422_v19  ;;  %v568_v26 = vpop.f32.mrb[12].mxu0  ;;  %v751_v28 = vpop.f32.mrb[12].mxu1  ;;  %v349_v40 = vadd.f32 %v713_v20, %v747_v11 }
  0xfe   :  { %v297_v30 = vpop.f32.mrb[13].mxu0  ;;  %v753_v31 = vpop.f32.mrb[13].mxu1  ;;  %v306_v38 = vadd.f32 %v568_v26, %v713_v20  ;;  %v434_v19 = vmul.f32 %v333_v22, %v333_v22 }
  0xff   :  { %v454_v33 = vadd.f32 %v453_v25, %v423_v21  ;;  %v298_v34 = vadd.f32 %v713_v20, %v297_v30  ;;  %v386_v35 = vadd.f32 %v385_v23, %v293_v17  ;;  %v569_v36 = vpop.f32.mrb[14].mxu0  ;;  %v756_v37 = vpop.f32.mrb[14].mxu1  ;;  %v341_v17 = vadd.f32 %v732_v48, %v713_v20 }
 0x100   :  { %v300_v39 = vpop.f32.mrb[15].mxu0  ;;  %v759_v41 = vpop.f32.mrb[15].mxu1  ;;  %v309_v50 = vadd.f32 %v569_v36, %v713_v20  ;;  %v427_v54 = vmul.f32 %v306_v38, %v306_v38  ;;  %v346_v21 = vadd.f32 %v713_v20, %v741_v2  ;;  %v435_v23 = vmul.f32 %v338_v15, %v338_v15 }
 0x101   :  { %v387_v43 = vadd.f32 %v386_v35, %v298_v34  ;;  %v425_v44 = vmul.f32 %v298_v34, %v298_v34  ;;  %v455_v45 = vadd.f32 %v454_v33, %v424_v32  ;;  %v301_v46 = vadd.f32 %v713_v20, %v300_v39 }
 0x102   :  { %v428_v58 = vmul.f32 %v309_v50, %v309_v50  ;;  %v436_v30 = vmul.f32 %v341_v17, %v341_v17  ;;  %v437_v33 = vmul.f32 %v346_v21, %v346_v21  ;;  %v354_v34 = vadd.f32 %v739_v0, %v713_v20 }
 0x103   :  { %v456_v49 = vadd.f32 %v455_v45, %v425_v44  ;;  %v388_v52 = vadd.f32 %v387_v43, %v301_v46  ;;  %v426_v53 = vmul.f32 %v301_v46, %v301_v46  ;;  %v357_v36 = vadd.f32 %v744_v8, %v713_v20 }
 0x104   :  { %v438_v39 = vmul.f32 %v349_v40, %v349_v40  ;;  %v362_v43 = vadd.f32 %v713_v20, %v753_v31  ;;  %v439_v44 = vmul.f32 %v354_v34, %v354_v34  ;;  %v365_v0 = vadd.f32 %v713_v20, %v759_v41 }
 0x105   :  { %v389_v55 = vadd.f32 %v388_v52, %v306_v38  ;;  %v457_v56 = vadd.f32 %v456_v49, %v426_v53  ;;  %v370_v52 = vadd.f32 %v751_v28, %v713_v20 }
 0x107   :  { %v458_v59 = vadd.f32 %v457_v56, %v427_v54  ;;  %v390_v60 = vadd.f32 %v389_v55, %v309_v50  ;;  %v441_v50 = vmul.f32 %v362_v43, %v362_v43  ;;  %v373_v55 = vadd.f32 %v756_v37, %v713_v20 }
 0x108   :  { %v442_v56 = vmul.f32 %v365_v0, %v365_v0 }
 0x109   :  { %v391_v63 = vadd.f32 %v390_v60, %v314_v47  ;;  %v459_v24 = vadd.f32 %v458_v59, %v428_v58  ;;  %v440_v47 = vmul.f32 %v357_v36, %v357_v36  ;;  %v444_v60 = vmul.f32 %v373_v55, %v373_v55 }
 0x10b   :  { %v460_v3 = vadd.f32 %v459_v24, %v429_v57  ;;  %v392_v4 = vadd.f32 %v391_v63, %v317_v61  ;;  %v443_v57 = vmul.f32 %v370_v52, %v370_v52 }
 0x10d   :  { %v393_v9 = vadd.f32 %v392_v4, %v322_v62  ;;  %v461_v10 = vadd.f32 %v460_v3, %v430_v5 }
 0x10f   :  { %v462_v13 = vadd.f32 %v461_v10, %v431_v7  ;;  %v394_v29 = vadd.f32 %v393_v9, %v325_v1 }
 0x111   :  { %v395_v27 = vadd.f32 %v394_v29, %v330_v6  ;;  %v463_v16 = vadd.f32 %v462_v13, %v432_v12 }
 0x113   :  { %v464_v18 = vadd.f32 %v463_v16, %v433_v14  ;;  %v396_v42 = vadd.f32 %v395_v27, %v333_v22 }
 0x115   :  { %v397_v25 = vadd.f32 %v396_v42, %v338_v15  ;;  %v465_v26 = vadd.f32 %v464_v18, %v434_v19 }
 0x117   :  { %v466_v32 = vadd.f32 %v465_v26, %v435_v23  ;;  %v398_v51 = vadd.f32 %v397_v25, %v341_v17 }
 0x119   :  { %v399_v48 = vadd.f32 %v398_v51, %v346_v21  ;;  %v467_v35 = vadd.f32 %v466_v32, %v436_v30 }
 0x11b   :  { %v468_v38 = vadd.f32 %v467_v35, %v437_v33  ;;  %v400_v2 = vadd.f32 %v399_v48, %v349_v40 }
 0x11d   :  { %v401_v45 = vadd.f32 %v400_v2, %v354_v34  ;;  %v469_v46 = vadd.f32 %v468_v38, %v438_v39 }
 0x11f   :  { %v470_v49 = vadd.f32 %v469_v46, %v439_v44  ;;  %v402_v11 = vadd.f32 %v401_v45, %v357_v36 }
 0x121   :  { %v403_v8 = vadd.f32 %v402_v11, %v362_v43  ;;  %v471_v53 = vadd.f32 %v470_v49, %v440_v47 }
 0x123   :  { %v472_v54 = vadd.f32 %v471_v53, %v441_v50  ;;  %v404_v31 = vadd.f32 %v403_v8, %v365_v0 }
 0x125   :  { %v405_v58 = vadd.f32 %v404_v31, %v370_v52  ;;  %v473_v59 = vadd.f32 %v472_v54, %v442_v56 }
 0x127   :  { %v406_v61 = vadd.f32 %v405_v58, %v373_v55  ;;  %v474_v62 = vadd.f32 %v473_v59, %v443_v57 }
 0x129   :  { %v407_v63 = vrot.slane %v406_v61, 4  ;;  %v475_v24 = vadd.f32 %v474_v62, %v444_v60 }
 0x12b   :  { %v408_v41 = vadd.f32 %v407_v63, %v406_v61  ;;  %v476_v1 = vrot.slane %v475_v24, 4 }
 0x12d   :  { %v409_v3 = vrot.slane %v408_v41, 2  ;;  %v477_v28 = vadd.f32 %v476_v1, %v475_v24 }
 0x12f   :  { %v410_v4 = vadd.f32 %v409_v3, %v408_v41  ;;  %v478_v5 = vrot.slane %v477_v28, 2 }
 0x131   :  { %v411_v6 = vrot.slane %v410_v4, 1  ;;  %v479_v7 = vadd.f32 %v478_v5, %v477_v28 }
 0x133   :  { %v480_v9 = vrot.slane %v479_v7, 1  ;;  %v412_v20 = vadd.f32 %v411_v6, %v410_v4 }
 0x135   :  { %v481_v37 = vadd.f32 %v480_v9, %v479_v7 }
 0x137   :  { %v483_v10 = vsel %vm482_vm1, %v412_v20, %v481_v37 }
 0x138   :  { %484 = vst [vmem:[%s801_s3] sm:$0x3] %v483_v10 }

// kernel: point_pillars_forward.24
= control target key start
LH: loop header
LB: loop body
LE: loop exit
PB: predicated region body
PF: predicated region fallthrough
CT: control target
= control target key end

     0   :  { %s1297_s15 = smov 0   ;;  %s1299_s16 = smov 0   ;;  %s1436_s0 = inlined_call_operand.vmem [shape: bf16[2,6,34,128], index: 0, kind: input, shape index: {}]   ;;  %s1437_s1 = inlined_call_operand.vmem [shape: bf16[3,3,128,128], index: 1, kind: input, shape index: {}]   ;;  %s1438_s2 = inlined_call_operand.vmem [shape: f32[1,128], index: 2, kind: input, shape index: {}]   ;;  %s1439_s3 = inlined_call_operand.vmem [shape: bf16[2,4,32,128], index: 3, kind: output, shape index: {0}]   ;;  %s1440_s4 = inlined_call_operand.vmem [shape: f32[2,4,2,128], index: 4, kind: output, shape index: {1}]  }
   0x1   :  { %s1301_s17 = smov 0   ;;  %s1303_s18 = smov 0  }
   0x2   :  { %s1305_s19 = smov 0   ;;  %s1307_s20 = smov 0  }
   0x3   :  { %s1309_s21 = smov 0  }
   0x4 LB: > { %s27_s22 = sadd.s32 1, %s1257_s18  ;;  %s30_s23 = sadd.s32 1, %s1261_s19  ;;  %s1269_s21 = sphi %s1309_s21, %s15_s21   ;;  %s1265_s20 = sphi %s1307_s20, %s1446_s20   ;;  %s1261_s19 = sphi %s1305_s19, %s1445_s19   ;;  %s1257_s18 = sphi %s1303_s18, %s1444_s18   ;;  %s1253_s17 = sphi %s1301_s17, %s1443_s17   ;;  %s1249_s16 = sphi %s1299_s16, %s1442_s16   ;;  %s1245_s15 = sphi %s1297_s15, %s1441_s15  }
   0x5   : > { %p28_p0 = scmp.ge.s32.totalorder %s27_s22, 3  ;;  %p938_p1 = scmp.ge.s32.totalorder %s1269_s21, 1 }
   0x6   : > { %p208_p2 = scmp.lt.s32.totalorder %s1269_s21, 25  ;;  %s34_s24 = sadd.s32 1, %s1265_s20 }
   0x7   : > { %s1448_s22 = smov (%p28_p0, %s27_s22), 0  ;;  %s1450_s23 = smov (!%p28_p0, %s30_s23), %s1261_s19 }
   0x8   : > { %p209_p3 = pnand %p938_p1, %p208_p2  ;;  %p32_p4 = scmp.ge.s32.totalorder %s1450_s23, 4 }
   0x9   : > { %s256_s25 = sadd.s32 (!%p209_p3), %s1245_s15, %s1249_s16  ;;  %p257_p6 = scmp.lt.s32.totalorder (!%p209_p3), %s1253_s17, 1 }
   0xa   : > { %s1452_s23 = smov (%p32_p4, %s1450_s23), 0  ;;  %s1454_s24 = smov (!%p32_p4, %s34_s24), %s1265_s20 }
   0xb   : > { %p36_p5 = scmp.ge.s32.totalorder %s1454_s24, 2  ;;  %212 = sbr.rel (%p209_p3) target bundleno = 349 (0x15d), region = 32 }
   0xc   : > { %p259_p7 = scmp.lt.s32.totalorder (!%p209_p3), %s256_s25, 5  ;;  %p267_p8 = scmp.lt.s32.totalorder (!%p209_p3), %s1245_s15, 2 }
   0xd   : > { %s1456_s24 = smov (%p36_p5, %s1454_s24), 0  ;;  %p274_p9 = scmp.lt.s32.totalorder (!%p209_p3), %s1249_s16, 3 }
   0xe   : > { %p946_p10 = scmp.ne.s32.totalorder (!%p209_p3), %s1245_s15, 0 }
  0x12   : > { %s1458_s17 = smov (!%p257_p6, %s1253_s17), 1  ;;  %s1460_s25 = smov (!%p259_p7, %s256_s25), 5 }
  0x13   : > { %s1132_s26 = smul.u32 30, %s1458_s17  ;;  %s942_s30 = sshll.u32 %s1458_s17, 4  ;;  %v1271_v5 = vmov (!%p946_p10), 0.0  }
  0x14   : > { %s1131_s27 = smul.u32 5, %s1460_s25  ;;  %s944_s10 = sshll.u32 %s1458_s17, 2  ;;  %299 = vst [vmem:[#allocation2] sm:$0xff] (!%p946_p10), %v1271_v5  ;;  %300 = vst [vmem:[#allocation2 + $0x8] sm:$0xff] (!%p946_p10), %v1271_v5 }
  0x15   : > { %s268_s28 = scalar_select %p267_p8, %s1245_s15, 2 }
  0x16   : > { %s263_s29 = sadd.s32 %s1132_s26, %s1131_s27  ;;  %s1462_s16 = smov (!%p274_p9, %s1249_s16), 3  ;;  %301 = vst [vmem:[#allocation2 + $0x10] sm:$0xff] (!%p946_p10), %v1271_v5  ;;  %302 = vst [vmem:[#allocation2 + $0x18] sm:$0xff] (!%p946_p10), %v1271_v5 }
  0x17   : > { %s939_s5 = sshll.u32 %s263_s29, 2  ;;  %s1133_s6 = smul.u32 192, %s268_s28 }
  0x18   : > { %s265_s9 = scalar_lea.vmem %s1436_s0, %s939_s5  ;;  %s941_s14 = sshll.u32 %s1462_s16, 2 }
  0x19   : > { %s1354_s13 = scalar_lea.vmem %s1437_s1, %s1133_s6  ;;  %v290_v0 = vld [vmem:[%s265_s9] sm:$0xf]  ;;  %v291_v1 = vld [vmem:[%s265_s9 + $0x4] sm:$0xf]  ;;  %v292_v2 = vld [vmem:[%s265_s9 + $0x8] sm:$0xf]  ;;  %s286_s25 = sadd.s32 %s944_s10, %s1462_s16 }
  0x1a   : > { %v293_v3 = vld [vmem:[%s265_s9 + $0xc] sm:$0xf]  ;;  %v294_v4 = vld [vmem:[%s265_s9 + $0x10] sm:$0x1]  ;;  %s278_s26 = sadd.s32 %s942_s30, %s941_s14  ;;  %s945_s27 = sshll.u32 %s286_s25, 1 }
  0x1b   : > { %s943_s28 = sshll.u32 %s278_s26, 2  ;;  %s1360_s17 = scalar_lea.vmem %s1440_s4, %s945_s27 }
  0x1c   : > { %s1365_s6 = scalar_lea.vmem %s1439_s3, %s943_s28  ;;  %298 = sbr.rel (%p946_p10) target bundleno = 35 (0x23), region = 36 }
  0x23 PF: > { %v1191_v6 = vld [vmem:[%s1354_s13 + $0x40] sm:$0xff]   ;;  %v1369_v7 = vcombine.low %v290_v0, %v291_v1  ;;  %v1371_v8 = vcombine.low %v292_v2, %v293_v3  ;;  %v1192_v9 = vld [vmem:[%s1354_s13 + $0x48] sm:$0xff]   ;;  %v1193_v12 = vld [vmem:[%s1354_s13 + $0x50] sm:$0xff]   ;;  %vm456_vm0 = vsmask.f32 7424  ;;  %v973_v25 = vcombine.low %v294_v4, %v294_v4  ;;  %p1006_p11 = scmp.ne.s32.totalorder %s1245_s15, 2 }
  0x24   : > { %1079 = vmatprep.subr.bf16.mxu0 %v1191_v6  ;;  %v1198_v15 = vld [vmem:[%s1354_s13] sm:$0xff]   ;;  %v1194_v18 = vld [vmem:[%s1354_s13 + $0x58] sm:$0xff]   ;;  %v1200_v19 = vld [vmem:[%s1354_s13 + $0x8] sm:$0xff]   ;;  %vm597_vm1 = vcmask 1046528   ;;  %vm771_vm2 = vcmask (!%p1006_p11), 1040384  }
  0x25   : > { %1075 = vmatprep.mubr.bf16.mxu1 %v1369_v7  ;;  %1080 = vmatpush3.bf16.msra.mxu0 %v1191_v6  ;;  %v458_v10 = vshrl.u32 %v1369_v7, 16  ;;  %v460_v11 = vshll.u32 %v1369_v7, 16  ;;  %v465_v13 = vshll.u32 %v1371_v8, 16  ;;  %v1195_v20 = vld [vmem:[%s1354_s13 + $0x60] sm:$0xff]   ;;  %v1202_v22 = vld [vmem:[%s1354_s13 + $0x10] sm:$0xff]   ;;  %v1204_v23 = vld [vmem:[%s1354_s13 + $0x18] sm:$0xff]  }
  0x26   : > { %1081 = vmatprep.subr.bf16.mxu0 %v1192_v9  ;;  %1059 = vmatprep.subr.bf16.mxu1 %v1198_v15  ;;  %v1196_v24 = vld [vmem:[%s1354_s13 + $0x68] sm:$0xff]   ;;  %v1206_v26 = vld [vmem:[%s1354_s13 + $0x20] sm:$0xff]   ;;  %v1197_v27 = vld [vmem:[%s1354_s13 + $0x70] sm:$0xff]   ;;  %v469_v28 = vshrl.u32 %v1371_v8, 16  ;;  %v473_v29 = vshll.u32 %v973_v25, 16  ;;  %v598_v36 = vrot.slane %v1369_v7, 1 }
  0x27   : > { %v462_v14 = vrot.slane %v460_v11, 1  ;;  %v467_v17 = vrot.slane %v465_v13, 1  ;;  %1060 = vmatpush3.bf16.msra.mxu1 %v1198_v15  ;;  %v1208_v30 = vld [vmem:[%s1354_s13 + $0x28] sm:$0xff]   ;;  %v1199_v31 = vld [vmem:[%s1354_s13 + $0x78] sm:$0xff]   ;;  %v1210_v34 = vld [vmem:[%s1354_s13 + $0x30] sm:$0xff]   ;;  %v599_v37 = vrot.slane %v1371_v8, 1 }
  0x28   : > { %1061 = vmatprep.subr.bf16.mxu1 %v1200_v19  ;;  %v475_v33 = vrot.slane %v473_v29, 1  ;;  %v1201_v35 = vld [vmem:[%s1354_s13 + $0x80] sm:$0xff]   ;;  %v1212_v39 = vld [vmem:[%s1354_s13 + $0x38] sm:$0xff]   ;;  %v1203_v40 = vld [vmem:[%s1354_s13 + $0x88] sm:$0xff]   ;;  %v601_v48 = vrot.slane %v973_v25, 1 }
  0x29   : > { %1082 = vmatpush3.bf16.msra.mxu0 %v1192_v9  ;;  %v463_v16 = vor.u32 %v462_v14, %v458_v10  ;;  %v471_v32 = vor.u32 %v469_v28, %v467_v17  ;;  %v600_v41 = vsel %vm597_vm1, %v598_v36, %v599_v37  ;;  %v1205_v42 = vld [vmem:[%s1354_s13 + $0x90] sm:$0xff]   ;;  %v1207_v43 = vld [vmem:[%s1354_s13 + $0x98] sm:$0xff]   ;;  %v1209_v44 = vld [vmem:[%s1354_s13 + $0xa0] sm:$0xff]  }
  0x2a   : > { %1083 = vmatprep.subr.bf16.mxu0 %v1193_v12  ;;  %v1211_v45 = vld [vmem:[%s1354_s13 + $0xa8] sm:$0xff]   ;;  %v1213_v46 = vld [vmem:[%s1354_s13 + $0xb0] sm:$0xff]   ;;  %v1214_v47 = vld [vmem:[%s1354_s13 + $0xb8] sm:$0xff]   ;;  %v602_v49 = vsel %vm597_vm1, %v599_v37, %v601_v48 }
  0x2b   : > { %v468_v21 = vsel %vm456_vm0, %v463_v16, %v467_v17  ;;  %1062 = vmatpush3.bf16.msra.mxu1 %v1200_v19  ;;  %v476_v38 = vsel %vm456_vm0, %v471_v32, %v475_v33  ;;  %v305_v54 = vld [vmem:[#allocation2 + $0x10] sm:$0xff]  ;;  %v303_v55 = vld [vmem:[#allocation2] sm:$0xff]  ;;  %v306_v58 = vld [vmem:[#allocation2 + $0x18] sm:$0xff] }
  0x2c   : > { %1095 = vmatprep.mubr.bf16.mxu0 %v468_v21  ;;  %1063 = vmatprep.subr.bf16.mxu1 %v1202_v22  ;;  %v304_v59 = vld [vmem:[#allocation2 + $0x8] sm:$0xff] }
  0x2d   : > { %1084 = vmatpush3.bf16.msra.mxu0 %v1193_v12 }
  0x2e   : > { %1085 = vmatprep.subr.bf16.mxu0 %v1194_v18 }
  0x2f   : > { %1064 = vmatpush3.bf16.msra.mxu1 %v1202_v22 }
  0x30   : > { %1065 = vmatprep.subr.bf16.mxu1 %v1204_v23 }
  0x31   : > { %1086 = vmatpush3.bf16.msra.mxu0 %v1194_v18 }
  0x32   : > { %1087 = vmatprep.subr.bf16.mxu0 %v1195_v20 }
  0x33   : > { %1066 = vmatpush3.bf16.msra.mxu1 %v1204_v23 }
  0x34   : > { %1067 = vmatprep.subr.bf16.mxu1 %v1206_v26 }
  0x35   : > { %1088 = vmatpush3.bf16.msra.mxu0 %v1195_v20 }
  0x36   : > { %1089 = vmatprep.subr.bf16.mxu0 %v1196_v24 }
  0x37   : > { %1068 = vmatpush3.bf16.msra.mxu1 %v1206_v26 }
  0x38   : > { %1069 = vmatprep.subr.bf16.mxu1 %v1208_v30 }
  0x39   : > { %1090 = vmatpush3.bf16.msra.mxu0 %v1196_v24 }
  0x3a   : > { %1091 = vmatprep.subr.bf16.mxu0 %v1197_v27 }
  0x3b   : > { %1070 = vmatpush3.bf16.msra.mxu1 %v1208_v30 }
  0x3c   : > { %1071 = vmatprep.subr.bf16.mxu1 %v1210_v34 }
  0x3d   : > { %1092 = vmatpush3.bf16.msra.mxu0 %v1197_v27 }
  0x3e   : > { %1093 = vmatprep.subr.bf16.mxu0 %v1199_v31 }
  0x3f   : > { %1072 = vmatpush3.bf16.msra.mxu1 %v1210_v34 }
  0x40   : > { %1073 = vmatprep.subr.bf16.mxu1 %v1212_v39 }
  0x41   : > { %1094 = vmatpush3.bf16.msra.mxu0 %v1199_v31 }
  0x42   : > { %1099 = vmatprep.subr.bf16.mxu0 %v1201_v35 }
  0x43   : > { %1074 = vmatpush3.bf16.msra.mxu1 %v1212_v39 }
  0x44   : > { %1096 = vmatmul.mubr.bf16.vlgmr.msra.gmra.mrb[0].mxu0 %v476_v38 }
  0x45   : > { %1100 = vmatpush3.bf16.msra.mxu0 %v1201_v35  ;;  %1115 = vmatprep.mubr.bf16.mxu0 %v600_v41 }
  0x46   : > { %1101 = vmatprep.subr.bf16.mxu0 %v1203_v40  ;;  %1076 = vmatmul.mubr.bf16.vlgmr.msra.gmra.mrb[0].mxu1 %v1371_v8  ;;  %v1007_v8 = vld [vmem:[%s1438_s2] ss:$0 sm:$0xff] (!%p1006_p11) }
  0x49   : > { %1102 = vmatpush3.bf16.msra.mxu0 %v1203_v40 }
  0x4a   : > { %1103 = vmatprep.subr.bf16.mxu0 %v1205_v42 }
  0x4d   : > { %1104 = vmatpush3.bf16.msra.mxu0 %v1205_v42 }
  0x4e   : > { %1105 = vmatprep.subr.bf16.mxu0 %v1207_v43 }
  0x51   : > { %1106 = vmatpush3.bf16.msra.mxu0 %v1207_v43 }
  0x52   : > { %1107 = vmatprep.subr.bf16.mxu0 %v1209_v44 }
  0x55   : > { %1108 = vmatpush3.bf16.msra.mxu0 %v1209_v44 }
  0x56   : > { %1109 = vmatprep.subr.bf16.mxu0 %v1211_v45 }
  0x59   : > { %1110 = vmatpush3.bf16.msra.mxu0 %v1211_v45 }
  0x5a   : > { %1111 = vmatprep.subr.bf16.mxu0 %v1213_v46 }
  0x5d   : > { %1112 = vmatpush3.bf16.msra.mxu0 %v1213_v46 }
  0x5e   : > { %1113 = vmatprep.subr.bf16.mxu0 %v1214_v47 }
  0x61   : > { %1114 = vmatpush3.bf16.msra.mxu0 %v1214_v47 }
  0x64   : > { %1116 = vmatmul.mubr.bf16.vlgmr.msra.gmra.mrb[0].mxu0 %v602_v49 }
 0x119   : > { %v1077_v50 = vpop.f32.mrb[0].mxu1 }
 0x11a   : > { %v417_v51 = vpop.f32.mrb[1].mxu1  ;;  %v434_v56 = vadd.f32 %v1077_v50, %v305_v54 }
 0x11b   : > { %v1078_v52 = vpop.f32.mrb[2].mxu1  ;;  %v432_v57 = vadd.f32 %v417_v51, %v303_v55 }
 0x11c   : > { %v420_v53 = vpop.f32.mrb[3].mxu1  ;;  %v435_v61 = vadd.f32 %v1078_v52, %v306_v58 }
 0x11d   : > { %v433_v0 = vadd.f32 %v420_v53, %v304_v59 }
 0x137   : > { %v1117_v60 = vpop.f32.mrb[0].mxu0  ;;  %713 = sbr.rel (%p1006_p11) target bundleno = 349 (0x15d), region = 40 }
 0x138   : > { %v1120_v62 = vadd.f32 %v1117_v60, %v434_v56  ;;  %v687_v63 = vpop.f32.mrb[1].mxu0 }
 0x139   : > { %v1122_v1 = vadd.f32 %v687_v63, %v432_v57  ;;  %v1118_v2 = vpop.f32.mrb[2].mxu0 }
 0x13a   : > { %708 = vst [vmem:[#allocation2 + $0x10] sm:$0xff] %v1120_v62  ;;  %v1124_v3 = vadd.f32 %v1118_v2, %v435_v61  ;;  %v690_v4 = vpop.f32.mrb[3].mxu0 }
 0x13b   : > { %706 = vst [vmem:[#allocation2] sm:$0xff] %v1122_v1  ;;  %v1126_v5 = vadd.f32 %v690_v4, %v433_v0 }
 0x13c   : > { %709 = vst [vmem:[#allocation2 + $0x18] sm:$0xff] %v1124_v3 }
 0x13d   : > { %707 = vst [vmem:[#allocation2 + $0x8] sm:$0xff] %v1126_v5 }
 0x141   : > { %v716_v11 = vld [vmem:[#allocation2 + $0x10] sm:$0xff] }
 0x142   : > { %v714_v6 = vld [vmem:[#allocation2] sm:$0xff]  ;;  %v727_v13 = vadd.f32 %v1007_v8, %v716_v11 }
 0x143   : > { %v725_v9 = vadd.f32 %v1007_v8, %v714_v6  ;;  %v717_v12 = vld [vmem:[#allocation2 + $0x18] sm:$0xff] }
 0x144   : > { %v715_v7 = vld [vmem:[#allocation2 + $0x8] sm:$0xff]  ;;  %v728_v14 = vadd.f32 %v1007_v8, %v717_v12  ;;  %v760_v20 = vmul.f32 %v727_v13, %v727_v13 }
 0x145   : > { %v726_v10 = vadd.f32 %v1007_v8, %v715_v7  ;;  %v758_v17 = vmul.f32 %v725_v9, %v725_v9 }
 0x146   : > { %v1026_v19 = vpack.c.bf16 %v728_v14, %v727_v13  ;;  %v761_v23 = vmul.f32 %v728_v14, %v728_v14 }
 0x147   : > { %v1021_v15 = vpack.c.bf16 %v726_v10, %v725_v9  ;;  %v749_v16 = vadd.f32 %v726_v10, %v725_v9  ;;  %v759_v18 = vmul.f32 %v726_v10, %v726_v10 }
 0x148   : > { %1028 = vst [vmem:[%s1365_s6 + $0x8] sm:$0xff] %v1026_v19  }
 0x149   : > { %1022 = vst [vmem:[%s1365_s6] sm:$0xff] %v1021_v15   ;;  %v762_v21 = vadd.f32 %v759_v18, %v758_v17  ;;  %v750_v22 = vadd.f32 %v749_v16, %v727_v13 }
 0x14b   : > { %v751_v24 = vadd.f32 %v750_v22, %v728_v14  ;;  %v763_v25 = vadd.f32 %v762_v21, %v760_v20 }
 0x14d   : > { %v752_v26 = vrot.slane %v751_v24, 4  ;;  %v764_v27 = vadd.f32 %v763_v25, %v761_v23 }
 0x14f   : > { %v753_v28 = vadd.f32 %v752_v26, %v751_v24  ;;  %v765_v29 = vrot.slane %v764_v27, 4 }
 0x151   : > { %v754_v30 = vrot.slane %v753_v28, 2  ;;  %v766_v31 = vadd.f32 %v765_v29, %v764_v27 }
 0x153   : > { %v755_v32 = vadd.f32 %v754_v30, %v753_v28  ;;  %v767_v33 = vrot.slane %v766_v31, 2 }
 0x155   : > { %v756_v34 = vrot.slane %v755_v32, 1  ;;  %v768_v35 = vadd.f32 %v767_v33, %v766_v31 }
 0x157   : > { %v757_v36 = vadd.f32 %v756_v34, %v755_v32  ;;  %v769_v37 = vrot.slane %v768_v35, 1 }
 0x159   : > { %v770_v38 = vadd.f32 %v769_v37, %v768_v35 }
 0x15b   : > { %v772_v39 = vsel %vm771_vm2, %v757_v36, %v770_v38 }
 0x15c   : > { %773 = vst [vmem:[%s1360_s17] sm:$0x3] %v772_v39 }
 0x15d PF: > { %s15_s21 = sadd.s32 1, %s1269_s21   ;;  %s1441_s15 = smov %s1257_s18 }
 0x15e   : > { %p12_p12 = scmp.ge.s32.totalorder %s15_s21, 26   ;;  %s1442_s16 = smov %s1261_s19 }
 0x15f   : > { %s1443_s17 = smov %s1265_s20  ;;  %s1444_s18 = smov %s1448_s22 }
 0x160   : > { %s1445_s19 = smov %s1452_s23  ;;  %s1446_s20 = smov %s1456_s24 }
 0x161   :  { %14 = sbr.rel (!%p12_p12) target bundleno = 4 (0x4), region = 87 }

// kernel: point_pillars_forward.27
= control target key start
LH: loop header
LB: loop body
LE: loop exit
PB: predicated region body
PF: predicated region fallthrough
CT: control target
= control target key end

     0   :  { %s205_s0 = inlined_call_operand.vmem [shape: bf16[4,2,16,256], index: 0, kind: input, shape index: {}]   ;;  %s206_s1 = inlined_call_operand.vmem [shape: bf16[4,16,128], index: 1, kind: output, shape index: {}]  }
   0x1   :  { %v8_v0 = vld [vmem:[%s205_s0] sm:$0xff]  ;;  %v9_v1 = vld [vmem:[%s205_s0 + $0x8] sm:$0xff]  ;;  %v10_v2 = vld [vmem:[%s205_s0 + $0x10] sm:$0xff] }
   0x2   :  { %v11_v3 = vld [vmem:[%s205_s0 + $0x18] sm:$0xff]  ;;  %v40_v4 = vrot.slane %v8_v0, 4  ;;  %v41_v5 = vrot.slane %v9_v1, 4  ;;  %v42_v6 = vrot.slane %v10_v2, 4  ;;  %v12_v7 = vld [vmem:[%s205_s0 + $0x20] sm:$0xff]  ;;  %v13_v8 = vld [vmem:[%s205_s0 + $0x28] sm:$0xff] }
   0x3   :  { %v43_v9 = vrot.slane %v11_v3, 4  ;;  %v14_v10 = vld [vmem:[%s205_s0 + $0x30] sm:$0xff]  ;;  %v15_v11 = vld [vmem:[%s205_s0 + $0x38] sm:$0xff]  ;;  %v44_v12 = vrot.slane %v12_v7, 4  ;;  %v45_v13 = vrot.slane %v13_v8, 4  ;;  %v16_v14 = vld [vmem:[%s205_s0 + $0x40] sm:$0xff] }
   0x4   :  { %v72_v15 = vmax.bf16 %v40_v4, %v8_v0  ;;  %v73_v16 = vmax.bf16 %v41_v5, %v9_v1  ;;  %v74_v17 = vmax.bf16 %v42_v6, %v10_v2  ;;  %v46_v18 = vrot.slane %v14_v10, 4  ;;  %v17_v19 = vld [vmem:[%s205_s0 + $0x48] sm:$0xff]  ;;  %v18_v20 = vld [vmem:[%s205_s0 + $0x50] sm:$0xff]  ;;  %v19_v21 = vld [vmem:[%s205_s0 + $0x58] sm:$0xff] }
   0x5   :  { %v75_v22 = vmax.bf16 %v43_v9, %v11_v3  ;;  %v47_v23 = vrot.slane %v15_v11, 4  ;;  %v76_v24 = vmax.bf16 %v44_v12, %v12_v7  ;;  %v77_v25 = vmax.bf16 %v45_v13, %v13_v8  ;;  %v20_v26 = vld [vmem:[%s205_s0 + $0x60] sm:$0xff]  ;;  %v21_v35 = vld [vmem:[%s205_s0 + $0x68] sm:$0xff]  ;;  %v22_v36 = vld [vmem:[%s205_s0 + $0x70] sm:$0xff] }
   0x6   :  { %v88_v27 = vmax.bf16 %v74_v17, %v72_v15  ;;  %v78_v28 = vmax.bf16 %v46_v18, %v14_v10  ;;  %v48_v29 = vrot.slane %v16_v14, 4  ;;  %v49_v30 = vrot.slane %v17_v19, 4  ;;  %v23_v37 = vld [vmem:[%s205_s0 + $0x78] sm:$0xff] }
   0x7   :  { %v89_v31 = vmax.bf16 %v75_v22, %v73_v16  ;;  %v79_v32 = vmax.bf16 %v47_v23, %v15_v11  ;;  %v50_v33 = vrot.slane %v18_v20, 4  ;;  %v51_v34 = vrot.slane %v19_v21, 4 }
   0x8   :  { %v90_v38 = vmax.bf16 %v78_v28, %v76_v24  ;;  %v80_v39 = vmax.bf16 %v48_v29, %v16_v14  ;;  %v81_v40 = vmax.bf16 %v49_v30, %v17_v19  ;;  %v52_v41 = vrot.slane %v20_v26, 4 }
   0x9   :  { %v128_v42 = vcombine.low %v88_v27, %v89_v31  ;;  %v91_v43 = vmax.bf16 %v79_v32, %v77_v25  ;;  %v82_v44 = vmax.bf16 %v50_v33, %v18_v20  ;;  %v83_v45 = vmax.bf16 %v51_v34, %v19_v21 }
   0xa   :  { %v53_v46 = vrot.slane %v21_v35, 4  ;;  %v54_v47 = vrot.slane %v22_v36, 4  ;;  %v55_v48 = vrot.slane %v23_v37, 4  ;;  %v84_v49 = vmax.bf16 %v52_v41, %v20_v26 }
   0xb   :  { %112 = vst [vmem:[%s206_s1] sm:$0xff] %v128_v42   ;;  %v129_v50 = vcombine.low %v90_v38, %v91_v43  ;;  %v92_v51 = vmax.bf16 %v82_v44, %v80_v39  ;;  %v93_v52 = vmax.bf16 %v83_v45, %v81_v40 }
   0xc   :  { %v85_v53 = vmax.bf16 %v53_v46, %v21_v35  ;;  %v86_v54 = vmax.bf16 %v54_v47, %v22_v36  ;;  %v87_v55 = vmax.bf16 %v55_v48, %v23_v37 }
   0xd   :  { %130 = vst [vmem:[%s206_s1 + $0x8] sm:$0xff] %v129_v50   ;;  %v131_v56 = vcombine.low %v92_v51, %v93_v52 }
   0xe   :  { %v94_v57 = vmax.bf16 %v86_v54, %v84_v49  ;;  %v95_v58 = vmax.bf16 %v87_v55, %v85_v53 }
   0xf   :  { %132 = vst [vmem:[%s206_s1 + $0x10] sm:$0xff] %v131_v56  }
  0x10   :  { %v133_v59 = vcombine.low %v94_v57, %v95_v58 }
  0x12   :  { %134 = vst [vmem:[%s206_s1 + $0x18] sm:$0xff] %v133_v59  }

// kernel: point_pillars_forward.26
= control target key start
LH: loop header
LB: loop body
LE: loop exit
PB: predicated region body
PF: predicated region fallthrough
CT: control target
= control target key end

     0   :  { %vm323_vm0 = vcmask 523264   ;;  %s1717_s2 = inlined_call_operand.vmem [shape: bf16[64,128], index: 2, kind: input, shape index: {}]   ;;  %s1718_s1 = inlined_call_operand.vmem [shape: bf16[256,64], index: 1, kind: input, shape index: {}]   ;;  %s1719_s0 = inlined_call_operand.vmem [shape: bf16[256,128], index: 0, kind: input, shape index: {}]   ;;  %s1720_s4 = inlined_call_operand.vmem [shape: f32[1,128], index: 4, kind: input, shape index: {}]   ;;  %s1721_s5 = inlined_call_operand.vmem [shape: f32[1,128], index: 5, kind: input, shape index: {}]   ;;  %s1722_s3 = inlined_call_operand.vmem [shape: f32[1,128], index: 3, kind: input, shape index: {}]   ;;  %s1723_s6 = inlined_call_operand.vmem [shape: f32[1,128], index: 6, kind: input, shape index: {}]   ;;  %s1724_s7 = inlined_call_operand.vmem [shape: f32[1,128], index: 7, kind: input, shape index: {}]   ;;  %s1725_s8 = inlined_call_operand.vmem [shape: bf16[256,128], index: 8, kind: output, shape index: {}]  }
   0x1   :  { %v1186_v0 = vld [vmem:[%s1717_s2] sm:$0xff]   ;;  %v1187_v1 = vld [vmem:[%s1717_s2 + $0x8] sm:$0xff]   ;;  %v1188_v2 = vld [vmem:[%s1717_s2 + $0x10] sm:$0xff]  }
   0x2   :  { %1138 = vmatprep.subr.bf16.mxu0 %v1186_v0  ;;  %1178 = vmatprep.subr.bf16.mxu1 %v1186_v0  ;;  %v1190_v3 = vld [vmem:[%s1718_s1] sm:$0xff]   ;;  %v1189_v5 = vld [vmem:[%s1717_s2 + $0x18] sm:$0xff]   ;;  %v1192_v6 = vld [vmem:[%s1718_s1 + $0x8] sm:$0xff]  }
   0x3   :  { %1139 = vmatpush3.bf16.msra.mxu0 %v1186_v0  ;;  %1182 = vmatpush3.bf16.msra.mxu1 %v1186_v0  ;;  %v1191_v4 = vld [vmem:[%s1718_s1 + $0x40] sm:$0xff]   ;;  %v1193_v7 = vld [vmem:[%s1718_s1 + $0x48] sm:$0xff]   ;;  %v1194_v8 = vld [vmem:[%s1718_s1 + $0x10] sm:$0xff]  }
   0x4   :  { %1140 = vmatprep.subr.bf16.mxu0 %v1187_v1  ;;  %1179 = vmatprep.subr.bf16.mxu1 %v1187_v1  ;;  %v1195_v9 = vld [vmem:[%s1718_s1 + $0x50] sm:$0xff]   ;;  %v1196_v10 = vld [vmem:[%s1718_s1 + $0x18] sm:$0xff]   ;;  %v1198_v12 = vld [vmem:[%s1718_s1 + $0x20] sm:$0xff]  }
   0x5   :  { %1146 = vmatprep.mubr.msk.bf16.mxu0 %vm323_vm0, %v1190_v3  ;;  %1162 = vmatprep.mubr.msk.bf16.mxu1 %vm323_vm0, %v1191_v4  ;;  %v1197_v11 = vld [vmem:[%s1718_s1 + $0x58] sm:$0xff]   ;;  %v1199_v13 = vld [vmem:[%s1718_s1 + $0x60] sm:$0xff]   ;;  %v1200_v14 = vld [vmem:[%s1718_s1 + $0x28] sm:$0xff]  }
   0x6   :  { %v1201_v15 = vld [vmem:[%s1718_s1 + $0x68] sm:$0xff]   ;;  %v1202_v16 = vld [vmem:[%s1718_s1 + $0x30] sm:$0xff]   ;;  %v1204_v18 = vld [vmem:[%s1718_s1 + $0x38] sm:$0xff]  }
   0x7   :  { %1141 = vmatpush3.bf16.msra.mxu0 %v1187_v1  ;;  %1183 = vmatpush3.bf16.msra.mxu1 %v1187_v1  ;;  %v1203_v17 = vld [vmem:[%s1718_s1 + $0x70] sm:$0xff]   ;;  %v1205_v19 = vld [vmem:[%s1718_s1 + $0x78] sm:$0xff]   ;;  %v1088_v20 = vld [vmem:[%s1719_s0 + $0x8] sm:$0xff]  }
   0x8   :  { %1142 = vmatprep.subr.bf16.mxu0 %v1188_v2  ;;  %1180 = vmatprep.subr.bf16.mxu1 %v1188_v2  ;;  %v1096_v21 = vld [vmem:[%s1719_s0 + $0x48] sm:$0xff]   ;;  %v945_v22 = vld [vmem:[%s1719_s0] sm:$0xff]   ;;  %v1090_v24 = vld [vmem:[%s1719_s0 + $0x18] sm:$0xff]   ;;  %v950_v26 = vunpack.c.l.bf16 %v1088_v20  ;;  %v951_v32 = vunpack.c.h.bf16 %v1088_v20 }
   0x9   :  { %v1095_v23 = vld [vmem:[%s1719_s0 + $0x40] sm:$0xff]   ;;  %v1345_v25 = vld [vmem:[%s1719_s0 + $0x58] sm:$0xff]   ;;  %v982_v27 = vunpack.c.l.bf16 %v1096_v21  ;;  %v946_v28 = vunpack.c.l.bf16 %v945_v22  ;;  %v1089_v30 = vld [vmem:[%s1719_s0 + $0x10] sm:$0xff]   ;;  %v983_v33 = vunpack.c.h.bf16 %v1096_v21  ;;  %v947_v34 = vunpack.c.h.bf16 %v945_v22 }
   0xa   :  { %v978_v29 = vunpack.c.l.bf16 %v1095_v23  ;;  %v1353_v31 = vld [vmem:[%s1720_s4] ss:$0 sm:$0xff]  ;;  %v979_v35 = vunpack.c.h.bf16 %v1095_v23  ;;  %v958_v36 = vunpack.c.l.bf16 %v1090_v24  ;;  %v990_v37 = vunpack.c.l.bf16 %v1345_v25  ;;  %v1097_v39 = vld [vmem:[%s1719_s0 + $0x50] sm:$0xff]   ;;  %v1092_v58 = vld [vmem:[%s1719_s0 + $0x28] sm:$0xff]  }
   0xb   :  { %1143 = vmatpush3.bf16.msra.mxu0 %v1188_v2  ;;  %1184 = vmatpush3.bf16.msra.mxu1 %v1188_v2  ;;  %v954_v38 = vunpack.c.l.bf16 %v1089_v30  ;;  %v103_v40 = vmul.f32 %v950_v26, %v1353_v31  ;;  %v119_v41 = vmul.f32 %v982_v27, %v1353_v31  ;;  %v101_v42 = vmul.f32 %v946_v28, %v1353_v31  ;;  %v1366_v44 = vld [vmem:[%s1721_s5] ss:$0 sm:$0xff]  ;;  %v1100_v63 = vld [vmem:[%s1719_s0 + $0x68] sm:$0xff]  }
   0xc   :  { %1144 = vmatprep.subr.bf16.mxu0 %v1189_v5  ;;  %1181 = vmatprep.subr.bf16.mxu1 %v1189_v5  ;;  %v117_v43 = vmul.f32 %v978_v29, %v1353_v31  ;;  %v104_v45 = vmul.f32 %v951_v32, %v1353_v31  ;;  %v120_v46 = vmul.f32 %v983_v33, %v1353_v31  ;;  %v986_v51 = vunpack.c.l.bf16 %v1097_v39  ;;  %v1091_v0 = vld [vmem:[%s1719_s0 + $0x20] sm:$0xff]   ;;  %v1450_v29 = vld [vmem:[%s1719_s0 + $0x70] sm:$0xff]  }
   0xd   :  { %v102_v47 = vmul.f32 %v947_v34, %v1353_v31  ;;  %v118_v48 = vmul.f32 %v979_v35, %v1353_v31  ;;  %v107_v49 = vmul.f32 %v958_v36, %v1353_v31  ;;  %v123_v50 = vmul.f32 %v990_v37, %v1353_v31  ;;  %v1099_v1 = vld [vmem:[%s1719_s0 + $0x60] sm:$0xff]  }
   0xe   :  { %v959_v52 = vunpack.c.h.bf16 %v1090_v24  ;;  %v105_v53 = vmul.f32 %v954_v38, %v1353_v31  ;;  %v1376_v54 = vadd.f32 %v1366_v44, %v103_v40  ;;  %v1379_v55 = vadd.f32 %v1366_v44, %v119_v41 }
   0xf   :  { %1145 = vmatpush3.bf16.msra.mxu0 %v1189_v5  ;;  %1185 = vmatpush3.bf16.msra.mxu1 %v1189_v5  ;;  %v1382_v56 = vadd.f32 %v1366_v44, %v101_v42  ;;  %v1385_v57 = vadd.f32 %v1366_v44, %v117_v43  ;;  %v1391_v59 = vadd.f32 %v1366_v44, %v104_v45  ;;  %v995_v20 = vunpack.c.h.bf16 %v1099_v1 }
  0x10   :  { %v1394_v60 = vadd.f32 %v1366_v44, %v120_v46  ;;  %v1397_v61 = vadd.f32 %v1366_v44, %v102_v47  ;;  %v1400_v62 = vadd.f32 %v1366_v44, %v118_v48  ;;  %v1412_v2 = vadd.f32 %v1366_v44, %v107_v49  ;;  %v1476_v48 = vld [vmem:[%s1722_s3] ss:$0 sm:$0xff] }
  0x11   :  { %v1415_v3 = vadd.f32 %v1366_v44, %v123_v50  ;;  %v121_v4 = vmul.f32 %v986_v51, %v1353_v31  ;;  %v108_v5 = vmul.f32 %v959_v52, %v1353_v31  ;;  %v126_v38 = vmul.f32 %v995_v20, %v1353_v31 }
  0x12   :  { %1147 = vmatmul.mubr.msk.bf16.vlgmr.msra.gmra.mrb[0].mxu0 %vm323_vm0, %v1192_v6  ;;  %1163 = vmatmul.mubr.msk.bf16.vlgmr.msra.gmra.mrb[0].mxu1 %vm323_vm0, %v1193_v7  ;;  %v1420_v6 = vadd.f32 %v1366_v44, %v105_v53  ;;  %v991_v7 = vunpack.c.h.bf16 %v1345_v25  ;;  %v1002_v41 = vunpack.c.l.bf16 %v1450_v29 }
  0x13   :  { %1150 = vmatprep.mubr.msk.bf16.mxu0 %vm323_vm0, %v1194_v8  ;;  %1166 = vmatprep.mubr.msk.bf16.mxu1 %vm323_vm0, %v1195_v9  ;;  %v955_v8 = vunpack.c.h.bf16 %v1089_v30  ;;  %v987_v9 = vunpack.c.h.bf16 %v1097_v39  ;;  %v1437_v21 = vadd.f32 %v1366_v44, %v121_v4  ;;  %v1440_v22 = vadd.f32 %v1366_v44, %v108_v5  ;;  %v1505_v4 = vld [vmem:[%s1723_s6] ss:$0 sm:$0xff] }
  0x14   :  { %v124_v25 = vmul.f32 %v991_v7, %v1353_v31 }
  0x15   :  { %v106_v26 = vmul.f32 %v955_v8, %v1353_v31  ;;  %v122_v27 = vmul.f32 %v987_v9, %v1353_v31  ;;  %v1514_v9 = vmul.f32 %v1002_v41, %v1353_v31 }
  0x16   :  { %v1464_v43 = vadd.f32 %v1366_v44, %v124_v25 }
  0x17   :  { %v1467_v45 = vadd.f32 %v1366_v44, %v106_v26  ;;  %v1470_v46 = vadd.f32 %v1366_v44, %v122_v27  ;;  %v1003_v26 = vunpack.c.h.bf16 %v1450_v29 }
  0x1a   :  { %1151 = vmatmul.mubr.msk.bf16.gmra.mrb[4].mxu0 %vm323_vm0, %v1196_v10  ;;  %1167 = vmatmul.mubr.msk.bf16.gmra.mrb[4].mxu1 %vm323_vm0, %v1197_v11  ;;  %v1094_v10 = vld [vmem:[%s1719_s0 + $0x38] sm:$0xff]  }
  0x1b   :  { %1154 = vmatprep.mubr.msk.bf16.mxu0 %vm323_vm0, %v1198_v12  ;;  %1170 = vmatprep.mubr.msk.bf16.mxu1 %vm323_vm0, %v1199_v13  ;;  %v1429_v11 = vld [vmem:[%s1719_s0 + $0x78] sm:$0xff]   ;;  %v966_v12 = vunpack.c.l.bf16 %v1092_v58  ;;  %v998_v13 = vunpack.c.l.bf16 %v1100_v63  ;;  %v974_v23 = vunpack.c.l.bf16 %v1094_v10  ;;  %v975_v42 = vunpack.c.h.bf16 %v1094_v10 }
  0x1c   :  { %v1006_v24 = vunpack.c.l.bf16 %v1429_v11 }
  0x1d   :  { %v111_v30 = vmul.f32 %v966_v12, %v1353_v31  ;;  %v127_v32 = vmul.f32 %v998_v13, %v1353_v31  ;;  %v115_v39 = vmul.f32 %v974_v23, %v1353_v31  ;;  %v1517_v10 = vmul.f32 %v975_v42, %v1353_v31 }
  0x1e   :  { %v131_v40 = vmul.f32 %v1006_v24, %v1353_v31 }
  0x1f   :  { %v1479_v49 = vadd.f32 %v1366_v44, %v111_v30  ;;  %v1482_v50 = vadd.f32 %v1366_v44, %v127_v32  ;;  %v1508_v7 = vadd.f32 %v1366_v44, %v115_v39 }
  0x20   :  { %v1511_v8 = vadd.f32 %v1366_v44, %v131_v40 }
  0x22   :  { %1155 = vmatmul.mubr.msk.bf16.gmra.mrb[8].mxu0 %vm323_vm0, %v1200_v14  ;;  %1171 = vmatmul.mubr.msk.bf16.gmra.mrb[8].mxu1 %vm323_vm0, %v1201_v15  ;;  %v962_v14 = vunpack.c.l.bf16 %v1091_v0  ;;  %v994_v15 = vunpack.c.l.bf16 %v1099_v1 }
  0x23   :  { %1158 = vmatprep.mubr.msk.bf16.mxu0 %vm323_vm0, %v1202_v16  ;;  %1174 = vmatprep.mubr.msk.bf16.mxu1 %vm323_vm0, %v1203_v17  ;;  %v1434_v16 = vld [vmem:[%s1719_s0 + $0x30] sm:$0xff]   ;;  %v967_v17 = vunpack.c.h.bf16 %v1092_v58 }
  0x24   :  { %v970_v28 = vunpack.c.l.bf16 %v1434_v16  ;;  %v109_v33 = vmul.f32 %v962_v14, %v1353_v31  ;;  %v125_v34 = vmul.f32 %v994_v15, %v1353_v31  ;;  %v971_v25 = vunpack.c.h.bf16 %v1434_v16 }
  0x25   :  { %v112_v35 = vmul.f32 %v967_v17, %v1353_v31 }
  0x26   :  { %v113_v47 = vmul.f32 %v970_v28, %v1353_v31  ;;  %v1485_v51 = vadd.f32 %v1366_v44, %v109_v33  ;;  %v1488_v52 = vadd.f32 %v1366_v44, %v125_v34 }
  0x27   :  { %v1491_v53 = vadd.f32 %v1366_v44, %v112_v35  ;;  %v1536_v35 = vld [vmem:[%s1724_s7] ss:$0 sm:$0xff] }
  0x28   :  { %v1522_v17 = vadd.f32 %v1366_v44, %v113_v47 }
  0x2a   :  { %1159 = vmatmul.mubr.msk.bf16.gmra.mrb[12].mxu0 %vm323_vm0, %v1204_v18  ;;  %1175 = vmatmul.mubr.msk.bf16.gmra.mrb[12].mxu1 %vm323_vm0, %v1205_v19  ;;  %v999_v18 = vunpack.c.h.bf16 %v1100_v63  ;;  %v963_v19 = vunpack.c.h.bf16 %v1091_v0  ;;  %v1500_v0 = vadd.f32 %v1366_v44, %v126_v38 }
  0x2c   :  { %v128_v36 = vmul.f32 %v999_v18, %v1353_v31  ;;  %v110_v37 = vmul.f32 %v963_v19, %v1353_v31  ;;  %v1007_v18 = vunpack.c.h.bf16 %v1429_v11  ;;  %v130_v11 = vmul.f32 %v1003_v26, %v1353_v31 }
  0x2e   :  { %v1494_v58 = vadd.f32 %v1366_v44, %v128_v36  ;;  %v1497_v63 = vadd.f32 %v1366_v44, %v110_v37 }
  0xe5   :  { %v1148_v1 = vpop.f32.mrb[0].mxu0  ;;  %v1164_v5 = vpop.f32.mrb[0].mxu1 }
  0xe6   :  { %v415_v12 = vadd.f32 %v1148_v1, %v1476_v48  ;;  %v479_v13 = vadd.f32 %v1164_v5, %v1476_v48  ;;  %v406_v14 = vpop.f32.mrb[1].mxu0  ;;  %v470_v15 = vpop.f32.mrb[1].mxu1 }
  0xe7   :  { %v407_v19 = vadd.f32 %v1476_v48, %v406_v14  ;;  %v471_v20 = vadd.f32 %v1476_v48, %v470_v15  ;;  %v1149_v23 = vpop.f32.mrb[2].mxu0  ;;  %v1165_v24 = vpop.f32.mrb[2].mxu1 }
  0xe8   :  { %v542_v27 = vmul.f32 %v1505_v4, %v415_v12  ;;  %v558_v28 = vmul.f32 %v1505_v4, %v479_v13  ;;  %v418_v30 = vadd.f32 %v1149_v23, %v1476_v48  ;;  %v482_v32 = vadd.f32 %v1165_v24, %v1476_v48  ;;  %v409_v33 = vpop.f32.mrb[3].mxu0  ;;  %v473_v34 = vpop.f32.mrb[3].mxu1 }
  0xe9   :  { %v540_v36 = vmul.f32 %v1505_v4, %v407_v19  ;;  %v556_v37 = vmul.f32 %v1505_v4, %v471_v20  ;;  %v410_v38 = vadd.f32 %v1476_v48, %v409_v33  ;;  %v474_v39 = vadd.f32 %v1476_v48, %v473_v34 }
  0xea   :  { %v574_v40 = vadd.f32 %v542_v27, %v1376_v54  ;;  %v590_v41 = vadd.f32 %v558_v28, %v1379_v55  ;;  %v543_v42 = vmul.f32 %v1505_v4, %v418_v30  ;;  %v559_v47 = vmul.f32 %v1505_v4, %v482_v32 }
  0xeb   :  { %v572_v1 = vadd.f32 %v540_v36, %v1382_v56  ;;  %v588_v5 = vadd.f32 %v556_v37, %v1385_v57  ;;  %v541_v12 = vmul.f32 %v1505_v4, %v410_v38  ;;  %v557_v13 = vmul.f32 %v1505_v4, %v474_v39 }
  0xec   :  { %v613_v14 = vadd.f32 %v1536_v35, %v574_v40  ;;  %v629_v15 = vadd.f32 %v1536_v35, %v590_v41  ;;  %v575_v54 = vadd.f32 %v543_v42, %v1391_v59  ;;  %v591_v55 = vadd.f32 %v559_v47, %v1394_v60 }
  0xed   :  { %v611_v19 = vadd.f32 %v1536_v35, %v572_v1  ;;  %v627_v20 = vadd.f32 %v1536_v35, %v588_v5  ;;  %v573_v56 = vadd.f32 %v541_v12, %v1397_v61  ;;  %v589_v57 = vadd.f32 %v557_v13, %v1400_v62  ;;  %v1152_v23 = vpop.f32.mrb[4].mxu0  ;;  %v1168_v24 = vpop.f32.mrb[4].mxu1 }
  0xee   :  { %v645_v27 = vmax.f32 %v613_v14, 0.0  ;;  %v661_v28 = vmax.f32 %v629_v15, 0.0  ;;  %v614_v30 = vadd.f32 %v1536_v35, %v575_v54  ;;  %v630_v32 = vadd.f32 %v1536_v35, %v591_v55  ;;  %v422_v33 = vpop.f32.mrb[5].mxu0  ;;  %v486_v59 = vpop.f32.mrb[5].mxu1 }
  0xef   :  { %v643_v34 = vmax.f32 %v611_v19, 0.0  ;;  %v659_v60 = vmax.f32 %v627_v20, 0.0  ;;  %v612_v36 = vadd.f32 %v1536_v35, %v573_v56  ;;  %v628_v37 = vadd.f32 %v1536_v35, %v589_v57  ;;  %v1153_v38 = vpop.f32.mrb[6].mxu0  ;;  %v1169_v61 = vpop.f32.mrb[6].mxu1 }
  0xf0   :  { %v646_v39 = vmax.f32 %v614_v30, 0.0  ;;  %v662_v62 = vmax.f32 %v630_v32, 0.0  ;;  %v431_v40 = vadd.f32 %v1152_v23, %v1476_v48  ;;  %v495_v41 = vadd.f32 %v1168_v24, %v1476_v48  ;;  %v425_v42 = vpop.f32.mrb[7].mxu0  ;;  %v489_v47 = vpop.f32.mrb[7].mxu1 }
  0xf1   :  { %v644_v1 = vmax.f32 %v612_v36, 0.0  ;;  %v660_v5 = vmax.f32 %v628_v37, 0.0  ;;  %v423_v12 = vadd.f32 %v1476_v48, %v422_v33  ;;  %v487_v13 = vadd.f32 %v1476_v48, %v486_v59 }
  0xf2   :  { %v1016_v14 = vpack.c.bf16 %v646_v39, %v645_v27  ;;  %v1056_v15 = vpack.c.bf16 %v662_v62, %v661_v28  ;;  %v546_v54 = vmul.f32 %v1505_v4, %v431_v40  ;;  %v562_v55 = vmul.f32 %v1505_v4, %v495_v41 }
  0xf3   :  { %v1011_v19 = vpack.c.bf16 %v644_v1, %v643_v34  ;;  %v1051_v20 = vpack.c.bf16 %v660_v5, %v659_v60  ;;  %v544_v56 = vmul.f32 %v1505_v4, %v423_v12  ;;  %v560_v57 = vmul.f32 %v1505_v4, %v487_v13 }
  0xf4   :  { %1103 = vst [vmem:[%s1725_s8 + $0x8] sm:$0xff] %v1016_v14   ;;  %1111 = vst [vmem:[%s1725_s8 + $0x48] sm:$0xff] %v1056_v15   ;;  %v578_v23 = vadd.f32 %v546_v54, %v1412_v2  ;;  %v594_v24 = vadd.f32 %v562_v55, %v1415_v3  ;;  %v434_v27 = vadd.f32 %v1153_v38, %v1476_v48 }
  0xf5   :  { %v498_v28 = vadd.f32 %v1169_v61, %v1476_v48  ;;  %1012 = vst [vmem:[%s1725_s8] sm:$0xff] %v1011_v19   ;;  %1110 = vst [vmem:[%s1725_s8 + $0x40] sm:$0xff] %v1051_v20   ;;  %v576_v30 = vadd.f32 %v544_v56, %v1420_v6  ;;  %v592_v32 = vadd.f32 %v560_v57, %v1437_v21  ;;  %v1156_v33 = vpop.f32.mrb[8].mxu0  ;;  %v1172_v59 = vpop.f32.mrb[8].mxu1 }
  0xf6   :  { %v426_v2 = vadd.f32 %v1476_v48, %v425_v42  ;;  %v490_v3 = vadd.f32 %v1476_v48, %v489_v47  ;;  %v617_v34 = vadd.f32 %v1536_v35, %v578_v23  ;;  %v633_v60 = vadd.f32 %v1536_v35, %v594_v24  ;;  %v438_v38 = vpop.f32.mrb[9].mxu0  ;;  %v502_v61 = vpop.f32.mrb[9].mxu1 }
  0xf7   :  { %v547_v36 = vmul.f32 %v1505_v4, %v434_v27  ;;  %v563_v37 = vmul.f32 %v1505_v4, %v498_v28  ;;  %v615_v6 = vadd.f32 %v1536_v35, %v576_v30  ;;  %v631_v21 = vadd.f32 %v1536_v35, %v592_v32  ;;  %v1157_v40 = vpop.f32.mrb[10].mxu0  ;;  %v1173_v41 = vpop.f32.mrb[10].mxu1 }
  0xf8   :  { %v545_v39 = vmul.f32 %v1505_v4, %v426_v2  ;;  %v561_v62 = vmul.f32 %v1505_v4, %v490_v3  ;;  %v649_v42 = vmax.f32 %v617_v34, 0.0  ;;  %v665_v47 = vmax.f32 %v633_v60, 0.0  ;;  %v441_v12 = vpop.f32.mrb[11].mxu0  ;;  %v505_v13 = vpop.f32.mrb[11].mxu1 }
  0xf9   :  { %v579_v1 = vadd.f32 %v547_v36, %v1440_v22  ;;  %v595_v5 = vadd.f32 %v563_v37, %v1464_v43  ;;  %v647_v14 = vmax.f32 %v615_v6, 0.0  ;;  %v663_v15 = vmax.f32 %v631_v21, 0.0 }
  0xfa   :  { %v577_v54 = vadd.f32 %v545_v39, %v1467_v45  ;;  %v593_v55 = vadd.f32 %v561_v62, %v1470_v46  ;;  %v447_v56 = vadd.f32 %v1156_v33, %v1476_v48  ;;  %v511_v57 = vadd.f32 %v1172_v59, %v1476_v48 }
  0xfb   :  { %v618_v19 = vadd.f32 %v1536_v35, %v579_v1  ;;  %v634_v20 = vadd.f32 %v1536_v35, %v595_v5  ;;  %v439_v23 = vadd.f32 %v1476_v48, %v438_v38  ;;  %v503_v24 = vadd.f32 %v1476_v48, %v502_v61 }
  0xfc   :  { %v616_v22 = vadd.f32 %v1536_v35, %v577_v54  ;;  %v632_v43 = vadd.f32 %v1536_v35, %v593_v55  ;;  %v550_v46 = vmul.f32 %v1505_v4, %v447_v56  ;;  %v566_v28 = vmul.f32 %v1505_v4, %v511_v57 }
  0xfd   :  { %v650_v27 = vmax.f32 %v618_v19, 0.0  ;;  %v666_v45 = vmax.f32 %v634_v20, 0.0  ;;  %v548_v2 = vmul.f32 %v1505_v4, %v439_v23  ;;  %v564_v3 = vmul.f32 %v1505_v4, %v503_v24  ;;  %v1160_v33 = vpop.f32.mrb[12].mxu0  ;;  %v1176_v59 = vpop.f32.mrb[12].mxu1 }
  0xfe   :  { %v648_v30 = vmax.f32 %v616_v22, 0.0  ;;  %v664_v32 = vmax.f32 %v632_v43, 0.0  ;;  %v582_v36 = vadd.f32 %v550_v46, %v1479_v49  ;;  %v598_v37 = vadd.f32 %v566_v28, %v1482_v50  ;;  %v454_v38 = vpop.f32.mrb[13].mxu0  ;;  %v518_v61 = vpop.f32.mrb[13].mxu1 }
  0xff   :  { %v1026_v34 = vpack.c.bf16 %v650_v27, %v649_v42  ;;  %v1066_v60 = vpack.c.bf16 %v666_v45, %v665_v47  ;;  %v580_v39 = vadd.f32 %v548_v2, %v1485_v51  ;;  %v596_v62 = vadd.f32 %v564_v3, %v1488_v52  ;;  %v1161_v1 = vpop.f32.mrb[14].mxu0  ;;  %v1177_v5 = vpop.f32.mrb[14].mxu1 }
 0x100   :  { %v1021_v6 = vpack.c.bf16 %v648_v30, %v647_v14  ;;  %v1061_v21 = vpack.c.bf16 %v664_v32, %v663_v15  ;;  %v450_v49 = vadd.f32 %v1157_v40, %v1476_v48  ;;  %v514_v50 = vadd.f32 %v1173_v41, %v1476_v48  ;;  %v457_v52 = vpop.f32.mrb[15].mxu0  ;;  %v521_v47 = vpop.f32.mrb[15].mxu1 }
 0x101   :  { %1105 = vst [vmem:[%s1725_s8 + $0x18] sm:$0xff] %v1026_v34   ;;  %1113 = vst [vmem:[%s1725_s8 + $0x58] sm:$0xff] %v1066_v60   ;;  %v168_v42 = vadd.f32 %v1366_v44, %v1514_v9  ;;  %v132_v51 = vmul.f32 %v1007_v18, %v1353_v31  ;;  %v442_v40 = vadd.f32 %v1476_v48, %v441_v12 }
 0x102   :  { %1104 = vst [vmem:[%s1725_s8 + $0x10] sm:$0xff] %v1021_v6   ;;  %1112 = vst [vmem:[%s1725_s8 + $0x50] sm:$0xff] %v1061_v21   ;;  %v506_v41 = vadd.f32 %v1476_v48, %v505_v13  ;;  %v114_v9 = vmul.f32 %v971_v25, %v1353_v31  ;;  %v621_v18 = vadd.f32 %v1536_v35, %v582_v36 }
 0x103   :  { %v637_v14 = vadd.f32 %v1536_v35, %v598_v37  ;;  %v551_v15 = vmul.f32 %v1505_v4, %v450_v49  ;;  %v567_v54 = vmul.f32 %v1505_v4, %v514_v50  ;;  %v619_v12 = vadd.f32 %v1536_v35, %v580_v39 }
 0x104   :  { %v635_v13 = vadd.f32 %v1536_v35, %v596_v62  ;;  %v549_v55 = vmul.f32 %v1505_v4, %v442_v40  ;;  %v565_v16 = vmul.f32 %v1505_v4, %v506_v41  ;;  %v463_v29 = vadd.f32 %v1160_v33, %v1476_v48 }
 0x105   :  { %v583_v25 = vadd.f32 %v551_v15, %v1491_v53  ;;  %v599_v31 = vadd.f32 %v567_v54, %v1494_v58  ;;  %v527_v26 = vadd.f32 %v1176_v59, %v1476_v48  ;;  %v455_v56 = vadd.f32 %v1476_v48, %v454_v38 }
 0x106   :  { %v581_v19 = vadd.f32 %v549_v55, %v1497_v63  ;;  %v597_v20 = vadd.f32 %v565_v16, %v1500_v0  ;;  %v519_v57 = vadd.f32 %v1476_v48, %v518_v61  ;;  %v653_v22 = vmax.f32 %v621_v18, 0.0 }
 0x107   :  { %v669_v43 = vmax.f32 %v637_v14, 0.0  ;;  %v622_v23 = vadd.f32 %v1536_v35, %v583_v25  ;;  %v638_v53 = vadd.f32 %v1536_v35, %v599_v31  ;;  %v651_v24 = vmax.f32 %v619_v12, 0.0 }
 0x108   :  { %v667_v58 = vmax.f32 %v635_v13, 0.0  ;;  %v620_v27 = vadd.f32 %v1536_v35, %v581_v19  ;;  %v636_v45 = vadd.f32 %v1536_v35, %v597_v20  ;;  %v554_v0 = vmul.f32 %v1505_v4, %v463_v29 }
 0x109   :  { %v654_v46 = vmax.f32 %v622_v23, 0.0  ;;  %v670_v63 = vmax.f32 %v638_v53, 0.0  ;;  %v570_v28 = vmul.f32 %v1505_v4, %v527_v26  ;;  %v552_v2 = vmul.f32 %v1505_v4, %v455_v56 }
 0x10a   :  { %v652_v30 = vmax.f32 %v620_v27, 0.0  ;;  %v668_v32 = vmax.f32 %v636_v45, 0.0  ;;  %v568_v3 = vmul.f32 %v1505_v4, %v519_v57  ;;  %v155_v34 = vadd.f32 %v1366_v44, %v1517_v10 }
 0x10b   :  { %v1036_v33 = vpack.c.bf16 %v654_v46, %v653_v22  ;;  %v1076_v59 = vpack.c.bf16 %v670_v63, %v669_v43  ;;  %v171_v60 = vadd.f32 %v1366_v44, %v132_v51  ;;  %v153_v38 = vadd.f32 %v1366_v44, %v114_v9 }
 0x10c   :  { %v1031_v36 = vpack.c.bf16 %v652_v30, %v651_v24  ;;  %v1071_v37 = vpack.c.bf16 %v668_v32, %v667_v58  ;;  %v169_v61 = vadd.f32 %v1366_v44, %v130_v11  ;;  %v586_v6 = vadd.f32 %v554_v0, %v1508_v7 }
 0x10d   :  { %1107 = vst [vmem:[%s1725_s8 + $0x28] sm:$0xff] %v1036_v33   ;;  %1115 = vst [vmem:[%s1725_s8 + $0x68] sm:$0xff] %v1076_v59   ;;  %v602_v10 = vadd.f32 %v570_v28, %v1511_v8  ;;  %v466_v21 = vadd.f32 %v1161_v1, %v1476_v48  ;;  %v530_v39 = vadd.f32 %v1177_v5, %v1476_v48 }
 0x10e   :  { %1106 = vst [vmem:[%s1725_s8 + $0x20] sm:$0xff] %v1031_v36   ;;  %1114 = vst [vmem:[%s1725_s8 + $0x60] sm:$0xff] %v1071_v37   ;;  %v584_v44 = vadd.f32 %v552_v2, %v1522_v17  ;;  %v600_v62 = vadd.f32 %v568_v3, %v168_v42  ;;  %v458_v49 = vadd.f32 %v1476_v48, %v457_v52 }
 0x10f   :  { %v522_v7 = vadd.f32 %v1476_v48, %v521_v47  ;;  %v555_v8 = vmul.f32 %v1505_v4, %v466_v21  ;;  %v571_v1 = vmul.f32 %v1505_v4, %v530_v39  ;;  %v625_v51 = vadd.f32 %v1536_v35, %v586_v6 }
 0x110   :  { %v553_v5 = vmul.f32 %v1505_v4, %v458_v49  ;;  %v641_v40 = vadd.f32 %v1536_v35, %v602_v10  ;;  %v623_v17 = vadd.f32 %v1536_v35, %v584_v44  ;;  %v639_v42 = vadd.f32 %v1536_v35, %v600_v62 }
 0x111   :  { %v569_v50 = vmul.f32 %v1505_v4, %v522_v7  ;;  %v587_v41 = vadd.f32 %v555_v8, %v155_v34  ;;  %v603_v9 = vadd.f32 %v571_v1, %v171_v60  ;;  %v657_v14 = vmax.f32 %v625_v51, 0.0 }
 0x112   :  { %v585_v52 = vadd.f32 %v553_v5, %v153_v38  ;;  %v673_v15 = vmax.f32 %v641_v40, 0.0  ;;  %v655_v13 = vmax.f32 %v623_v17, 0.0  ;;  %v671_v55 = vmax.f32 %v639_v42, 0.0 }
 0x113   :  { %v601_v48 = vadd.f32 %v569_v50, %v169_v61  ;;  %v626_v47 = vadd.f32 %v1536_v35, %v587_v41  ;;  %v642_v11 = vadd.f32 %v1536_v35, %v603_v9 }
 0x114   :  { %v624_v18 = vadd.f32 %v1536_v35, %v585_v52 }
 0x115   :  { %v640_v4 = vadd.f32 %v1536_v35, %v601_v48  ;;  %v658_v54 = vmax.f32 %v626_v47, 0.0  ;;  %v674_v12 = vmax.f32 %v642_v11, 0.0 }
 0x116   :  { %v656_v16 = vmax.f32 %v624_v18, 0.0 }
 0x117   :  { %v672_v25 = vmax.f32 %v640_v4, 0.0  ;;  %v1046_v31 = vpack.c.bf16 %v658_v54, %v657_v14  ;;  %v1086_v29 = vpack.c.bf16 %v674_v12, %v673_v15 }
 0x118   :  { %v1041_v26 = vpack.c.bf16 %v656_v16, %v655_v13 }
 0x119   :  { %v1081_v19 = vpack.c.bf16 %v672_v25, %v671_v55  ;;  %1109 = vst [vmem:[%s1725_s8 + $0x38] sm:$0xff] %v1046_v31   ;;  %1117 = vst [vmem:[%s1725_s8 + $0x78] sm:$0xff] %v1086_v29  }
 0x11a   :  { %1108 = vst [vmem:[%s1725_s8 + $0x30] sm:$0xff] %v1041_v26  }
 0x11b   :  { %1116 = vst [vmem:[%s1725_s8 + $0x70] sm:$0xff] %v1081_v19  }

// kernel: point_pillars_forward.31
= control target key start
LH: loop header
LB: loop body
LE: loop exit
PB: predicated region body
PF: predicated region fallthrough
CT: control target
= control target key end

     0   :  { %v381_v1 = vmov 0   ;;  %v41_v21 = vlaneseq  ;;  %vm296_vm0 = vcmask 1040384   ;;  %s478_s1 = inlined_call_operand.vmem [shape: bf16[128,256], index: 1, kind: input, shape index: {}]   ;;  %s479_s0 = inlined_call_operand.vmem [shape: bf16[64,128], index: 0, kind: input, shape index: {}]   ;;  %s480_s2 = inlined_call_operand.vmem [shape: f32[1,256], index: 2, kind: input, shape index: {}]   ;;  %s481_s3 = inlined_call_operand.vmem [shape: f32[1,2,256], index: 3, kind: output, shape index: {}]  }
   0x1   :  { %v353_v0 = vld [vmem:[%s478_s1 + $0x4] ss:$8 sps:$4 sm:$0xff]   ;;  %187 = vmatprep.mubr.bf16.mxu0 %v381_v1  ;;  %207 = vmatprep.mubr.bf16.mxu1 %v381_v1  ;;  %v355_v2 = vld [vmem:[%s478_s1] ss:$8 sps:$4 sm:$0xff]   ;;  %v356_v3 = vld [vmem:[%s478_s1 + $0x14] ss:$8 sps:$4 sm:$0xff]  }
   0x2   :  { %155 = vmatprep.subr.bf16.mxu0 %v353_v0  ;;  %336 = vmatprep.subr.bf16.mxu1 %v353_v0  ;;  %v358_v4 = vld [vmem:[%s478_s1 + $0x10] ss:$8 sps:$4 sm:$0xff]   ;;  %v359_v5 = vld [vmem:[%s478_s1 + $0x24] ss:$8 sps:$4 sm:$0xff]   ;;  %v361_v6 = vld [vmem:[%s478_s1 + $0x20] ss:$8 sps:$4 sm:$0xff]  }
   0x3   :  { %156 = vmatpush1.bf16.msra.mxu0 %v355_v2  ;;  %344 = vmatpush1.bf16.msra.mxu1 %v355_v2  ;;  %v362_v7 = vld [vmem:[%s478_s1 + $0x34] ss:$8 sps:$4 sm:$0xff]   ;;  %v364_v8 = vld [vmem:[%s478_s1 + $0x30] ss:$8 sps:$4 sm:$0xff]   ;;  %v365_v9 = vld [vmem:[%s478_s1 + $0x44] ss:$8 sps:$4 sm:$0xff]  }
   0x4   :  { %157 = vmatprep.subr.bf16.mxu0 %v356_v3  ;;  %337 = vmatprep.subr.bf16.mxu1 %v356_v3  ;;  %v367_v10 = vld [vmem:[%s478_s1 + $0x40] ss:$8 sps:$4 sm:$0xff]   ;;  %v368_v11 = vld [vmem:[%s478_s1 + $0x54] ss:$8 sps:$4 sm:$0xff]   ;;  %v370_v12 = vld [vmem:[%s478_s1 + $0x50] ss:$8 sps:$4 sm:$0xff]  }
   0x5   :  { %v371_v13 = vld [vmem:[%s478_s1 + $0x64] ss:$8 sps:$4 sm:$0xff]   ;;  %v373_v14 = vld [vmem:[%s478_s1 + $0x60] ss:$8 sps:$4 sm:$0xff]   ;;  %v374_v15 = vld [vmem:[%s478_s1 + $0x74] ss:$8 sps:$4 sm:$0xff]  }
   0x6   :  { %v376_v16 = vld [vmem:[%s478_s1 + $0x70] ss:$8 sps:$4 sm:$0xff]   ;;  %v377_v17 = vld [vmem:[%s479_s0] sm:$0xff]   ;;  %v379_v19 = vld [vmem:[%s479_s0 + $0x8] sm:$0xff]   ;;  %v42_v22 = vshrl.u32 %v41_v21, 7 }
   0x7   :  { %158 = vmatpush1.bf16.msra.mxu0 %v358_v4  ;;  %345 = vmatpush1.bf16.msra.mxu1 %v358_v4  ;;  %v378_v18 = vld [vmem:[%s479_s0 + $0x10] sm:$0xff]   ;;  %v380_v20 = vld [vmem:[%s479_s0 + $0x18] sm:$0xff]   ;;  %v39_v24 = vld [vmem:[%s480_s2] sm:$0x3] }
   0x8   :  { %159 = vmatprep.subr.bf16.mxu0 %v359_v5  ;;  %338 = vmatprep.subr.bf16.mxu1 %v359_v5  ;;  %v43_v23 = vsub.s32 0, %v42_v22  ;;  %v47_v25 = vsub.s32 1, %v42_v22 }
   0xa   :  { %v44_v26 = vrot.slane %v39_v24, %v43_v23  ;;  %v465_v27 = vrot.slane %v39_v24, %v47_v25 }
   0xb   :  { %160 = vmatpush1.bf16.msra.mxu0 %v361_v6  ;;  %346 = vmatpush1.bf16.msra.mxu1 %v361_v6 }
   0xc   :  { %161 = vmatprep.subr.bf16.mxu0 %v362_v7  ;;  %339 = vmatprep.subr.bf16.mxu1 %v362_v7 }
   0xf   :  { %162 = vmatpush1.bf16.msra.mxu0 %v364_v8  ;;  %347 = vmatpush1.bf16.msra.mxu1 %v364_v8 }
  0x10   :  { %163 = vmatprep.subr.bf16.mxu0 %v365_v9  ;;  %340 = vmatprep.subr.bf16.mxu1 %v365_v9 }
  0x13   :  { %164 = vmatpush1.bf16.msra.mxu0 %v367_v10  ;;  %348 = vmatpush1.bf16.msra.mxu1 %v367_v10 }
  0x14   :  { %165 = vmatprep.subr.bf16.mxu0 %v368_v11  ;;  %341 = vmatprep.subr.bf16.mxu1 %v368_v11 }
  0x17   :  { %166 = vmatpush1.bf16.msra.mxu0 %v370_v12  ;;  %349 = vmatpush1.bf16.msra.mxu1 %v370_v12 }
  0x18   :  { %167 = vmatprep.subr.bf16.mxu0 %v371_v13  ;;  %342 = vmatprep.subr.bf16.mxu1 %v371_v13 }
  0x1b   :  { %168 = vmatpush1.bf16.msra.mxu0 %v373_v14  ;;  %350 = vmatpush1.bf16.msra.mxu1 %v373_v14 }
  0x1c   :  { %169 = vmatprep.subr.bf16.mxu0 %v374_v15  ;;  %343 = vmatprep.subr.bf16.mxu1 %v374_v15 }
  0x1f   :  { %170 = vmatpush1.bf16.msra.mxu0 %v376_v16  ;;  %351 = vmatpush1.bf16.msra.mxu1 %v376_v16 }
  0x22   :  { %188 = vmatmul.mubr.bf16.vlgmr.msra.gmra.mrb[0].mxu0 %v377_v17  ;;  %208 = vmatmul.mubr.bf16.vlgmr.msra.gmra.mrb[0].mxu1 %v378_v18 }
  0x23   :  { %197 = vmatprep.mubr.bf16.mxu0 %v381_v1  ;;  %217 = vmatprep.mubr.bf16.mxu1 %v381_v1 }
  0x2a   :  { %198 = vmatmul.mubr.bf16.gmra.mrb[4].mxu0 %v379_v19  ;;  %218 = vmatmul.mubr.bf16.gmra.mrb[4].mxu1 %v380_v20 }
  0xf5   :  { %v189_v28 = vpop.f32.mrb[0].mxu0  ;;  %v209_v29 = vpop.f32.mrb[0].mxu1 }
  0xf6   :  { %v190_v30 = vadd.f32 %v189_v28, %v44_v26  ;;  %v191_v31 = vpop.f32.mrb[1].mxu0  ;;  %v211_v32 = vpop.f32.mrb[1].mxu1  ;;  %v210_v53 = vadd.f32 %v209_v29, %v44_v26 }
  0xf7   :  { %v192_v33 = vadd.f32 %v191_v31, %v465_v27  ;;  %v193_v34 = vpop.f32.mrb[2].mxu0  ;;  %v213_v35 = vpop.f32.mrb[2].mxu1  ;;  %v212_v54 = vadd.f32 %v211_v32, %v465_v27 }
  0xf8   :  { %v194_v36 = vadd.f32 %v193_v34, %v44_v26  ;;  %v195_v37 = vpop.f32.mrb[3].mxu0  ;;  %v215_v38 = vpop.f32.mrb[3].mxu1  ;;  %v254_v40 = vmul.f32 %v190_v30, %v190_v30  ;;  %v214_v58 = vadd.f32 %v213_v35, %v44_v26  ;;  %v262_v12 = vmul.f32 %v210_v53, %v210_v53 }
  0xf9   :  { %v196_v39 = vadd.f32 %v195_v37, %v465_v27  ;;  %v255_v43 = vmul.f32 %v192_v33, %v192_v33  ;;  %v216_v0 = vadd.f32 %v215_v38, %v465_v27  ;;  %v263_v13 = vmul.f32 %v212_v54, %v212_v54 }
  0xfa   :  { %v228_v41 = vadd.f32 %v194_v36, %v190_v30  ;;  %v256_v42 = vmul.f32 %v194_v36, %v194_v36  ;;  %v264_v16 = vmul.f32 %v214_v58, %v214_v58 }
  0xfb   :  { %v241_v44 = vadd.f32 %v196_v39, %v192_v33  ;;  %v257_v45 = vmul.f32 %v196_v39, %v196_v39  ;;  %v265_v17 = vmul.f32 %v216_v0, %v216_v0 }
  0xfc   :  { %v270_v46 = vadd.f32 %v256_v42, %v254_v40 }
  0xfd   :  { %v283_v47 = vadd.f32 %v257_v45, %v255_v43  ;;  %v199_v48 = vpop.f32.mrb[4].mxu0  ;;  %v219_v49 = vpop.f32.mrb[4].mxu1 }
  0xfe   :  { %v200_v50 = vadd.f32 %v199_v48, %v44_v26  ;;  %v201_v51 = vpop.f32.mrb[5].mxu0  ;;  %v221_v52 = vpop.f32.mrb[5].mxu1  ;;  %v220_v7 = vadd.f32 %v219_v49, %v44_v26 }
  0xff   :  { %v202_v55 = vadd.f32 %v201_v51, %v465_v27  ;;  %v203_v56 = vpop.f32.mrb[6].mxu0  ;;  %v223_v57 = vpop.f32.mrb[6].mxu1  ;;  %v222_v11 = vadd.f32 %v221_v52, %v465_v27 }
 0x100   :  { %v229_v59 = vadd.f32 %v228_v41, %v200_v50  ;;  %v258_v60 = vmul.f32 %v200_v50, %v200_v50  ;;  %v204_v61 = vadd.f32 %v203_v56, %v44_v26  ;;  %v205_v62 = vpop.f32.mrb[7].mxu0  ;;  %v225_v63 = vpop.f32.mrb[7].mxu1  ;;  %v266_v22 = vmul.f32 %v220_v7, %v220_v7 }
 0x101   :  { %v242_v1 = vadd.f32 %v241_v44, %v202_v55  ;;  %v259_v2 = vmul.f32 %v202_v55, %v202_v55  ;;  %v206_v3 = vadd.f32 %v205_v62, %v465_v27  ;;  %v224_v23 = vadd.f32 %v223_v57, %v44_v26 }
 0x102   :  { %v271_v4 = vadd.f32 %v270_v46, %v258_v60  ;;  %v230_v5 = vadd.f32 %v229_v59, %v204_v61  ;;  %v260_v6 = vmul.f32 %v204_v61, %v204_v61  ;;  %v267_v28 = vmul.f32 %v222_v11, %v222_v11 }
 0x103   :  { %v284_v8 = vadd.f32 %v283_v47, %v259_v2  ;;  %v243_v9 = vadd.f32 %v242_v1, %v206_v3  ;;  %v261_v10 = vmul.f32 %v206_v3, %v206_v3  ;;  %v226_v29 = vadd.f32 %v225_v63, %v465_v27 }
 0x104   :  { %v231_v14 = vadd.f32 %v230_v5, %v210_v53  ;;  %v272_v15 = vadd.f32 %v271_v4, %v260_v6  ;;  %v268_v36 = vmul.f32 %v224_v23, %v224_v23 }
 0x105   :  { %v244_v18 = vadd.f32 %v243_v9, %v212_v54  ;;  %v285_v19 = vadd.f32 %v284_v8, %v261_v10  ;;  %v269_v39 = vmul.f32 %v226_v29, %v226_v29 }
 0x106   :  { %v273_v20 = vadd.f32 %v272_v15, %v262_v12  ;;  %v232_v21 = vadd.f32 %v231_v14, %v214_v58 }
 0x107   :  { %v286_v24 = vadd.f32 %v285_v19, %v263_v13  ;;  %v245_v25 = vadd.f32 %v244_v18, %v216_v0 }
 0x108   :  { %v233_v30 = vadd.f32 %v232_v21, %v220_v7  ;;  %v274_v31 = vadd.f32 %v273_v20, %v264_v16 }
 0x109   :  { %v246_v32 = vadd.f32 %v245_v25, %v222_v11  ;;  %v287_v33 = vadd.f32 %v286_v24, %v265_v17 }
 0x10a   :  { %v275_v34 = vadd.f32 %v274_v31, %v266_v22  ;;  %v234_v35 = vadd.f32 %v233_v30, %v224_v23 }
 0x10b   :  { %v288_v37 = vadd.f32 %v287_v33, %v267_v28  ;;  %v247_v38 = vadd.f32 %v246_v32, %v226_v29 }
 0x10c   :  { %v235_v40 = vrot.slane %v234_v35, 4  ;;  %v276_v41 = vadd.f32 %v275_v34, %v268_v36 }
 0x10d   :  { %v248_v42 = vrot.slane %v247_v38, 4  ;;  %v289_v43 = vadd.f32 %v288_v37, %v269_v39 }
 0x10e   :  { %v236_v26 = vadd.f32 %v235_v40, %v234_v35  ;;  %v277_v44 = vrot.slane %v276_v41, 4 }
 0x10f   :  { %v249_v45 = vadd.f32 %v248_v42, %v247_v38  ;;  %v290_v46 = vrot.slane %v289_v43, 4 }
 0x110   :  { %v237_v47 = vrot.slane %v236_v26, 2  ;;  %v278_v27 = vadd.f32 %v277_v44, %v276_v41 }
 0x111   :  { %v250_v48 = vrot.slane %v249_v45, 2  ;;  %v291_v49 = vadd.f32 %v290_v46, %v289_v43 }
 0x112   :  { %v238_v50 = vadd.f32 %v237_v47, %v236_v26  ;;  %v279_v51 = vrot.slane %v278_v27, 2 }
 0x113   :  { %v251_v52 = vadd.f32 %v250_v48, %v249_v45  ;;  %v292_v53 = vrot.slane %v291_v49, 2 }
 0x114   :  { %v239_v54 = vrot.slane %v238_v50, 1  ;;  %v280_v55 = vadd.f32 %v279_v51, %v278_v27 }
 0x115   :  { %v252_v56 = vrot.slane %v251_v52, 1  ;;  %v293_v57 = vadd.f32 %v292_v53, %v291_v49 }
 0x116   :  { %v281_v58 = vrot.slane %v280_v55, 1  ;;  %v240_v60 = vadd.f32 %v239_v54, %v238_v50 }
 0x117   :  { %v294_v59 = vrot.slane %v293_v57, 1  ;;  %v253_v62 = vadd.f32 %v252_v56, %v251_v52 }
 0x118   :  { %v282_v61 = vadd.f32 %v281_v58, %v280_v55 }
 0x119   :  { %v295_v63 = vadd.f32 %v294_v59, %v293_v57 }
 0x11a   :  { %v297_v0 = vsel %vm296_vm0, %v240_v60, %v282_v61 }
 0x11b   :  { %v298_v1 = vsel %vm296_vm0, %v253_v62, %v295_v63 }
 0x11c   :  { %v301_v2 = vcombine.low %v297_v0, %v298_v1 }
 0x11e   :  { %335 = vst.sshfl [vmem:[%s481_s3] sm:$0x33 pattern:$0x76325410] %v301_v2 }

// kernel: point_pillars_forward.29
= control target key start
LH: loop header
LB: loop body
LE: loop exit
PB: predicated region body
PF: predicated region fallthrough
CT: control target
= control target key end

     0   :  { %v40_v0 = vlaneseq  ;;  %s260_s0 = inlined_call_operand.vmem [shape: bf16[64,256], index: 0, kind: input, shape index: {}]   ;;  %s261_s1 = inlined_call_operand.vmem [shape: f32[1,256], index: 1, kind: input, shape index: {}]   ;;  %s262_s2 = inlined_call_operand.vmem [shape: f32[1,256], index: 2, kind: input, shape index: {}]   ;;  %s263_s3 = inlined_call_operand.vmem [shape: bf16[64,256], index: 3, kind: output, shape index: {}]  }
   0x1   :  { %v14_v1 = vld [vmem:[%s260_s0] sm:$0xff]  ;;  %v15_v6 = vld [vmem:[%s260_s0 + $0x8] sm:$0xff]  ;;  %v16_v7 = vld [vmem:[%s260_s0 + $0x10] sm:$0xff] }
   0x2   :  { %v38_v2 = vld [vmem:[%s261_s1] sm:$0x3]  ;;  %v22_v3 = vunpack.c.l.bf16 %v14_v1  ;;  %v23_v4 = vunpack.c.h.bf16 %v14_v1  ;;  %v41_v5 = vshrl.u32 %v40_v0, 7  ;;  %v17_v8 = vld [vmem:[%s260_s0 + $0x18] sm:$0xff]  ;;  %v24_v10 = vunpack.c.l.bf16 %v15_v6  ;;  %v19_v15 = vld [vmem:[%s260_s0 + $0x28] sm:$0xff] }
   0x3   :  { %v66_v9 = vld [vmem:[%s262_s2] sm:$0x3]  ;;  %v25_v11 = vunpack.c.h.bf16 %v15_v6  ;;  %v26_v12 = vunpack.c.l.bf16 %v16_v7  ;;  %v27_v13 = vunpack.c.h.bf16 %v16_v7  ;;  %v28_v18 = vunpack.c.l.bf16 %v17_v8  ;;  %v20_v20 = vld [vmem:[%s260_s0 + $0x30] sm:$0xff]  ;;  %v21_v21 = vld [vmem:[%s260_s0 + $0x38] sm:$0xff] }
   0x4   :  { %v18_v14 = vld [vmem:[%s260_s0 + $0x20] sm:$0xff]  ;;  %v42_v16 = vsub.s32 0, %v41_v5  ;;  %v46_v17 = vsub.s32 1, %v41_v5  ;;  %v29_v19 = vunpack.c.h.bf16 %v17_v8  ;;  %v32_v24 = vunpack.c.l.bf16 %v19_v15 }
   0x5   :  { %v30_v22 = vunpack.c.l.bf16 %v18_v14  ;;  %v31_v23 = vunpack.c.h.bf16 %v18_v14  ;;  %v33_v25 = vunpack.c.h.bf16 %v19_v15  ;;  %v34_v30 = vunpack.c.l.bf16 %v20_v20 }
   0x6   :  { %v43_v26 = vrot.slane %v38_v2, %v42_v16  ;;  %v47_v27 = vrot.slane %v38_v2, %v46_v17  ;;  %v71_v28 = vrot.slane %v66_v9, %v42_v16  ;;  %v75_v29 = vrot.slane %v66_v9, %v46_v17 }
   0x7   :  { %v35_v31 = vunpack.c.h.bf16 %v20_v20  ;;  %v36_v32 = vunpack.c.l.bf16 %v21_v21  ;;  %v37_v33 = vunpack.c.h.bf16 %v21_v21 }
   0x8   :  { %v50_v34 = vmul.f32 %v43_v26, %v22_v3  ;;  %v51_v35 = vmul.f32 %v47_v27, %v23_v4  ;;  %v52_v36 = vmul.f32 %v43_v26, %v24_v10  ;;  %v53_v37 = vmul.f32 %v47_v27, %v25_v11 }
   0x9   :  { %v54_v38 = vmul.f32 %v43_v26, %v26_v12  ;;  %v55_v39 = vmul.f32 %v47_v27, %v27_v13  ;;  %v56_v40 = vmul.f32 %v43_v26, %v28_v18  ;;  %v57_v41 = vmul.f32 %v47_v27, %v29_v19 }
   0xa   :  { %v78_v42 = vadd.f32 %v71_v28, %v50_v34  ;;  %v79_v43 = vadd.f32 %v75_v29, %v51_v35  ;;  %v80_v44 = vadd.f32 %v71_v28, %v52_v36  ;;  %v81_v45 = vadd.f32 %v75_v29, %v53_v37 }
   0xb   :  { %v82_v46 = vadd.f32 %v71_v28, %v54_v38  ;;  %v83_v47 = vadd.f32 %v75_v29, %v55_v39  ;;  %v84_v48 = vadd.f32 %v71_v28, %v56_v40  ;;  %v85_v49 = vadd.f32 %v75_v29, %v57_v41 }
   0xc   :  { %v94_v50 = vmax.f32 %v78_v42, 0.0  ;;  %v95_v51 = vmax.f32 %v79_v43, 0.0  ;;  %v96_v52 = vmax.f32 %v80_v44, 0.0  ;;  %v97_v53 = vmax.f32 %v81_v45, 0.0 }
   0xd   :  { %v98_v54 = vmax.f32 %v82_v46, 0.0  ;;  %v99_v55 = vmax.f32 %v83_v47, 0.0  ;;  %v100_v56 = vmax.f32 %v84_v48, 0.0  ;;  %v101_v57 = vmax.f32 %v85_v49, 0.0 }
   0xe   :  { %v178_v58 = vpack.c.bf16 %v95_v51, %v94_v50  ;;  %v179_v59 = vpack.c.bf16 %v97_v53, %v96_v52  ;;  %v58_v60 = vmul.f32 %v43_v26, %v30_v22  ;;  %v59_v61 = vmul.f32 %v47_v27, %v31_v23 }
   0xf   :  { %v180_v62 = vpack.c.bf16 %v99_v55, %v98_v54  ;;  %v181_v63 = vpack.c.bf16 %v101_v57, %v100_v56  ;;  %v60_v0 = vmul.f32 %v43_v26, %v32_v24  ;;  %v61_v1 = vmul.f32 %v47_v27, %v33_v25 }
  0x10   :  { %158 = vst [vmem:[%s263_s3] sm:$0xff] %v178_v58  ;;  %159 = vst [vmem:[%s263_s3 + $0x8] sm:$0xff] %v179_v59  ;;  %v86_v2 = vadd.f32 %v71_v28, %v58_v60  ;;  %v87_v3 = vadd.f32 %v75_v29, %v59_v61  ;;  %v62_v4 = vmul.f32 %v43_v26, %v34_v30 }
  0x11   :  { %v63_v5 = vmul.f32 %v47_v27, %v35_v31  ;;  %160 = vst [vmem:[%s263_s3 + $0x10] sm:$0xff] %v180_v62  ;;  %161 = vst [vmem:[%s263_s3 + $0x18] sm:$0xff] %v181_v63  ;;  %v88_v6 = vadd.f32 %v71_v28, %v60_v0  ;;  %v89_v7 = vadd.f32 %v75_v29, %v61_v1 }
  0x12   :  { %v64_v8 = vmul.f32 %v43_v26, %v36_v32  ;;  %v65_v9 = vmul.f32 %v47_v27, %v37_v33  ;;  %v102_v10 = vmax.f32 %v86_v2, 0.0  ;;  %v103_v11 = vmax.f32 %v87_v3, 0.0 }
  0x13   :  { %v90_v12 = vadd.f32 %v71_v28, %v62_v4  ;;  %v91_v13 = vadd.f32 %v75_v29, %v63_v5  ;;  %v104_v14 = vmax.f32 %v88_v6, 0.0  ;;  %v105_v15 = vmax.f32 %v89_v7, 0.0 }
  0x14   :  { %v92_v16 = vadd.f32 %v71_v28, %v64_v8  ;;  %v93_v17 = vadd.f32 %v75_v29, %v65_v9  ;;  %v182_v18 = vpack.c.bf16 %v103_v11, %v102_v10 }
  0x15   :  { %v106_v19 = vmax.f32 %v90_v12, 0.0  ;;  %v107_v20 = vmax.f32 %v91_v13, 0.0  ;;  %v183_v21 = vpack.c.bf16 %v105_v15, %v104_v14 }
  0x16   :  { %v108_v22 = vmax.f32 %v92_v16, 0.0  ;;  %v109_v23 = vmax.f32 %v93_v17, 0.0  ;;  %162 = vst [vmem:[%s263_s3 + $0x20] sm:$0xff] %v182_v18 }
  0x17   :  { %v184_v24 = vpack.c.bf16 %v107_v20, %v106_v19  ;;  %163 = vst [vmem:[%s263_s3 + $0x28] sm:$0xff] %v183_v21 }
  0x18   :  { %v185_v25 = vpack.c.bf16 %v109_v23, %v108_v22 }
  0x19   :  { %164 = vst [vmem:[%s263_s3 + $0x30] sm:$0xff] %v184_v24 }
  0x1a   :  { %165 = vst [vmem:[%s263_s3 + $0x38] sm:$0xff] %v185_v25 }

// kernel: point_pillars_forward.28
= control target key start
LH: loop header
LB: loop body
LE: loop exit
PB: predicated region body
PF: predicated region fallthrough
CT: control target
= control target key end

     0   :  { %s1353_s15 = smov 0   ;;  %s1355_s16 = smov 0   ;;  %s1513_s0 = inlined_call_operand.vmem [shape: bf16[2,4,18,128], index: 0, kind: input, shape index: {}]   ;;  %s1514_s1 = inlined_call_operand.vmem [shape: bf16[3,3,128,256], index: 1, kind: input, shape index: {}]   ;;  %s1515_s2 = inlined_call_operand.vmem [shape: f32[1,256], index: 2, kind: input, shape index: {}]   ;;  %s1516_s3 = inlined_call_operand.vmem [shape: bf16[2,2,16,256], index: 3, kind: output, shape index: {0}]   ;;  %s1517_s4 = inlined_call_operand.vmem [shape: f32[2,2,2,256], index: 4, kind: output, shape index: {1}]  }
   0x1   :  { %s1357_s17 = smov 0   ;;  %s1359_s18 = smov 0  }
   0x2   :  { %s1361_s19 = smov 0   ;;  %s1363_s20 = smov 0  }
   0x3   :  { %s1365_s21 = smov 0  }
   0x4 LB: > { %s27_s22 = sadd.s32 1, %s1312_s18  ;;  %s30_s23 = sadd.s32 1, %s1316_s19  ;;  %s1324_s21 = sphi %s1365_s21, %s15_s21   ;;  %s1320_s20 = sphi %s1363_s20, %s1527_s20   ;;  %s1316_s19 = sphi %s1361_s19, %s1526_s19   ;;  %s1312_s18 = sphi %s1359_s18, %s1525_s18   ;;  %s1308_s17 = sphi %s1357_s17, %s1524_s17   ;;  %s1304_s16 = sphi %s1355_s16, %s1523_s16   ;;  %s1300_s15 = sphi %s1353_s15, %s1522_s15  }
   0x5   : > { %p28_p0 = scmp.ge.s32.totalorder %s27_s22, 3  ;;  %p1025_p1 = scmp.ge.s32.totalorder %s1324_s21, 1 }
   0x6   : > { %p208_p2 = scmp.lt.s32.totalorder %s1324_s21, 13  ;;  %s34_s24 = sadd.s32 1, %s1320_s20 }
   0x7   : > { %s1529_s22 = smov (%p28_p0, %s27_s22), 0  ;;  %s1531_s23 = smov (!%p28_p0, %s30_s23), %s1316_s19 }
   0x8   : > { %p209_p3 = pnand %p1025_p1, %p208_p2  ;;  %p32_p4 = scmp.ge.s32.totalorder %s1531_s23, 2 }
   0x9   : > { %s257_s25 = sadd.s32 (!%p209_p3), %s1300_s15, %s1304_s16  ;;  %p258_p6 = scmp.lt.s32.totalorder (!%p209_p3), %s1308_s17, 1 }
   0xa   : > { %s1533_s23 = smov (%p32_p4, %s1531_s23), 0  ;;  %s1535_s24 = smov (!%p32_p4, %s34_s24), %s1320_s20 }
   0xb   : > { %1518 = sst [smem:[#allocation3_spill]] %s1533_s23  ;;  %p36_p5 = scmp.ge.s32.totalorder %s1535_s24, 2 }
   0xc   : > { %212 = sbr.rel (%p209_p3) target bundleno = 349 (0x15d), region = 32  ;;  %p260_p7 = scmp.lt.s32.totalorder (!%p209_p3), %s257_s25, 3 }
   0xd   : > { %s1537_s24 = smov (%p36_p5, %s1535_s24), 0  ;;  %p268_p8 = scmp.lt.s32.totalorder (!%p209_p3), %s1300_s15, 2 }
   0xe   : > { %1519 = sst [smem:[#allocation4_spill]] %s1537_s24  ;;  %p275_p9 = scmp.lt.s32.totalorder (!%p209_p3), %s1304_s16, 1 }
   0xf   : > { %p1034_p10 = scmp.ne.s32.totalorder (!%p209_p3), %s1300_s15, 0 }
  0x13   : > { %s1539_s17 = smov (!%p258_p6, %s1308_s17), 1  ;;  %s1541_s25 = smov (!%p260_p7, %s257_s25), 3 }
  0x14   : > { %s1138_s26 = smul.u32 12, %s1539_s17  ;;  %s1029_s30 = sshll.u32 %s1539_s17, 3  ;;  %v1326_v3 = vmov (!%p1034_p10), 0.0  }
  0x15   : > { %s1137_s27 = smul.u32 3, %s1541_s25  ;;  %s1032_s10 = sshll.u32 %s1539_s17, 2  ;;  %299 = vst [vmem:[#allocation2] sm:$0xff] (!%p1034_p10), %v1326_v3  ;;  %300 = vst [vmem:[#allocation2 + $0x8] sm:$0xff] (!%p1034_p10), %v1326_v3 }
  0x16   : > { %s269_s28 = scalar_select %p268_p8, %s1300_s15, 2 }
  0x17   : > { %s264_s29 = sadd.s32 %s1138_s26, %s1137_s27  ;;  %s1543_s16 = smov (!%p275_p9, %s1304_s16), 1  ;;  %301 = vst [vmem:[#allocation2 + $0x10] sm:$0xff] (!%p1034_p10), %v1326_v3  ;;  %302 = vst [vmem:[#allocation2 + $0x18] sm:$0xff] (!%p1034_p10), %v1326_v3 }
  0x18   : > { %s1026_s5 = sshll.u32 %s264_s29, 2  ;;  %s1139_s6 = smul.u32 384, %s269_s28 }
  0x19   : > { %s266_s9 = scalar_lea.vmem %s1513_s0, %s1026_s5  ;;  %s1028_s14 = sshll.u32 %s1543_s16, 2 }
  0x1a   : > { %s1410_s13 = scalar_lea.vmem %s1514_s1, %s1139_s6  ;;  %v292_v0 = vld [vmem:[%s266_s9] sm:$0xf]  ;;  %v293_v1 = vld [vmem:[%s266_s9 + $0x4] sm:$0xf]  ;;  %v294_v2 = vld [vmem:[%s266_s9 + $0x8] sm:$0x1]  ;;  %s279_s26 = sadd.s32 %s1029_s30, %s1028_s14 }
  0x1b   : > { %s1031_s25 = sshll.u32 %s1543_s16, 1  ;;  %s1030_s29 = sshll.u32 %s279_s26, 2 }
  0x1c   : > { %s288_s27 = sadd.s32 %s1032_s10, %s1031_s25  ;;  %s1416_s5 = scalar_lea.vmem %s1516_s3, %s1030_s29 }
  0x1d   : > { %s1033_s28 = sshll.u32 %s288_s27, 1  ;;  %298 = sbr.rel (%p1034_p10) target bundleno = 36 (0x24), region = 36 }
  0x1e   : > { %s1421_s6 = scalar_lea.vmem %s1517_s4, %s1033_s28 }
  0x24 PF: > { %v1198_v4 = vld [vmem:[%s1410_s13 + $0x84] ss:$8 sps:$4 sm:$0xff]   ;;  %v1200_v5 = vld [vmem:[%s1410_s13 + $0x80] ss:$8 sps:$4 sm:$0xff]   ;;  %v1327_v6 = vmov 0   ;;  %v1440_v19 = vcombine.low %v292_v0, %v293_v1  ;;  %v1447_v25 = vcombine.low %v294_v2, %v294_v2  ;;  %vm634_vm1 = vcmask 1046528  }
  0x25   : > { %602 = vmatprep.mubr.bf16.mxu0 %v1327_v6  ;;  %441 = vmatprep.mubr.bf16.mxu1 %v1327_v6  ;;  %v1201_v7 = vld [vmem:[%s1410_s13 + $0x94] ss:$8 sps:$4 sm:$0xff]   ;;  %v1203_v8 = vld [vmem:[%s1410_s13 + $0x90] ss:$8 sps:$4 sm:$0xff]   ;;  %v1204_v9 = vld [vmem:[%s1410_s13 + $0xa4] ss:$8 sps:$4 sm:$0xff]  }
  0x26   : > { %570 = vmatprep.subr.bf16.mxu0 %v1198_v4  ;;  %v1206_v10 = vld [vmem:[%s1410_s13 + $0xa0] ss:$8 sps:$4 sm:$0xff]   ;;  %v1207_v11 = vld [vmem:[%s1410_s13 + $0xb4] ss:$8 sps:$4 sm:$0xff]   ;;  %v1219_v12 = vld [vmem:[%s1410_s13 + $0x4] ss:$8 sps:$4 sm:$0xff]  }
  0x27   : > { %571 = vmatpush1.bf16.msra.mxu0 %v1200_v5  ;;  %v1221_v13 = vld [vmem:[%s1410_s13] ss:$8 sps:$4 sm:$0xff]   ;;  %v1209_v14 = vld [vmem:[%s1410_s13 + $0xb0] ss:$8 sps:$4 sm:$0xff]   ;;  %v1210_v15 = vld [vmem:[%s1410_s13 + $0xc4] ss:$8 sps:$4 sm:$0xff]   ;;  %409 = vmatprep.subr.bf16.mxu1 %v1219_v12 }
  0x28   : > { %572 = vmatprep.subr.bf16.mxu0 %v1201_v7  ;;  %v1225_v16 = vld [vmem:[%s1410_s13 + $0x14] ss:$8 sps:$4 sm:$0xff]   ;;  %410 = vmatpush1.bf16.msra.mxu1 %v1221_v13  ;;  %v1227_v17 = vld [vmem:[%s1410_s13 + $0x10] ss:$8 sps:$4 sm:$0xff]   ;;  %v1212_v18 = vld [vmem:[%s1410_s13 + $0xc0] ss:$8 sps:$4 sm:$0xff]  }
  0x29   : > { %411 = vmatprep.subr.bf16.mxu1 %v1225_v16  ;;  %v1231_v20 = vld [vmem:[%s1410_s13 + $0x24] ss:$8 sps:$4 sm:$0xff]   ;;  %v1213_v21 = vld [vmem:[%s1410_s13 + $0xd4] ss:$8 sps:$4 sm:$0xff]   ;;  %v1233_v22 = vld [vmem:[%s1410_s13 + $0x20] ss:$8 sps:$4 sm:$0xff]  }
  0x2a   : > { %v1237_v23 = vld [vmem:[%s1410_s13 + $0x34] ss:$8 sps:$4 sm:$0xff]   ;;  %v1215_v24 = vld [vmem:[%s1410_s13 + $0xd0] ss:$8 sps:$4 sm:$0xff]   ;;  %v480_v26 = vshll.u32 %v1440_v19, 16  ;;  %v478_v31 = vshrl.u32 %v1440_v19, 16 }
  0x2b   : > { %573 = vmatpush1.bf16.msra.mxu0 %v1203_v8  ;;  %v1216_v27 = vld [vmem:[%s1410_s13 + $0xe4] ss:$8 sps:$4 sm:$0xff]   ;;  %v1239_v28 = vld [vmem:[%s1410_s13 + $0x30] ss:$8 sps:$4 sm:$0xff]   ;;  %v1218_v30 = vld [vmem:[%s1410_s13 + $0xe0] ss:$8 sps:$4 sm:$0xff]  }
  0x2c   : > { %574 = vmatprep.subr.bf16.mxu0 %v1204_v9  ;;  %412 = vmatpush1.bf16.msra.mxu1 %v1227_v17  ;;  %v1243_v29 = vld [vmem:[%s1410_s13 + $0x44] ss:$8 sps:$4 sm:$0xff]   ;;  %v482_v32 = vrot.slane %v480_v26, 1  ;;  %v485_v33 = vshll.u32 %v1447_v25, 16  ;;  %v1222_v34 = vld [vmem:[%s1410_s13 + $0xf4] ss:$8 sps:$4 sm:$0xff]  }
  0x2d   : > { %413 = vmatprep.subr.bf16.mxu1 %v1231_v20  ;;  %v1245_v35 = vld [vmem:[%s1410_s13 + $0x40] ss:$8 sps:$4 sm:$0xff]   ;;  %v1249_v36 = vld [vmem:[%s1410_s13 + $0x54] ss:$8 sps:$4 sm:$0xff]   ;;  %v1224_v37 = vld [vmem:[%s1410_s13 + $0xf0] ss:$8 sps:$4 sm:$0xff]  }
  0x2e   : > { %v483_v38 = vor.u32 %v482_v32, %v478_v31  ;;  %v487_v39 = vrot.slane %v485_v33, 1  ;;  %v1230_v40 = vld [vmem:[%s1410_s13 + $0x104] ss:$8 sps:$4 sm:$0xff]   ;;  %vm476_vm0 = vsmask.f32 7424  ;;  %v635_v62 = vrot.slane %v1440_v19, 1 }
  0x2f   : > { %575 = vmatpush1.bf16.msra.mxu0 %v1206_v10  ;;  %v1251_v41 = vld [vmem:[%s1410_s13 + $0x50] ss:$8 sps:$4 sm:$0xff]   ;;  %v1255_v42 = vld [vmem:[%s1410_s13 + $0x64] ss:$8 sps:$4 sm:$0xff]   ;;  %v1228_v43 = vld [vmem:[%s1410_s13 + $0x100] ss:$8 sps:$4 sm:$0xff]  }
  0x30   : > { %576 = vmatprep.subr.bf16.mxu0 %v1207_v11  ;;  %414 = vmatpush1.bf16.msra.mxu1 %v1233_v22  ;;  %v488_v44 = vsel %vm476_vm0, %v483_v38, %v487_v39  ;;  %v1236_v45 = vld [vmem:[%s1410_s13 + $0x114] ss:$8 sps:$4 sm:$0xff]   ;;  %v1257_v46 = vld [vmem:[%s1410_s13 + $0x60] ss:$8 sps:$4 sm:$0xff]   ;;  %v1234_v48 = vld [vmem:[%s1410_s13 + $0x110] ss:$8 sps:$4 sm:$0xff]  }
  0x31   : > { %415 = vmatprep.subr.bf16.mxu1 %v1237_v23  ;;  %v1261_v47 = vld [vmem:[%s1410_s13 + $0x74] ss:$8 sps:$4 sm:$0xff]   ;;  %v1242_v49 = vld [vmem:[%s1410_s13 + $0x124] ss:$8 sps:$4 sm:$0xff]   ;;  %v1263_v50 = vld [vmem:[%s1410_s13 + $0x70] ss:$8 sps:$4 sm:$0xff]  }
  0x32   : > { %v1240_v51 = vld [vmem:[%s1410_s13 + $0x120] ss:$8 sps:$4 sm:$0xff]   ;;  %v1248_v52 = vld [vmem:[%s1410_s13 + $0x134] ss:$8 sps:$4 sm:$0xff]   ;;  %v1246_v53 = vld [vmem:[%s1410_s13 + $0x130] ss:$8 sps:$4 sm:$0xff]  }
  0x33   : > { %577 = vmatpush1.bf16.msra.mxu0 %v1209_v14  ;;  %v1254_v54 = vld [vmem:[%s1410_s13 + $0x144] ss:$8 sps:$4 sm:$0xff]   ;;  %v1252_v55 = vld [vmem:[%s1410_s13 + $0x140] ss:$8 sps:$4 sm:$0xff]   ;;  %v1260_v56 = vld [vmem:[%s1410_s13 + $0x154] ss:$8 sps:$4 sm:$0xff]  }
  0x34   : > { %578 = vmatprep.subr.bf16.mxu0 %v1210_v15  ;;  %416 = vmatpush1.bf16.msra.mxu1 %v1239_v28  ;;  %v1258_v57 = vld [vmem:[%s1410_s13 + $0x150] ss:$8 sps:$4 sm:$0xff]   ;;  %v1266_v58 = vld [vmem:[%s1410_s13 + $0x164] ss:$8 sps:$4 sm:$0xff]   ;;  %v1264_v59 = vld [vmem:[%s1410_s13 + $0x160] ss:$8 sps:$4 sm:$0xff]  }
  0x35   : > { %417 = vmatprep.subr.bf16.mxu1 %v1243_v29  ;;  %v1269_v60 = vld [vmem:[%s1410_s13 + $0x174] ss:$8 sps:$4 sm:$0xff]   ;;  %v1267_v61 = vld [vmem:[%s1410_s13 + $0x170] ss:$8 sps:$4 sm:$0xff]   ;;  %v636_v63 = vrot.slane %v1447_v25, 1  ;;  %v303_v5 = vld [vmem:[#allocation2] sm:$0xff] }
  0x36   : > { %v305_v9 = vld [vmem:[#allocation2 + $0x10] sm:$0xff]  ;;  %v306_v10 = vld [vmem:[#allocation2 + $0x18] sm:$0xff]  ;;  %p1117_p11 = scmp.ne.s32.totalorder %s1300_s15, 2 }
  0x37   : > { %579 = vmatpush1.bf16.msra.mxu0 %v1212_v18  ;;  %v637_v0 = vsel %vm634_vm1, %v635_v62, %v636_v63  ;;  %v778_v23 = vld [vmem:[%s1515_s2] sm:$0x3] (!%p1117_p11)  ;;  %vm840_vm2 = vcmask (!%p1117_p11), 1040384  }
  0x38   : > { %580 = vmatprep.subr.bf16.mxu0 %v1213_v21  ;;  %418 = vmatpush1.bf16.msra.mxu1 %v1245_v35  ;;  %v780_v21 = vlaneseq (!%p1117_p11) }
  0x39   : > { %419 = vmatprep.subr.bf16.mxu1 %v1249_v36 }
  0x3a   : > { %v781_v22 = vshrl.u32 (!%p1117_p11), %v780_v21, 7 }
  0x3b   : > { %581 = vmatpush1.bf16.msra.mxu0 %v1215_v24 }
  0x3c   : > { %582 = vmatprep.subr.bf16.mxu0 %v1216_v27  ;;  %420 = vmatpush1.bf16.msra.mxu1 %v1251_v41  ;;  %v782_v25 = vsub.s32 (!%p1117_p11), 0, %v781_v22  ;;  %v786_v26 = vsub.s32 (!%p1117_p11), 1, %v781_v22 }
  0x3d   : > { %421 = vmatprep.subr.bf16.mxu1 %v1255_v42 }
  0x3e   : > { %v787_v31 = vrot.slane (!%p1117_p11), %v778_v23, %v786_v26 }
  0x3f   : > { %583 = vmatpush1.bf16.msra.mxu0 %v1218_v30  ;;  %v783_v30 = vrot.slane (!%p1117_p11), %v778_v23, %v782_v25 }
  0x40   : > { %584 = vmatprep.subr.bf16.mxu0 %v1222_v34  ;;  %422 = vmatpush1.bf16.msra.mxu1 %v1257_v46 }
  0x41   : > { %423 = vmatprep.subr.bf16.mxu1 %v1261_v47 }
  0x43   : > { %585 = vmatpush1.bf16.msra.mxu0 %v1224_v37 }
  0x44   : > { %719 = vmatprep.subr.bf16.mxu0 %v1230_v40  ;;  %424 = vmatpush1.bf16.msra.mxu1 %v1263_v50 }
  0x46   : > { %603 = vmatmul.mubr.bf16.vlgmr.msra.gmra.mrb[0].mxu0 %v488_v44 }
  0x47   : > { %720 = vmatpush1.bf16.msra.mxu0 %v1228_v43  ;;  %751 = vmatprep.mubr.bf16.mxu0 %v1327_v6  ;;  %v304_v6 = vld [vmem:[#allocation2 + $0x8] sm:$0xff] }
  0x48   : > { %721 = vmatprep.subr.bf16.mxu0 %v1236_v45  ;;  %442 = vmatmul.mubr.bf16.vlgmr.msra.gmra.mrb[0].mxu1 %v1440_v19 }
  0x4b   : > { %722 = vmatpush1.bf16.msra.mxu0 %v1234_v48 }
  0x4c   : > { %723 = vmatprep.subr.bf16.mxu0 %v1242_v49 }
  0x4f   : > { %724 = vmatpush1.bf16.msra.mxu0 %v1240_v51 }
  0x50   : > { %725 = vmatprep.subr.bf16.mxu0 %v1248_v52 }
  0x53   : > { %726 = vmatpush1.bf16.msra.mxu0 %v1246_v53 }
  0x54   : > { %727 = vmatprep.subr.bf16.mxu0 %v1254_v54 }
  0x57   : > { %728 = vmatpush1.bf16.msra.mxu0 %v1252_v55 }
  0x58   : > { %729 = vmatprep.subr.bf16.mxu0 %v1260_v56 }
  0x5b   : > { %730 = vmatpush1.bf16.msra.mxu0 %v1258_v57 }
  0x5c   : > { %731 = vmatprep.subr.bf16.mxu0 %v1266_v58 }
  0x5f   : > { %732 = vmatpush1.bf16.msra.mxu0 %v1264_v59 }
  0x60   : > { %733 = vmatprep.subr.bf16.mxu0 %v1269_v60 }
  0x63   : > { %734 = vmatpush1.bf16.msra.mxu0 %v1267_v61 }
  0x66   : > { %752 = vmatmul.mubr.bf16.vlgmr.msra.gmra.mrb[0].mxu0 %v637_v0 }
 0x11b   : > { %v443_v1 = vpop.f32.mrb[0].mxu1 }
 0x11c   : > { %v445_v2 = vpop.f32.mrb[1].mxu1  ;;  %v452_v7 = vadd.f32 %v443_v1, %v303_v5 }
 0x11d   : > { %v447_v3 = vpop.f32.mrb[2].mxu1  ;;  %v453_v8 = vadd.f32 %v445_v2, %v304_v6 }
 0x11e   : > { %v449_v4 = vpop.f32.mrb[3].mxu1  ;;  %v454_v12 = vadd.f32 %v447_v3, %v305_v9 }
 0x11f   : > { %v455_v15 = vadd.f32 %v449_v4, %v306_v10 }
 0x139   : > { %v753_v11 = vpop.f32.mrb[0].mxu0  ;;  %773 = sbr.rel (%p1117_p11) target bundleno = 349 (0x15d), region = 40 }
 0x13a   : > { %v1126_v13 = vadd.f32 %v753_v11, %v452_v7  ;;  %v755_v14 = vpop.f32.mrb[1].mxu0 }
 0x13b   : > { %v1128_v16 = vadd.f32 %v755_v14, %v453_v8  ;;  %v757_v17 = vpop.f32.mrb[2].mxu0 }
 0x13c   : > { %766 = vst [vmem:[#allocation2] sm:$0xff] %v1126_v13  ;;  %v1130_v18 = vadd.f32 %v757_v17, %v454_v12  ;;  %v759_v19 = vpop.f32.mrb[3].mxu0 }
 0x13d   : > { %767 = vst [vmem:[#allocation2 + $0x8] sm:$0xff] %v1128_v16  ;;  %v1132_v20 = vadd.f32 %v759_v19, %v455_v15 }
 0x13e   : > { %768 = vst [vmem:[#allocation2 + $0x10] sm:$0xff] %v1130_v18 }
 0x13f   : > { %769 = vst [vmem:[#allocation2 + $0x18] sm:$0xff] %v1132_v20 }
 0x143   : > { %v774_v24 = vld [vmem:[#allocation2] sm:$0xff] }
 0x144   : > { %v775_v27 = vld [vmem:[#allocation2 + $0x8] sm:$0xff]  ;;  %v790_v32 = vadd.f32 %v783_v30, %v774_v24 }
 0x145   : > { %v776_v28 = vld [vmem:[#allocation2 + $0x10] sm:$0xff]  ;;  %v791_v33 = vadd.f32 %v787_v31, %v775_v27 }
 0x146   : > { %v777_v29 = vld [vmem:[#allocation2 + $0x18] sm:$0xff]  ;;  %v792_v34 = vadd.f32 %v783_v30, %v776_v28  ;;  %v822_v37 = vmul.f32 %v790_v32, %v790_v32 }
 0x147   : > { %v793_v35 = vadd.f32 %v787_v31, %v777_v29  ;;  %v1123_v36 = vpack.c.bf16 %v791_v33, %v790_v32  ;;  %v823_v38 = vmul.f32 %v791_v33, %v791_v33 }
 0x148   : > { %v808_v40 = vadd.f32 %v792_v34, %v790_v32  ;;  %v824_v42 = vmul.f32 %v792_v34, %v792_v34 }
 0x149   : > { %v1124_v39 = vpack.c.bf16 %v793_v35, %v792_v34  ;;  %v815_v41 = vadd.f32 %v793_v35, %v791_v33  ;;  %v825_v43 = vmul.f32 %v793_v35, %v793_v35  ;;  %806 = vst [vmem:[%s1416_s5] sm:$0xff] %v1123_v36 }
 0x14a   : > { %v809_v44 = vrot.slane %v808_v40, 4  ;;  %v826_v46 = vadd.f32 %v824_v42, %v822_v37 }
 0x14b   : > { %807 = vst [vmem:[%s1416_s5 + $0x8] sm:$0xff] %v1124_v39  ;;  %v816_v45 = vrot.slane %v815_v41, 4  ;;  %v833_v47 = vadd.f32 %v825_v43, %v823_v38 }
 0x14c   : > { %v810_v48 = vadd.f32 %v809_v44, %v808_v40  ;;  %v827_v50 = vrot.slane %v826_v46, 4 }
 0x14d   : > { %v817_v49 = vadd.f32 %v816_v45, %v815_v41  ;;  %v834_v51 = vrot.slane %v833_v47, 4 }
 0x14e   : > { %v811_v52 = vrot.slane %v810_v48, 2  ;;  %v828_v54 = vadd.f32 %v827_v50, %v826_v46 }
 0x14f   : > { %v818_v53 = vrot.slane %v817_v49, 2  ;;  %v835_v55 = vadd.f32 %v834_v51, %v833_v47 }
 0x150   : > { %v812_v56 = vadd.f32 %v811_v52, %v810_v48  ;;  %v829_v58 = vrot.slane %v828_v54, 2 }
 0x151   : > { %v819_v57 = vadd.f32 %v818_v53, %v817_v49  ;;  %v836_v59 = vrot.slane %v835_v55, 2 }
 0x152   : > { %v813_v60 = vrot.slane %v812_v56, 1  ;;  %v830_v62 = vadd.f32 %v829_v58, %v828_v54 }
 0x153   : > { %v820_v61 = vrot.slane %v819_v57, 1  ;;  %v837_v63 = vadd.f32 %v836_v59, %v835_v55 }
 0x154   : > { %v814_v0 = vadd.f32 %v813_v60, %v812_v56  ;;  %v831_v2 = vrot.slane %v830_v62, 1 }
 0x155   : > { %v821_v1 = vadd.f32 %v820_v61, %v819_v57  ;;  %v838_v3 = vrot.slane %v837_v63, 1 }
 0x156   : > { %v832_v4 = vadd.f32 %v831_v2, %v830_v62 }
 0x157   : > { %v839_v5 = vadd.f32 %v838_v3, %v837_v63 }
 0x158   : > { %v841_v6 = vsel %vm840_vm2, %v814_v0, %v832_v4 }
 0x159   : > { %v842_v7 = vsel %vm840_vm2, %v821_v1, %v839_v5 }
 0x15a   : > { %v845_v8 = vcombine.low %v841_v6, %v842_v7 }
 0x15c   : > { %1120 = vst.sshfl [vmem:[%s1421_s6] sm:$0x33 pattern:$0x76325410] %v845_v8 }
 0x15d PF: > { %s15_s21 = sadd.s32 1, %s1324_s21   ;;  %s1520_s24 = sld [smem:[#allocation3_spill]] }
 0x15e   : > { %p12_p12 = scmp.ge.s32.totalorder %s15_s21, 14   ;;  %s1521_s30 = sld [smem:[#allocation4_spill]] }
 0x15f   : > { %s1522_s15 = smov %s1312_s18  ;;  %s1523_s16 = smov %s1316_s19 }
 0x160   : > { %s1524_s17 = smov %s1320_s20  ;;  %s1525_s18 = smov %s1529_s22 }
 0x161   :  { %14 = sbr.rel (!%p12_p12) target bundleno = 4 (0x4), region = 87 }
 0x163   : > { %s1526_s19 = smov %s1520_s24 }
 0x164   : > { %s1527_s20 = smov %s1521_s30 }

// kernel: point_pillars_forward.32
= control target key start
LH: loop header
LB: loop body
LE: loop exit
PB: predicated region body
PF: predicated region fallthrough
CT: control target
= control target key end

     0   :  { %v552_v1 = vmov 0   ;;  %v56_v21 = vlaneseq  ;;  %s818_s2 = inlined_call_operand.vmem [shape: bf16[128,256], index: 2, kind: input, shape index: {}]   ;;  %s819_s1 = inlined_call_operand.vmem [shape: bf16[64,128], index: 1, kind: input, shape index: {}]   ;;  %s820_s0 = inlined_call_operand.vmem [shape: bf16[64,256], index: 0, kind: input, shape index: {}]   ;;  %s821_s4 = inlined_call_operand.vmem [shape: f32[1,256], index: 4, kind: input, shape index: {}]   ;;  %s822_s5 = inlined_call_operand.vmem [shape: f32[1,256], index: 5, kind: input, shape index: {}]   ;;  %s823_s3 = inlined_call_operand.vmem [shape: f32[1,256], index: 3, kind: input, shape index: {}]   ;;  %s824_s6 = inlined_call_operand.vmem [shape: f32[1,256], index: 6, kind: input, shape index: {}]   ;;  %s825_s7 = inlined_call_operand.vmem [shape: f32[1,256], index: 7, kind: input, shape index: {}]   ;;  %s826_s8 = inlined_call_operand.vmem [shape: bf16[64,256], index: 8, kind: output, shape index: {}]  }
   0x1   :  { %v524_v0 = vld [vmem:[%s818_s2 + $0x4] ss:$8 sps:$4 sm:$0xff]   ;;  %282 = vmatprep.mubr.bf16.mxu0 %v552_v1  ;;  %302 = vmatprep.mubr.bf16.mxu1 %v552_v1  ;;  %v526_v2 = vld [vmem:[%s818_s2] ss:$8 sps:$4 sm:$0xff]   ;;  %v527_v3 = vld [vmem:[%s818_s2 + $0x14] ss:$8 sps:$4 sm:$0xff]  }
   0x2   :  { %250 = vmatprep.subr.bf16.mxu0 %v524_v0  ;;  %507 = vmatprep.subr.bf16.mxu1 %v524_v0  ;;  %v529_v4 = vld [vmem:[%s818_s2 + $0x10] ss:$8 sps:$4 sm:$0xff]   ;;  %v530_v5 = vld [vmem:[%s818_s2 + $0x24] ss:$8 sps:$4 sm:$0xff]   ;;  %v532_v6 = vld [vmem:[%s818_s2 + $0x20] ss:$8 sps:$4 sm:$0xff]  }
   0x3   :  { %251 = vmatpush1.bf16.msra.mxu0 %v526_v2  ;;  %515 = vmatpush1.bf16.msra.mxu1 %v526_v2  ;;  %v533_v7 = vld [vmem:[%s818_s2 + $0x34] ss:$8 sps:$4 sm:$0xff]   ;;  %v535_v8 = vld [vmem:[%s818_s2 + $0x30] ss:$8 sps:$4 sm:$0xff]   ;;  %v536_v9 = vld [vmem:[%s818_s2 + $0x44] ss:$8 sps:$4 sm:$0xff]  }
   0x4   :  { %252 = vmatprep.subr.bf16.mxu0 %v527_v3  ;;  %508 = vmatprep.subr.bf16.mxu1 %v527_v3  ;;  %v538_v10 = vld [vmem:[%s818_s2 + $0x40] ss:$8 sps:$4 sm:$0xff]   ;;  %v539_v11 = vld [vmem:[%s818_s2 + $0x54] ss:$8 sps:$4 sm:$0xff]   ;;  %v541_v12 = vld [vmem:[%s818_s2 + $0x50] ss:$8 sps:$4 sm:$0xff]  }
   0x5   :  { %v542_v13 = vld [vmem:[%s818_s2 + $0x64] ss:$8 sps:$4 sm:$0xff]   ;;  %v544_v14 = vld [vmem:[%s818_s2 + $0x60] ss:$8 sps:$4 sm:$0xff]   ;;  %v545_v15 = vld [vmem:[%s818_s2 + $0x74] ss:$8 sps:$4 sm:$0xff]  }
   0x6   :  { %v547_v16 = vld [vmem:[%s818_s2 + $0x70] ss:$8 sps:$4 sm:$0xff]   ;;  %v548_v17 = vld [vmem:[%s819_s1] sm:$0xff]   ;;  %v550_v19 = vld [vmem:[%s819_s1 + $0x8] sm:$0xff]   ;;  %v57_v22 = vshrl.u32 %v56_v21, 7 }
   0x7   :  { %253 = vmatpush1.bf16.msra.mxu0 %v529_v4  ;;  %516 = vmatpush1.bf16.msra.mxu1 %v529_v4  ;;  %v549_v18 = vld [vmem:[%s819_s1 + $0x10] sm:$0xff]   ;;  %v551_v20 = vld [vmem:[%s819_s1 + $0x18] sm:$0xff]   ;;  %v30_v24 = vld [vmem:[%s820_s0] sm:$0xff] }
   0x8   :  { %254 = vmatprep.subr.bf16.mxu0 %v530_v5  ;;  %509 = vmatprep.subr.bf16.mxu1 %v530_v5  ;;  %v58_v23 = vsub.s32 0, %v57_v22  ;;  %v54_v25 = vld [vmem:[%s821_s4] sm:$0x3]  ;;  %v38_v26 = vunpack.c.l.bf16 %v30_v24  ;;  %v62_v30 = vsub.s32 1, %v57_v22  ;;  %v39_v36 = vunpack.c.h.bf16 %v30_v24  ;;  %v31_v38 = vld [vmem:[%s820_s0 + $0x8] sm:$0xff]  ;;  %v32_v43 = vld [vmem:[%s820_s0 + $0x10] sm:$0xff] }
   0x9   :  { %v82_v28 = vld [vmem:[%s822_s5] sm:$0x3]  ;;  %v35_v39 = vld [vmem:[%s820_s0 + $0x28] sm:$0xff]  ;;  %v36_v44 = vld [vmem:[%s820_s0 + $0x30] sm:$0xff]  ;;  %v40_v48 = vunpack.c.l.bf16 %v31_v38  ;;  %v41_v53 = vunpack.c.h.bf16 %v31_v38  ;;  %v42_v55 = vunpack.c.l.bf16 %v32_v43  ;;  %v43_v57 = vunpack.c.h.bf16 %v32_v43 }
   0xa   :  { %v59_v27 = vrot.slane %v54_v25, %v58_v23  ;;  %v34_v29 = vld [vmem:[%s820_s0 + $0x20] sm:$0xff]  ;;  %v670_v32 = vrot.slane %v82_v28, %v58_v23  ;;  %v63_v37 = vrot.slane %v54_v25, %v62_v30  ;;  %v33_v49 = vld [vmem:[%s820_s0 + $0x18] sm:$0xff]  ;;  %v48_v52 = vunpack.c.l.bf16 %v35_v39 }
   0xb   :  { %255 = vmatpush1.bf16.msra.mxu0 %v532_v6  ;;  %517 = vmatpush1.bf16.msra.mxu1 %v532_v6  ;;  %v134_v33 = vld [vmem:[%s823_s3] sm:$0x3]  ;;  %v46_v34 = vunpack.c.l.bf16 %v34_v29  ;;  %v47_v42 = vunpack.c.h.bf16 %v34_v29  ;;  %v37_v50 = vld [vmem:[%s820_s0 + $0x38] sm:$0xff]  ;;  %v49_v54 = vunpack.c.h.bf16 %v35_v39  ;;  %v50_v56 = vunpack.c.l.bf16 %v36_v44 }
   0xc   :  { %256 = vmatprep.subr.bf16.mxu0 %v533_v7  ;;  %510 = vmatprep.subr.bf16.mxu1 %v533_v7  ;;  %v66_v31 = vmul.f32 %v59_v27, %v38_v26  ;;  %v323_v35 = vld [vmem:[%s824_s6] sm:$0x3]  ;;  %v687_v41 = vrot.slane %v134_v33, %v58_v23  ;;  %v697_v47 = vrot.slane %v134_v33, %v62_v30  ;;  %v51_v58 = vunpack.c.h.bf16 %v36_v44 }
   0xd   :  { %v695_v45 = vrot.slane %v323_v35, %v58_v23  ;;  %v74_v46 = vmul.f32 %v59_v27, %v46_v34  ;;  %v67_v51 = vmul.f32 %v63_v37, %v39_v36  ;;  %v91_v59 = vrot.slane %v82_v28, %v62_v30  ;;  %v367_v3 = vld [vmem:[%s825_s7] sm:$0x3] }
   0xe   :  { %v685_v40 = vadd.f32 %v670_v32, %v66_v31  ;;  %v75_v60 = vmul.f32 %v63_v37, %v47_v42  ;;  %v44_v61 = vunpack.c.l.bf16 %v33_v49  ;;  %v52_v62 = vunpack.c.l.bf16 %v37_v50 }
   0xf   :  { %257 = vmatpush1.bf16.msra.mxu0 %v535_v8  ;;  %518 = vmatpush1.bf16.msra.mxu1 %v535_v8  ;;  %v705_v63 = vrot.slane %v323_v35, %v62_v30  ;;  %v68_v0 = vmul.f32 %v59_v27, %v40_v48  ;;  %v53_v2 = vunpack.c.h.bf16 %v37_v50  ;;  %v102_v4 = vadd.f32 %v670_v32, %v74_v46 }
  0x10   :  { %258 = vmatprep.subr.bf16.mxu0 %v536_v9  ;;  %511 = vmatprep.subr.bf16.mxu1 %v536_v9  ;;  %v76_v5 = vmul.f32 %v59_v27, %v48_v52  ;;  %v69_v6 = vmul.f32 %v63_v37, %v41_v53  ;;  %v77_v7 = vmul.f32 %v63_v37, %v49_v54 }
  0x11   :  { %v70_v8 = vmul.f32 %v59_v27, %v42_v55  ;;  %v78_v9 = vmul.f32 %v59_v27, %v50_v56 }
  0x12   :  { %v104_v21 = vadd.f32 %v670_v32, %v76_v5  ;;  %v97_v22 = vadd.f32 %v91_v59, %v69_v6  ;;  %v105_v24 = vadd.f32 %v91_v59, %v77_v7 }
  0x13   :  { %259 = vmatpush1.bf16.msra.mxu0 %v538_v10  ;;  %519 = vmatpush1.bf16.msra.mxu1 %v538_v10  ;;  %v71_v10 = vmul.f32 %v63_v37, %v43_v57  ;;  %v718_v28 = vadd.f32 %v670_v32, %v70_v8  ;;  %v721_v29 = vadd.f32 %v670_v32, %v78_v9 }
  0x14   :  { %260 = vmatprep.subr.bf16.mxu0 %v539_v11  ;;  %512 = vmatprep.subr.bf16.mxu1 %v539_v11  ;;  %v79_v11 = vmul.f32 %v63_v37, %v51_v58 }
  0x17   :  { %261 = vmatpush1.bf16.msra.mxu0 %v541_v12  ;;  %520 = vmatpush1.bf16.msra.mxu1 %v541_v12  ;;  %v95_v12 = vadd.f32 %v91_v59, %v67_v51 }
  0x18   :  { %262 = vmatprep.subr.bf16.mxu0 %v542_v13  ;;  %513 = vmatprep.subr.bf16.mxu1 %v542_v13  ;;  %v103_v13 = vadd.f32 %v91_v59, %v75_v60 }
  0x1b   :  { %263 = vmatpush1.bf16.msra.mxu0 %v544_v14  ;;  %521 = vmatpush1.bf16.msra.mxu1 %v544_v14  ;;  %v72_v14 = vmul.f32 %v59_v27, %v44_v61 }
  0x1c   :  { %264 = vmatprep.subr.bf16.mxu0 %v545_v15  ;;  %514 = vmatprep.subr.bf16.mxu1 %v545_v15  ;;  %v80_v15 = vmul.f32 %v59_v27, %v52_v62  ;;  %v725_v27 = vadd.f32 %v91_v59, %v79_v11 }
  0x1d   :  { %v730_v35 = vadd.f32 %v670_v32, %v72_v14 }
  0x1e   :  { %v733_v36 = vadd.f32 %v670_v32, %v80_v15 }
  0x1f   :  { %265 = vmatpush1.bf16.msra.mxu0 %v547_v16  ;;  %522 = vmatpush1.bf16.msra.mxu1 %v547_v16  ;;  %v711_v16 = vrot.slane %v367_v3, %v58_v23  ;;  %v723_v23 = vadd.f32 %v91_v59, %v71_v10 }
  0x22   :  { %283 = vmatmul.mubr.bf16.vlgmr.msra.gmra.mrb[0].mxu0 %v548_v17  ;;  %303 = vmatmul.mubr.bf16.vlgmr.msra.gmra.mrb[0].mxu1 %v549_v18  ;;  %v96_v17 = vadd.f32 %v670_v32, %v68_v0 }
  0x23   :  { %292 = vmatprep.mubr.bf16.mxu0 %v552_v1  ;;  %312 = vmatprep.mubr.bf16.mxu1 %v552_v1  ;;  %v45_v1 = vunpack.c.h.bf16 %v33_v49 }
  0x25   :  { %v73_v18 = vmul.f32 %v63_v37, %v45_v1 }
  0x27   :  { %v737_v43 = vadd.f32 %v91_v59, %v73_v18 }
  0x2a   :  { %293 = vmatmul.mubr.bf16.gmra.mrb[4].mxu0 %v550_v19  ;;  %313 = vmatmul.mubr.bf16.gmra.mrb[4].mxu1 %v551_v20  ;;  %v81_v19 = vmul.f32 %v63_v37, %v53_v2  ;;  %v714_v20 = vrot.slane %v367_v3, %v62_v30 }
  0x2c   :  { %v739_v44 = vadd.f32 %v91_v59, %v81_v19 }
  0xf5   :  { %v284_v25 = vpop.f32.mrb[0].mxu0  ;;  %v304_v26 = vpop.f32.mrb[0].mxu1 }
  0xf6   :  { %v285_v31 = vadd.f32 %v284_v25, %v687_v41  ;;  %v305_v30 = vadd.f32 %v304_v26, %v687_v41  ;;  %v286_v33 = vpop.f32.mrb[1].mxu0  ;;  %v306_v34 = vpop.f32.mrb[1].mxu1 }
  0xf7   :  { %v287_v37 = vadd.f32 %v286_v33, %v697_v47  ;;  %v307_v38 = vadd.f32 %v306_v34, %v697_v47  ;;  %v288_v39 = vpop.f32.mrb[2].mxu0  ;;  %v308_v42 = vpop.f32.mrb[2].mxu1 }
  0xf8   :  { %v335_v46 = vmul.f32 %v695_v45, %v285_v31  ;;  %v343_v48 = vmul.f32 %v695_v45, %v305_v30  ;;  %v289_v49 = vadd.f32 %v288_v39, %v687_v41  ;;  %v309_v50 = vadd.f32 %v308_v42, %v687_v41  ;;  %v290_v32 = vpop.f32.mrb[3].mxu0  ;;  %v310_v51 = vpop.f32.mrb[3].mxu1 }
  0xf9   :  { %v336_v52 = vmul.f32 %v705_v63, %v287_v37  ;;  %v344_v53 = vmul.f32 %v705_v63, %v307_v38  ;;  %v291_v54 = vadd.f32 %v290_v32, %v697_v47  ;;  %v311_v55 = vadd.f32 %v310_v51, %v697_v47 }
  0xfa   :  { %v351_v56 = vadd.f32 %v335_v46, %v685_v40  ;;  %v359_v57 = vadd.f32 %v343_v48, %v102_v4  ;;  %v337_v58 = vmul.f32 %v695_v45, %v289_v49  ;;  %v345_v59 = vmul.f32 %v695_v45, %v309_v50 }
  0xfb   :  { %v352_v60 = vadd.f32 %v336_v52, %v95_v12  ;;  %v360_v61 = vadd.f32 %v344_v53, %v103_v13  ;;  %v338_v62 = vmul.f32 %v705_v63, %v291_v54  ;;  %v346_v0 = vmul.f32 %v705_v63, %v311_v55 }
  0xfc   :  { %v379_v1 = vadd.f32 %v711_v16, %v351_v56  ;;  %v387_v2 = vadd.f32 %v711_v16, %v359_v57  ;;  %v353_v3 = vadd.f32 %v337_v58, %v96_v17  ;;  %v361_v5 = vadd.f32 %v345_v59, %v104_v21 }
  0xfd   :  { %v380_v6 = vadd.f32 %v714_v20, %v352_v60  ;;  %v388_v40 = vadd.f32 %v714_v20, %v360_v61  ;;  %v354_v4 = vadd.f32 %v338_v62, %v97_v22  ;;  %v362_v7 = vadd.f32 %v346_v0, %v105_v24  ;;  %v294_v8 = vpop.f32.mrb[4].mxu0  ;;  %v314_v9 = vpop.f32.mrb[4].mxu1 }
  0xfe   :  { %v395_v10 = vmax.f32 %v379_v1, 0.0  ;;  %v403_v11 = vmax.f32 %v387_v2, 0.0  ;;  %v381_v12 = vadd.f32 %v711_v16, %v353_v3  ;;  %v389_v13 = vadd.f32 %v711_v16, %v361_v5  ;;  %v296_v14 = vpop.f32.mrb[5].mxu0  ;;  %v316_v15 = vpop.f32.mrb[5].mxu1 }
  0xff   :  { %v396_v18 = vmax.f32 %v380_v6, 0.0  ;;  %v404_v19 = vmax.f32 %v388_v40, 0.0  ;;  %v382_v17 = vadd.f32 %v714_v20, %v354_v4  ;;  %v390_v21 = vadd.f32 %v714_v20, %v362_v7  ;;  %v298_v25 = vpop.f32.mrb[6].mxu0  ;;  %v318_v26 = vpop.f32.mrb[6].mxu1 }
 0x100   :  { %v397_v22 = vmax.f32 %v381_v12, 0.0  ;;  %v405_v24 = vmax.f32 %v389_v13, 0.0  ;;  %v295_v31 = vadd.f32 %v294_v8, %v687_v41  ;;  %v315_v30 = vadd.f32 %v314_v9, %v687_v41  ;;  %v300_v33 = vpop.f32.mrb[7].mxu0  ;;  %v320_v34 = vpop.f32.mrb[7].mxu1 }
 0x101   :  { %v499_v37 = vpack.c.bf16 %v396_v18, %v395_v10  ;;  %v503_v38 = vpack.c.bf16 %v404_v19, %v403_v11  ;;  %v398_v39 = vmax.f32 %v382_v17, 0.0  ;;  %v406_v42 = vmax.f32 %v390_v21, 0.0 }
 0x102   :  { %v339_v46 = vmul.f32 %v695_v45, %v295_v31  ;;  %v347_v48 = vmul.f32 %v695_v45, %v315_v30  ;;  %v297_v49 = vadd.f32 %v296_v14, %v697_v47  ;;  %v317_v50 = vadd.f32 %v316_v15, %v697_v47 }
 0x103   :  { %459 = vst [vmem:[%s826_s8] sm:$0xff] %v499_v37  ;;  %463 = vst [vmem:[%s826_s8 + $0x20] sm:$0xff] %v503_v38  ;;  %v500_v32 = vpack.c.bf16 %v398_v39, %v397_v22  ;;  %v504_v51 = vpack.c.bf16 %v406_v42, %v405_v24  ;;  %v299_v52 = vadd.f32 %v298_v25, %v687_v41 }
 0x104   :  { %v319_v53 = vadd.f32 %v318_v26, %v687_v41  ;;  %v355_v54 = vadd.f32 %v339_v46, %v718_v28  ;;  %v363_v55 = vadd.f32 %v347_v48, %v721_v29  ;;  %v340_v56 = vmul.f32 %v705_v63, %v297_v49 }
 0x105   :  { %v348_v57 = vmul.f32 %v705_v63, %v317_v50  ;;  %460 = vst [vmem:[%s826_s8 + $0x8] sm:$0xff] %v500_v32  ;;  %464 = vst [vmem:[%s826_s8 + $0x28] sm:$0xff] %v504_v51  ;;  %v341_v58 = vmul.f32 %v695_v45, %v299_v52  ;;  %v301_v28 = vadd.f32 %v300_v33, %v697_v47 }
 0x106   :  { %v349_v41 = vmul.f32 %v695_v45, %v319_v53  ;;  %v321_v29 = vadd.f32 %v320_v34, %v697_v47  ;;  %v383_v59 = vadd.f32 %v711_v16, %v355_v54  ;;  %v391_v60 = vadd.f32 %v711_v16, %v363_v55 }
 0x107   :  { %v356_v61 = vadd.f32 %v340_v56, %v723_v23  ;;  %v364_v62 = vadd.f32 %v348_v57, %v725_v27  ;;  %v357_v0 = vadd.f32 %v341_v58, %v730_v35  ;;  %v342_v2 = vmul.f32 %v705_v63, %v301_v28 }
 0x108   :  { %v365_v1 = vadd.f32 %v349_v41, %v733_v36  ;;  %v350_v45 = vmul.f32 %v705_v63, %v321_v29  ;;  %v399_v3 = vmax.f32 %v383_v59, 0.0  ;;  %v407_v5 = vmax.f32 %v391_v60, 0.0 }
 0x109   :  { %v384_v47 = vadd.f32 %v714_v20, %v356_v61  ;;  %v392_v6 = vadd.f32 %v714_v20, %v364_v62  ;;  %v385_v40 = vadd.f32 %v711_v16, %v357_v0  ;;  %v358_v27 = vadd.f32 %v342_v2, %v737_v43 }
 0x10a   :  { %v393_v23 = vadd.f32 %v711_v16, %v365_v1  ;;  %v366_v35 = vadd.f32 %v350_v45, %v739_v44 }
 0x10b   :  { %v400_v4 = vmax.f32 %v384_v47, 0.0  ;;  %v408_v36 = vmax.f32 %v392_v6, 0.0  ;;  %v401_v7 = vmax.f32 %v385_v40, 0.0  ;;  %v386_v63 = vadd.f32 %v714_v20, %v358_v27 }
 0x10c   :  { %v409_v8 = vmax.f32 %v393_v23, 0.0  ;;  %v394_v9 = vadd.f32 %v714_v20, %v366_v35 }
 0x10d   :  { %v501_v10 = vpack.c.bf16 %v400_v4, %v399_v3  ;;  %v505_v11 = vpack.c.bf16 %v408_v36, %v407_v5  ;;  %v402_v12 = vmax.f32 %v386_v63, 0.0 }
 0x10e   :  { %v410_v13 = vmax.f32 %v394_v9, 0.0 }
 0x10f   :  { %461 = vst [vmem:[%s826_s8 + $0x10] sm:$0xff] %v501_v10  ;;  %465 = vst [vmem:[%s826_s8 + $0x30] sm:$0xff] %v505_v11  ;;  %v502_v16 = vpack.c.bf16 %v402_v12, %v401_v7 }
 0x110   :  { %v506_v43 = vpack.c.bf16 %v410_v13, %v409_v8 }
 0x111   :  { %462 = vst [vmem:[%s826_s8 + $0x18] sm:$0xff] %v502_v16 }
 0x112   :  { %466 = vst [vmem:[%s826_s8 + $0x38] sm:$0xff] %v506_v43 }

// kernel: point_pillars_forward.30
= control target key start
LH: loop header
LB: loop body
LE: loop exit
PB: predicated region body
PF: predicated region fallthrough
CT: control target
= control target key end

     0   :  { %s1815_s15 = smov 0   ;;  %s1817_s16 = smov 0   ;;  %s2048_s0 = inlined_call_operand.vmem [shape: bf16[2,4,18,256], index: 0, kind: input, shape index: {}]   ;;  %s2049_s1 = inlined_call_operand.vmem [shape: bf16[3,3,256,256], index: 1, kind: input, shape index: {}]   ;;  %s2050_s2 = inlined_call_operand.vmem [shape: f32[1,256], index: 2, kind: input, shape index: {}]   ;;  %s2051_s3 = inlined_call_operand.vmem [shape: bf16[2,2,16,256], index: 3, kind: output, shape index: {0}]   ;;  %s2052_s4 = inlined_call_operand.vmem [shape: f32[2,2,2,256], index: 4, kind: output, shape index: {1}]  }
   0x1   :  { %s1819_s17 = smov 0   ;;  %s1821_s18 = smov 0  }
   0x2   :  { %s1823_s19 = smov 0   ;;  %s1825_s20 = smov 0  }
   0x3   :  { %s1827_s21 = smov 0  }
   0x4 LB: > { %s27_s22 = sadd.s32 1, %s1775_s18  ;;  %s30_s23 = sadd.s32 1, %s1779_s19  ;;  %s1787_s21 = sphi %s1827_s21, %s15_s21   ;;  %s1783_s20 = sphi %s1825_s20, %s2058_s20   ;;  %s1779_s19 = sphi %s1823_s19, %s2057_s19   ;;  %s1775_s18 = sphi %s1821_s18, %s2056_s18   ;;  %s1771_s17 = sphi %s1819_s17, %s2055_s17   ;;  %s1767_s16 = sphi %s1817_s16, %s2054_s16   ;;  %s1763_s15 = sphi %s1815_s15, %s2053_s15  }
   0x5   : > { %p28_p0 = scmp.ge.s32.totalorder %s27_s22, 3  ;;  %p1335_p1 = scmp.ge.s32.totalorder %s1787_s21, 1 }
   0x6   : > { %p208_p2 = scmp.lt.s32.totalorder %s1787_s21, 13  ;;  %s34_s24 = sadd.s32 1, %s1783_s20 }
   0x7   : > { %s2060_s22 = smov (%p28_p0, %s27_s22), 0  ;;  %s2062_s23 = smov (!%p28_p0, %s30_s23), %s1779_s19 }
   0x8   : > { %p209_p3 = pnand %p1335_p1, %p208_p2  ;;  %p32_p4 = scmp.ge.s32.totalorder %s2062_s23, 2 }
   0x9   : > { %s257_s25 = sadd.s32 (!%p209_p3), %s1763_s15, %s1767_s16  ;;  %p258_p6 = scmp.lt.s32.totalorder (!%p209_p3), %s1771_s17, 1 }
   0xa   : > { %s2064_s23 = smov (%p32_p4, %s2062_s23), 0  ;;  %s2066_s24 = smov (!%p32_p4, %s34_s24), %s1783_s20 }
   0xb   : > { %p36_p5 = scmp.ge.s32.totalorder %s2066_s24, 2  ;;  %212 = sbr.rel (%p209_p3) target bundleno = 412 (0x19c), region = 32 }
   0xc   : > { %p260_p7 = scmp.lt.s32.totalorder (!%p209_p3), %s257_s25, 3  ;;  %p268_p8 = scmp.lt.s32.totalorder (!%p209_p3), %s1763_s15, 2 }
   0xd   : > { %s2068_s24 = smov (%p36_p5, %s2066_s24), 0  ;;  %p275_p9 = scmp.lt.s32.totalorder (!%p209_p3), %s1767_s16, 1 }
   0xe   : > { %p1344_p10 = scmp.ne.s32.totalorder (!%p209_p3), %s1763_s15, 0 }
  0x12   : > { %s2070_s17 = smov (!%p258_p6, %s1771_s17), 1  ;;  %s2072_s25 = smov (!%p260_p7, %s257_s25), 3 }
  0x13   : > { %s1530_s26 = smul.u32 24, %s2070_s17  ;;  %s1339_s9 = sshll.u32 %s2070_s17, 3  ;;  %v1789_v3 = vmov (!%p1344_p10), 0.0  }
  0x14   : > { %s1529_s27 = smul.u32 6, %s2072_s25  ;;  %s1342_s13 = sshll.u32 %s2070_s17, 2  ;;  %298 = vst [vmem:[#allocation2] sm:$0xff] (!%p1344_p10), %v1789_v3  ;;  %299 = vst [vmem:[#allocation2 + $0x8] sm:$0xff] (!%p1344_p10), %v1789_v3 }
  0x15   : > { %s269_s28 = scalar_select %p268_p8, %s1763_s15, 2 }
  0x16   : > { %s264_s29 = sadd.s32 %s1530_s26, %s1529_s27  ;;  %s2074_s16 = smov (!%p275_p9, %s1767_s16), 1  ;;  %300 = vst [vmem:[#allocation2 + $0x10] sm:$0xff] (!%p1344_p10), %v1789_v3  ;;  %301 = vst [vmem:[#allocation2 + $0x18] sm:$0xff] (!%p1344_p10), %v1789_v3 }
  0x17   : > { %s1336_s30 = sshll.u32 %s264_s29, 2  ;;  %s1531_s5 = smul.u32 768, %s269_s28 }
  0x18   : > { %s266_s8 = scalar_lea.vmem %s2048_s0, %s1336_s30  ;;  %s1338_s14 = sshll.u32 %s2074_s16, 2 }
  0x19   : > { %s1872_s12 = scalar_lea.vmem %s2049_s1, %s1531_s5  ;;  %v1874_v0 = vld [vmem:[%s266_s8] sm:$0xff]  ;;  %v1876_v1 = vld [vmem:[%s266_s8 + $0x8] sm:$0xff]  ;;  %v1878_v2 = vld [vmem:[%s266_s8 + $0x10] sm:$0x11]  ;;  %s1341_s25 = sshll.u32 %s2074_s16, 1 }
  0x1a   : > { %s279_s26 = sadd.s32 %s1339_s9, %s1338_s14  ;;  %s288_s27 = sadd.s32 %s1342_s13, %s1341_s25 }
  0x1b   : > { %s1340_s28 = sshll.u32 %s279_s26, 2  ;;  %s1343_s29 = sshll.u32 %s288_s27, 1 }
  0x1c   : > { %s1884_s7 = scalar_lea.vmem %s2051_s3, %s1340_s28  ;;  %s1889_s10 = scalar_lea.vmem %s2052_s4, %s1343_s29 }
  0x1d   : > { %297 = sbr.rel (%p1344_p10) target bundleno = 36 (0x24), region = 36 }
  0x24 PF: > { %v1589_v4 = vld [vmem:[%s1872_s12 + $0x104] ss:$8 sps:$4 sm:$0xff]   ;;  %v1895_v5 = vcombine.high %v1874_v0, %v1876_v1  ;;  %v1899_v6 = vcombine.high %v1878_v2, %v1878_v2  ;;  %v1591_v7 = vld [vmem:[%s1872_s12 + $0x100] ss:$8 sps:$4 sm:$0xff]   ;;  %v1592_v8 = vld [vmem:[%s1872_s12 + $0x114] ss:$8 sps:$4 sm:$0xff]   ;;  %v1948_v54 = vcombine.low %v1874_v0, %v1876_v1  ;;  %v1958_v61 = vcombine.low %v1878_v2, %v1878_v2 }
  0x25   : > { %780 = vmatprep.subr.bf16.mxu0 %v1589_v4  ;;  %v1594_v9 = vld [vmem:[%s1872_s12 + $0x110] ss:$8 sps:$4 sm:$0xff]   ;;  %v1595_v12 = vld [vmem:[%s1872_s12 + $0x124] ss:$8 sps:$4 sm:$0xff]   ;;  %vm593_vm0 = vsmask.f32 7424 }
  0x26   : > { %540 = vmatprep.mubr.bf16.mxu1 %v1895_v5  ;;  %781 = vmatpush1.bf16.msra.mxu0 %v1591_v7  ;;  %v607_v10 = vshrl.u32 %v1895_v5, 16  ;;  %v609_v11 = vshll.u32 %v1895_v5, 16  ;;  %v614_v13 = vshll.u32 %v1899_v6, 16  ;;  %v1597_v16 = vld [vmem:[%s1872_s12 + $0x120] ss:$8 sps:$4 sm:$0xff]   ;;  %v597_v59 = vshll.u32 %v1948_v54, 16 }
  0x27   : > { %782 = vmatprep.subr.bf16.mxu0 %v1592_v8  ;;  %v1598_v18 = vld [vmem:[%s1872_s12 + $0x134] ss:$8 sps:$4 sm:$0xff]   ;;  %v1600_v20 = vld [vmem:[%s1872_s12 + $0x130] ss:$8 sps:$4 sm:$0xff]   ;;  %v1601_v21 = vld [vmem:[%s1872_s12 + $0x144] ss:$8 sps:$4 sm:$0xff]  }
  0x28   : > { %v611_v14 = vrot.slane %v609_v11, 1  ;;  %v616_v15 = vrot.slane %v614_v13, 1  ;;  %v1603_v22 = vld [vmem:[%s1872_s12 + $0x140] ss:$8 sps:$4 sm:$0xff]   ;;  %v1604_v23 = vld [vmem:[%s1872_s12 + $0x154] ss:$8 sps:$4 sm:$0xff]  }
  0x29   : > { %v1606_v24 = vld [vmem:[%s1872_s12 + $0x150] ss:$8 sps:$4 sm:$0xff]   ;;  %v1607_v25 = vld [vmem:[%s1872_s12 + $0x164] ss:$8 sps:$4 sm:$0xff]   ;;  %v1636_v27 = vld [vmem:[%s1872_s12] ss:$8 sps:$4 sm:$0xff]  }
  0x2a   : > { %783 = vmatpush1.bf16.msra.mxu0 %v1594_v9  ;;  %v612_v17 = vor.u32 %v611_v14, %v607_v10  ;;  %v1634_v26 = vld [vmem:[%s1872_s12 + $0x4] ss:$8 sps:$4 sm:$0xff]   ;;  %v1609_v28 = vld [vmem:[%s1872_s12 + $0x160] ss:$8 sps:$4 sm:$0xff]   ;;  %v1640_v29 = vld [vmem:[%s1872_s12 + $0x14] ss:$8 sps:$4 sm:$0xff]  }
  0x2b   : > { %784 = vmatprep.subr.bf16.mxu0 %v1595_v12  ;;  %508 = vmatprep.subr.bf16.mxu1 %v1634_v26  ;;  %v1642_v30 = vld [vmem:[%s1872_s12 + $0x10] ss:$8 sps:$4 sm:$0xff]   ;;  %v1610_v31 = vld [vmem:[%s1872_s12 + $0x174] ss:$8 sps:$4 sm:$0xff]   ;;  %v1646_v33 = vld [vmem:[%s1872_s12 + $0x24] ss:$8 sps:$4 sm:$0xff]  }
  0x2c   : > { %v617_v19 = vsel %vm593_vm0, %v612_v17, %v616_v15  ;;  %509 = vmatpush1.bf16.msra.mxu1 %v1636_v27  ;;  %v1612_v32 = vld [vmem:[%s1872_s12 + $0x170] ss:$8 sps:$4 sm:$0xff]   ;;  %v1613_v34 = vld [vmem:[%s1872_s12 + $0x184] ss:$8 sps:$4 sm:$0xff]   ;;  %v1648_v35 = vld [vmem:[%s1872_s12 + $0x20] ss:$8 sps:$4 sm:$0xff]  }
  0x2d   : > { %812 = vmatprep.mubr.bf16.mxu0 %v617_v19  ;;  %510 = vmatprep.subr.bf16.mxu1 %v1640_v29  ;;  %v1652_v36 = vld [vmem:[%s1872_s12 + $0x34] ss:$8 sps:$4 sm:$0xff]   ;;  %v1615_v37 = vld [vmem:[%s1872_s12 + $0x180] ss:$8 sps:$4 sm:$0xff]   ;;  %v1654_v39 = vld [vmem:[%s1872_s12 + $0x30] ss:$8 sps:$4 sm:$0xff]  }
  0x2e   : > { %785 = vmatpush1.bf16.msra.mxu0 %v1597_v16  ;;  %v1616_v38 = vld [vmem:[%s1872_s12 + $0x194] ss:$8 sps:$4 sm:$0xff]   ;;  %v1658_v40 = vld [vmem:[%s1872_s12 + $0x44] ss:$8 sps:$4 sm:$0xff]   ;;  %v1618_v41 = vld [vmem:[%s1872_s12 + $0x190] ss:$8 sps:$4 sm:$0xff]  }
  0x2f   : > { %786 = vmatprep.subr.bf16.mxu0 %v1598_v18  ;;  %v1619_v42 = vld [vmem:[%s1872_s12 + $0x1a4] ss:$8 sps:$4 sm:$0xff]   ;;  %v1660_v43 = vld [vmem:[%s1872_s12 + $0x40] ss:$8 sps:$4 sm:$0xff]   ;;  %v1664_v44 = vld [vmem:[%s1872_s12 + $0x54] ss:$8 sps:$4 sm:$0xff]  }
  0x30   : > { %511 = vmatpush1.bf16.msra.mxu1 %v1642_v30  ;;  %v1621_v45 = vld [vmem:[%s1872_s12 + $0x1a0] ss:$8 sps:$4 sm:$0xff]   ;;  %v1622_v46 = vld [vmem:[%s1872_s12 + $0x1b4] ss:$8 sps:$4 sm:$0xff]   ;;  %v1666_v47 = vld [vmem:[%s1872_s12 + $0x50] ss:$8 sps:$4 sm:$0xff]  }
  0x31   : > { %512 = vmatprep.subr.bf16.mxu1 %v1646_v33  ;;  %v1670_v48 = vld [vmem:[%s1872_s12 + $0x64] ss:$8 sps:$4 sm:$0xff]   ;;  %v1624_v49 = vld [vmem:[%s1872_s12 + $0x1b0] ss:$8 sps:$4 sm:$0xff]   ;;  %v1672_v51 = vld [vmem:[%s1872_s12 + $0x60] ss:$8 sps:$4 sm:$0xff]  }
  0x32   : > { %787 = vmatpush1.bf16.msra.mxu0 %v1600_v20  ;;  %v1625_v50 = vld [vmem:[%s1872_s12 + $0x1c4] ss:$8 sps:$4 sm:$0xff]   ;;  %v1676_v52 = vld [vmem:[%s1872_s12 + $0x74] ss:$8 sps:$4 sm:$0xff]   ;;  %v1627_v53 = vld [vmem:[%s1872_s12 + $0x1c0] ss:$8 sps:$4 sm:$0xff]  }
  0x33   : > { %788 = vmatprep.subr.bf16.mxu0 %v1601_v21  ;;  %v1628_v55 = vld [vmem:[%s1872_s12 + $0x1d4] ss:$8 sps:$4 sm:$0xff]   ;;  %v1678_v56 = vld [vmem:[%s1872_s12 + $0x70] ss:$8 sps:$4 sm:$0xff]   ;;  %v1682_v57 = vld [vmem:[%s1872_s12 + $0x84] ss:$8 sps:$4 sm:$0xff]  }
  0x34   : > { %513 = vmatpush1.bf16.msra.mxu1 %v1648_v35  ;;  %v1630_v58 = vld [vmem:[%s1872_s12 + $0x1d0] ss:$8 sps:$4 sm:$0xff]   ;;  %v1631_v60 = vld [vmem:[%s1872_s12 + $0x1e4] ss:$8 sps:$4 sm:$0xff]   ;;  %v1684_v62 = vld [vmem:[%s1872_s12 + $0x80] ss:$8 sps:$4 sm:$0xff]  }
  0x35   : > { %514 = vmatprep.subr.bf16.mxu1 %v1652_v36  ;;  %v1688_v63 = vld [vmem:[%s1872_s12 + $0x94] ss:$8 sps:$4 sm:$0xff]   ;;  %v1633_v0 = vld [vmem:[%s1872_s12 + $0x1e0] ss:$8 sps:$4 sm:$0xff]   ;;  %v595_v1 = vshrl.u32 %v1948_v54, 16  ;;  %v599_v3 = vrot.slane %v597_v59, 1 }
  0x36   : > { %789 = vmatpush1.bf16.msra.mxu0 %v1603_v22  ;;  %v1637_v4 = vld [vmem:[%s1872_s12 + $0x1f4] ss:$8 sps:$4 sm:$0xff]   ;;  %v602_v7 = vshll.u32 %v1958_v61, 16  ;;  %v1690_v2 = vld [vmem:[%s1872_s12 + $0x90] ss:$8 sps:$4 sm:$0xff]   ;;  %v864_v15 = vrot.slane %v1895_v5, 1 }
  0x37   : > { %790 = vmatprep.subr.bf16.mxu0 %v1604_v23  ;;  %v1694_v8 = vld [vmem:[%s1872_s12 + $0xa4] ss:$8 sps:$4 sm:$0xff]   ;;  %v1639_v9 = vld [vmem:[%s1872_s12 + $0x1f0] ss:$8 sps:$4 sm:$0xff]   ;;  %v600_v11 = vor.u32 %v599_v3, %v595_v1  ;;  %v1696_v13 = vld [vmem:[%s1872_s12 + $0xa0] ss:$8 sps:$4 sm:$0xff]  }
  0x38   : > { %515 = vmatpush1.bf16.msra.mxu1 %v1654_v39  ;;  %v1645_v10 = vld [vmem:[%s1872_s12 + $0x204] ss:$8 sps:$4 sm:$0xff]   ;;  %v604_v12 = vrot.slane %v602_v7, 1  ;;  %v1700_v14 = vld [vmem:[%s1872_s12 + $0xb4] ss:$8 sps:$4 sm:$0xff]   ;;  %v865_v16 = vrot.slane %v1899_v6, 1 }
  0x39   : > { %516 = vmatprep.subr.bf16.mxu1 %v1658_v40  ;;  %v1643_v17 = vld [vmem:[%s1872_s12 + $0x200] ss:$8 sps:$4 sm:$0xff]   ;;  %v1702_v19 = vld [vmem:[%s1872_s12 + $0xb0] ss:$8 sps:$4 sm:$0xff]   ;;  %vm860_vm1 = vcmask 1046528   ;;  %v862_v59 = vrot.slane %v1958_v61, 1 }
  0x3a   : > { %791 = vmatpush1.bf16.msra.mxu0 %v1606_v24  ;;  %v605_v18 = vsel %vm593_vm0, %v600_v11, %v604_v12  ;;  %v1651_v20 = vld [vmem:[%s1872_s12 + $0x214] ss:$8 sps:$4 sm:$0xff]   ;;  %v1706_v21 = vld [vmem:[%s1872_s12 + $0xc4] ss:$8 sps:$4 sm:$0xff]   ;;  %v866_v5 = vsel %vm860_vm1, %v864_v15, %v865_v16  ;;  %v1649_v6 = vld [vmem:[%s1872_s12 + $0x210] ss:$8 sps:$4 sm:$0xff]  }
  0x3b   : > { %792 = vmatprep.subr.bf16.mxu0 %v1607_v25  ;;  %v1708_v22 = vld [vmem:[%s1872_s12 + $0xc0] ss:$8 sps:$4 sm:$0xff]   ;;  %v1657_v23 = vld [vmem:[%s1872_s12 + $0x224] ss:$8 sps:$4 sm:$0xff]   ;;  %v1712_v24 = vld [vmem:[%s1872_s12 + $0xd4] ss:$8 sps:$4 sm:$0xff]  }
  0x3c   : > { %517 = vmatpush1.bf16.msra.mxu1 %v1660_v43  ;;  %v1655_v25 = vld [vmem:[%s1872_s12 + $0x220] ss:$8 sps:$4 sm:$0xff]   ;;  %v1714_v26 = vld [vmem:[%s1872_s12 + $0xd0] ss:$8 sps:$4 sm:$0xff]   ;;  %v1663_v27 = vld [vmem:[%s1872_s12 + $0x234] ss:$8 sps:$4 sm:$0xff]  }
  0x3d   : > { %518 = vmatprep.subr.bf16.mxu1 %v1664_v44  ;;  %v1661_v29 = vld [vmem:[%s1872_s12 + $0x230] ss:$8 sps:$4 sm:$0xff]   ;;  %v1720_v30 = vld [vmem:[%s1872_s12 + $0xe0] ss:$8 sps:$4 sm:$0xff]   ;;  %v1675_v35 = vld [vmem:[%s1872_s12 + $0x254] ss:$8 sps:$4 sm:$0xff]  }
  0x3e   : > { %793 = vmatpush1.bf16.msra.mxu0 %v1609_v28  ;;  %v1718_v28 = vld [vmem:[%s1872_s12 + $0xe4] ss:$8 sps:$4 sm:$0xff]   ;;  %v1667_v33 = vld [vmem:[%s1872_s12 + $0x240] ss:$8 sps:$4 sm:$0xff]   ;;  %v1673_v36 = vld [vmem:[%s1872_s12 + $0x250] ss:$8 sps:$4 sm:$0xff]  }
  0x3f   : > { %794 = vmatprep.subr.bf16.mxu0 %v1610_v31  ;;  %v1669_v31 = vld [vmem:[%s1872_s12 + $0x244] ss:$8 sps:$4 sm:$0xff]   ;;  %v1687_v39 = vld [vmem:[%s1872_s12 + $0x274] ss:$8 sps:$4 sm:$0xff]   ;;  %v1685_v40 = vld [vmem:[%s1872_s12 + $0x270] ss:$8 sps:$4 sm:$0xff]  }
  0x40   : > { %519 = vmatpush1.bf16.msra.mxu1 %v1666_v47  ;;  %v1699_v43 = vld [vmem:[%s1872_s12 + $0x294] ss:$8 sps:$4 sm:$0xff]   ;;  %v1697_v44 = vld [vmem:[%s1872_s12 + $0x290] ss:$8 sps:$4 sm:$0xff]   ;;  %v302_v3 = vld [vmem:[#allocation2] sm:$0xff]  ;;  %p1509_p11 = scmp.ne.s32.totalorder %s1763_s15, 2 }
  0x41   : > { %520 = vmatprep.subr.bf16.mxu1 %v1670_v48  ;;  %v1711_v47 = vld [vmem:[%s1872_s12 + $0x2b4] ss:$8 sps:$4 sm:$0xff]   ;;  %v1709_v48 = vld [vmem:[%s1872_s12 + $0x2b0] ss:$8 sps:$4 sm:$0xff]   ;;  %vm1150_vm2 = vcmask (!%p1509_p11), 1040384  }
  0x42   : > { %795 = vmatpush1.bf16.msra.mxu0 %v1612_v32  ;;  %v1724_v32 = vld [vmem:[%s1872_s12 + $0xf4] ss:$8 sps:$4 sm:$0xff]  }
  0x43   : > { %796 = vmatprep.subr.bf16.mxu0 %v1613_v34  ;;  %v1726_v34 = vld [vmem:[%s1872_s12 + $0xf0] ss:$8 sps:$4 sm:$0xff]  }
  0x44   : > { %521 = vmatpush1.bf16.msra.mxu1 %v1672_v51  ;;  %v1723_v51 = vld [vmem:[%s1872_s12 + $0x2d4] ss:$8 sps:$4 sm:$0xff]  }
  0x45   : > { %522 = vmatprep.subr.bf16.mxu1 %v1676_v52  ;;  %v1721_v52 = vld [vmem:[%s1872_s12 + $0x2d0] ss:$8 sps:$4 sm:$0xff]  }
  0x46   : > { %797 = vmatpush1.bf16.msra.mxu0 %v1615_v37  ;;  %v1681_v37 = vld [vmem:[%s1872_s12 + $0x264] ss:$8 sps:$4 sm:$0xff]  }
  0x47   : > { %798 = vmatprep.subr.bf16.mxu0 %v1616_v38  ;;  %v1679_v38 = vld [vmem:[%s1872_s12 + $0x260] ss:$8 sps:$4 sm:$0xff]  }
  0x48   : > { %523 = vmatpush1.bf16.msra.mxu1 %v1678_v56  ;;  %v1732_v56 = vld [vmem:[%s1872_s12 + $0x2f4] ss:$8 sps:$4 sm:$0xff]  }
  0x49   : > { %524 = vmatprep.subr.bf16.mxu1 %v1682_v57  ;;  %v1730_v57 = vld [vmem:[%s1872_s12 + $0x2f0] ss:$8 sps:$4 sm:$0xff]  }
  0x4a   : > { %799 = vmatpush1.bf16.msra.mxu0 %v1618_v41  ;;  %v1693_v41 = vld [vmem:[%s1872_s12 + $0x284] ss:$8 sps:$4 sm:$0xff]  }
  0x4b   : > { %800 = vmatprep.subr.bf16.mxu0 %v1619_v42  ;;  %v1691_v42 = vld [vmem:[%s1872_s12 + $0x280] ss:$8 sps:$4 sm:$0xff]  }
  0x4c   : > { %525 = vmatpush1.bf16.msra.mxu1 %v1684_v62 }
  0x4d   : > { %526 = vmatprep.subr.bf16.mxu1 %v1688_v63 }
  0x4e   : > { %801 = vmatpush1.bf16.msra.mxu0 %v1621_v45  ;;  %v1705_v45 = vld [vmem:[%s1872_s12 + $0x2a4] ss:$8 sps:$4 sm:$0xff]  }
  0x4f   : > { %802 = vmatprep.subr.bf16.mxu0 %v1622_v46  ;;  %v1703_v46 = vld [vmem:[%s1872_s12 + $0x2a0] ss:$8 sps:$4 sm:$0xff]  }
  0x50   : > { %527 = vmatpush1.bf16.msra.mxu1 %v1690_v2 }
  0x51   : > { %528 = vmatprep.subr.bf16.mxu1 %v1694_v8  ;;  %v304_v8 = vld [vmem:[#allocation2 + $0x10] sm:$0xff] }
  0x52   : > { %803 = vmatpush1.bf16.msra.mxu0 %v1624_v49  ;;  %v1717_v49 = vld [vmem:[%s1872_s12 + $0x2c4] ss:$8 sps:$4 sm:$0xff]  }
  0x53   : > { %804 = vmatprep.subr.bf16.mxu0 %v1625_v50  ;;  %v1715_v50 = vld [vmem:[%s1872_s12 + $0x2c0] ss:$8 sps:$4 sm:$0xff]  }
  0x54   : > { %529 = vmatpush1.bf16.msra.mxu1 %v1696_v13 }
  0x55   : > { %530 = vmatprep.subr.bf16.mxu1 %v1700_v14 }
  0x56   : > { %805 = vmatpush1.bf16.msra.mxu0 %v1627_v53  ;;  %v1729_v53 = vld [vmem:[%s1872_s12 + $0x2e4] ss:$8 sps:$4 sm:$0xff]  }
  0x57   : > { %806 = vmatprep.subr.bf16.mxu0 %v1628_v55  ;;  %v1727_v55 = vld [vmem:[%s1872_s12 + $0x2e0] ss:$8 sps:$4 sm:$0xff]  }
  0x58   : > { %531 = vmatpush1.bf16.msra.mxu1 %v1702_v19 }
  0x59   : > { %532 = vmatprep.subr.bf16.mxu1 %v1706_v21 }
  0x5a   : > { %807 = vmatpush1.bf16.msra.mxu0 %v1630_v58  ;;  %v861_v58 = vrot.slane %v1948_v54, 1 }
  0x5b   : > { %808 = vmatprep.subr.bf16.mxu0 %v1631_v60 }
  0x5c   : > { %533 = vmatpush1.bf16.msra.mxu1 %v1708_v22  ;;  %v863_v60 = vsel %vm860_vm1, %v861_v58, %v862_v59 }
  0x5d   : > { %534 = vmatprep.subr.bf16.mxu1 %v1712_v24 }
  0x5e   : > { %809 = vmatpush1.bf16.msra.mxu0 %v1633_v0 }
  0x5f   : > { %810 = vmatprep.subr.bf16.mxu0 %v1637_v4  ;;  %v303_v4 = vld [vmem:[#allocation2 + $0x8] sm:$0xff] }
  0x60   : > { %535 = vmatpush1.bf16.msra.mxu1 %v1714_v26 }
  0x61   : > { %536 = vmatprep.subr.bf16.mxu1 %v1718_v28 }
  0x62   : > { %811 = vmatpush1.bf16.msra.mxu0 %v1639_v9  ;;  %v305_v9 = vld [vmem:[#allocation2 + $0x18] sm:$0xff] }
  0x63   : > { %1029 = vmatprep.subr.bf16.mxu0 %v1645_v10 }
  0x64   : > { %537 = vmatpush1.bf16.msra.mxu1 %v1720_v30 }
  0x65   : > { %813 = vmatmul.mubr.bf16.vlgmr.msra.gmra.mrb[0].mxu0 %v605_v18  ;;  %538 = vmatprep.subr.bf16.mxu1 %v1724_v32  ;;  %v1090_v18 = vlaneseq (!%p1509_p11) }
  0x66   : > { %1030 = vmatpush1.bf16.msra.mxu0 %v1643_v17  ;;  %1061 = vmatprep.mubr.bf16.mxu0 %v866_v5 }
  0x67   : > { %1031 = vmatprep.subr.bf16.mxu0 %v1651_v20  ;;  %v1091_v19 = vshrl.u32 (!%p1509_p11), %v1090_v18, 7  ;;  %v1088_v20 = vld [vmem:[%s2050_s2] sm:$0x3] (!%p1509_p11) }
  0x68   : > { %539 = vmatpush1.bf16.msra.mxu1 %v1726_v34 }
  0x69   : > { %v1092_v5 = vsub.s32 (!%p1509_p11), 0, %v1091_v19 }
  0x6a   : > { %1032 = vmatpush1.bf16.msra.mxu0 %v1649_v6  ;;  %v1096_v6 = vsub.s32 (!%p1509_p11), 1, %v1091_v19 }
  0x6b   : > { %1033 = vmatprep.subr.bf16.mxu0 %v1657_v23  ;;  %541 = vmatmul.mubr.bf16.vlgmr.msra.gmra.mrb[0].mxu1 %v1948_v54 }
  0x6c   : > { %v1097_v26 = vrot.slane (!%p1509_p11), %v1088_v20, %v1096_v6 }
  0x6e   : > { %1034 = vmatpush1.bf16.msra.mxu0 %v1655_v25  ;;  %v1093_v25 = vrot.slane (!%p1509_p11), %v1088_v20, %v1092_v5 }
  0x6f   : > { %1035 = vmatprep.subr.bf16.mxu0 %v1663_v27 }
  0x72   : > { %1036 = vmatpush1.bf16.msra.mxu0 %v1661_v29 }
  0x73   : > { %1037 = vmatprep.subr.bf16.mxu0 %v1669_v31 }
  0x76   : > { %1038 = vmatpush1.bf16.msra.mxu0 %v1667_v33 }
  0x77   : > { %1039 = vmatprep.subr.bf16.mxu0 %v1675_v35 }
  0x7a   : > { %1040 = vmatpush1.bf16.msra.mxu0 %v1673_v36 }
  0x7b   : > { %1041 = vmatprep.subr.bf16.mxu0 %v1681_v37 }
  0x7e   : > { %1042 = vmatpush1.bf16.msra.mxu0 %v1679_v38 }
  0x7f   : > { %1043 = vmatprep.subr.bf16.mxu0 %v1687_v39 }
  0x82   : > { %1044 = vmatpush1.bf16.msra.mxu0 %v1685_v40 }
  0x83   : > { %1045 = vmatprep.subr.bf16.mxu0 %v1693_v41 }
  0x86   : > { %1046 = vmatpush1.bf16.msra.mxu0 %v1691_v42 }
  0x87   : > { %1047 = vmatprep.subr.bf16.mxu0 %v1699_v43 }
  0x8a   : > { %1048 = vmatpush1.bf16.msra.mxu0 %v1697_v44 }
  0x8b   : > { %1049 = vmatprep.subr.bf16.mxu0 %v1705_v45 }
  0x8e   : > { %1050 = vmatpush1.bf16.msra.mxu0 %v1703_v46 }
  0x8f   : > { %1051 = vmatprep.subr.bf16.mxu0 %v1711_v47 }
  0x92   : > { %1052 = vmatpush1.bf16.msra.mxu0 %v1709_v48 }
  0x93   : > { %1053 = vmatprep.subr.bf16.mxu0 %v1717_v49 }
  0x96   : > { %1054 = vmatpush1.bf16.msra.mxu0 %v1715_v50 }
  0x97   : > { %1055 = vmatprep.subr.bf16.mxu0 %v1723_v51 }
  0x9a   : > { %1056 = vmatpush1.bf16.msra.mxu0 %v1721_v52 }
  0x9b   : > { %1057 = vmatprep.subr.bf16.mxu0 %v1729_v53 }
  0x9e   : > { %1058 = vmatpush1.bf16.msra.mxu0 %v1727_v55 }
  0x9f   : > { %1059 = vmatprep.subr.bf16.mxu0 %v1732_v56 }
  0xa2   : > { %1060 = vmatpush1.bf16.msra.mxu0 %v1730_v57 }
  0xa5   : > { %1062 = vmatmul.mubr.bf16.vlgmr.msra.gmra.mrb[0].mxu0 %v863_v60 }
 0x13e   : > { %v542_v62 = vpop.f32.mrb[0].mxu1 }
 0x13f   : > { %v544_v63 = vpop.f32.mrb[1].mxu1  ;;  %v551_v7 = vadd.f32 %v542_v62, %v302_v3 }
 0x140   : > { %v546_v0 = vpop.f32.mrb[2].mxu1  ;;  %v552_v2 = vadd.f32 %v544_v63, %v303_v4 }
 0x141   : > { %v548_v1 = vpop.f32.mrb[3].mxu1  ;;  %v553_v11 = vadd.f32 %v546_v0, %v304_v8 }
 0x142   : > { %v554_v61 = vadd.f32 %v548_v1, %v305_v9 }
 0x178   : > { %v1063_v10 = vpop.f32.mrb[0].mxu0  ;;  %1083 = sbr.rel (%p1509_p11) target bundleno = 412 (0x19c), region = 40 }
 0x179   : > { %v1518_v54 = vadd.f32 %v1063_v10, %v551_v7  ;;  %v1065_v12 = vpop.f32.mrb[1].mxu0 }
 0x17a   : > { %v1520_v13 = vadd.f32 %v1065_v12, %v552_v2  ;;  %v1067_v14 = vpop.f32.mrb[2].mxu0 }
 0x17b   : > { %1076 = vst [vmem:[#allocation2] sm:$0xff] %v1518_v54  ;;  %v1522_v15 = vadd.f32 %v1067_v14, %v553_v11  ;;  %v1069_v16 = vpop.f32.mrb[3].mxu0 }
 0x17c   : > { %1077 = vst [vmem:[#allocation2 + $0x8] sm:$0xff] %v1520_v13  ;;  %v1524_v17 = vadd.f32 %v1069_v16, %v554_v61 }
 0x17d   : > { %1078 = vst [vmem:[#allocation2 + $0x10] sm:$0xff] %v1522_v15 }
 0x17e   : > { %1079 = vst [vmem:[#allocation2 + $0x18] sm:$0xff] %v1524_v17 }
 0x182   : > { %v1084_v21 = vld [vmem:[#allocation2] sm:$0xff] }
 0x183   : > { %v1085_v22 = vld [vmem:[#allocation2 + $0x8] sm:$0xff]  ;;  %v1100_v27 = vadd.f32 %v1093_v25, %v1084_v21 }
 0x184   : > { %v1086_v23 = vld [vmem:[#allocation2 + $0x10] sm:$0xff]  ;;  %v1101_v28 = vadd.f32 %v1097_v26, %v1085_v22 }
 0x185   : > { %v1087_v24 = vld [vmem:[#allocation2 + $0x18] sm:$0xff]  ;;  %v1102_v29 = vadd.f32 %v1093_v25, %v1086_v23  ;;  %v1132_v32 = vmul.f32 %v1100_v27, %v1100_v27 }
 0x186   : > { %v1103_v30 = vadd.f32 %v1097_v26, %v1087_v24  ;;  %v1515_v31 = vpack.c.bf16 %v1101_v28, %v1100_v27  ;;  %v1133_v33 = vmul.f32 %v1101_v28, %v1101_v28 }
 0x187   : > { %v1118_v35 = vadd.f32 %v1102_v29, %v1100_v27  ;;  %v1134_v37 = vmul.f32 %v1102_v29, %v1102_v29 }
 0x188   : > { %v1516_v34 = vpack.c.bf16 %v1103_v30, %v1102_v29  ;;  %v1125_v36 = vadd.f32 %v1103_v30, %v1101_v28  ;;  %v1135_v38 = vmul.f32 %v1103_v30, %v1103_v30  ;;  %1116 = vst [vmem:[%s1884_s7] sm:$0xff] %v1515_v31 }
 0x189   : > { %v1119_v39 = vrot.slane %v1118_v35, 4  ;;  %v1136_v41 = vadd.f32 %v1134_v37, %v1132_v32 }
 0x18a   : > { %1117 = vst [vmem:[%s1884_s7 + $0x8] sm:$0xff] %v1516_v34  ;;  %v1126_v40 = vrot.slane %v1125_v36, 4  ;;  %v1143_v42 = vadd.f32 %v1135_v38, %v1133_v33 }
 0x18b   : > { %v1120_v43 = vadd.f32 %v1119_v39, %v1118_v35  ;;  %v1137_v45 = vrot.slane %v1136_v41, 4 }
 0x18c   : > { %v1127_v44 = vadd.f32 %v1126_v40, %v1125_v36  ;;  %v1144_v46 = vrot.slane %v1143_v42, 4 }
 0x18d   : > { %v1121_v47 = vrot.slane %v1120_v43, 2  ;;  %v1138_v49 = vadd.f32 %v1137_v45, %v1136_v41 }
 0x18e   : > { %v1128_v48 = vrot.slane %v1127_v44, 2  ;;  %v1145_v50 = vadd.f32 %v1144_v46, %v1143_v42 }
 0x18f   : > { %v1122_v51 = vadd.f32 %v1121_v47, %v1120_v43  ;;  %v1139_v53 = vrot.slane %v1138_v49, 2 }
 0x190   : > { %v1129_v52 = vadd.f32 %v1128_v48, %v1127_v44  ;;  %v1146_v55 = vrot.slane %v1145_v50, 2 }
 0x191   : > { %v1123_v56 = vrot.slane %v1122_v51, 1  ;;  %v1140_v58 = vadd.f32 %v1139_v53, %v1138_v49 }
 0x192   : > { %v1130_v57 = vrot.slane %v1129_v52, 1  ;;  %v1147_v59 = vadd.f32 %v1146_v55, %v1145_v50 }
 0x193   : > { %v1124_v60 = vadd.f32 %v1123_v56, %v1122_v51  ;;  %v1141_v63 = vrot.slane %v1140_v58, 1 }
 0x194   : > { %v1131_v62 = vadd.f32 %v1130_v57, %v1129_v52  ;;  %v1148_v0 = vrot.slane %v1147_v59, 1 }
 0x195   : > { %v1142_v1 = vadd.f32 %v1141_v63, %v1140_v58 }
 0x196   : > { %v1149_v3 = vadd.f32 %v1148_v0, %v1147_v59 }
 0x197   : > { %v1151_v4 = vsel %vm1150_vm2, %v1124_v60, %v1142_v1 }
 0x198   : > { %v1152_v7 = vsel %vm1150_vm2, %v1131_v62, %v1149_v3 }
 0x199   : > { %v1155_v2 = vcombine.low %v1151_v4, %v1152_v7 }
 0x19b   : > { %1512 = vst.sshfl [vmem:[%s1889_s10] sm:$0x33 pattern:$0x76325410] %v1155_v2 }
 0x19c PF: > { %s15_s21 = sadd.s32 1, %s1787_s21   ;;  %s2053_s15 = smov %s1775_s18 }
 0x19d   : > { %p12_p12 = scmp.ge.s32.totalorder %s15_s21, 14   ;;  %s2054_s16 = smov %s1779_s19 }
 0x19e   : > { %s2055_s17 = smov %s1783_s20  ;;  %s2056_s18 = smov %s2060_s22 }
 0x19f   : > { %s2057_s19 = smov %s2064_s23  ;;  %s2058_s20 = smov %s2068_s24 }
 0x1a0   :  { %14 = sbr.rel (!%p12_p12) target bundleno = 4 (0x4), region = 87 }

// kernel: point_pillars_forward.33
= control target key start
LH: loop header
LB: loop body
LE: loop exit
PB: predicated region body
PF: predicated region fallthrough
CT: control target
= control target key end

     0   :  { %s68_s0 = inlined_call_operand.vmem [shape: bf16[2,2,8,512], index: 0, kind: input, shape index: {}]   ;;  %s69_s1 = inlined_call_operand.vmem [shape: bf16[2,8,256], index: 1, kind: output, shape index: {}]  }
   0x1   :  { %v8_v0 = vld [vmem:[%s68_s0] sm:$0xff]  ;;  %v9_v1 = vld [vmem:[%s68_s0 + $0x8] sm:$0xff]  ;;  %v10_v2 = vld [vmem:[%s68_s0 + $0x10] sm:$0xff] }
   0x2   :  { %v11_v3 = vld [vmem:[%s68_s0 + $0x18] sm:$0xff]  ;;  %v16_v4 = vmax.bf16 %v9_v1, %v8_v0  ;;  %v12_v5 = vld [vmem:[%s68_s0 + $0x20] sm:$0xff]  ;;  %v13_v6 = vld [vmem:[%s68_s0 + $0x28] sm:$0xff] }
   0x3   :  { %v17_v7 = vmax.bf16 %v11_v3, %v10_v2  ;;  %v14_v8 = vld [vmem:[%s68_s0 + $0x30] sm:$0xff]  ;;  %v15_v9 = vld [vmem:[%s68_s0 + $0x38] sm:$0xff]  ;;  %v18_v10 = vmax.bf16 %v13_v6, %v12_v5 }
   0x4   :  { %v19_v11 = vmax.bf16 %v15_v9, %v14_v8 }
   0x5   :  { %v20_v12 = vmax.bf16 %v17_v7, %v16_v4 }
   0x6   :  { %v21_v13 = vmax.bf16 %v19_v11, %v18_v10 }
   0x7   :  { %22 = vst [vmem:[%s69_s1] sm:$0xff] %v20_v12 }
   0x8   :  { %23 = vst [vmem:[%s69_s1 + $0x8] sm:$0xff] %v21_v13 }

</bundles_post_ra>
